<compile_context>
chip_gen: v6e
topology: v6e:2x2x1
jax: 0.10.0
libtpu: 0.0.40
codegen_flags: <defaults>
</compile_context>

<pallas_src>
import functools

import jax
import jax.numpy as jnp
from jax.experimental import pallas as pl
from jax.experimental.pallas import tpu as pltpu


# f32 keeps exact parity with the PyTorch reference.  On v6e/v7x at non-toy
# shapes, set to jnp.bfloat16 for the native MXU rate (accumulation stays f32).
_MXU_DTYPE = jnp.float32


def _mm(a, b):
    return jnp.dot(a.astype(_MXU_DTYPE), b.astype(_MXU_DTYPE),
                   preferred_element_type=jnp.float32)


def _bmm(spec, a, b):
    return jnp.einsum(spec, a.astype(_MXU_DTYPE), b.astype(_MXU_DTYPE),
                      preferred_element_type=jnp.float32)


def _sigmoid(x):
    return 1.0 / (1.0 + jnp.exp(-x))


# ----------------------------------------------------------------------------
# Kernel 1: fused bidirectional masked GRU (+ masked avg/max pooling tail).
#   One fused MXU matmul per timestep handles the input projection and the
#   recurrence for BOTH directions; outputs are stored lane-dense (N, S*2H).
# ----------------------------------------------------------------------------
def _bigru_pool_kernel(x_ref, m_ref, w_ref, b_ref, y_ref, pool_ref, *, hidden):
    H = hidden
    N, S, D = x_ref.shape[1], x_ref.shape[2], x_ref.shape[3]
    NEG = -1e7

    x = x_ref[0]                      # (N, S, D)
    mts = m_ref[0]                    # (S, N, 1) time-major mask
    w = w_ref[0]                      # (2D+2H, 12H) block-structured weight
    b = b_ref[0]                      # (1, 12H)

    # hoisted mask broadcast (one broadcast_in_dim, sliced per step)
    mb = jnp.broadcast_to(mts, (S, N, H))
    omb = 1.0 - mb

    def cell(h, xg, hg, m, om):
        r = _sigmoid(xg[:, 0:H] + hg[:, 0:H])
        z = _sigmoid(xg[:, H:2 * H] + hg[:, H:2 * H])
        n = jnp.tanh(xg[:, 2 * H:3 * H] + r * hg[:, 2 * H:3 * H])
        h_new = (1.0 - z) * n + z * h
        return m * h_new + om * h     # freeze state on padding

    h_f = jnp.zeros((N, H), jnp.float32)
    h_b = jnp.zeros((N, H), jnp.float32)
    sum_f = jnp.zeros((N, H), jnp.float32)
    sum_b = jnp.zeros((N, H), jnp.float32)
    max_f = jnp.full((N, H), NEG, jnp.float32)
    max_b = jnp.full((N, H), NEG, jnp.float32)

    for t in range(S):                # S is small & static: unroll
        tb = S - 1 - t
        # ONE MXU op per step: [x_fwd, x_bwd, h_fwd, h_bwd] @ W_block
        op = jnp.concatenate([x[:, t, :], x[:, tb, :], h_f, h_b], axis=-1)
        g = _mm(op, w) + b            # (N, 12H) = [xg_f | hg_f | xg_b | hg_b]

        h_f = cell(h_f, g[:, 0:3 * H], g[:, 3 * H:6 * H], mb[t], omb[t])
        h_b = cell(h_b, g[:, 6 * H:9 * H], g[:, 9 * H:12 * H], mb[tb], omb[tb])

        of = h_f * mb[t]              # zero outputs at padding (pad_packed)
        ob = h_b * mb[tb]

        # lane-dense (N, S*2H) layout: 32-lane-aligned stores, no tile straddle,
        # one full lane-dense DMA writeback per grid step.
        y_ref[0, :, t * 2 * H:t * 2 * H + H] = of
        y_ref[0, :, tb * 2 * H + H:(tb + 1) * 2 * H] = ob

        sum_f = sum_f + of
        sum_b = sum_b + ob
        max_f = jnp.maximum(max_f, of + NEG * omb[t])
        max_b = jnp.maximum(max_b, ob + NEG * omb[tb])

    # fused masked avg / max pooling (vectorized over the whole batch block).
    # NOTE: matches the reference exactly -> division by sum(mask) is
    # unguarded and would NaN only for an all-padding sequence (never hit).
    inv = 1.0 / jnp.sum(mts, axis=0)          # (N, 1)
    pool_ref[0, :, 0:H] = sum_f * inv
    pool_ref[0, :, H:2 * H] = sum_b * inv
    pool_ref[0, :, 2 * H:3 * H] = max_f
    pool_ref[0, :, 3 * H:4 * H] = max_b


def bigru_pool_stack(x_all, m_t_all, w_all, b_all, hidden):
    """x_all: (G, N, S, D) batch-major; m_t_all: (G, S, N, 1) time-major mask.
    Returns y: (G, N, S, 2H) and pooled [avg(2H), max(2H)]: (G, N, 4H)."""
    G, N, S, D = x_all.shape
    H = hidden
    y, pooled = pl.pallas_call(
        functools.partial(_bigru_pool_kernel, hidden=H),
        out_shape=(jax.ShapeDtypeStruct((G, N, S * 2 * H), jnp.float32),
                   jax.ShapeDtypeStruct((G, N, 4 * H), jnp.float32)),
        grid=(G,),
        in_specs=[
            pl.BlockSpec((1, N, S, D), lambda g: (g, 0, 0, 0)),
            pl.BlockSpec((1, S, N, 1), lambda g: (g, 0, 0, 0)),
            pl.BlockSpec((1, 2 * D + 2 * H, 12 * H), lambda g: (g, 0, 0)),
            pl.BlockSpec((1, 1, 12 * H), lambda g: (g, 0, 0)),
        ],
        out_specs=(pl.BlockSpec((1, N, S * 2 * H), lambda g: (g, 0, 0)),
                   pl.BlockSpec((1, N, 4 * H), lambda g: (g, 0, 0))),
        compiler_params=pltpu.CompilerParams(
            dimension_semantics=("parallel",)),   # word/char branches -> 2 TCs on v7x
    )(x_all, m_t_all, w_all, b_all)
    return y.reshape(G, N, S, 2 * H), pooled      # free lane-split reshape


# ----------------------------------------------------------------------------
# Kernel 2: fused ESIM cross-attention + enhancement + projection.
#   Grid over the branch axis only; the batch dim is batched inside the kernel.
# ----------------------------------------------------------------------------
def _esim_attention_kernel(ep_ref, eh_ref, tw_ref, wc_ref, pb_ref,
                           op_ref, oh_ref):
    ep = ep_ref[0]                    # (B, Sp, 2H)
    eh = eh_ref[0]                    # (B, Sh, 2H)
    tw = tw_ref[0]                    # (3, 2H): rows [w1+w3, w2-w3, w4]
    wc = wc_ref[0]                    # (6H, H): [W1+W3; W2-W3; W4]
    pb = pb_ref[0]                    # (1, H)

    B = ep.shape[0]
    wA, wB, w4 = tw[0:1, :], tw[1:2, :], tw[2:3, :]

    # Bias terms constant along each softmax axis (including the reference's
    # -999999 mask biases) cancel exactly; the remaining terms are folded into
    # the similarity matmul operands -> no XLU transposes, no 8H concat.
    sim_a = _bmm('bpd,bhd->bph', ep * w4 + wB, eh)     # (B, Sp, Sh)
    sim_bt = _bmm('bhd,bpd->bhp', eh * w4 + wA, ep)    # (B, Sh, Sp)

    def softmax_last(s):
        e = jnp.exp(s - jnp.max(s, axis=-1, keepdims=True))
        return e / jnp.sum(e, axis=-1, keepdims=True)  # exact div (parity)

    att_p = _bmm('bph,bhd->bpd', softmax_last(sim_a), eh)    # (B, Sp, 2H)
    att_h = _bmm('bhp,bpd->bhd', softmax_last(sim_bt), ep)   # (B, Sh, 2H)

    # [x; att; x-att; x*att] @ Wproj == [x, att, x*att] @ [W1+W3; W2-W3; W4]
    # -> one fused K=6H matmul per branch (weight broadcast hoisted once).
    wc_b = jnp.broadcast_to(wc[None, :, :], (B,) + wc.shape)

    def project(x, att):
        feats = jnp.concatenate([x, att, x * att], axis=-1)  # (B, S, 6H)
        return jnp.maximum(_bmm('bsk,bkh->bsh', feats, wc_b) + pb, 0.0)

    op_ref[0] = project(ep, att_p)
    oh_ref[0] = project(eh, att_h)


def esim_attention(enc_p, enc_h, tw, wcat, pb):
    """enc_p/enc_h: (G, B, S, 2H) -> projected (G, B, S, H) x 2."""
    G, B, Sp, D2 = enc_p.shape
    Sh = enc_h.shape[2]
    H = wcat.shape[2]
    return pl.pallas_call(
        _esim_attention_kernel,
        out_shape=(jax.ShapeDtypeStruct((G, B, Sp, H), jnp.float32),
                   jax.ShapeDtypeStruct((G, B, Sh, H), jnp.float32)),
        grid=(G,),
        in_specs=[
            pl.BlockSpec((1, B, Sp, D2), lambda g: (g, 0, 0, 0)),
            pl.BlockSpec((1, B, Sh, D2), lambda g: (g, 0, 0, 0)),
            pl.BlockSpec((1, 3, D2), lambda g: (g, 0, 0)),
            pl.BlockSpec((1, 3 * D2, H), lambda g: (g, 0, 0)),
            pl.BlockSpec((1, 1, H), lambda g: (g, 0, 0)),
        ],
        out_specs=(pl.BlockSpec((1, B, Sp, H), lambda g: (g, 0, 0, 0)),
                   pl.BlockSpec((1, B, Sh, H), lambda g: (g, 0, 0, 0))),
        compiler_params=pltpu.CompilerParams(
            dimension_semantics=("parallel",)),
    )(enc_p, enc_h, tw, wcat, pb)


# ----------------------------------------------------------------------------
# Kernel 3: classifier MLP on the (already pooled) features.
# ----------------------------------------------------------------------------
def _classifier_kernel(p_ref, w1t_ref, b1_ref, w2t_ref, b2_ref, o_ref, *,
                       batch):
    B = batch
    pooled = p_ref[...]               # (2, 2B, 4H); rows: [premises | hypotheses]
    # v = [p_avg,p_max, h_avg,h_max, cp_avg,cp_max, ch_avg,ch_max]  (B, 16H)
    # every piece is 128-lane aligned -> the concat is free vreg placement,
    # and the first Linear becomes one K=16H matmul.
    v = jnp.concatenate([pooled[0, 0:B], pooled[0, B:2 * B],
                         pooled[1, 0:B], pooled[1, B:2 * B]], axis=-1)
    hdn = jnp.tanh(_mm(v, w1t_ref[...]) + b1_ref[...])
    o_ref[...] = _mm(hdn, w2t_ref[...]) + b2_ref[...]


def classify(pooled, w1t, b1, w2t, b2):
    """pooled: (2, 2B, 4H) -> logits (B, C)."""
    G, N2, H4 = pooled.shape
    B = N2 // 2
    C = w2t.shape[1]
    return pl.pallas_call(
        functools.partial(_classifier_kernel, batch=B),
        out_shape=jax.ShapeDtypeStruct((B, C), jnp.float32),
        grid=(1,),   # tiny head; the heavy pooling work already ran on the
                     # parallel (G,) grid inside the composition-GRU kernel.
        in_specs=[
            pl.BlockSpec((G, N2, H4), lambda i: (0, 0, 0)),
            pl.BlockSpec(w1t.shape, lambda i: (0, 0)),
            pl.BlockSpec(b1.shape, lambda i: (0, 0)),
            pl.BlockSpec(w2t.shape, lambda i: (0, 0)),
            pl.BlockSpec(b2.shape, lambda i: (0, 0)),
        ],
        out_specs=pl.BlockSpec((B, C), lambda i: (0, 0)),
    )(pooled, w1t, b1, w2t, b2)


# ----------------------------------------------------------------------------
# parameter packing (PyTorch-shaped params -> kernel-ready stacked operands)
# ----------------------------------------------------------------------------
def _pack_gru(gru, d_pad, hidden):
    """Block-structured per-timestep weight (2*d_pad+2H, 12H) and bias (1,12H).
    Output columns: [xg_fwd | hg_fwd | xg_bwd | hg_bwd], each 3H wide."""
    H = hidden
    d_in = gru["wih_f"].shape[1]
    W = jnp.zeros((2 * d_pad + 2 * H, 12 * H), jnp.float32)
    W = W.at[0:d_in, 0:3 * H].set(gru["wih_f"].T)
    W = W.at[d_pad:d_pad + d_in, 6 * H:9 * H].set(gru["wih_b"].T)
    W = W.at[2 * d_pad:2 * d_pad + H, 3 * H:6 * H].set(gru["whh_f"].T)
    W = W.at[2 * d_pad + H:2 * d_pad + 2 * H, 9 * H:12 * H].set(gru["whh_b"].T)
    bias = jnp.concatenate([gru["bih_f"], gru["bhh_f"],
                            gru["bih_b"], gru["bhh_b"]])[None, :]
    return W, bias


def _pack_gru_pair(gru0, gru1, d_pad, hidden):
    w0, b0 = _pack_gru(gru0, d_pad, hidden)
    w1, b1 = _pack_gru(gru1, d_pad, hidden)
    return jnp.stack([w0, w1], axis=0), jnp.stack([b0, b1], axis=0)


def _pack_attention(trans_w, proj_w, proj_b, H):
    w = trans_w.reshape(4, 2 * H)                 # rows for [a, b, a-b, a*b]
    tw = jnp.stack([w[0] + w[2], w[1] - w[2], w[3]], axis=0)        # (3, 2H)
    pw = proj_w.T                                 # (8H, H)
    wcat = jnp.concatenate([pw[0:2 * H] + pw[4 * H:6 * H],
                            pw[2 * H:4 * H] - pw[4 * H:6 * H],
                            pw[6 * H:8 * H]], axis=0)               # (6H, H)
    return tw, wcat, proj_b[None, :]


def _pack_attention_pair(params, H):
    word = _pack_attention(params["trans_w"], params["proj_w"],
                           params["proj_b"], H)
    char = _pack_attention(params["ctrans_w"], params["cproj_w"],
                           params["cproj_b"], H)
    return tuple(jnp.stack([word[i], char[i]], axis=0) for i in range(3))


# ----------------------------------------------------------------------------
# full forward
# ----------------------------------------------------------------------------
@jax.jit
def multi_att_forward(params, prem_idx, hyp_idx, cprem_idx, chyp_idx):
    B, S = prem_idx.shape
    H = params["sent_gru"]["whh_f"].shape[1]
    E = params["embed"].shape[1]
    CD = params["cembed"].shape[1]
    D1 = max(E, CD)

    # get_mask semantics: padding_idx = 0, trailing padding
    prem_mask = (prem_idx != 0).astype(jnp.float32)
    hyp_mask = (hyp_idx != 0).astype(jnp.float32)
    cprem_mask = (cprem_idx != 0).astype(jnp.float32)
    chyp_mask = (chyp_idx != 0).astype(jnp.float32)

    # embedding lookups stay in XLA (gather)
    emb_p = jnp.take(params["embed"], prem_idx, axis=0)
    emb_h = jnp.take(params["embed"], hyp_idx, axis=0)
    cemb_p = jnp.take(params["cembed"], cprem_idx, axis=0)
    cemb_h = jnp.take(params["cembed"], chyp_idx, axis=0)

    def pad_feat(x):
        d = x.shape[-1]
        return x if d == D1 else jnp.pad(x, ((0, 0), (0, 0), (0, D1 - d)))

    x_enc = jnp.stack(
        [pad_feat(jnp.concatenate([emb_p, emb_h], axis=0)),
         pad_feat(jnp.concatenate([cemb_p, cemb_h], axis=0))],
        axis=0)                                                   # (2, 2B, S, D1)
    m_all = jnp.stack(
        [jnp.concatenate([prem_mask, hyp_mask], axis=0),
         jnp.concatenate([cprem_mask, chyp_mask], axis=0)],
        axis=0)                                                   # (2, 2B, S)
    # tiny (2*2B*S) time-major mask view, built once, reused by both GRU stages
    m_t = jnp.transpose(m_all, (0, 2, 1))[..., None]              # (2, S, 2B, 1)

    # ---- stage 1: fused word + char bidirectional GRU encoders ----
    w1g, b1g = _pack_gru_pair(params["sent_gru"], params["char_gru"], D1, H)
    enc_all, _ = bigru_pool_stack(x_enc, m_t, w1g, b1g, H)        # (2, 2B, S, 2H)

    # ---- stage 2: fused ESIM cross attention (both branches, batched B) ----
    tw, wcat, pb = _pack_attention_pair(params, H)
    proj_p, proj_h = esim_attention(
        enc_all[:, :B], enc_all[:, B:], tw, wcat, pb)             # (2, B, S, H) x2

    # ---- stage 3: fused composition GRUs + masked avg/max pooling ----
    x_comp = jnp.concatenate([proj_p, proj_h], axis=1)            # (2, 2B, S, H)
    w2g, b2g = _pack_gru_pair(params["comp_gru"], params["ccomp_gru"], H, H)
    _, comp_pool = bigru_pool_stack(x_comp, m_t, w2g, b2g, H)     # (2, 2B, 4H)

    # ---- stage 4: classifier MLP on the pooled features ----
    return classify(comp_pool,
                    params["cls_w1"].T, params["cls_b1"][None, :],
                    params["cls_w2"].T, params["cls_b2"][None, :])


# ----------------------------------------------------------------------------
# parameter construction (deterministic, synthetic)
# ----------------------------------------------------------------------------
class KeyGen:
    def __init__(self, seed):
        self.key = jax.random.PRNGKey(seed)

    def __call__(self):
        self.key, k = jax.random.split(self.key)
        return k


def _xavier(kg, shape):
    fan_out, fan_in = shape[0], shape[-1]
    a = (6.0 / (fan_in + fan_out)) ** 0.5
    return jax.random.uniform(kg(), shape, jnp.float32, -a, a)


def _make_gru(kg, in_dim, hidden):
    def direction():
        return (_xavier(kg, (3 * hidden, in_dim)),
                _xavier(kg, (3 * hidden, hidden)),
                jnp.zeros((3 * hidden,), jnp.float32),
                jnp.zeros((3 * hidden,), jnp.float32))
    wf, whf, bf, bhf = direction()
    wb, whb, bb, bhb = direction()
    return dict(wih_f=wf, whh_f=whf, bih_f=bf, bhh_f=bhf,
                wih_b=wb, whh_b=whb, bih_b=bb, bhh_b=bhb)


def make_params(kg, vocab, cvocab, embed_dim, char_dim, hidden, num_classes):
    H = hidden
    embed = 0.1 * jax.random.normal(kg(), (vocab, embed_dim), jnp.float32)
    embed = embed.at[0].set(0.0)                    # padding_idx = 0
    cembed = 0.1 * jax.random.normal(kg(), (cvocab, char_dim), jnp.float32)
    cembed = cembed.at[0].set(0.0)
    return dict(
        embed=embed,
        cembed=cembed,
        sent_gru=_make_gru(kg, embed_dim, H),
        char_gru=_make_gru(kg, char_dim, H),
        comp_gru=_make_gru(kg, H, H),
        ccomp_gru=_make_gru(kg, H, H),
        trans_w=_xavier(kg, (1, 8 * H)),
        ctrans_w=_xavier(kg, (1, 8 * H)),
        proj_w=_xavier(kg, (H, 8 * H)),
        proj_b=jnp.zeros((H,), jnp.float32),
        cproj_w=_xavier(kg, (H, 8 * H)),
        cproj_b=jnp.zeros((H,), jnp.float32),
        cls_w1=_xavier(kg, (2 * H, 16 * H)),
        cls_b1=jnp.zeros((2 * H,), jnp.float32),
        cls_w2=_xavier(kg, (num_classes, 2 * H)),
        cls_b2=jnp.zeros((num_classes,), jnp.float32),
    )


# ----------------------------------------------------------------------------
# main
# ----------------------------------------------------------------------------
if __name__ == "__main__":
    B, S = 2, 8
    HIDDEN = 32
    EMBED_DIM = 32
    CHAR_DIM = 16
    VOCAB = 50
    CVOCAB = 40
    NUM_CLASSES = 3

    kg = KeyGen(0)
    params = make_params(kg, VOCAB, CVOCAB, EMBED_DIM, CHAR_DIM, HIDDEN,
                         NUM_CLASSES)

    def make_indices(key, lengths, vocab):
        ids = jax.random.randint(key, (B, S), 1, vocab, dtype=jnp.int32)
        pos = jnp.arange(S)[None, :]
        return jnp.where(pos < jnp.asarray(lengths)[:, None], ids, 0)

    prem_idx = make_indices(kg(), [S, 5], VOCAB)
    hyp_idx = make_indices(kg(), [S, 6], VOCAB)
    cprem_idx = make_indices(kg(), [S, 7], CVOCAB)
    chyp_idx = make_indices(kg(), [S, 4], CVOCAB)

    logits = multi_att_forward(params, prem_idx, hyp_idx, cprem_idx, chyp_idx)
    logits = jax.block_until_ready(logits)

    assert logits.shape == (B, NUM_CLASSES)
    assert bool(jnp.all(jnp.isfinite(logits)))
    print("KERNEL_OK")
</pallas_src>

<mosaic_0001>
module attributes {stable_mosaic.version = 11 : i64} {
  func.func @_bigru_pool_kernel(%arg0: i32, %arg1: memref<1x4x8x32xf32, #tpu.memory_space<vmem>>, %arg2: memref<1x8x4x1xf32, #tpu.memory_space<vmem>>, %arg3: memref<1x128x384xf32, #tpu.memory_space<vmem>>, %arg4: memref<1x1x384xf32, #tpu.memory_space<vmem>>, %arg5: memref<1x4x512xf32, #tpu.memory_space<vmem>>, %arg6: memref<1x4x128xf32, #tpu.memory_space<vmem>>) attributes {dimension_semantics = [#tpu.dimension_semantics<parallel>], iteration_bounds = array<i64: 2>, scalar_prefetch = 0 : i64, scratch_operands = 0 : i64, tpu.core_type = #tpu.core_type<tc>, window_params = [{transform_indices = @transform_0, window_bounds = array<i64: 1, 4, 8, 32>}, {transform_indices = @transform_1, window_bounds = array<i64: 1, 8, 4, 1>}, {transform_indices = @transform_2, window_bounds = array<i64: 1, 128, 384>}, {transform_indices = @transform_3, window_bounds = array<i64: 1, 1, 384>}, {transform_indices = @transform_4, window_bounds = array<i64: 1, 4, 512>}, {transform_indices = @transform_5, window_bounds = array<i64: 1, 4, 128>}]} {
    %c0 = arith.constant 0 : index
    %c0_0 = arith.constant 0 : index
    %c0_1 = arith.constant 0 : index
    %c0_2 = arith.constant 0 : index
    %0 = vector.load %arg1[%c0, %c0_0, %c0_1, %c0_2] : memref<1x4x8x32xf32, #tpu.memory_space<vmem>>, vector<1x4x8x32xf32>
    %1 = vector.shape_cast %0 : vector<1x4x8x32xf32> to vector<4x8x32xf32>
    %c0_3 = arith.constant 0 : index
    %c0_4 = arith.constant 0 : index
    %c0_5 = arith.constant 0 : index
    %c0_6 = arith.constant 0 : index
    %2 = vector.load %arg2[%c0_3, %c0_4, %c0_5, %c0_6] : memref<1x8x4x1xf32, #tpu.memory_space<vmem>>, vector<1x8x4x1xf32>
    %3 = vector.shape_cast %2 : vector<1x8x4x1xf32> to vector<8x4x1xf32>
    %c0_7 = arith.constant 0 : index
    %c0_8 = arith.constant 0 : index
    %c0_9 = arith.constant 0 : index
    %4 = vector.load %arg3[%c0_7, %c0_8, %c0_9] : memref<1x128x384xf32, #tpu.memory_space<vmem>>, vector<1x128x384xf32>
    %5 = vector.shape_cast %4 : vector<1x128x384xf32> to vector<128x384xf32>
    %c0_10 = arith.constant 0 : index
    %c0_11 = arith.constant 0 : index
    %c0_12 = arith.constant 0 : index
    %6 = vector.load %arg4[%c0_10, %c0_11, %c0_12] : memref<1x1x384xf32, #tpu.memory_space<vmem>>, vector<1x1x384xf32>
    %7 = vector.shape_cast %6 : vector<1x1x384xf32> to vector<1x384xf32>
    %8 = vector.shape_cast %3 : vector<8x4x1xf32> to vector<8x4x1xf32>
    %9 = vector.broadcast %8 : vector<8x4x1xf32> to vector<8x4x32xf32>
    %cst = arith.constant 1.000000e+00 : f32
    %10 = vector.broadcast %cst : f32 to vector<8x4x32xf32>
    %11 = arith.subf %10, %9 : vector<8x4x32xf32>
    %cst_13 = arith.constant 0.000000e+00 : f32
    %12 = vector.broadcast %cst_13 : f32 to vector<4x32xf32>
    %cst_14 = arith.constant 0.000000e+00 : f32
    %13 = vector.broadcast %cst_14 : f32 to vector<4x32xf32>
    %cst_15 = arith.constant 0.000000e+00 : f32
    %14 = vector.broadcast %cst_15 : f32 to vector<4x32xf32>
    %cst_16 = arith.constant 0.000000e+00 : f32
    %15 = vector.broadcast %cst_16 : f32 to vector<4x32xf32>
    %cst_17 = arith.constant -1.000000e+07 : f32
    %16 = vector.broadcast %cst_17 : f32 to vector<4x32xf32>
    %cst_18 = arith.constant -1.000000e+07 : f32
    %17 = vector.broadcast %cst_18 : f32 to vector<4x32xf32>
    %18 = vector.extract_strided_slice %1 {offsets = [0, 0, 0], sizes = [4, 1, 32], strides = [1, 1, 1]} : vector<4x8x32xf32> to vector<4x1x32xf32>
    %19 = vector.shape_cast %18 : vector<4x1x32xf32> to vector<4x32xf32>
    %20 = vector.extract_strided_slice %1 {offsets = [0, 7, 0], sizes = [4, 1, 32], strides = [1, 1, 1]} : vector<4x8x32xf32> to vector<4x1x32xf32>
    %21 = vector.shape_cast %20 : vector<4x1x32xf32> to vector<4x32xf32>
    %22 = tpu.concatenate %19, %21, %12, %13 in 1 : vector<4x32xf32>, vector<4x32xf32>, vector<4x32xf32>, vector<4x32xf32> -> vector<4x128xf32>
    %cst_19 = arith.constant dense<0.000000e+00> : vector<4x384xf32>
    %23 = tpu.matmul %22, %5, %cst_19 {dimension_numbers = #tpu.dot_dimension_numbers<[1], [0], [0], [1], [0, 0, 1, 1], [], []>} : vector<4x128xf32>, vector<128x384xf32>, vector<4x384xf32> -> vector<4x384xf32>
    %24 = vector.broadcast %7 : vector<1x384xf32> to vector<4x384xf32>
    %25 = arith.addf %23, %24 : vector<4x384xf32>
    %26 = vector.extract_strided_slice %25 {offsets = [0, 0], sizes = [4, 96], strides = [1, 1]} : vector<4x384xf32> to vector<4x96xf32>
    %27 = vector.extract_strided_slice %25 {offsets = [0, 96], sizes = [4, 96], strides = [1, 1]} : vector<4x384xf32> to vector<4x96xf32>
    %28 = vector.extract_strided_slice %9 {offsets = [0, 0, 0], sizes = [1, 4, 32], strides = [1, 1, 1]} : vector<8x4x32xf32> to vector<1x4x32xf32>
    %29 = vector.shape_cast %28 : vector<1x4x32xf32> to vector<4x32xf32>
    %30 = vector.extract_strided_slice %11 {offsets = [0, 0, 0], sizes = [1, 4, 32], strides = [1, 1, 1]} : vector<8x4x32xf32> to vector<1x4x32xf32>
    %31 = vector.shape_cast %30 : vector<1x4x32xf32> to vector<4x32xf32>
    %32 = vector.extract_strided_slice %26 {offsets = [0, 0], sizes = [4, 32], strides = [1, 1]} : vector<4x96xf32> to vector<4x32xf32>
    %33 = vector.extract_strided_slice %27 {offsets = [0, 0], sizes = [4, 32], strides = [1, 1]} : vector<4x96xf32> to vector<4x32xf32>
    %34 = arith.addf %32, %33 : vector<4x32xf32>
    %cst_20 = arith.constant 0.000000e+00 : f32
    %35 = vector.broadcast %cst_20 : f32 to vector<4x32xf32>
    %36 = arith.subf %35, %34 : vector<4x32xf32>
    %37 = math.exp %36 : vector<4x32xf32>
    %cst_21 = arith.constant 1.000000e+00 : f32
    %38 = vector.broadcast %cst_21 : f32 to vector<4x32xf32>
    %39 = arith.addf %38, %37 : vector<4x32xf32>
    %cst_22 = arith.constant 1.000000e+00 : f32
    %40 = vector.broadcast %cst_22 : f32 to vector<4x32xf32>
    %41 = arith.divf %40, %39 : vector<4x32xf32>
    %42 = vector.extract_strided_slice %26 {offsets = [0, 32], sizes = [4, 32], strides = [1, 1]} : vector<4x96xf32> to vector<4x32xf32>
    %43 = vector.extract_strided_slice %27 {offsets = [0, 32], sizes = [4, 32], strides = [1, 1]} : vector<4x96xf32> to vector<4x32xf32>
    %44 = arith.addf %42, %43 : vector<4x32xf32>
    %cst_23 = arith.constant 0.000000e+00 : f32
    %45 = vector.broadcast %cst_23 : f32 to vector<4x32xf32>
    %46 = arith.subf %45, %44 : vector<4x32xf32>
    %47 = math.exp %46 : vector<4x32xf32>
    %cst_24 = arith.constant 1.000000e+00 : f32
    %48 = vector.broadcast %cst_24 : f32 to vector<4x32xf32>
    %49 = arith.addf %48, %47 : vector<4x32xf32>
    %cst_25 = arith.constant 1.000000e+00 : f32
    %50 = vector.broadcast %cst_25 : f32 to vector<4x32xf32>
    %51 = arith.divf %50, %49 : vector<4x32xf32>
    %52 = vector.extract_strided_slice %26 {offsets = [0, 64], sizes = [4, 32], strides = [1, 1]} : vector<4x96xf32> to vector<4x32xf32>
    %53 = vector.extract_strided_slice %27 {offsets = [0, 64], sizes = [4, 32], strides = [1, 1]} : vector<4x96xf32> to vector<4x32xf32>
    %54 = arith.mulf %41, %53 : vector<4x32xf32>
    %55 = arith.addf %52, %54 : vector<4x32xf32>
    %56 = math.tanh %55 : vector<4x32xf32>
    %cst_26 = arith.constant 1.000000e+00 : f32
    %57 = vector.broadcast %cst_26 : f32 to vector<4x32xf32>
    %58 = arith.subf %57, %51 : vector<4x32xf32>
    %59 = arith.mulf %58, %56 : vector<4x32xf32>
    %60 = arith.mulf %51, %12 : vector<4x32xf32>
    %61 = arith.addf %59, %60 : vector<4x32xf32>
    %62 = arith.mulf %29, %61 : vector<4x32xf32>
    %63 = arith.mulf %31, %12 : vector<4x32xf32>
    %64 = arith.addf %62, %63 : vector<4x32xf32>
    %65 = vector.extract_strided_slice %25 {offsets = [0, 192], sizes = [4, 96], strides = [1, 1]} : vector<4x384xf32> to vector<4x96xf32>
    %66 = vector.extract_strided_slice %25 {offsets = [0, 288], sizes = [4, 96], strides = [1, 1]} : vector<4x384xf32> to vector<4x96xf32>
    %67 = vector.extract_strided_slice %9 {offsets = [7, 0, 0], sizes = [1, 4, 32], strides = [1, 1, 1]} : vector<8x4x32xf32> to vector<1x4x32xf32>
    %68 = vector.shape_cast %67 : vector<1x4x32xf32> to vector<4x32xf32>
    %69 = vector.extract_strided_slice %11 {offsets = [7, 0, 0], sizes = [1, 4, 32], strides = [1, 1, 1]} : vector<8x4x32xf32> to vector<1x4x32xf32>
    %70 = vector.shape_cast %69 : vector<1x4x32xf32> to vector<4x32xf32>
    %71 = vector.extract_strided_slice %65 {offsets = [0, 0], sizes = [4, 32], strides = [1, 1]} : vector<4x96xf32> to vector<4x32xf32>
    %72 = vector.extract_strided_slice %66 {offsets = [0, 0], sizes = [4, 32], strides = [1, 1]} : vector<4x96xf32> to vector<4x32xf32>
    %73 = arith.addf %71, %72 : vector<4x32xf32>
    %cst_27 = arith.constant 0.000000e+00 : f32
    %74 = vector.broadcast %cst_27 : f32 to vector<4x32xf32>
    %75 = arith.subf %74, %73 : vector<4x32xf32>
    %76 = math.exp %75 : vector<4x32xf32>
    %cst_28 = arith.constant 1.000000e+00 : f32
    %77 = vector.broadcast %cst_28 : f32 to vector<4x32xf32>
    %78 = arith.addf %77, %76 : vector<4x32xf32>
    %cst_29 = arith.constant 1.000000e+00 : f32
    %79 = vector.broadcast %cst_29 : f32 to vector<4x32xf32>
    %80 = arith.divf %79, %78 : vector<4x32xf32>
    %81 = vector.extract_strided_slice %65 {offsets = [0, 32], sizes = [4, 32], strides = [1, 1]} : vector<4x96xf32> to vector<4x32xf32>
    %82 = vector.extract_strided_slice %66 {offsets = [0, 32], sizes = [4, 32], strides = [1, 1]} : vector<4x96xf32> to vector<4x32xf32>
    %83 = arith.addf %81, %82 : vector<4x32xf32>
    %cst_30 = arith.constant 0.000000e+00 : f32
    %84 = vector.broadcast %cst_30 : f32 to vector<4x32xf32>
    %85 = arith.subf %84, %83 : vector<4x32xf32>
    %86 = math.exp %85 : vector<4x32xf32>
    %cst_31 = arith.constant 1.000000e+00 : f32
    %87 = vector.broadcast %cst_31 : f32 to vector<4x32xf32>
    %88 = arith.addf %87, %86 : vector<4x32xf32>
    %cst_32 = arith.constant 1.000000e+00 : f32
    %89 = vector.broadcast %cst_32 : f32 to vector<4x32xf32>
    %90 = arith.divf %89, %88 : vector<4x32xf32>
    %91 = vector.extract_strided_slice %65 {offsets = [0, 64], sizes = [4, 32], strides = [1, 1]} : vector<4x96xf32> to vector<4x32xf32>
    %92 = vector.extract_strided_slice %66 {offsets = [0, 64], sizes = [4, 32], strides = [1, 1]} : vector<4x96xf32> to vector<4x32xf32>
    %93 = arith.mulf %80, %92 : vector<4x32xf32>
    %94 = arith.addf %91, %93 : vector<4x32xf32>
    %95 = math.tanh %94 : vector<4x32xf32>
    %cst_33 = arith.constant 1.000000e+00 : f32
    %96 = vector.broadcast %cst_33 : f32 to vector<4x32xf32>
    %97 = arith.subf %96, %90 : vector<4x32xf32>
    %98 = arith.mulf %97, %95 : vector<4x32xf32>
    %99 = arith.mulf %90, %13 : vector<4x32xf32>
    %100 = arith.addf %98, %99 : vector<4x32xf32>
    %101 = arith.mulf %68, %100 : vector<4x32xf32>
    %102 = arith.mulf %70, %13 : vector<4x32xf32>
    %103 = arith.addf %101, %102 : vector<4x32xf32>
    %104 = vector.extract_strided_slice %9 {offsets = [0, 0, 0], sizes = [1, 4, 32], strides = [1, 1, 1]} : vector<8x4x32xf32> to vector<1x4x32xf32>
    %105 = vector.shape_cast %104 : vector<1x4x32xf32> to vector<4x32xf32>
    %106 = arith.mulf %64, %105 : vector<4x32xf32>
    %107 = vector.extract_strided_slice %9 {offsets = [7, 0, 0], sizes = [1, 4, 32], strides = [1, 1, 1]} : vector<8x4x32xf32> to vector<1x4x32xf32>
    %108 = vector.shape_cast %107 : vector<1x4x32xf32> to vector<4x32xf32>
    %109 = arith.mulf %103, %108 : vector<4x32xf32>
    %c0_34 = arith.constant 0 : index
    %c0_35 = arith.constant 0 : index
    %c0_36 = arith.constant 0 : index
    %110 = vector.load %arg5[%c0_34, %c0_35, %c0_36] : memref<1x4x512xf32, #tpu.memory_space<vmem>>, vector<1x4x32xf32>
    %111 = vector.shape_cast %110 : vector<1x4x32xf32> to vector<4x32xf32>
    %112 = vector.shape_cast %106 : vector<4x32xf32> to vector<1x4x32xf32>
    tpu.vector_store %arg5[%c0_34, %c0_35, %c0_36], %112 {strides = array<i32>} : memref<1x4x512xf32, #tpu.memory_space<vmem>>, vector<1x4x32xf32>,
    %c0_37 = arith.constant 0 : index
    %c0_38 = arith.constant 0 : index
    %c480 = arith.constant 480 : index
    %113 = vector.load %arg5[%c0_37, %c0_38, %c480] : memref<1x4x512xf32, #tpu.memory_space<vmem>>, vector<1x4x32xf32>
    %114 = vector.shape_cast %113 : vector<1x4x32xf32> to vector<4x32xf32>
    %115 = vector.shape_cast %109 : vector<4x32xf32> to vector<1x4x32xf32>
    tpu.vector_store %arg5[%c0_37, %c0_38, %c480], %115 {strides = array<i32>} : memref<1x4x512xf32, #tpu.memory_space<vmem>>, vector<1x4x32xf32>,
    %116 = arith.addf %14, %106 : vector<4x32xf32>
    %117 = arith.addf %15, %109 : vector<4x32xf32>
    %118 = vector.extract_strided_slice %11 {offsets = [0, 0, 0], sizes = [1, 4, 32], strides = [1, 1, 1]} : vector<8x4x32xf32> to vector<1x4x32xf32>
    %119 = vector.shape_cast %118 : vector<1x4x32xf32> to vector<4x32xf32>
    %cst_39 = arith.constant -1.000000e+07 : f32
    %120 = vector.broadcast %cst_39 : f32 to vector<4x32xf32>
    %121 = arith.mulf %120, %119 : vector<4x32xf32>
    %122 = arith.addf %106, %121 : vector<4x32xf32>
    %123 = arith.maximumf %16, %122 : vector<4x32xf32>
    %124 = vector.extract_strided_slice %11 {offsets = [7, 0, 0], sizes = [1, 4, 32], strides = [1, 1, 1]} : vector<8x4x32xf32> to vector<1x4x32xf32>
    %125 = vector.shape_cast %124 : vector<1x4x32xf32> to vector<4x32xf32>
    %cst_40 = arith.constant -1.000000e+07 : f32
    %126 = vector.broadcast %cst_40 : f32 to vector<4x32xf32>
    %127 = arith.mulf %126, %125 : vector<4x32xf32>
    %128 = arith.addf %109, %127 : vector<4x32xf32>
    %129 = arith.maximumf %17, %128 : vector<4x32xf32>
    %130 = vector.extract_strided_slice %1 {offsets = [0, 1, 0], sizes = [4, 1, 32], strides = [1, 1, 1]} : vector<4x8x32xf32> to vector<4x1x32xf32>
    %131 = vector.shape_cast %130 : vector<4x1x32xf32> to vector<4x32xf32>
    %132 = vector.extract_strided_slice %1 {offsets = [0, 6, 0], sizes = [4, 1, 32], strides = [1, 1, 1]} : vector<4x8x32xf32> to vector<4x1x32xf32>
    %133 = vector.shape_cast %132 : vector<4x1x32xf32> to vector<4x32xf32>
    %134 = tpu.concatenate %131, %133, %64, %103 in 1 : vector<4x32xf32>, vector<4x32xf32>, vector<4x32xf32>, vector<4x32xf32> -> vector<4x128xf32>
    %cst_41 = arith.constant dense<0.000000e+00> : vector<4x384xf32>
    %135 = tpu.matmul %134, %5, %cst_41 {dimension_numbers = #tpu.dot_dimension_numbers<[1], [0], [0], [1], [0, 0, 1, 1], [], []>} : vector<4x128xf32>, vector<128x384xf32>, vector<4x384xf32> -> vector<4x384xf32>
    %136 = vector.broadcast %7 : vector<1x384xf32> to vector<4x384xf32>
    %137 = arith.addf %135, %136 : vector<4x384xf32>
    %138 = vector.extract_strided_slice %137 {offsets = [0, 0], sizes = [4, 96], strides = [1, 1]} : vector<4x384xf32> to vector<4x96xf32>
    %139 = vector.extract_strided_slice %137 {offsets = [0, 96], sizes = [4, 96], strides = [1, 1]} : vector<4x384xf32> to vector<4x96xf32>
    %140 = vector.extract_strided_slice %9 {offsets = [1, 0, 0], sizes = [1, 4, 32], strides = [1, 1, 1]} : vector<8x4x32xf32> to vector<1x4x32xf32>
    %141 = vector.shape_cast %140 : vector<1x4x32xf32> to vector<4x32xf32>
    %142 = vector.extract_strided_slice %11 {offsets = [1, 0, 0], sizes = [1, 4, 32], strides = [1, 1, 1]} : vector<8x4x32xf32> to vector<1x4x32xf32>
    %143 = vector.shape_cast %142 : vector<1x4x32xf32> to vector<4x32xf32>
    %144 = vector.extract_strided_slice %138 {offsets = [0, 0], sizes = [4, 32], strides = [1, 1]} : vector<4x96xf32> to vector<4x32xf32>
    %145 = vector.extract_strided_slice %139 {offsets = [0, 0], sizes = [4, 32], strides = [1, 1]} : vector<4x96xf32> to vector<4x32xf32>
    %146 = arith.addf %144, %145 : vector<4x32xf32>
    %cst_42 = arith.constant 0.000000e+00 : f32
    %147 = vector.broadcast %cst_42 : f32 to vector<4x32xf32>
    %148 = arith.subf %147, %146 : vector<4x32xf32>
    %149 = math.exp %148 : vector<4x32xf32>
    %cst_43 = arith.constant 1.000000e+00 : f32
    %150 = vector.broadcast %cst_43 : f32 to vector<4x32xf32>
    %151 = arith.addf %150, %149 : vector<4x32xf32>
    %cst_44 = arith.constant 1.000000e+00 : f32
    %152 = vector.broadcast %cst_44 : f32 to vector<4x32xf32>
    %153 = arith.divf %152, %151 : vector<4x32xf32>
    %154 = vector.extract_strided_slice %138 {offsets = [0, 32], sizes = [4, 32], strides = [1, 1]} : vector<4x96xf32> to vector<4x32xf32>
    %155 = vector.extract_strided_slice %139 {offsets = [0, 32], sizes = [4, 32], strides = [1, 1]} : vector<4x96xf32> to vector<4x32xf32>
    %156 = arith.addf %154, %155 : vector<4x32xf32>
    %cst_45 = arith.constant 0.000000e+00 : f32
    %157 = vector.broadcast %cst_45 : f32 to vector<4x32xf32>
    %158 = arith.subf %157, %156 : vector<4x32xf32>
    %159 = math.exp %158 : vector<4x32xf32>
    %cst_46 = arith.constant 1.000000e+00 : f32
    %160 = vector.broadcast %cst_46 : f32 to vector<4x32xf32>
    %161 = arith.addf %160, %159 : vector<4x32xf32>
    %cst_47 = arith.constant 1.000000e+00 : f32
    %162 = vector.broadcast %cst_47 : f32 to vector<4x32xf32>
    %163 = arith.divf %162, %161 : vector<4x32xf32>
    %164 = vector.extract_strided_slice %138 {offsets = [0, 64], sizes = [4, 32], strides = [1, 1]} : vector<4x96xf32> to vector<4x32xf32>
    %165 = vector.extract_strided_slice %139 {offsets = [0, 64], sizes = [4, 32], strides = [1, 1]} : vector<4x96xf32> to vector<4x32xf32>
    %166 = arith.mulf %153, %165 : vector<4x32xf32>
    %167 = arith.addf %164, %166 : vector<4x32xf32>
    %168 = math.tanh %167 : vector<4x32xf32>
    %cst_48 = arith.constant 1.000000e+00 : f32
    %169 = vector.broadcast %cst_48 : f32 to vector<4x32xf32>
    %170 = arith.subf %169, %163 : vector<4x32xf32>
    %171 = arith.mulf %170, %168 : vector<4x32xf32>
    %172 = arith.mulf %163, %64 : vector<4x32xf32>
    %173 = arith.addf %171, %172 : vector<4x32xf32>
    %174 = arith.mulf %141, %173 : vector<4x32xf32>
    %175 = arith.mulf %143, %64 : vector<4x32xf32>
    %176 = arith.addf %174, %175 : vector<4x32xf32>
    %177 = vector.extract_strided_slice %137 {offsets = [0, 192], sizes = [4, 96], strides = [1, 1]} : vector<4x384xf32> to vector<4x96xf32>
    %178 = vector.extract_strided_slice %137 {offsets = [0, 288], sizes = [4, 96], strides = [1, 1]} : vector<4x384xf32> to vector<4x96xf32>
    %179 = vector.extract_strided_slice %9 {offsets = [6, 0, 0], sizes = [1, 4, 32], strides = [1, 1, 1]} : vector<8x4x32xf32> to vector<1x4x32xf32>
    %180 = vector.shape_cast %179 : vector<1x4x32xf32> to vector<4x32xf32>
    %181 = vector.extract_strided_slice %11 {offsets = [6, 0, 0], sizes = [1, 4, 32], strides = [1, 1, 1]} : vector<8x4x32xf32> to vector<1x4x32xf32>
    %182 = vector.shape_cast %181 : vector<1x4x32xf32> to vector<4x32xf32>
    %183 = vector.extract_strided_slice %177 {offsets = [0, 0], sizes = [4, 32], strides = [1, 1]} : vector<4x96xf32> to vector<4x32xf32>
    %184 = vector.extract_strided_slice %178 {offsets = [0, 0], sizes = [4, 32], strides = [1, 1]} : vector<4x96xf32> to vector<4x32xf32>
    %185 = arith.addf %183, %184 : vector<4x32xf32>
    %cst_49 = arith.constant 0.000000e+00 : f32
    %186 = vector.broadcast %cst_49 : f32 to vector<4x32xf32>
    %187 = arith.subf %186, %185 : vector<4x32xf32>
    %188 = math.exp %187 : vector<4x32xf32>
    %cst_50 = arith.constant 1.000000e+00 : f32
    %189 = vector.broadcast %cst_50 : f32 to vector<4x32xf32>
    %190 = arith.addf %189, %188 : vector<4x32xf32>
    %cst_51 = arith.constant 1.000000e+00 : f32
    %191 = vector.broadcast %cst_51 : f32 to vector<4x32xf32>
    %192 = arith.divf %191, %190 : vector<4x32xf32>
    %193 = vector.extract_strided_slice %177 {offsets = [0, 32], sizes = [4, 32], strides = [1, 1]} : vector<4x96xf32> to vector<4x32xf32>
    %194 = vector.extract_strided_slice %178 {offsets = [0, 32], sizes = [4, 32], strides = [1, 1]} : vector<4x96xf32> to vector<4x32xf32>
    %195 = arith.addf %193, %194 : vector<4x32xf32>
    %cst_52 = arith.constant 0.000000e+00 : f32
    %196 = vector.broadcast %cst_52 : f32 to vector<4x32xf32>
    %197 = arith.subf %196, %195 : vector<4x32xf32>
    %198 = math.exp %197 : vector<4x32xf32>
    %cst_53 = arith.constant 1.000000e+00 : f32
    %199 = vector.broadcast %cst_53 : f32 to vector<4x32xf32>
    %200 = arith.addf %199, %198 : vector<4x32xf32>
    %cst_54 = arith.constant 1.000000e+00 : f32
    %201 = vector.broadcast %cst_54 : f32 to vector<4x32xf32>
    %202 = arith.divf %201, %200 : vector<4x32xf32>
    %203 = vector.extract_strided_slice %177 {offsets = [0, 64], sizes = [4, 32], strides = [1, 1]} : vector<4x96xf32> to vector<4x32xf32>
    %204 = vector.extract_strided_slice %178 {offsets = [0, 64], sizes = [4, 32], strides = [1, 1]} : vector<4x96xf32> to vector<4x32xf32>
    %205 = arith.mulf %192, %204 : vector<4x32xf32>
    %206 = arith.addf %203, %205 : vector<4x32xf32>
    %207 = math.tanh %206 : vector<4x32xf32>
    %cst_55 = arith.constant 1.000000e+00 : f32
    %208 = vector.broadcast %cst_55 : f32 to vector<4x32xf32>
    %209 = arith.subf %208, %202 : vector<4x32xf32>
    %210 = arith.mulf %209, %207 : vector<4x32xf32>
    %211 = arith.mulf %202, %103 : vector<4x32xf32>
    %212 = arith.addf %210, %211 : vector<4x32xf32>
    %213 = arith.mulf %180, %212 : vector<4x32xf32>
    %214 = arith.mulf %182, %103 : vector<4x32xf32>
    %215 = arith.addf %213, %214 : vector<4x32xf32>
    %216 = vector.extract_strided_slice %9 {offsets = [1, 0, 0], sizes = [1, 4, 32], strides = [1, 1, 1]} : vector<8x4x32xf32> to vector<1x4x32xf32>
    %217 = vector.shape_cast %216 : vector<1x4x32xf32> to vector<4x32xf32>
    %218 = arith.mulf %176, %217 : vector<4x32xf32>
    %219 = vector.extract_strided_slice %9 {offsets = [6, 0, 0], sizes = [1, 4, 32], strides = [1, 1, 1]} : vector<8x4x32xf32> to vector<1x4x32xf32>
    %220 = vector.shape_cast %219 : vector<1x4x32xf32> to vector<4x32xf32>
    %221 = arith.mulf %215, %220 : vector<4x32xf32>
    %c0_56 = arith.constant 0 : index
    %c0_57 = arith.constant 0 : index
    %c64 = arith.constant 64 : index
    %222 = vector.load %arg5[%c0_56, %c0_57, %c64] : memref<1x4x512xf32, #tpu.memory_space<vmem>>, vector<1x4x32xf32>
    %223 = vector.shape_cast %222 : vector<1x4x32xf32> to vector<4x32xf32>
    %224 = vector.shape_cast %218 : vector<4x32xf32> to vector<1x4x32xf32>
    tpu.vector_store %arg5[%c0_56, %c0_57, %c64], %224 {strides = array<i32>} : memref<1x4x512xf32, #tpu.memory_space<vmem>>, vector<1x4x32xf32>,
    %c0_58 = arith.constant 0 : index
    %c0_59 = arith.constant 0 : index
    %c416 = arith.constant 416 : index
    %225 = vector.load %arg5[%c0_58, %c0_59, %c416] : memref<1x4x512xf32, #tpu.memory_space<vmem>>, vector<1x4x32xf32>
    %226 = vector.shape_cast %225 : vector<1x4x32xf32> to vector<4x32xf32>
    %227 = vector.shape_cast %221 : vector<4x32xf32> to vector<1x4x32xf32>
    tpu.vector_store %arg5[%c0_58, %c0_59, %c416], %227 {strides = array<i32>} : memref<1x4x512xf32, #tpu.memory_space<vmem>>, vector<1x4x32xf32>,
    %228 = arith.addf %116, %218 : vector<4x32xf32>
    %229 = arith.addf %117, %221 : vector<4x32xf32>
    %230 = vector.extract_strided_slice %11 {offsets = [1, 0, 0], sizes = [1, 4, 32], strides = [1, 1, 1]} : vector<8x4x32xf32> to vector<1x4x32xf32>
    %231 = vector.shape_cast %230 : vector<1x4x32xf32> to vector<4x32xf32>
    %cst_60 = arith.constant -1.000000e+07 : f32
    %232 = vector.broadcast %cst_60 : f32 to vector<4x32xf32>
    %233 = arith.mulf %232, %231 : vector<4x32xf32>
    %234 = arith.addf %218, %233 : vector<4x32xf32>
    %235 = arith.maximumf %123, %234 : vector<4x32xf32>
    %236 = vector.extract_strided_slice %11 {offsets = [6, 0, 0], sizes = [1, 4, 32], strides = [1, 1, 1]} : vector<8x4x32xf32> to vector<1x4x32xf32>
    %237 = vector.shape_cast %236 : vector<1x4x32xf32> to vector<4x32xf32>
    %cst_61 = arith.constant -1.000000e+07 : f32
    %238 = vector.broadcast %cst_61 : f32 to vector<4x32xf32>
    %239 = arith.mulf %238, %237 : vector<4x32xf32>
    %240 = arith.addf %221, %239 : vector<4x32xf32>
    %241 = arith.maximumf %129, %240 : vector<4x32xf32>
    %242 = vector.extract_strided_slice %1 {offsets = [0, 2, 0], sizes = [4, 1, 32], strides = [1, 1, 1]} : vector<4x8x32xf32> to vector<4x1x32xf32>
    %243 = vector.shape_cast %242 : vector<4x1x32xf32> to vector<4x32xf32>
    %244 = vector.extract_strided_slice %1 {offsets = [0, 5, 0], sizes = [4, 1, 32], strides = [1, 1, 1]} : vector<4x8x32xf32> to vector<4x1x32xf32>
    %245 = vector.shape_cast %244 : vector<4x1x32xf32> to vector<4x32xf32>
    %246 = tpu.concatenate %243, %245, %176, %215 in 1 : vector<4x32xf32>, vector<4x32xf32>, vector<4x32xf32>, vector<4x32xf32> -> vector<4x128xf32>
    %cst_62 = arith.constant dense<0.000000e+00> : vector<4x384xf32>
    %247 = tpu.matmul %246, %5, %cst_62 {dimension_numbers = #tpu.dot_dimension_numbers<[1], [0], [0], [1], [0, 0, 1, 1], [], []>} : vector<4x128xf32>, vector<128x384xf32>, vector<4x384xf32> -> vector<4x384xf32>
    %248 = vector.broadcast %7 : vector<1x384xf32> to vector<4x384xf32>
    %249 = arith.addf %247, %248 : vector<4x384xf32>
    %250 = vector.extract_strided_slice %249 {offsets = [0, 0], sizes = [4, 96], strides = [1, 1]} : vector<4x384xf32> to vector<4x96xf32>
    %251 = vector.extract_strided_slice %249 {offsets = [0, 96], sizes = [4, 96], strides = [1, 1]} : vector<4x384xf32> to vector<4x96xf32>
    %252 = vector.extract_strided_slice %9 {offsets = [2, 0, 0], sizes = [1, 4, 32], strides = [1, 1, 1]} : vector<8x4x32xf32> to vector<1x4x32xf32>
    %253 = vector.shape_cast %252 : vector<1x4x32xf32> to vector<4x32xf32>
    %254 = vector.extract_strided_slice %11 {offsets = [2, 0, 0], sizes = [1, 4, 32], strides = [1, 1, 1]} : vector<8x4x32xf32> to vector<1x4x32xf32>
    %255 = vector.shape_cast %254 : vector<1x4x32xf32> to vector<4x32xf32>
    %256 = vector.extract_strided_slice %250 {offsets = [0, 0], sizes = [4, 32], strides = [1, 1]} : vector<4x96xf32> to vector<4x32xf32>
    %257 = vector.extract_strided_slice %251 {offsets = [0, 0], sizes = [4, 32], strides = [1, 1]} : vector<4x96xf32> to vector<4x32xf32>
    %258 = arith.addf %256, %257 : vector<4x32xf32>
    %cst_63 = arith.constant 0.000000e+00 : f32
    %259 = vector.broadcast %cst_63 : f32 to vector<4x32xf32>
    %260 = arith.subf %259, %258 : vector<4x32xf32>
    %261 = math.exp %260 : vector<4x32xf32>
    %cst_64 = arith.constant 1.000000e+00 : f32
    %262 = vector.broadcast %cst_64 : f32 to vector<4x32xf32>
    %263 = arith.addf %262, %261 : vector<4x32xf32>
    %cst_65 = arith.constant 1.000000e+00 : f32
    %264 = vector.broadcast %cst_65 : f32 to vector<4x32xf32>
    %265 = arith.divf %264, %263 : vector<4x32xf32>
    %266 = vector.extract_strided_slice %250 {offsets = [0, 32], sizes = [4, 32], strides = [1, 1]} : vector<4x96xf32> to vector<4x32xf32>
    %267 = vector.extract_strided_slice %251 {offsets = [0, 32], sizes = [4, 32], strides = [1, 1]} : vector<4x96xf32> to vector<4x32xf32>
    %268 = arith.addf %266, %267 : vector<4x32xf32>
    %cst_66 = arith.constant 0.000000e+00 : f32
    %269 = vector.broadcast %cst_66 : f32 to vector<4x32xf32>
    %270 = arith.subf %269, %268 : vector<4x32xf32>
    %271 = math.exp %270 : vector<4x32xf32>
    %cst_67 = arith.constant 1.000000e+00 : f32
    %272 = vector.broadcast %cst_67 : f32 to vector<4x32xf32>
    %273 = arith.addf %272, %271 : vector<4x32xf32>
    %cst_68 = arith.constant 1.000000e+00 : f32
    %274 = vector.broadcast %cst_68 : f32 to vector<4x32xf32>
    %275 = arith.divf %274, %273 : vector<4x32xf32>
    %276 = vector.extract_strided_slice %250 {offsets = [0, 64], sizes = [4, 32], strides = [1, 1]} : vector<4x96xf32> to vector<4x32xf32>
    %277 = vector.extract_strided_slice %251 {offsets = [0, 64], sizes = [4, 32], strides = [1, 1]} : vector<4x96xf32> to vector<4x32xf32>
    %278 = arith.mulf %265, %277 : vector<4x32xf32>
    %279 = arith.addf %276, %278 : vector<4x32xf32>
    %280 = math.tanh %279 : vector<4x32xf32>
    %cst_69 = arith.constant 1.000000e+00 : f32
    %281 = vector.broadcast %cst_69 : f32 to vector<4x32xf32>
    %282 = arith.subf %281, %275 : vector<4x32xf32>
    %283 = arith.mulf %282, %280 : vector<4x32xf32>
    %284 = arith.mulf %275, %176 : vector<4x32xf32>
    %285 = arith.addf %283, %284 : vector<4x32xf32>
    %286 = arith.mulf %253, %285 : vector<4x32xf32>
    %287 = arith.mulf %255, %176 : vector<4x32xf32>
    %288 = arith.addf %286, %287 : vector<4x32xf32>
    %289 = vector.extract_strided_slice %249 {offsets = [0, 192], sizes = [4, 96], strides = [1, 1]} : vector<4x384xf32> to vector<4x96xf32>
    %290 = vector.extract_strided_slice %249 {offsets = [0, 288], sizes = [4, 96], strides = [1, 1]} : vector<4x384xf32> to vector<4x96xf32>
    %291 = vector.extract_strided_slice %9 {offsets = [5, 0, 0], sizes = [1, 4, 32], strides = [1, 1, 1]} : vector<8x4x32xf32> to vector<1x4x32xf32>
    %292 = vector.shape_cast %291 : vector<1x4x32xf32> to vector<4x32xf32>
    %293 = vector.extract_strided_slice %11 {offsets = [5, 0, 0], sizes = [1, 4, 32], strides = [1, 1, 1]} : vector<8x4x32xf32> to vector<1x4x32xf32>
    %294 = vector.shape_cast %293 : vector<1x4x32xf32> to vector<4x32xf32>
    %295 = vector.extract_strided_slice %289 {offsets = [0, 0], sizes = [4, 32], strides = [1, 1]} : vector<4x96xf32> to vector<4x32xf32>
    %296 = vector.extract_strided_slice %290 {offsets = [0, 0], sizes = [4, 32], strides = [1, 1]} : vector<4x96xf32> to vector<4x32xf32>
    %297 = arith.addf %295, %296 : vector<4x32xf32>
    %cst_70 = arith.constant 0.000000e+00 : f32
    %298 = vector.broadcast %cst_70 : f32 to vector<4x32xf32>
    %299 = arith.subf %298, %297 : vector<4x32xf32>
    %300 = math.exp %299 : vector<4x32xf32>
    %cst_71 = arith.constant 1.000000e+00 : f32
    %301 = vector.broadcast %cst_71 : f32 to vector<4x32xf32>
    %302 = arith.addf %301, %300 : vector<4x32xf32>
    %cst_72 = arith.constant 1.000000e+00 : f32
    %303 = vector.broadcast %cst_72 : f32 to vector<4x32xf32>
    %304 = arith.divf %303, %302 : vector<4x32xf32>
    %305 = vector.extract_strided_slice %289 {offsets = [0, 32], sizes = [4, 32], strides = [1, 1]} : vector<4x96xf32> to vector<4x32xf32>
    %306 = vector.extract_strided_slice %290 {offsets = [0, 32], sizes = [4, 32], strides = [1, 1]} : vector<4x96xf32> to vector<4x32xf32>
    %307 = arith.addf %305, %306 : vector<4x32xf32>
    %cst_73 = arith.constant 0.000000e+00 : f32
    %308 = vector.broadcast %cst_73 : f32 to vector<4x32xf32>
    %309 = arith.subf %308, %307 : vector<4x32xf32>
    %310 = math.exp %309 : vector<4x32xf32>
    %cst_74 = arith.constant 1.000000e+00 : f32
    %311 = vector.broadcast %cst_74 : f32 to vector<4x32xf32>
    %312 = arith.addf %311, %310 : vector<4x32xf32>
    %cst_75 = arith.constant 1.000000e+00 : f32
    %313 = vector.broadcast %cst_75 : f32 to vector<4x32xf32>
    %314 = arith.divf %313, %312 : vector<4x32xf32>
    %315 = vector.extract_strided_slice %289 {offsets = [0, 64], sizes = [4, 32], strides = [1, 1]} : vector<4x96xf32> to vector<4x32xf32>
    %316 = vector.extract_strided_slice %290 {offsets = [0, 64], sizes = [4, 32], strides = [1, 1]} : vector<4x96xf32> to vector<4x32xf32>
    %317 = arith.mulf %304, %316 : vector<4x32xf32>
    %318 = arith.addf %315, %317 : vector<4x32xf32>
    %319 = math.tanh %318 : vector<4x32xf32>
    %cst_76 = arith.constant 1.000000e+00 : f32
    %320 = vector.broadcast %cst_76 : f32 to vector<4x32xf32>
    %321 = arith.subf %320, %314 : vector<4x32xf32>
    %322 = arith.mulf %321, %319 : vector<4x32xf32>
    %323 = arith.mulf %314, %215 : vector<4x32xf32>
    %324 = arith.addf %322, %323 : vector<4x32xf32>
    %325 = arith.mulf %292, %324 : vector<4x32xf32>
    %326 = arith.mulf %294, %215 : vector<4x32xf32>
    %327 = arith.addf %325, %326 : vector<4x32xf32>
    %328 = vector.extract_strided_slice %9 {offsets = [2, 0, 0], sizes = [1, 4, 32], strides = [1, 1, 1]} : vector<8x4x32xf32> to vector<1x4x32xf32>
    %329 = vector.shape_cast %328 : vector<1x4x32xf32> to vector<4x32xf32>
    %330 = arith.mulf %288, %329 : vector<4x32xf32>
    %331 = vector.extract_strided_slice %9 {offsets = [5, 0, 0], sizes = [1, 4, 32], strides = [1, 1, 1]} : vector<8x4x32xf32> to vector<1x4x32xf32>
    %332 = vector.shape_cast %331 : vector<1x4x32xf32> to vector<4x32xf32>
    %333 = arith.mulf %327, %332 : vector<4x32xf32>
    %c0_77 = arith.constant 0 : index
    %c0_78 = arith.constant 0 : index
    %c128 = arith.constant 128 : index
    %334 = vector.load %arg5[%c0_77, %c0_78, %c128] : memref<1x4x512xf32, #tpu.memory_space<vmem>>, vector<1x4x32xf32>
    %335 = vector.shape_cast %334 : vector<1x4x32xf32> to vector<4x32xf32>
    %336 = vector.shape_cast %330 : vector<4x32xf32> to vector<1x4x32xf32>
    tpu.vector_store %arg5[%c0_77, %c0_78, %c128], %336 {strides = array<i32>} : memref<1x4x512xf32, #tpu.memory_space<vmem>>, vector<1x4x32xf32>,
    %c0_79 = arith.constant 0 : index
    %c0_80 = arith.constant 0 : index
    %c352 = arith.constant 352 : index
    %337 = vector.load %arg5[%c0_79, %c0_80, %c352] : memref<1x4x512xf32, #tpu.memory_space<vmem>>, vector<1x4x32xf32>
    %338 = vector.shape_cast %337 : vector<1x4x32xf32> to vector<4x32xf32>
    %339 = vector.shape_cast %333 : vector<4x32xf32> to vector<1x4x32xf32>
    tpu.vector_store %arg5[%c0_79, %c0_80, %c352], %339 {strides = array<i32>} : memref<1x4x512xf32, #tpu.memory_space<vmem>>, vector<1x4x32xf32>,
    %340 = arith.addf %228, %330 : vector<4x32xf32>
    %341 = arith.addf %229, %333 : vector<4x32xf32>
    %342 = vector.extract_strided_slice %11 {offsets = [2, 0, 0], sizes = [1, 4, 32], strides = [1, 1, 1]} : vector<8x4x32xf32> to vector<1x4x32xf32>
    %343 = vector.shape_cast %342 : vector<1x4x32xf32> to vector<4x32xf32>
    %cst_81 = arith.constant -1.000000e+07 : f32
    %344 = vector.broadcast %cst_81 : f32 to vector<4x32xf32>
    %345 = arith.mulf %344, %343 : vector<4x32xf32>
    %346 = arith.addf %330, %345 : vector<4x32xf32>
    %347 = arith.maximumf %235, %346 : vector<4x32xf32>
    %348 = vector.extract_strided_slice %11 {offsets = [5, 0, 0], sizes = [1, 4, 32], strides = [1, 1, 1]} : vector<8x4x32xf32> to vector<1x4x32xf32>
    %349 = vector.shape_cast %348 : vector<1x4x32xf32> to vector<4x32xf32>
    %cst_82 = arith.constant -1.000000e+07 : f32
    %350 = vector.broadcast %cst_82 : f32 to vector<4x32xf32>
    %351 = arith.mulf %350, %349 : vector<4x32xf32>
    %352 = arith.addf %333, %351 : vector<4x32xf32>
    %353 = arith.maximumf %241, %352 : vector<4x32xf32>
    %354 = vector.extract_strided_slice %1 {offsets = [0, 3, 0], sizes = [4, 1, 32], strides = [1, 1, 1]} : vector<4x8x32xf32> to vector<4x1x32xf32>
    %355 = vector.shape_cast %354 : vector<4x1x32xf32> to vector<4x32xf32>
    %356 = vector.extract_strided_slice %1 {offsets = [0, 4, 0], sizes = [4, 1, 32], strides = [1, 1, 1]} : vector<4x8x32xf32> to vector<4x1x32xf32>
    %357 = vector.shape_cast %356 : vector<4x1x32xf32> to vector<4x32xf32>
    %358 = tpu.concatenate %355, %357, %288, %327 in 1 : vector<4x32xf32>, vector<4x32xf32>, vector<4x32xf32>, vector<4x32xf32> -> vector<4x128xf32>
    %cst_83 = arith.constant dense<0.000000e+00> : vector<4x384xf32>
    %359 = tpu.matmul %358, %5, %cst_83 {dimension_numbers = #tpu.dot_dimension_numbers<[1], [0], [0], [1], [0, 0, 1, 1], [], []>} : vector<4x128xf32>, vector<128x384xf32>, vector<4x384xf32> -> vector<4x384xf32>
    %360 = vector.broadcast %7 : vector<1x384xf32> to vector<4x384xf32>
    %361 = arith.addf %359, %360 : vector<4x384xf32>
    %362 = vector.extract_strided_slice %361 {offsets = [0, 0], sizes = [4, 96], strides = [1, 1]} : vector<4x384xf32> to vector<4x96xf32>
    %363 = vector.extract_strided_slice %361 {offsets = [0, 96], sizes = [4, 96], strides = [1, 1]} : vector<4x384xf32> to vector<4x96xf32>
    %364 = vector.extract_strided_slice %9 {offsets = [3, 0, 0], sizes = [1, 4, 32], strides = [1, 1, 1]} : vector<8x4x32xf32> to vector<1x4x32xf32>
    %365 = vector.shape_cast %364 : vector<1x4x32xf32> to vector<4x32xf32>
    %366 = vector.extract_strided_slice %11 {offsets = [3, 0, 0], sizes = [1, 4, 32], strides = [1, 1, 1]} : vector<8x4x32xf32> to vector<1x4x32xf32>
    %367 = vector.shape_cast %366 : vector<1x4x32xf32> to vector<4x32xf32>
    %368 = vector.extract_strided_slice %362 {offsets = [0, 0], sizes = [4, 32], strides = [1, 1]} : vector<4x96xf32> to vector<4x32xf32>
    %369 = vector.extract_strided_slice %363 {offsets = [0, 0], sizes = [4, 32], strides = [1, 1]} : vector<4x96xf32> to vector<4x32xf32>
    %370 = arith.addf %368, %369 : vector<4x32xf32>
    %cst_84 = arith.constant 0.000000e+00 : f32
    %371 = vector.broadcast %cst_84 : f32 to vector<4x32xf32>
    %372 = arith.subf %371, %370 : vector<4x32xf32>
    %373 = math.exp %372 : vector<4x32xf32>
    %cst_85 = arith.constant 1.000000e+00 : f32
    %374 = vector.broadcast %cst_85 : f32 to vector<4x32xf32>
    %375 = arith.addf %374, %373 : vector<4x32xf32>
    %cst_86 = arith.constant 1.000000e+00 : f32
    %376 = vector.broadcast %cst_86 : f32 to vector<4x32xf32>
    %377 = arith.divf %376, %375 : vector<4x32xf32>
    %378 = vector.extract_strided_slice %362 {offsets = [0, 32], sizes = [4, 32], strides = [1, 1]} : vector<4x96xf32> to vector<4x32xf32>
    %379 = vector.extract_strided_slice %363 {offsets = [0, 32], sizes = [4, 32], strides = [1, 1]} : vector<4x96xf32> to vector<4x32xf32>
    %380 = arith.addf %378, %379 : vector<4x32xf32>
    %cst_87 = arith.constant 0.000000e+00 : f32
    %381 = vector.broadcast %cst_87 : f32 to vector<4x32xf32>
    %382 = arith.subf %381, %380 : vector<4x32xf32>
    %383 = math.exp %382 : vector<4x32xf32>
    %cst_88 = arith.constant 1.000000e+00 : f32
    %384 = vector.broadcast %cst_88 : f32 to vector<4x32xf32>
    %385 = arith.addf %384, %383 : vector<4x32xf32>
    %cst_89 = arith.constant 1.000000e+00 : f32
    %386 = vector.broadcast %cst_89 : f32 to vector<4x32xf32>
    %387 = arith.divf %386, %385 : vector<4x32xf32>
    %388 = vector.extract_strided_slice %362 {offsets = [0, 64], sizes = [4, 32], strides = [1, 1]} : vector<4x96xf32> to vector<4x32xf32>
    %389 = vector.extract_strided_slice %363 {offsets = [0, 64], sizes = [4, 32], strides = [1, 1]} : vector<4x96xf32> to vector<4x32xf32>
    %390 = arith.mulf %377, %389 : vector<4x32xf32>
    %391 = arith.addf %388, %390 : vector<4x32xf32>
    %392 = math.tanh %391 : vector<4x32xf32>
    %cst_90 = arith.constant 1.000000e+00 : f32
    %393 = vector.broadcast %cst_90 : f32 to vector<4x32xf32>
    %394 = arith.subf %393, %387 : vector<4x32xf32>
    %395 = arith.mulf %394, %392 : vector<4x32xf32>
    %396 = arith.mulf %387, %288 : vector<4x32xf32>
    %397 = arith.addf %395, %396 : vector<4x32xf32>
    %398 = arith.mulf %365, %397 : vector<4x32xf32>
    %399 = arith.mulf %367, %288 : vector<4x32xf32>
    %400 = arith.addf %398, %399 : vector<4x32xf32>
    %401 = vector.extract_strided_slice %361 {offsets = [0, 192], sizes = [4, 96], strides = [1, 1]} : vector<4x384xf32> to vector<4x96xf32>
    %402 = vector.extract_strided_slice %361 {offsets = [0, 288], sizes = [4, 96], strides = [1, 1]} : vector<4x384xf32> to vector<4x96xf32>
    %403 = vector.extract_strided_slice %9 {offsets = [4, 0, 0], sizes = [1, 4, 32], strides = [1, 1, 1]} : vector<8x4x32xf32> to vector<1x4x32xf32>
    %404 = vector.shape_cast %403 : vector<1x4x32xf32> to vector<4x32xf32>
    %405 = vector.extract_strided_slice %11 {offsets = [4, 0, 0], sizes = [1, 4, 32], strides = [1, 1, 1]} : vector<8x4x32xf32> to vector<1x4x32xf32>
    %406 = vector.shape_cast %405 : vector<1x4x32xf32> to vector<4x32xf32>
    %407 = vector.extract_strided_slice %401 {offsets = [0, 0], sizes = [4, 32], strides = [1, 1]} : vector<4x96xf32> to vector<4x32xf32>
    %408 = vector.extract_strided_slice %402 {offsets = [0, 0], sizes = [4, 32], strides = [1, 1]} : vector<4x96xf32> to vector<4x32xf32>
    %409 = arith.addf %407, %408 : vector<4x32xf32>
    %cst_91 = arith.constant 0.000000e+00 : f32
    %410 = vector.broadcast %cst_91 : f32 to vector<4x32xf32>
    %411 = arith.subf %410, %409 : vector<4x32xf32>
    %412 = math.exp %411 : vector<4x32xf32>
    %cst_92 = arith.constant 1.000000e+00 : f32
    %413 = vector.broadcast %cst_92 : f32 to vector<4x32xf32>
    %414 = arith.addf %413, %412 : vector<4x32xf32>
    %cst_93 = arith.constant 1.000000e+00 : f32
    %415 = vector.broadcast %cst_93 : f32 to vector<4x32xf32>
    %416 = arith.divf %415, %414 : vector<4x32xf32>
    %417 = vector.extract_strided_slice %401 {offsets = [0, 32], sizes = [4, 32], strides = [1, 1]} : vector<4x96xf32> to vector<4x32xf32>
    %418 = vector.extract_strided_slice %402 {offsets = [0, 32], sizes = [4, 32], strides = [1, 1]} : vector<4x96xf32> to vector<4x32xf32>
    %419 = arith.addf %417, %418 : vector<4x32xf32>
    %cst_94 = arith.constant 0.000000e+00 : f32
    %420 = vector.broadcast %cst_94 : f32 to vector<4x32xf32>
    %421 = arith.subf %420, %419 : vector<4x32xf32>
    %422 = math.exp %421 : vector<4x32xf32>
    %cst_95 = arith.constant 1.000000e+00 : f32
    %423 = vector.broadcast %cst_95 : f32 to vector<4x32xf32>
    %424 = arith.addf %423, %422 : vector<4x32xf32>
    %cst_96 = arith.constant 1.000000e+00 : f32
    %425 = vector.broadcast %cst_96 : f32 to vector<4x32xf32>
    %426 = arith.divf %425, %424 : vector<4x32xf32>
    %427 = vector.extract_strided_slice %401 {offsets = [0, 64], sizes = [4, 32], strides = [1, 1]} : vector<4x96xf32> to vector<4x32xf32>
    %428 = vector.extract_strided_slice %402 {offsets = [0, 64], sizes = [4, 32], strides = [1, 1]} : vector<4x96xf32> to vector<4x32xf32>
    %429 = arith.mulf %416, %428 : vector<4x32xf32>
    %430 = arith.addf %427, %429 : vector<4x32xf32>
    %431 = math.tanh %430 : vector<4x32xf32>
    %cst_97 = arith.constant 1.000000e+00 : f32
    %432 = vector.broadcast %cst_97 : f32 to vector<4x32xf32>
    %433 = arith.subf %432, %426 : vector<4x32xf32>
    %434 = arith.mulf %433, %431 : vector<4x32xf32>
    %435 = arith.mulf %426, %327 : vector<4x32xf32>
    %436 = arith.addf %434, %435 : vector<4x32xf32>
    %437 = arith.mulf %404, %436 : vector<4x32xf32>
    %438 = arith.mulf %406, %327 : vector<4x32xf32>
    %439 = arith.addf %437, %438 : vector<4x32xf32>
    %440 = vector.extract_strided_slice %9 {offsets = [3, 0, 0], sizes = [1, 4, 32], strides = [1, 1, 1]} : vector<8x4x32xf32> to vector<1x4x32xf32>
    %441 = vector.shape_cast %440 : vector<1x4x32xf32> to vector<4x32xf32>
    %442 = arith.mulf %400, %441 : vector<4x32xf32>
    %443 = vector.extract_strided_slice %9 {offsets = [4, 0, 0], sizes = [1, 4, 32], strides = [1, 1, 1]} : vector<8x4x32xf32> to vector<1x4x32xf32>
    %444 = vector.shape_cast %443 : vector<1x4x32xf32> to vector<4x32xf32>
    %445 = arith.mulf %439, %444 : vector<4x32xf32>
    %c0_98 = arith.constant 0 : index
    %c0_99 = arith.constant 0 : index
    %c192 = arith.constant 192 : index
    %446 = vector.load %arg5[%c0_98, %c0_99, %c192] : memref<1x4x512xf32, #tpu.memory_space<vmem>>, vector<1x4x32xf32>
    %447 = vector.shape_cast %446 : vector<1x4x32xf32> to vector<4x32xf32>
    %448 = vector.shape_cast %442 : vector<4x32xf32> to vector<1x4x32xf32>
    tpu.vector_store %arg5[%c0_98, %c0_99, %c192], %448 {strides = array<i32>} : memref<1x4x512xf32, #tpu.memory_space<vmem>>, vector<1x4x32xf32>,
    %c0_100 = arith.constant 0 : index
    %c0_101 = arith.constant 0 : index
    %c288 = arith.constant 288 : index
    %449 = vector.load %arg5[%c0_100, %c0_101, %c288] : memref<1x4x512xf32, #tpu.memory_space<vmem>>, vector<1x4x32xf32>
    %450 = vector.shape_cast %449 : vector<1x4x32xf32> to vector<4x32xf32>
    %451 = vector.shape_cast %445 : vector<4x32xf32> to vector<1x4x32xf32>
    tpu.vector_store %arg5[%c0_100, %c0_101, %c288], %451 {strides = array<i32>} : memref<1x4x512xf32, #tpu.memory_space<vmem>>, vector<1x4x32xf32>,
    %452 = arith.addf %340, %442 : vector<4x32xf32>
    %453 = arith.addf %341, %445 : vector<4x32xf32>
    %454 = vector.extract_strided_slice %11 {offsets = [3, 0, 0], sizes = [1, 4, 32], strides = [1, 1, 1]} : vector<8x4x32xf32> to vector<1x4x32xf32>
    %455 = vector.shape_cast %454 : vector<1x4x32xf32> to vector<4x32xf32>
    %cst_102 = arith.constant -1.000000e+07 : f32
    %456 = vector.broadcast %cst_102 : f32 to vector<4x32xf32>
    %457 = arith.mulf %456, %455 : vector<4x32xf32>
    %458 = arith.addf %442, %457 : vector<4x32xf32>
    %459 = arith.maximumf %347, %458 : vector<4x32xf32>
    %460 = vector.extract_strided_slice %11 {offsets = [4, 0, 0], sizes = [1, 4, 32], strides = [1, 1, 1]} : vector<8x4x32xf32> to vector<1x4x32xf32>
    %461 = vector.shape_cast %460 : vector<1x4x32xf32> to vector<4x32xf32>
    %cst_103 = arith.constant -1.000000e+07 : f32
    %462 = vector.broadcast %cst_103 : f32 to vector<4x32xf32>
    %463 = arith.mulf %462, %461 : vector<4x32xf32>
    %464 = arith.addf %445, %463 : vector<4x32xf32>
    %465 = arith.maximumf %353, %464 : vector<4x32xf32>
    %466 = vector.extract_strided_slice %1 {offsets = [0, 4, 0], sizes = [4, 1, 32], strides = [1, 1, 1]} : vector<4x8x32xf32> to vector<4x1x32xf32>
    %467 = vector.shape_cast %466 : vector<4x1x32xf32> to vector<4x32xf32>
    %468 = vector.extract_strided_slice %1 {offsets = [0, 3, 0], sizes = [4, 1, 32], strides = [1, 1, 1]} : vector<4x8x32xf32> to vector<4x1x32xf32>
    %469 = vector.shape_cast %468 : vector<4x1x32xf32> to vector<4x32xf32>
    %470 = tpu.concatenate %467, %469, %400, %439 in 1 : vector<4x32xf32>, vector<4x32xf32>, vector<4x32xf32>, vector<4x32xf32> -> vector<4x128xf32>
    %cst_104 = arith.constant dense<0.000000e+00> : vector<4x384xf32>
    %471 = tpu.matmul %470, %5, %cst_104 {dimension_numbers = #tpu.dot_dimension_numbers<[1], [0], [0], [1], [0, 0, 1, 1], [], []>} : vector<4x128xf32>, vector<128x384xf32>, vector<4x384xf32> -> vector<4x384xf32>
    %472 = vector.broadcast %7 : vector<1x384xf32> to vector<4x384xf32>
    %473 = arith.addf %471, %472 : vector<4x384xf32>
    %474 = vector.extract_strided_slice %473 {offsets = [0, 0], sizes = [4, 96], strides = [1, 1]} : vector<4x384xf32> to vector<4x96xf32>
    %475 = vector.extract_strided_slice %473 {offsets = [0, 96], sizes = [4, 96], strides = [1, 1]} : vector<4x384xf32> to vector<4x96xf32>
    %476 = vector.extract_strided_slice %9 {offsets = [4, 0, 0], sizes = [1, 4, 32], strides = [1, 1, 1]} : vector<8x4x32xf32> to vector<1x4x32xf32>
    %477 = vector.shape_cast %476 : vector<1x4x32xf32> to vector<4x32xf32>
    %478 = vector.extract_strided_slice %11 {offsets = [4, 0, 0], sizes = [1, 4, 32], strides = [1, 1, 1]} : vector<8x4x32xf32> to vector<1x4x32xf32>
    %479 = vector.shape_cast %478 : vector<1x4x32xf32> to vector<4x32xf32>
    %480 = vector.extract_strided_slice %474 {offsets = [0, 0], sizes = [4, 32], strides = [1, 1]} : vector<4x96xf32> to vector<4x32xf32>
    %481 = vector.extract_strided_slice %475 {offsets = [0, 0], sizes = [4, 32], strides = [1, 1]} : vector<4x96xf32> to vector<4x32xf32>
    %482 = arith.addf %480, %481 : vector<4x32xf32>
    %cst_105 = arith.constant 0.000000e+00 : f32
    %483 = vector.broadcast %cst_105 : f32 to vector<4x32xf32>
    %484 = arith.subf %483, %482 : vector<4x32xf32>
    %485 = math.exp %484 : vector<4x32xf32>
    %cst_106 = arith.constant 1.000000e+00 : f32
    %486 = vector.broadcast %cst_106 : f32 to vector<4x32xf32>
    %487 = arith.addf %486, %485 : vector<4x32xf32>
    %cst_107 = arith.constant 1.000000e+00 : f32
    %488 = vector.broadcast %cst_107 : f32 to vector<4x32xf32>
    %489 = arith.divf %488, %487 : vector<4x32xf32>
    %490 = vector.extract_strided_slice %474 {offsets = [0, 32], sizes = [4, 32], strides = [1, 1]} : vector<4x96xf32> to vector<4x32xf32>
    %491 = vector.extract_strided_slice %475 {offsets = [0, 32], sizes = [4, 32], strides = [1, 1]} : vector<4x96xf32> to vector<4x32xf32>
    %492 = arith.addf %490, %491 : vector<4x32xf32>
    %cst_108 = arith.constant 0.000000e+00 : f32
    %493 = vector.broadcast %cst_108 : f32 to vector<4x32xf32>
    %494 = arith.subf %493, %492 : vector<4x32xf32>
    %495 = math.exp %494 : vector<4x32xf32>
    %cst_109 = arith.constant 1.000000e+00 : f32
    %496 = vector.broadcast %cst_109 : f32 to vector<4x32xf32>
    %497 = arith.addf %496, %495 : vector<4x32xf32>
    %cst_110 = arith.constant 1.000000e+00 : f32
    %498 = vector.broadcast %cst_110 : f32 to vector<4x32xf32>
    %499 = arith.divf %498, %497 : vector<4x32xf32>
    %500 = vector.extract_strided_slice %474 {offsets = [0, 64], sizes = [4, 32], strides = [1, 1]} : vector<4x96xf32> to vector<4x32xf32>
    %501 = vector.extract_strided_slice %475 {offsets = [0, 64], sizes = [4, 32], strides = [1, 1]} : vector<4x96xf32> to vector<4x32xf32>
    %502 = arith.mulf %489, %501 : vector<4x32xf32>
    %503 = arith.addf %500, %502 : vector<4x32xf32>
    %504 = math.tanh %503 : vector<4x32xf32>
    %cst_111 = arith.constant 1.000000e+00 : f32
    %505 = vector.broadcast %cst_111 : f32 to vector<4x32xf32>
    %506 = arith.subf %505, %499 : vector<4x32xf32>
    %507 = arith.mulf %506, %504 : vector<4x32xf32>
    %508 = arith.mulf %499, %400 : vector<4x32xf32>
    %509 = arith.addf %507, %508 : vector<4x32xf32>
    %510 = arith.mulf %477, %509 : vector<4x32xf32>
    %511 = arith.mulf %479, %400 : vector<4x32xf32>
    %512 = arith.addf %510, %511 : vector<4x32xf32>
    %513 = vector.extract_strided_slice %473 {offsets = [0, 192], sizes = [4, 96], strides = [1, 1]} : vector<4x384xf32> to vector<4x96xf32>
    %514 = vector.extract_strided_slice %473 {offsets = [0, 288], sizes = [4, 96], strides = [1, 1]} : vector<4x384xf32> to vector<4x96xf32>
    %515 = vector.extract_strided_slice %9 {offsets = [3, 0, 0], sizes = [1, 4, 32], strides = [1, 1, 1]} : vector<8x4x32xf32> to vector<1x4x32xf32>
    %516 = vector.shape_cast %515 : vector<1x4x32xf32> to vector<4x32xf32>
    %517 = vector.extract_strided_slice %11 {offsets = [3, 0, 0], sizes = [1, 4, 32], strides = [1, 1, 1]} : vector<8x4x32xf32> to vector<1x4x32xf32>
    %518 = vector.shape_cast %517 : vector<1x4x32xf32> to vector<4x32xf32>
    %519 = vector.extract_strided_slice %513 {offsets = [0, 0], sizes = [4, 32], strides = [1, 1]} : vector<4x96xf32> to vector<4x32xf32>
    %520 = vector.extract_strided_slice %514 {offsets = [0, 0], sizes = [4, 32], strides = [1, 1]} : vector<4x96xf32> to vector<4x32xf32>
    %521 = arith.addf %519, %520 : vector<4x32xf32>
    %cst_112 = arith.constant 0.000000e+00 : f32
    %522 = vector.broadcast %cst_112 : f32 to vector<4x32xf32>
    %523 = arith.subf %522, %521 : vector<4x32xf32>
    %524 = math.exp %523 : vector<4x32xf32>
    %cst_113 = arith.constant 1.000000e+00 : f32
    %525 = vector.broadcast %cst_113 : f32 to vector<4x32xf32>
    %526 = arith.addf %525, %524 : vector<4x32xf32>
    %cst_114 = arith.constant 1.000000e+00 : f32
    %527 = vector.broadcast %cst_114 : f32 to vector<4x32xf32>
    %528 = arith.divf %527, %526 : vector<4x32xf32>
    %529 = vector.extract_strided_slice %513 {offsets = [0, 32], sizes = [4, 32], strides = [1, 1]} : vector<4x96xf32> to vector<4x32xf32>
    %530 = vector.extract_strided_slice %514 {offsets = [0, 32], sizes = [4, 32], strides = [1, 1]} : vector<4x96xf32> to vector<4x32xf32>
    %531 = arith.addf %529, %530 : vector<4x32xf32>
    %cst_115 = arith.constant 0.000000e+00 : f32
    %532 = vector.broadcast %cst_115 : f32 to vector<4x32xf32>
    %533 = arith.subf %532, %531 : vector<4x32xf32>
    %534 = math.exp %533 : vector<4x32xf32>
    %cst_116 = arith.constant 1.000000e+00 : f32
    %535 = vector.broadcast %cst_116 : f32 to vector<4x32xf32>
    %536 = arith.addf %535, %534 : vector<4x32xf32>
    %cst_117 = arith.constant 1.000000e+00 : f32
    %537 = vector.broadcast %cst_117 : f32 to vector<4x32xf32>
    %538 = arith.divf %537, %536 : vector<4x32xf32>
    %539 = vector.extract_strided_slice %513 {offsets = [0, 64], sizes = [4, 32], strides = [1, 1]} : vector<4x96xf32> to vector<4x32xf32>
    %540 = vector.extract_strided_slice %514 {offsets = [0, 64], sizes = [4, 32], strides = [1, 1]} : vector<4x96xf32> to vector<4x32xf32>
    %541 = arith.mulf %528, %540 : vector<4x32xf32>
    %542 = arith.addf %539, %541 : vector<4x32xf32>
    %543 = math.tanh %542 : vector<4x32xf32>
    %cst_118 = arith.constant 1.000000e+00 : f32
    %544 = vector.broadcast %cst_118 : f32 to vector<4x32xf32>
    %545 = arith.subf %544, %538 : vector<4x32xf32>
    %546 = arith.mulf %545, %543 : vector<4x32xf32>
    %547 = arith.mulf %538, %439 : vector<4x32xf32>
    %548 = arith.addf %546, %547 : vector<4x32xf32>
    %549 = arith.mulf %516, %548 : vector<4x32xf32>
    %550 = arith.mulf %518, %439 : vector<4x32xf32>
    %551 = arith.addf %549, %550 : vector<4x32xf32>
    %552 = vector.extract_strided_slice %9 {offsets = [4, 0, 0], sizes = [1, 4, 32], strides = [1, 1, 1]} : vector<8x4x32xf32> to vector<1x4x32xf32>
    %553 = vector.shape_cast %552 : vector<1x4x32xf32> to vector<4x32xf32>
    %554 = arith.mulf %512, %553 : vector<4x32xf32>
    %555 = vector.extract_strided_slice %9 {offsets = [3, 0, 0], sizes = [1, 4, 32], strides = [1, 1, 1]} : vector<8x4x32xf32> to vector<1x4x32xf32>
    %556 = vector.shape_cast %555 : vector<1x4x32xf32> to vector<4x32xf32>
    %557 = arith.mulf %551, %556 : vector<4x32xf32>
    %c0_119 = arith.constant 0 : index
    %c0_120 = arith.constant 0 : index
    %c256 = arith.constant 256 : index
    %558 = vector.load %arg5[%c0_119, %c0_120, %c256] : memref<1x4x512xf32, #tpu.memory_space<vmem>>, vector<1x4x32xf32>
    %559 = vector.shape_cast %558 : vector<1x4x32xf32> to vector<4x32xf32>
    %560 = vector.shape_cast %554 : vector<4x32xf32> to vector<1x4x32xf32>
    tpu.vector_store %arg5[%c0_119, %c0_120, %c256], %560 {strides = array<i32>} : memref<1x4x512xf32, #tpu.memory_space<vmem>>, vector<1x4x32xf32>,
    %c0_121 = arith.constant 0 : index
    %c0_122 = arith.constant 0 : index
    %c224 = arith.constant 224 : index
    %561 = vector.load %arg5[%c0_121, %c0_122, %c224] : memref<1x4x512xf32, #tpu.memory_space<vmem>>, vector<1x4x32xf32>
    %562 = vector.shape_cast %561 : vector<1x4x32xf32> to vector<4x32xf32>
    %563 = vector.shape_cast %557 : vector<4x32xf32> to vector<1x4x32xf32>
    tpu.vector_store %arg5[%c0_121, %c0_122, %c224], %563 {strides = array<i32>} : memref<1x4x512xf32, #tpu.memory_space<vmem>>, vector<1x4x32xf32>,
    %564 = arith.addf %452, %554 : vector<4x32xf32>
    %565 = arith.addf %453, %557 : vector<4x32xf32>
    %566 = vector.extract_strided_slice %11 {offsets = [4, 0, 0], sizes = [1, 4, 32], strides = [1, 1, 1]} : vector<8x4x32xf32> to vector<1x4x32xf32>
    %567 = vector.shape_cast %566 : vector<1x4x32xf32> to vector<4x32xf32>
    %cst_123 = arith.constant -1.000000e+07 : f32
    %568 = vector.broadcast %cst_123 : f32 to vector<4x32xf32>
    %569 = arith.mulf %568, %567 : vector<4x32xf32>
    %570 = arith.addf %554, %569 : vector<4x32xf32>
    %571 = arith.maximumf %459, %570 : vector<4x32xf32>
    %572 = vector.extract_strided_slice %11 {offsets = [3, 0, 0], sizes = [1, 4, 32], strides = [1, 1, 1]} : vector<8x4x32xf32> to vector<1x4x32xf32>
    %573 = vector.shape_cast %572 : vector<1x4x32xf32> to vector<4x32xf32>
    %cst_124 = arith.constant -1.000000e+07 : f32
    %574 = vector.broadcast %cst_124 : f32 to vector<4x32xf32>
    %575 = arith.mulf %574, %573 : vector<4x32xf32>
    %576 = arith.addf %557, %575 : vector<4x32xf32>
    %577 = arith.maximumf %465, %576 : vector<4x32xf32>
    %578 = vector.extract_strided_slice %1 {offsets = [0, 5, 0], sizes = [4, 1, 32], strides = [1, 1, 1]} : vector<4x8x32xf32> to vector<4x1x32xf32>
    %579 = vector.shape_cast %578 : vector<4x1x32xf32> to vector<4x32xf32>
    %580 = vector.extract_strided_slice %1 {offsets = [0, 2, 0], sizes = [4, 1, 32], strides = [1, 1, 1]} : vector<4x8x32xf32> to vector<4x1x32xf32>
    %581 = vector.shape_cast %580 : vector<4x1x32xf32> to vector<4x32xf32>
    %582 = tpu.concatenate %579, %581, %512, %551 in 1 : vector<4x32xf32>, vector<4x32xf32>, vector<4x32xf32>, vector<4x32xf32> -> vector<4x128xf32>
    %cst_125 = arith.constant dense<0.000000e+00> : vector<4x384xf32>
    %583 = tpu.matmul %582, %5, %cst_125 {dimension_numbers = #tpu.dot_dimension_numbers<[1], [0], [0], [1], [0, 0, 1, 1], [], []>} : vector<4x128xf32>, vector<128x384xf32>, vector<4x384xf32> -> vector<4x384xf32>
    %584 = vector.broadcast %7 : vector<1x384xf32> to vector<4x384xf32>
    %585 = arith.addf %583, %584 : vector<4x384xf32>
    %586 = vector.extract_strided_slice %585 {offsets = [0, 0], sizes = [4, 96], strides = [1, 1]} : vector<4x384xf32> to vector<4x96xf32>
    %587 = vector.extract_strided_slice %585 {offsets = [0, 96], sizes = [4, 96], strides = [1, 1]} : vector<4x384xf32> to vector<4x96xf32>
    %588 = vector.extract_strided_slice %9 {offsets = [5, 0, 0], sizes = [1, 4, 32], strides = [1, 1, 1]} : vector<8x4x32xf32> to vector<1x4x32xf32>
    %589 = vector.shape_cast %588 : vector<1x4x32xf32> to vector<4x32xf32>
    %590 = vector.extract_strided_slice %11 {offsets = [5, 0, 0], sizes = [1, 4, 32], strides = [1, 1, 1]} : vector<8x4x32xf32> to vector<1x4x32xf32>
    %591 = vector.shape_cast %590 : vector<1x4x32xf32> to vector<4x32xf32>
    %592 = vector.extract_strided_slice %586 {offsets = [0, 0], sizes = [4, 32], strides = [1, 1]} : vector<4x96xf32> to vector<4x32xf32>
    %593 = vector.extract_strided_slice %587 {offsets = [0, 0], sizes = [4, 32], strides = [1, 1]} : vector<4x96xf32> to vector<4x32xf32>
    %594 = arith.addf %592, %593 : vector<4x32xf32>
    %cst_126 = arith.constant 0.000000e+00 : f32
    %595 = vector.broadcast %cst_126 : f32 to vector<4x32xf32>
    %596 = arith.subf %595, %594 : vector<4x32xf32>
    %597 = math.exp %596 : vector<4x32xf32>
    %cst_127 = arith.constant 1.000000e+00 : f32
    %598 = vector.broadcast %cst_127 : f32 to vector<4x32xf32>
    %599 = arith.addf %598, %597 : vector<4x32xf32>
    %cst_128 = arith.constant 1.000000e+00 : f32
    %600 = vector.broadcast %cst_128 : f32 to vector<4x32xf32>
    %601 = arith.divf %600, %599 : vector<4x32xf32>
    %602 = vector.extract_strided_slice %586 {offsets = [0, 32], sizes = [4, 32], strides = [1, 1]} : vector<4x96xf32> to vector<4x32xf32>
    %603 = vector.extract_strided_slice %587 {offsets = [0, 32], sizes = [4, 32], strides = [1, 1]} : vector<4x96xf32> to vector<4x32xf32>
    %604 = arith.addf %602, %603 : vector<4x32xf32>
    %cst_129 = arith.constant 0.000000e+00 : f32
    %605 = vector.broadcast %cst_129 : f32 to vector<4x32xf32>
    %606 = arith.subf %605, %604 : vector<4x32xf32>
    %607 = math.exp %606 : vector<4x32xf32>
    %cst_130 = arith.constant 1.000000e+00 : f32
    %608 = vector.broadcast %cst_130 : f32 to vector<4x32xf32>
    %609 = arith.addf %608, %607 : vector<4x32xf32>
    %cst_131 = arith.constant 1.000000e+00 : f32
    %610 = vector.broadcast %cst_131 : f32 to vector<4x32xf32>
    %611 = arith.divf %610, %609 : vector<4x32xf32>
    %612 = vector.extract_strided_slice %586 {offsets = [0, 64], sizes = [4, 32], strides = [1, 1]} : vector<4x96xf32> to vector<4x32xf32>
    %613 = vector.extract_strided_slice %587 {offsets = [0, 64], sizes = [4, 32], strides = [1, 1]} : vector<4x96xf32> to vector<4x32xf32>
    %614 = arith.mulf %601, %613 : vector<4x32xf32>
    %615 = arith.addf %612, %614 : vector<4x32xf32>
    %616 = math.tanh %615 : vector<4x32xf32>
    %cst_132 = arith.constant 1.000000e+00 : f32
    %617 = vector.broadcast %cst_132 : f32 to vector<4x32xf32>
    %618 = arith.subf %617, %611 : vector<4x32xf32>
    %619 = arith.mulf %618, %616 : vector<4x32xf32>
    %620 = arith.mulf %611, %512 : vector<4x32xf32>
    %621 = arith.addf %619, %620 : vector<4x32xf32>
    %622 = arith.mulf %589, %621 : vector<4x32xf32>
    %623 = arith.mulf %591, %512 : vector<4x32xf32>
    %624 = arith.addf %622, %623 : vector<4x32xf32>
    %625 = vector.extract_strided_slice %585 {offsets = [0, 192], sizes = [4, 96], strides = [1, 1]} : vector<4x384xf32> to vector<4x96xf32>
    %626 = vector.extract_strided_slice %585 {offsets = [0, 288], sizes = [4, 96], strides = [1, 1]} : vector<4x384xf32> to vector<4x96xf32>
    %627 = vector.extract_strided_slice %9 {offsets = [2, 0, 0], sizes = [1, 4, 32], strides = [1, 1, 1]} : vector<8x4x32xf32> to vector<1x4x32xf32>
    %628 = vector.shape_cast %627 : vector<1x4x32xf32> to vector<4x32xf32>
    %629 = vector.extract_strided_slice %11 {offsets = [2, 0, 0], sizes = [1, 4, 32], strides = [1, 1, 1]} : vector<8x4x32xf32> to vector<1x4x32xf32>
    %630 = vector.shape_cast %629 : vector<1x4x32xf32> to vector<4x32xf32>
    %631 = vector.extract_strided_slice %625 {offsets = [0, 0], sizes = [4, 32], strides = [1, 1]} : vector<4x96xf32> to vector<4x32xf32>
    %632 = vector.extract_strided_slice %626 {offsets = [0, 0], sizes = [4, 32], strides = [1, 1]} : vector<4x96xf32> to vector<4x32xf32>
    %633 = arith.addf %631, %632 : vector<4x32xf32>
    %cst_133 = arith.constant 0.000000e+00 : f32
    %634 = vector.broadcast %cst_133 : f32 to vector<4x32xf32>
    %635 = arith.subf %634, %633 : vector<4x32xf32>
    %636 = math.exp %635 : vector<4x32xf32>
    %cst_134 = arith.constant 1.000000e+00 : f32
    %637 = vector.broadcast %cst_134 : f32 to vector<4x32xf32>
    %638 = arith.addf %637, %636 : vector<4x32xf32>
    %cst_135 = arith.constant 1.000000e+00 : f32
    %639 = vector.broadcast %cst_135 : f32 to vector<4x32xf32>
    %640 = arith.divf %639, %638 : vector<4x32xf32>
    %641 = vector.extract_strided_slice %625 {offsets = [0, 32], sizes = [4, 32], strides = [1, 1]} : vector<4x96xf32> to vector<4x32xf32>
    %642 = vector.extract_strided_slice %626 {offsets = [0, 32], sizes = [4, 32], strides = [1, 1]} : vector<4x96xf32> to vector<4x32xf32>
    %643 = arith.addf %641, %642 : vector<4x32xf32>
    %cst_136 = arith.constant 0.000000e+00 : f32
    %644 = vector.broadcast %cst_136 : f32 to vector<4x32xf32>
    %645 = arith.subf %644, %643 : vector<4x32xf32>
    %646 = math.exp %645 : vector<4x32xf32>
    %cst_137 = arith.constant 1.000000e+00 : f32
    %647 = vector.broadcast %cst_137 : f32 to vector<4x32xf32>
    %648 = arith.addf %647, %646 : vector<4x32xf32>
    %cst_138 = arith.constant 1.000000e+00 : f32
    %649 = vector.broadcast %cst_138 : f32 to vector<4x32xf32>
    %650 = arith.divf %649, %648 : vector<4x32xf32>
    %651 = vector.extract_strided_slice %625 {offsets = [0, 64], sizes = [4, 32], strides = [1, 1]} : vector<4x96xf32> to vector<4x32xf32>
    %652 = vector.extract_strided_slice %626 {offsets = [0, 64], sizes = [4, 32], strides = [1, 1]} : vector<4x96xf32> to vector<4x32xf32>
    %653 = arith.mulf %640, %652 : vector<4x32xf32>
    %654 = arith.addf %651, %653 : vector<4x32xf32>
    %655 = math.tanh %654 : vector<4x32xf32>
    %cst_139 = arith.constant 1.000000e+00 : f32
    %656 = vector.broadcast %cst_139 : f32 to vector<4x32xf32>
    %657 = arith.subf %656, %650 : vector<4x32xf32>
    %658 = arith.mulf %657, %655 : vector<4x32xf32>
    %659 = arith.mulf %650, %551 : vector<4x32xf32>
    %660 = arith.addf %658, %659 : vector<4x32xf32>
    %661 = arith.mulf %628, %660 : vector<4x32xf32>
    %662 = arith.mulf %630, %551 : vector<4x32xf32>
    %663 = arith.addf %661, %662 : vector<4x32xf32>
    %664 = vector.extract_strided_slice %9 {offsets = [5, 0, 0], sizes = [1, 4, 32], strides = [1, 1, 1]} : vector<8x4x32xf32> to vector<1x4x32xf32>
    %665 = vector.shape_cast %664 : vector<1x4x32xf32> to vector<4x32xf32>
    %666 = arith.mulf %624, %665 : vector<4x32xf32>
    %667 = vector.extract_strided_slice %9 {offsets = [2, 0, 0], sizes = [1, 4, 32], strides = [1, 1, 1]} : vector<8x4x32xf32> to vector<1x4x32xf32>
    %668 = vector.shape_cast %667 : vector<1x4x32xf32> to vector<4x32xf32>
    %669 = arith.mulf %663, %668 : vector<4x32xf32>
    %c0_140 = arith.constant 0 : index
    %c0_141 = arith.constant 0 : index
    %c320 = arith.constant 320 : index
    %670 = vector.load %arg5[%c0_140, %c0_141, %c320] : memref<1x4x512xf32, #tpu.memory_space<vmem>>, vector<1x4x32xf32>
    %671 = vector.shape_cast %670 : vector<1x4x32xf32> to vector<4x32xf32>
    %672 = vector.shape_cast %666 : vector<4x32xf32> to vector<1x4x32xf32>
    tpu.vector_store %arg5[%c0_140, %c0_141, %c320], %672 {strides = array<i32>} : memref<1x4x512xf32, #tpu.memory_space<vmem>>, vector<1x4x32xf32>,
    %c0_142 = arith.constant 0 : index
    %c0_143 = arith.constant 0 : index
    %c160 = arith.constant 160 : index
    %673 = vector.load %arg5[%c0_142, %c0_143, %c160] : memref<1x4x512xf32, #tpu.memory_space<vmem>>, vector<1x4x32xf32>
    %674 = vector.shape_cast %673 : vector<1x4x32xf32> to vector<4x32xf32>
    %675 = vector.shape_cast %669 : vector<4x32xf32> to vector<1x4x32xf32>
    tpu.vector_store %arg5[%c0_142, %c0_143, %c160], %675 {strides = array<i32>} : memref<1x4x512xf32, #tpu.memory_space<vmem>>, vector<1x4x32xf32>,
    %676 = arith.addf %564, %666 : vector<4x32xf32>
    %677 = arith.addf %565, %669 : vector<4x32xf32>
    %678 = vector.extract_strided_slice %11 {offsets = [5, 0, 0], sizes = [1, 4, 32], strides = [1, 1, 1]} : vector<8x4x32xf32> to vector<1x4x32xf32>
    %679 = vector.shape_cast %678 : vector<1x4x32xf32> to vector<4x32xf32>
    %cst_144 = arith.constant -1.000000e+07 : f32
    %680 = vector.broadcast %cst_144 : f32 to vector<4x32xf32>
    %681 = arith.mulf %680, %679 : vector<4x32xf32>
    %682 = arith.addf %666, %681 : vector<4x32xf32>
    %683 = arith.maximumf %571, %682 : vector<4x32xf32>
    %684 = vector.extract_strided_slice %11 {offsets = [2, 0, 0], sizes = [1, 4, 32], strides = [1, 1, 1]} : vector<8x4x32xf32> to vector<1x4x32xf32>
    %685 = vector.shape_cast %684 : vector<1x4x32xf32> to vector<4x32xf32>
    %cst_145 = arith.constant -1.000000e+07 : f32
    %686 = vector.broadcast %cst_145 : f32 to vector<4x32xf32>
    %687 = arith.mulf %686, %685 : vector<4x32xf32>
    %688 = arith.addf %669, %687 : vector<4x32xf32>
    %689 = arith.maximumf %577, %688 : vector<4x32xf32>
    %690 = vector.extract_strided_slice %1 {offsets = [0, 6, 0], sizes = [4, 1, 32], strides = [1, 1, 1]} : vector<4x8x32xf32> to vector<4x1x32xf32>
    %691 = vector.shape_cast %690 : vector<4x1x32xf32> to vector<4x32xf32>
    %692 = vector.extract_strided_slice %1 {offsets = [0, 1, 0], sizes = [4, 1, 32], strides = [1, 1, 1]} : vector<4x8x32xf32> to vector<4x1x32xf32>
    %693 = vector.shape_cast %692 : vector<4x1x32xf32> to vector<4x32xf32>
    %694 = tpu.concatenate %691, %693, %624, %663 in 1 : vector<4x32xf32>, vector<4x32xf32>, vector<4x32xf32>, vector<4x32xf32> -> vector<4x128xf32>
    %cst_146 = arith.constant dense<0.000000e+00> : vector<4x384xf32>
    %695 = tpu.matmul %694, %5, %cst_146 {dimension_numbers = #tpu.dot_dimension_numbers<[1], [0], [0], [1], [0, 0, 1, 1], [], []>} : vector<4x128xf32>, vector<128x384xf32>, vector<4x384xf32> -> vector<4x384xf32>
    %696 = vector.broadcast %7 : vector<1x384xf32> to vector<4x384xf32>
    %697 = arith.addf %695, %696 : vector<4x384xf32>
    %698 = vector.extract_strided_slice %697 {offsets = [0, 0], sizes = [4, 96], strides = [1, 1]} : vector<4x384xf32> to vector<4x96xf32>
    %699 = vector.extract_strided_slice %697 {offsets = [0, 96], sizes = [4, 96], strides = [1, 1]} : vector<4x384xf32> to vector<4x96xf32>
    %700 = vector.extract_strided_slice %9 {offsets = [6, 0, 0], sizes = [1, 4, 32], strides = [1, 1, 1]} : vector<8x4x32xf32> to vector<1x4x32xf32>
    %701 = vector.shape_cast %700 : vector<1x4x32xf32> to vector<4x32xf32>
    %702 = vector.extract_strided_slice %11 {offsets = [6, 0, 0], sizes = [1, 4, 32], strides = [1, 1, 1]} : vector<8x4x32xf32> to vector<1x4x32xf32>
    %703 = vector.shape_cast %702 : vector<1x4x32xf32> to vector<4x32xf32>
    %704 = vector.extract_strided_slice %698 {offsets = [0, 0], sizes = [4, 32], strides = [1, 1]} : vector<4x96xf32> to vector<4x32xf32>
    %705 = vector.extract_strided_slice %699 {offsets = [0, 0], sizes = [4, 32], strides = [1, 1]} : vector<4x96xf32> to vector<4x32xf32>
    %706 = arith.addf %704, %705 : vector<4x32xf32>
    %cst_147 = arith.constant 0.000000e+00 : f32
    %707 = vector.broadcast %cst_147 : f32 to vector<4x32xf32>
    %708 = arith.subf %707, %706 : vector<4x32xf32>
    %709 = math.exp %708 : vector<4x32xf32>
    %cst_148 = arith.constant 1.000000e+00 : f32
    %710 = vector.broadcast %cst_148 : f32 to vector<4x32xf32>
    %711 = arith.addf %710, %709 : vector<4x32xf32>
    %cst_149 = arith.constant 1.000000e+00 : f32
    %712 = vector.broadcast %cst_149 : f32 to vector<4x32xf32>
    %713 = arith.divf %712, %711 : vector<4x32xf32>
    %714 = vector.extract_strided_slice %698 {offsets = [0, 32], sizes = [4, 32], strides = [1, 1]} : vector<4x96xf32> to vector<4x32xf32>
    %715 = vector.extract_strided_slice %699 {offsets = [0, 32], sizes = [4, 32], strides = [1, 1]} : vector<4x96xf32> to vector<4x32xf32>
    %716 = arith.addf %714, %715 : vector<4x32xf32>
    %cst_150 = arith.constant 0.000000e+00 : f32
    %717 = vector.broadcast %cst_150 : f32 to vector<4x32xf32>
    %718 = arith.subf %717, %716 : vector<4x32xf32>
    %719 = math.exp %718 : vector<4x32xf32>
    %cst_151 = arith.constant 1.000000e+00 : f32
    %720 = vector.broadcast %cst_151 : f32 to vector<4x32xf32>
    %721 = arith.addf %720, %719 : vector<4x32xf32>
    %cst_152 = arith.constant 1.000000e+00 : f32
    %722 = vector.broadcast %cst_152 : f32 to vector<4x32xf32>
    %723 = arith.divf %722, %721 : vector<4x32xf32>
    %724 = vector.extract_strided_slice %698 {offsets = [0, 64], sizes = [4, 32], strides = [1, 1]} : vector<4x96xf32> to vector<4x32xf32>
    %725 = vector.extract_strided_slice %699 {offsets = [0, 64], sizes = [4, 32], strides = [1, 1]} : vector<4x96xf32> to vector<4x32xf32>
    %726 = arith.mulf %713, %725 : vector<4x32xf32>
    %727 = arith.addf %724, %726 : vector<4x32xf32>
    %728 = math.tanh %727 : vector<4x32xf32>
    %cst_153 = arith.constant 1.000000e+00 : f32
    %729 = vector.broadcast %cst_153 : f32 to vector<4x32xf32>
    %730 = arith.subf %729, %723 : vector<4x32xf32>
    %731 = arith.mulf %730, %728 : vector<4x32xf32>
    %732 = arith.mulf %723, %624 : vector<4x32xf32>
    %733 = arith.addf %731, %732 : vector<4x32xf32>
    %734 = arith.mulf %701, %733 : vector<4x32xf32>
    %735 = arith.mulf %703, %624 : vector<4x32xf32>
    %736 = arith.addf %734, %735 : vector<4x32xf32>
    %737 = vector.extract_strided_slice %697 {offsets = [0, 192], sizes = [4, 96], strides = [1, 1]} : vector<4x384xf32> to vector<4x96xf32>
    %738 = vector.extract_strided_slice %697 {offsets = [0, 288], sizes = [4, 96], strides = [1, 1]} : vector<4x384xf32> to vector<4x96xf32>
    %739 = vector.extract_strided_slice %9 {offsets = [1, 0, 0], sizes = [1, 4, 32], strides = [1, 1, 1]} : vector<8x4x32xf32> to vector<1x4x32xf32>
    %740 = vector.shape_cast %739 : vector<1x4x32xf32> to vector<4x32xf32>
    %741 = vector.extract_strided_slice %11 {offsets = [1, 0, 0], sizes = [1, 4, 32], strides = [1, 1, 1]} : vector<8x4x32xf32> to vector<1x4x32xf32>
    %742 = vector.shape_cast %741 : vector<1x4x32xf32> to vector<4x32xf32>
    %743 = vector.extract_strided_slice %737 {offsets = [0, 0], sizes = [4, 32], strides = [1, 1]} : vector<4x96xf32> to vector<4x32xf32>
    %744 = vector.extract_strided_slice %738 {offsets = [0, 0], sizes = [4, 32], strides = [1, 1]} : vector<4x96xf32> to vector<4x32xf32>
    %745 = arith.addf %743, %744 : vector<4x32xf32>
    %cst_154 = arith.constant 0.000000e+00 : f32
    %746 = vector.broadcast %cst_154 : f32 to vector<4x32xf32>
    %747 = arith.subf %746, %745 : vector<4x32xf32>
    %748 = math.exp %747 : vector<4x32xf32>
    %cst_155 = arith.constant 1.000000e+00 : f32
    %749 = vector.broadcast %cst_155 : f32 to vector<4x32xf32>
    %750 = arith.addf %749, %748 : vector<4x32xf32>
    %cst_156 = arith.constant 1.000000e+00 : f32
    %751 = vector.broadcast %cst_156 : f32 to vector<4x32xf32>
    %752 = arith.divf %751, %750 : vector<4x32xf32>
    %753 = vector.extract_strided_slice %737 {offsets = [0, 32], sizes = [4, 32], strides = [1, 1]} : vector<4x96xf32> to vector<4x32xf32>
    %754 = vector.extract_strided_slice %738 {offsets = [0, 32], sizes = [4, 32], strides = [1, 1]} : vector<4x96xf32> to vector<4x32xf32>
    %755 = arith.addf %753, %754 : vector<4x32xf32>
    %cst_157 = arith.constant 0.000000e+00 : f32
    %756 = vector.broadcast %cst_157 : f32 to vector<4x32xf32>
    %757 = arith.subf %756, %755 : vector<4x32xf32>
    %758 = math.exp %757 : vector<4x32xf32>
    %cst_158 = arith.constant 1.000000e+00 : f32
    %759 = vector.broadcast %cst_158 : f32 to vector<4x32xf32>
    %760 = arith.addf %759, %758 : vector<4x32xf32>
    %cst_159 = arith.constant 1.000000e+00 : f32
    %761 = vector.broadcast %cst_159 : f32 to vector<4x32xf32>
    %762 = arith.divf %761, %760 : vector<4x32xf32>
    %763 = vector.extract_strided_slice %737 {offsets = [0, 64], sizes = [4, 32], strides = [1, 1]} : vector<4x96xf32> to vector<4x32xf32>
    %764 = vector.extract_strided_slice %738 {offsets = [0, 64], sizes = [4, 32], strides = [1, 1]} : vector<4x96xf32> to vector<4x32xf32>
    %765 = arith.mulf %752, %764 : vector<4x32xf32>
    %766 = arith.addf %763, %765 : vector<4x32xf32>
    %767 = math.tanh %766 : vector<4x32xf32>
    %cst_160 = arith.constant 1.000000e+00 : f32
    %768 = vector.broadcast %cst_160 : f32 to vector<4x32xf32>
    %769 = arith.subf %768, %762 : vector<4x32xf32>
    %770 = arith.mulf %769, %767 : vector<4x32xf32>
    %771 = arith.mulf %762, %663 : vector<4x32xf32>
    %772 = arith.addf %770, %771 : vector<4x32xf32>
    %773 = arith.mulf %740, %772 : vector<4x32xf32>
    %774 = arith.mulf %742, %663 : vector<4x32xf32>
    %775 = arith.addf %773, %774 : vector<4x32xf32>
    %776 = vector.extract_strided_slice %9 {offsets = [6, 0, 0], sizes = [1, 4, 32], strides = [1, 1, 1]} : vector<8x4x32xf32> to vector<1x4x32xf32>
    %777 = vector.shape_cast %776 : vector<1x4x32xf32> to vector<4x32xf32>
    %778 = arith.mulf %736, %777 : vector<4x32xf32>
    %779 = vector.extract_strided_slice %9 {offsets = [1, 0, 0], sizes = [1, 4, 32], strides = [1, 1, 1]} : vector<8x4x32xf32> to vector<1x4x32xf32>
    %780 = vector.shape_cast %779 : vector<1x4x32xf32> to vector<4x32xf32>
    %781 = arith.mulf %775, %780 : vector<4x32xf32>
    %c0_161 = arith.constant 0 : index
    %c0_162 = arith.constant 0 : index
    %c384 = arith.constant 384 : index
    %782 = vector.load %arg5[%c0_161, %c0_162, %c384] : memref<1x4x512xf32, #tpu.memory_space<vmem>>, vector<1x4x32xf32>
    %783 = vector.shape_cast %782 : vector<1x4x32xf32> to vector<4x32xf32>
    %784 = vector.shape_cast %778 : vector<4x32xf32> to vector<1x4x32xf32>
    tpu.vector_store %arg5[%c0_161, %c0_162, %c384], %784 {strides = array<i32>} : memref<1x4x512xf32, #tpu.memory_space<vmem>>, vector<1x4x32xf32>,
    %c0_163 = arith.constant 0 : index
    %c0_164 = arith.constant 0 : index
    %c96 = arith.constant 96 : index
    %785 = vector.load %arg5[%c0_163, %c0_164, %c96] : memref<1x4x512xf32, #tpu.memory_space<vmem>>, vector<1x4x32xf32>
    %786 = vector.shape_cast %785 : vector<1x4x32xf32> to vector<4x32xf32>
    %787 = vector.shape_cast %781 : vector<4x32xf32> to vector<1x4x32xf32>
    tpu.vector_store %arg5[%c0_163, %c0_164, %c96], %787 {strides = array<i32>} : memref<1x4x512xf32, #tpu.memory_space<vmem>>, vector<1x4x32xf32>,
    %788 = arith.addf %676, %778 : vector<4x32xf32>
    %789 = arith.addf %677, %781 : vector<4x32xf32>
    %790 = vector.extract_strided_slice %11 {offsets = [6, 0, 0], sizes = [1, 4, 32], strides = [1, 1, 1]} : vector<8x4x32xf32> to vector<1x4x32xf32>
    %791 = vector.shape_cast %790 : vector<1x4x32xf32> to vector<4x32xf32>
    %cst_165 = arith.constant -1.000000e+07 : f32
    %792 = vector.broadcast %cst_165 : f32 to vector<4x32xf32>
    %793 = arith.mulf %792, %791 : vector<4x32xf32>
    %794 = arith.addf %778, %793 : vector<4x32xf32>
    %795 = arith.maximumf %683, %794 : vector<4x32xf32>
    %796 = vector.extract_strided_slice %11 {offsets = [1, 0, 0], sizes = [1, 4, 32], strides = [1, 1, 1]} : vector<8x4x32xf32> to vector<1x4x32xf32>
    %797 = vector.shape_cast %796 : vector<1x4x32xf32> to vector<4x32xf32>
    %cst_166 = arith.constant -1.000000e+07 : f32
    %798 = vector.broadcast %cst_166 : f32 to vector<4x32xf32>
    %799 = arith.mulf %798, %797 : vector<4x32xf32>
    %800 = arith.addf %781, %799 : vector<4x32xf32>
    %801 = arith.maximumf %689, %800 : vector<4x32xf32>
    %802 = vector.extract_strided_slice %1 {offsets = [0, 7, 0], sizes = [4, 1, 32], strides = [1, 1, 1]} : vector<4x8x32xf32> to vector<4x1x32xf32>
    %803 = vector.shape_cast %802 : vector<4x1x32xf32> to vector<4x32xf32>
    %804 = vector.extract_strided_slice %1 {offsets = [0, 0, 0], sizes = [4, 1, 32], strides = [1, 1, 1]} : vector<4x8x32xf32> to vector<4x1x32xf32>
    %805 = vector.shape_cast %804 : vector<4x1x32xf32> to vector<4x32xf32>
    %806 = tpu.concatenate %803, %805, %736, %775 in 1 : vector<4x32xf32>, vector<4x32xf32>, vector<4x32xf32>, vector<4x32xf32> -> vector<4x128xf32>
    %cst_167 = arith.constant dense<0.000000e+00> : vector<4x384xf32>
    %807 = tpu.matmul %806, %5, %cst_167 {dimension_numbers = #tpu.dot_dimension_numbers<[1], [0], [0], [1], [0, 0, 1, 1], [], []>} : vector<4x128xf32>, vector<128x384xf32>, vector<4x384xf32> -> vector<4x384xf32>
    %808 = vector.broadcast %7 : vector<1x384xf32> to vector<4x384xf32>
    %809 = arith.addf %807, %808 : vector<4x384xf32>
    %810 = vector.extract_strided_slice %809 {offsets = [0, 0], sizes = [4, 96], strides = [1, 1]} : vector<4x384xf32> to vector<4x96xf32>
    %811 = vector.extract_strided_slice %809 {offsets = [0, 96], sizes = [4, 96], strides = [1, 1]} : vector<4x384xf32> to vector<4x96xf32>
    %812 = vector.extract_strided_slice %9 {offsets = [7, 0, 0], sizes = [1, 4, 32], strides = [1, 1, 1]} : vector<8x4x32xf32> to vector<1x4x32xf32>
    %813 = vector.shape_cast %812 : vector<1x4x32xf32> to vector<4x32xf32>
    %814 = vector.extract_strided_slice %11 {offsets = [7, 0, 0], sizes = [1, 4, 32], strides = [1, 1, 1]} : vector<8x4x32xf32> to vector<1x4x32xf32>
    %815 = vector.shape_cast %814 : vector<1x4x32xf32> to vector<4x32xf32>
    %816 = vector.extract_strided_slice %810 {offsets = [0, 0], sizes = [4, 32], strides = [1, 1]} : vector<4x96xf32> to vector<4x32xf32>
    %817 = vector.extract_strided_slice %811 {offsets = [0, 0], sizes = [4, 32], strides = [1, 1]} : vector<4x96xf32> to vector<4x32xf32>
    %818 = arith.addf %816, %817 : vector<4x32xf32>
    %cst_168 = arith.constant 0.000000e+00 : f32
    %819 = vector.broadcast %cst_168 : f32 to vector<4x32xf32>
    %820 = arith.subf %819, %818 : vector<4x32xf32>
    %821 = math.exp %820 : vector<4x32xf32>
    %cst_169 = arith.constant 1.000000e+00 : f32
    %822 = vector.broadcast %cst_169 : f32 to vector<4x32xf32>
    %823 = arith.addf %822, %821 : vector<4x32xf32>
    %cst_170 = arith.constant 1.000000e+00 : f32
    %824 = vector.broadcast %cst_170 : f32 to vector<4x32xf32>
    %825 = arith.divf %824, %823 : vector<4x32xf32>
    %826 = vector.extract_strided_slice %810 {offsets = [0, 32], sizes = [4, 32], strides = [1, 1]} : vector<4x96xf32> to vector<4x32xf32>
    %827 = vector.extract_strided_slice %811 {offsets = [0, 32], sizes = [4, 32], strides = [1, 1]} : vector<4x96xf32> to vector<4x32xf32>
    %828 = arith.addf %826, %827 : vector<4x32xf32>
    %cst_171 = arith.constant 0.000000e+00 : f32
    %829 = vector.broadcast %cst_171 : f32 to vector<4x32xf32>
    %830 = arith.subf %829, %828 : vector<4x32xf32>
    %831 = math.exp %830 : vector<4x32xf32>
    %cst_172 = arith.constant 1.000000e+00 : f32
    %832 = vector.broadcast %cst_172 : f32 to vector<4x32xf32>
    %833 = arith.addf %832, %831 : vector<4x32xf32>
    %cst_173 = arith.constant 1.000000e+00 : f32
    %834 = vector.broadcast %cst_173 : f32 to vector<4x32xf32>
    %835 = arith.divf %834, %833 : vector<4x32xf32>
    %836 = vector.extract_strided_slice %810 {offsets = [0, 64], sizes = [4, 32], strides = [1, 1]} : vector<4x96xf32> to vector<4x32xf32>
    %837 = vector.extract_strided_slice %811 {offsets = [0, 64], sizes = [4, 32], strides = [1, 1]} : vector<4x96xf32> to vector<4x32xf32>
    %838 = arith.mulf %825, %837 : vector<4x32xf32>
    %839 = arith.addf %836, %838 : vector<4x32xf32>
    %840 = math.tanh %839 : vector<4x32xf32>
    %cst_174 = arith.constant 1.000000e+00 : f32
    %841 = vector.broadcast %cst_174 : f32 to vector<4x32xf32>
    %842 = arith.subf %841, %835 : vector<4x32xf32>
    %843 = arith.mulf %842, %840 : vector<4x32xf32>
    %844 = arith.mulf %835, %736 : vector<4x32xf32>
    %845 = arith.addf %843, %844 : vector<4x32xf32>
    %846 = arith.mulf %813, %845 : vector<4x32xf32>
    %847 = arith.mulf %815, %736 : vector<4x32xf32>
    %848 = arith.addf %846, %847 : vector<4x32xf32>
    %849 = vector.extract_strided_slice %809 {offsets = [0, 192], sizes = [4, 96], strides = [1, 1]} : vector<4x384xf32> to vector<4x96xf32>
    %850 = vector.extract_strided_slice %809 {offsets = [0, 288], sizes = [4, 96], strides = [1, 1]} : vector<4x384xf32> to vector<4x96xf32>
    %851 = vector.extract_strided_slice %9 {offsets = [0, 0, 0], sizes = [1, 4, 32], strides = [1, 1, 1]} : vector<8x4x32xf32> to vector<1x4x32xf32>
    %852 = vector.shape_cast %851 : vector<1x4x32xf32> to vector<4x32xf32>
    %853 = vector.extract_strided_slice %11 {offsets = [0, 0, 0], sizes = [1, 4, 32], strides = [1, 1, 1]} : vector<8x4x32xf32> to vector<1x4x32xf32>
    %854 = vector.shape_cast %853 : vector<1x4x32xf32> to vector<4x32xf32>
    %855 = vector.extract_strided_slice %849 {offsets = [0, 0], sizes = [4, 32], strides = [1, 1]} : vector<4x96xf32> to vector<4x32xf32>
    %856 = vector.extract_strided_slice %850 {offsets = [0, 0], sizes = [4, 32], strides = [1, 1]} : vector<4x96xf32> to vector<4x32xf32>
    %857 = arith.addf %855, %856 : vector<4x32xf32>
    %cst_175 = arith.constant 0.000000e+00 : f32
    %858 = vector.broadcast %cst_175 : f32 to vector<4x32xf32>
    %859 = arith.subf %858, %857 : vector<4x32xf32>
    %860 = math.exp %859 : vector<4x32xf32>
    %cst_176 = arith.constant 1.000000e+00 : f32
    %861 = vector.broadcast %cst_176 : f32 to vector<4x32xf32>
    %862 = arith.addf %861, %860 : vector<4x32xf32>
    %cst_177 = arith.constant 1.000000e+00 : f32
    %863 = vector.broadcast %cst_177 : f32 to vector<4x32xf32>
    %864 = arith.divf %863, %862 : vector<4x32xf32>
    %865 = vector.extract_strided_slice %849 {offsets = [0, 32], sizes = [4, 32], strides = [1, 1]} : vector<4x96xf32> to vector<4x32xf32>
    %866 = vector.extract_strided_slice %850 {offsets = [0, 32], sizes = [4, 32], strides = [1, 1]} : vector<4x96xf32> to vector<4x32xf32>
    %867 = arith.addf %865, %866 : vector<4x32xf32>
    %cst_178 = arith.constant 0.000000e+00 : f32
    %868 = vector.broadcast %cst_178 : f32 to vector<4x32xf32>
    %869 = arith.subf %868, %867 : vector<4x32xf32>
    %870 = math.exp %869 : vector<4x32xf32>
    %cst_179 = arith.constant 1.000000e+00 : f32
    %871 = vector.broadcast %cst_179 : f32 to vector<4x32xf32>
    %872 = arith.addf %871, %870 : vector<4x32xf32>
    %cst_180 = arith.constant 1.000000e+00 : f32
    %873 = vector.broadcast %cst_180 : f32 to vector<4x32xf32>
    %874 = arith.divf %873, %872 : vector<4x32xf32>
    %875 = vector.extract_strided_slice %849 {offsets = [0, 64], sizes = [4, 32], strides = [1, 1]} : vector<4x96xf32> to vector<4x32xf32>
    %876 = vector.extract_strided_slice %850 {offsets = [0, 64], sizes = [4, 32], strides = [1, 1]} : vector<4x96xf32> to vector<4x32xf32>
    %877 = arith.mulf %864, %876 : vector<4x32xf32>
    %878 = arith.addf %875, %877 : vector<4x32xf32>
    %879 = math.tanh %878 : vector<4x32xf32>
    %cst_181 = arith.constant 1.000000e+00 : f32
    %880 = vector.broadcast %cst_181 : f32 to vector<4x32xf32>
    %881 = arith.subf %880, %874 : vector<4x32xf32>
    %882 = arith.mulf %881, %879 : vector<4x32xf32>
    %883 = arith.mulf %874, %775 : vector<4x32xf32>
    %884 = arith.addf %882, %883 : vector<4x32xf32>
    %885 = arith.mulf %852, %884 : vector<4x32xf32>
    %886 = arith.mulf %854, %775 : vector<4x32xf32>
    %887 = arith.addf %885, %886 : vector<4x32xf32>
    %888 = vector.extract_strided_slice %9 {offsets = [7, 0, 0], sizes = [1, 4, 32], strides = [1, 1, 1]} : vector<8x4x32xf32> to vector<1x4x32xf32>
    %889 = vector.shape_cast %888 : vector<1x4x32xf32> to vector<4x32xf32>
    %890 = arith.mulf %848, %889 : vector<4x32xf32>
    %891 = vector.extract_strided_slice %9 {offsets = [0, 0, 0], sizes = [1, 4, 32], strides = [1, 1, 1]} : vector<8x4x32xf32> to vector<1x4x32xf32>
    %892 = vector.shape_cast %891 : vector<1x4x32xf32> to vector<4x32xf32>
    %893 = arith.mulf %887, %892 : vector<4x32xf32>
    %c0_182 = arith.constant 0 : index
    %c0_183 = arith.constant 0 : index
    %c448 = arith.constant 448 : index
    %894 = vector.load %arg5[%c0_182, %c0_183, %c448] : memref<1x4x512xf32, #tpu.memory_space<vmem>>, vector<1x4x32xf32>
    %895 = vector.shape_cast %894 : vector<1x4x32xf32> to vector<4x32xf32>
    %896 = vector.shape_cast %890 : vector<4x32xf32> to vector<1x4x32xf32>
    tpu.vector_store %arg5[%c0_182, %c0_183, %c448], %896 {strides = array<i32>} : memref<1x4x512xf32, #tpu.memory_space<vmem>>, vector<1x4x32xf32>,
    %c0_184 = arith.constant 0 : index
    %c0_185 = arith.constant 0 : index
    %c32 = arith.constant 32 : index
    %897 = vector.load %arg5[%c0_184, %c0_185, %c32] : memref<1x4x512xf32, #tpu.memory_space<vmem>>, vector<1x4x32xf32>
    %898 = vector.shape_cast %897 : vector<1x4x32xf32> to vector<4x32xf32>
    %899 = vector.shape_cast %893 : vector<4x32xf32> to vector<1x4x32xf32>
    tpu.vector_store %arg5[%c0_184, %c0_185, %c32], %899 {strides = array<i32>} : memref<1x4x512xf32, #tpu.memory_space<vmem>>, vector<1x4x32xf32>,
    %900 = arith.addf %788, %890 : vector<4x32xf32>
    %901 = arith.addf %789, %893 : vector<4x32xf32>
    %902 = vector.extract_strided_slice %11 {offsets = [7, 0, 0], sizes = [1, 4, 32], strides = [1, 1, 1]} : vector<8x4x32xf32> to vector<1x4x32xf32>
    %903 = vector.shape_cast %902 : vector<1x4x32xf32> to vector<4x32xf32>
    %cst_186 = arith.constant -1.000000e+07 : f32
    %904 = vector.broadcast %cst_186 : f32 to vector<4x32xf32>
    %905 = arith.mulf %904, %903 : vector<4x32xf32>
    %906 = arith.addf %890, %905 : vector<4x32xf32>
    %907 = arith.maximumf %795, %906 : vector<4x32xf32>
    %908 = vector.extract_strided_slice %11 {offsets = [0, 0, 0], sizes = [1, 4, 32], strides = [1, 1, 1]} : vector<8x4x32xf32> to vector<1x4x32xf32>
    %909 = vector.shape_cast %908 : vector<1x4x32xf32> to vector<4x32xf32>
    %cst_187 = arith.constant -1.000000e+07 : f32
    %910 = vector.broadcast %cst_187 : f32 to vector<4x32xf32>
    %911 = arith.mulf %910, %909 : vector<4x32xf32>
    %912 = arith.addf %893, %911 : vector<4x32xf32>
    %913 = arith.maximumf %801, %912 : vector<4x32xf32>
    %cst_188 = arith.constant dense<0.000000e+00> : vector<4x1xf32>
    %914 = vector.multi_reduction <add>, %3, %cst_188 [0] : vector<8x4x1xf32> to vector<4x1xf32>
    %cst_189 = arith.constant 1.000000e+00 : f32
    %915 = vector.broadcast %cst_189 : f32 to vector<4x1xf32>
    %916 = arith.divf %915, %914 : vector<4x1xf32>
    %917 = vector.broadcast %916 : vector<4x1xf32> to vector<4x32xf32>
    %918 = arith.mulf %900, %917 : vector<4x32xf32>
    %c0_190 = arith.constant 0 : index
    %c0_191 = arith.constant 0 : index
    %c0_192 = arith.constant 0 : index
    %919 = vector.load %arg6[%c0_190, %c0_191, %c0_192] : memref<1x4x128xf32, #tpu.memory_space<vmem>>, vector<1x4x32xf32>
    %920 = vector.shape_cast %919 : vector<1x4x32xf32> to vector<4x32xf32>
    %921 = vector.shape_cast %918 : vector<4x32xf32> to vector<1x4x32xf32>
    tpu.vector_store %arg6[%c0_190, %c0_191, %c0_192], %921 {strides = array<i32>} : memref<1x4x128xf32, #tpu.memory_space<vmem>>, vector<1x4x32xf32>,
    %922 = vector.broadcast %916 : vector<4x1xf32> to vector<4x32xf32>
    %923 = arith.mulf %901, %922 : vector<4x32xf32>
    %c0_193 = arith.constant 0 : index
    %c0_194 = arith.constant 0 : index
    %c32_195 = arith.constant 32 : index
    %924 = vector.load %arg6[%c0_193, %c0_194, %c32_195] : memref<1x4x128xf32, #tpu.memory_space<vmem>>, vector<1x4x32xf32>
    %925 = vector.shape_cast %924 : vector<1x4x32xf32> to vector<4x32xf32>
    %926 = vector.shape_cast %923 : vector<4x32xf32> to vector<1x4x32xf32>
    tpu.vector_store %arg6[%c0_193, %c0_194, %c32_195], %926 {strides = array<i32>} : memref<1x4x128xf32, #tpu.memory_space<vmem>>, vector<1x4x32xf32>,
    %c0_196 = arith.constant 0 : index
    %c0_197 = arith.constant 0 : index
    %c64_198 = arith.constant 64 : index
    %927 = vector.load %arg6[%c0_196, %c0_197, %c64_198] : memref<1x4x128xf32, #tpu.memory_space<vmem>>, vector<1x4x32xf32>
    %928 = vector.shape_cast %927 : vector<1x4x32xf32> to vector<4x32xf32>
    %929 = vector.shape_cast %907 : vector<4x32xf32> to vector<1x4x32xf32>
    tpu.vector_store %arg6[%c0_196, %c0_197, %c64_198], %929 {strides = array<i32>} : memref<1x4x128xf32, #tpu.memory_space<vmem>>, vector<1x4x32xf32>,
    %c0_199 = arith.constant 0 : index
    %c0_200 = arith.constant 0 : index
    %c96_201 = arith.constant 96 : index
    %930 = vector.load %arg6[%c0_199, %c0_200, %c96_201] : memref<1x4x128xf32, #tpu.memory_space<vmem>>, vector<1x4x32xf32>
    %931 = vector.shape_cast %930 : vector<1x4x32xf32> to vector<4x32xf32>
    %932 = vector.shape_cast %913 : vector<4x32xf32> to vector<1x4x32xf32>
    tpu.vector_store %arg6[%c0_199, %c0_200, %c96_201], %932 {strides = array<i32>} : memref<1x4x128xf32, #tpu.memory_space<vmem>>, vector<1x4x32xf32>,
    return
  }
  func.func @transform_0(%arg0: i32) -> (i32, i32, i32, i32) {
    %c0_i32 = arith.constant 0 : i32
    %c0_i32_0 = arith.constant 0 : i32
    %c0_i32_1 = arith.constant 0 : i32
    %c0_i32_2 = arith.constant 0 : i32
    return %arg0, %c0_i32, %c0_i32_0, %c0_i32_1 : i32, i32, i32, i32
  }
  func.func @transform_1(%arg0: i32) -> (i32, i32, i32, i32) {
    %c0_i32 = arith.constant 0 : i32
    %c0_i32_0 = arith.constant 0 : i32
    %c0_i32_1 = arith.constant 0 : i32
    %c0_i32_2 = arith.constant 0 : i32
    return %arg0, %c0_i32, %c0_i32_0, %c0_i32_1 : i32, i32, i32, i32
  }
  func.func @transform_2(%arg0: i32) -> (i32, i32, i32) {
    %c0_i32 = arith.constant 0 : i32
    %c0_i32_0 = arith.constant 0 : i32
    %c0_i32_1 = arith.constant 0 : i32
    return %arg0, %c0_i32, %c0_i32_0 : i32, i32, i32
  }
  func.func @transform_3(%arg0: i32) -> (i32, i32, i32) {
    %c0_i32 = arith.constant 0 : i32
    %c0_i32_0 = arith.constant 0 : i32
    %c0_i32_1 = arith.constant 0 : i32
    return %arg0, %c0_i32, %c0_i32_0 : i32, i32, i32
  }
  func.func @transform_4(%arg0: i32) -> (i32, i32, i32) {
    %c0_i32 = arith.constant 0 : i32
    %c0_i32_0 = arith.constant 0 : i32
    %c0_i32_1 = arith.constant 0 : i32
    return %arg0, %c0_i32, %c0_i32_0 : i32, i32, i32
  }
  func.func @transform_5(%arg0: i32) -> (i32, i32, i32) {
    %c0_i32 = arith.constant 0 : i32
    %c0_i32_0 = arith.constant 0 : i32
    %c0_i32_1 = arith.constant 0 : i32
    return %arg0, %c0_i32, %c0_i32_0 : i32, i32, i32
  }
}

module attributes {stable_mosaic.version = 11 : i64} {
  func.func @_esim_attention_kernel(%arg0: i32, %arg1: memref<1x2x8x64xf32, #tpu.memory_space<vmem>>, %arg2: memref<1x2x8x64xf32, #tpu.memory_space<vmem>>, %arg3: memref<1x3x64xf32, #tpu.memory_space<vmem>>, %arg4: memref<1x192x32xf32, #tpu.memory_space<vmem>>, %arg5: memref<1x1x32xf32, #tpu.memory_space<vmem>>, %arg6: memref<1x2x8x32xf32, #tpu.memory_space<vmem>>, %arg7: memref<1x2x8x32xf32, #tpu.memory_space<vmem>>) attributes {dimension_semantics = [#tpu.dimension_semantics<parallel>], iteration_bounds = array<i64: 2>, scalar_prefetch = 0 : i64, scratch_operands = 0 : i64, tpu.core_type = #tpu.core_type<tc>, window_params = [{transform_indices = @transform_0, window_bounds = array<i64: 1, 2, 8, 64>}, {transform_indices = @transform_1, window_bounds = array<i64: 1, 2, 8, 64>}, {transform_indices = @transform_2, window_bounds = array<i64: 1, 3, 64>}, {transform_indices = @transform_3, window_bounds = array<i64: 1, 192, 32>}, {transform_indices = @transform_4, window_bounds = array<i64: 1, 1, 32>}, {transform_indices = @transform_5, window_bounds = array<i64: 1, 2, 8, 32>}, {transform_indices = @transform_6, window_bounds = array<i64: 1, 2, 8, 32>}]} {
    %c0 = arith.constant 0 : index
    %c0_0 = arith.constant 0 : index
    %c0_1 = arith.constant 0 : index
    %c0_2 = arith.constant 0 : index
    %0 = vector.load %arg1[%c0, %c0_0, %c0_1, %c0_2] : memref<1x2x8x64xf32, #tpu.memory_space<vmem>>, vector<1x2x8x64xf32>
    %1 = vector.shape_cast %0 : vector<1x2x8x64xf32> to vector<2x8x64xf32>
    %c0_3 = arith.constant 0 : index
    %c0_4 = arith.constant 0 : index
    %c0_5 = arith.constant 0 : index
    %c0_6 = arith.constant 0 : index
    %2 = vector.load %arg2[%c0_3, %c0_4, %c0_5, %c0_6] : memref<1x2x8x64xf32, #tpu.memory_space<vmem>>, vector<1x2x8x64xf32>
    %3 = vector.shape_cast %2 : vector<1x2x8x64xf32> to vector<2x8x64xf32>
    %c0_7 = arith.constant 0 : index
    %c0_8 = arith.constant 0 : index
    %c0_9 = arith.constant 0 : index
    %4 = vector.load %arg3[%c0_7, %c0_8, %c0_9] : memref<1x3x64xf32, #tpu.memory_space<vmem>>, vector<1x3x64xf32>
    %5 = vector.shape_cast %4 : vector<1x3x64xf32> to vector<3x64xf32>
    %c0_10 = arith.constant 0 : index
    %c0_11 = arith.constant 0 : index
    %c0_12 = arith.constant 0 : index
    %6 = vector.load %arg4[%c0_10, %c0_11, %c0_12] : memref<1x192x32xf32, #tpu.memory_space<vmem>>, vector<1x192x32xf32>
    %7 = vector.shape_cast %6 : vector<1x192x32xf32> to vector<192x32xf32>
    %c0_13 = arith.constant 0 : index
    %c0_14 = arith.constant 0 : index
    %c0_15 = arith.constant 0 : index
    %8 = vector.load %arg5[%c0_13, %c0_14, %c0_15] : memref<1x1x32xf32, #tpu.memory_space<vmem>>, vector<1x1x32xf32>
    %9 = vector.shape_cast %8 : vector<1x1x32xf32> to vector<1x32xf32>
    %10 = vector.extract_strided_slice %5 {offsets = [0, 0], sizes = [1, 64], strides = [1, 1]} : vector<3x64xf32> to vector<1x64xf32>
    %11 = vector.extract_strided_slice %5 {offsets = [1, 0], sizes = [1, 64], strides = [1, 1]} : vector<3x64xf32> to vector<1x64xf32>
    %12 = vector.extract_strided_slice %5 {offsets = [2, 0], sizes = [1, 64], strides = [1, 1]} : vector<3x64xf32> to vector<1x64xf32>
    %13 = vector.shape_cast %12 : vector<1x64xf32> to vector<1x1x64xf32>
    %14 = vector.broadcast %13 : vector<1x1x64xf32> to vector<2x8x64xf32>
    %15 = arith.mulf %1, %14 : vector<2x8x64xf32>
    %16 = vector.shape_cast %11 : vector<1x64xf32> to vector<1x1x64xf32>
    %17 = vector.broadcast %16 : vector<1x1x64xf32> to vector<2x8x64xf32>
    %18 = arith.addf %15, %17 : vector<2x8x64xf32>
    "tpu.trace_start"() <{level = 10 : i32, message = "bpd,bhd->bph"}> : () -> ()
    %cst = arith.constant dense<0.000000e+00> : vector<2x8x8xf32>
    %19 = tpu.matmul %18, %3, %cst {dimension_numbers = #tpu.dot_dimension_numbers<[2], [2], [1], [1], [0, 0, 0, 1, 1, 1], [0], [0]>} : vector<2x8x64xf32>, vector<2x8x64xf32>, vector<2x8x8xf32> -> vector<2x8x8xf32>
    "tpu.trace_stop"() : () -> ()
    %20 = vector.shape_cast %12 : vector<1x64xf32> to vector<1x1x64xf32>
    %21 = vector.broadcast %20 : vector<1x1x64xf32> to vector<2x8x64xf32>
    %22 = arith.mulf %3, %21 : vector<2x8x64xf32>
    %23 = vector.shape_cast %10 : vector<1x64xf32> to vector<1x1x64xf32>
    %24 = vector.broadcast %23 : vector<1x1x64xf32> to vector<2x8x64xf32>
    %25 = arith.addf %22, %24 : vector<2x8x64xf32>
    "tpu.trace_start"() <{level = 10 : i32, message = "bhd,bpd->bhp"}> : () -> ()
    %cst_16 = arith.constant dense<0.000000e+00> : vector<2x8x8xf32>
    %26 = tpu.matmul %25, %1, %cst_16 {dimension_numbers = #tpu.dot_dimension_numbers<[2], [2], [1], [1], [0, 0, 0, 1, 1, 1], [0], [0]>} : vector<2x8x64xf32>, vector<2x8x64xf32>, vector<2x8x8xf32> -> vector<2x8x8xf32>
    "tpu.trace_stop"() : () -> ()
    %cst_17 = arith.constant dense<0xFF800000> : vector<2x8xf32>
    %27 = vector.multi_reduction <maximumf>, %19, %cst_17 [2] : vector<2x8x8xf32> to vector<2x8xf32>
    %28 = vector.shape_cast %27 : vector<2x8xf32> to vector<2x8x1xf32>
    %29 = vector.broadcast %28 : vector<2x8x1xf32> to vector<2x8x8xf32>
    %30 = arith.subf %19, %29 : vector<2x8x8xf32>
    %31 = math.exp %30 : vector<2x8x8xf32>
    %cst_18 = arith.constant dense<0.000000e+00> : vector<2x8xf32>
    %32 = vector.multi_reduction <add>, %31, %cst_18 [2] : vector<2x8x8xf32> to vector<2x8xf32>
    %33 = vector.shape_cast %32 : vector<2x8xf32> to vector<2x8x1xf32>
    %34 = vector.broadcast %33 : vector<2x8x1xf32> to vector<2x8x8xf32>
    %35 = arith.divf %31, %34 : vector<2x8x8xf32>
    "tpu.trace_start"() <{level = 10 : i32, message = "bph,bhd->bpd"}> : () -> ()
    %cst_19 = arith.constant dense<0.000000e+00> : vector<2x8x64xf32>
    %36 = tpu.matmul %35, %3, %cst_19 {dimension_numbers = #tpu.dot_dimension_numbers<[2], [1], [1], [2], [0, 0, 0, 1, 1, 2], [0], [0]>} : vector<2x8x8xf32>, vector<2x8x64xf32>, vector<2x8x64xf32> -> vector<2x8x64xf32>
    "tpu.trace_stop"() : () -> ()
    %cst_20 = arith.constant dense<0xFF800000> : vector<2x8xf32>
    %37 = vector.multi_reduction <maximumf>, %26, %cst_20 [2] : vector<2x8x8xf32> to vector<2x8xf32>
    %38 = vector.shape_cast %37 : vector<2x8xf32> to vector<2x8x1xf32>
    %39 = vector.broadcast %38 : vector<2x8x1xf32> to vector<2x8x8xf32>
    %40 = arith.subf %26, %39 : vector<2x8x8xf32>
    %41 = math.exp %40 : vector<2x8x8xf32>
    %cst_21 = arith.constant dense<0.000000e+00> : vector<2x8xf32>
    %42 = vector.multi_reduction <add>, %41, %cst_21 [2] : vector<2x8x8xf32> to vector<2x8xf32>
    %43 = vector.shape_cast %42 : vector<2x8xf32> to vector<2x8x1xf32>
    %44 = vector.broadcast %43 : vector<2x8x1xf32> to vector<2x8x8xf32>
    %45 = arith.divf %41, %44 : vector<2x8x8xf32>
    "tpu.trace_start"() <{level = 10 : i32, message = "bhp,bpd->bhd"}> : () -> ()
    %cst_22 = arith.constant dense<0.000000e+00> : vector<2x8x64xf32>
    %46 = tpu.matmul %45, %1, %cst_22 {dimension_numbers = #tpu.dot_dimension_numbers<[2], [1], [1], [2], [0, 0, 0, 1, 1, 2], [0], [0]>} : vector<2x8x8xf32>, vector<2x8x64xf32>, vector<2x8x64xf32> -> vector<2x8x64xf32>
    "tpu.trace_stop"() : () -> ()
    %47 = vector.shape_cast %7 : vector<192x32xf32> to vector<1x192x32xf32>
    %48 = vector.shape_cast %47 : vector<1x192x32xf32> to vector<1x192x32xf32>
    %49 = vector.broadcast %48 : vector<1x192x32xf32> to vector<2x192x32xf32>
    %50 = arith.mulf %1, %36 : vector<2x8x64xf32>
    %51 = tpu.concatenate %1, %36, %50 in 2 : vector<2x8x64xf32>, vector<2x8x64xf32>, vector<2x8x64xf32> -> vector<2x8x192xf32>
    "tpu.trace_start"() <{level = 10 : i32, message = "bsk,bkh->bsh"}> : () -> ()
    %cst_23 = arith.constant dense<0.000000e+00> : vector<2x8x32xf32>
    %52 = tpu.matmul %51, %49, %cst_23 {dimension_numbers = #tpu.dot_dimension_numbers<[2], [1], [1], [2], [0, 0, 0, 1, 1, 2], [0], [0]>} : vector<2x8x192xf32>, vector<2x192x32xf32>, vector<2x8x32xf32> -> vector<2x8x32xf32>
    "tpu.trace_stop"() : () -> ()
    %53 = vector.shape_cast %9 : vector<1x32xf32> to vector<1x1x32xf32>
    %54 = vector.broadcast %53 : vector<1x1x32xf32> to vector<2x8x32xf32>
    %55 = arith.addf %52, %54 : vector<2x8x32xf32>
    %cst_24 = arith.constant 0.000000e+00 : f32
    %56 = vector.broadcast %cst_24 : f32 to vector<2x8x32xf32>
    %57 = arith.maximumf %55, %56 : vector<2x8x32xf32>
    %c0_25 = arith.constant 0 : index
    %c0_26 = arith.constant 0 : index
    %c0_27 = arith.constant 0 : index
    %c0_28 = arith.constant 0 : index
    %58 = vector.load %arg6[%c0_25, %c0_26, %c0_27, %c0_28] : memref<1x2x8x32xf32, #tpu.memory_space<vmem>>, vector<1x2x8x32xf32>
    %59 = vector.shape_cast %58 : vector<1x2x8x32xf32> to vector<2x8x32xf32>
    %60 = vector.shape_cast %57 : vector<2x8x32xf32> to vector<1x2x8x32xf32>
    tpu.vector_store %arg6[%c0_25, %c0_26, %c0_27, %c0_28], %60 {strides = array<i32>} : memref<1x2x8x32xf32, #tpu.memory_space<vmem>>, vector<1x2x8x32xf32>,
    %61 = arith.mulf %3, %46 : vector<2x8x64xf32>
    %62 = tpu.concatenate %3, %46, %61 in 2 : vector<2x8x64xf32>, vector<2x8x64xf32>, vector<2x8x64xf32> -> vector<2x8x192xf32>
    "tpu.trace_start"() <{level = 10 : i32, message = "bsk,bkh->bsh"}> : () -> ()
    %cst_29 = arith.constant dense<0.000000e+00> : vector<2x8x32xf32>
    %63 = tpu.matmul %62, %49, %cst_29 {dimension_numbers = #tpu.dot_dimension_numbers<[2], [1], [1], [2], [0, 0, 0, 1, 1, 2], [0], [0]>} : vector<2x8x192xf32>, vector<2x192x32xf32>, vector<2x8x32xf32> -> vector<2x8x32xf32>
    "tpu.trace_stop"() : () -> ()
    %64 = vector.shape_cast %9 : vector<1x32xf32> to vector<1x1x32xf32>
    %65 = vector.broadcast %64 : vector<1x1x32xf32> to vector<2x8x32xf32>
    %66 = arith.addf %63, %65 : vector<2x8x32xf32>
    %cst_30 = arith.constant 0.000000e+00 : f32
    %67 = vector.broadcast %cst_30 : f32 to vector<2x8x32xf32>
    %68 = arith.maximumf %66, %67 : vector<2x8x32xf32>
    %c0_31 = arith.constant 0 : index
    %c0_32 = arith.constant 0 : index
    %c0_33 = arith.constant 0 : index
    %c0_34 = arith.constant 0 : index
    %69 = vector.load %arg7[%c0_31, %c0_32, %c0_33, %c0_34] : memref<1x2x8x32xf32, #tpu.memory_space<vmem>>, vector<1x2x8x32xf32>
    %70 = vector.shape_cast %69 : vector<1x2x8x32xf32> to vector<2x8x32xf32>
    %71 = vector.shape_cast %68 : vector<2x8x32xf32> to vector<1x2x8x32xf32>
    tpu.vector_store %arg7[%c0_31, %c0_32, %c0_33, %c0_34], %71 {strides = array<i32>} : memref<1x2x8x32xf32, #tpu.memory_space<vmem>>, vector<1x2x8x32xf32>,
    return
  }
  func.func @transform_0(%arg0: i32) -> (i32, i32, i32, i32) {
    %c0_i32 = arith.constant 0 : i32
    %c0_i32_0 = arith.constant 0 : i32
    %c0_i32_1 = arith.constant 0 : i32
    %c0_i32_2 = arith.constant 0 : i32
    return %arg0, %c0_i32, %c0_i32_0, %c0_i32_1 : i32, i32, i32, i32
  }
  func.func @transform_1(%arg0: i32) -> (i32, i32, i32, i32) {
    %c0_i32 = arith.constant 0 : i32
    %c0_i32_0 = arith.constant 0 : i32
    %c0_i32_1 = arith.constant 0 : i32
    %c0_i32_2 = arith.constant 0 : i32
    return %arg0, %c0_i32, %c0_i32_0, %c0_i32_1 : i32, i32, i32, i32
  }
  func.func @transform_2(%arg0: i32) -> (i32, i32, i32) {
    %c0_i32 = arith.constant 0 : i32
    %c0_i32_0 = arith.constant 0 : i32
    %c0_i32_1 = arith.constant 0 : i32
    return %arg0, %c0_i32, %c0_i32_0 : i32, i32, i32
  }
  func.func @transform_3(%arg0: i32) -> (i32, i32, i32) {
    %c0_i32 = arith.constant 0 : i32
    %c0_i32_0 = arith.constant 0 : i32
    %c0_i32_1 = arith.constant 0 : i32
    return %arg0, %c0_i32, %c0_i32_0 : i32, i32, i32
  }
  func.func @transform_4(%arg0: i32) -> (i32, i32, i32) {
    %c0_i32 = arith.constant 0 : i32
    %c0_i32_0 = arith.constant 0 : i32
    %c0_i32_1 = arith.constant 0 : i32
    return %arg0, %c0_i32, %c0_i32_0 : i32, i32, i32
  }
  func.func @transform_5(%arg0: i32) -> (i32, i32, i32, i32) {
    %c0_i32 = arith.constant 0 : i32
    %c0_i32_0 = arith.constant 0 : i32
    %c0_i32_1 = arith.constant 0 : i32
    %c0_i32_2 = arith.constant 0 : i32
    return %arg0, %c0_i32, %c0_i32_0, %c0_i32_1 : i32, i32, i32, i32
  }
  func.func @transform_6(%arg0: i32) -> (i32, i32, i32, i32) {
    %c0_i32 = arith.constant 0 : i32
    %c0_i32_0 = arith.constant 0 : i32
    %c0_i32_1 = arith.constant 0 : i32
    %c0_i32_2 = arith.constant 0 : i32
    return %arg0, %c0_i32, %c0_i32_0, %c0_i32_1 : i32, i32, i32, i32
  }
}

module attributes {stable_mosaic.version = 11 : i64} {
  func.func @_classifier_kernel(%arg0: i32, %arg1: memref<2x4x128xf32, #tpu.memory_space<vmem>>, %arg2: memref<512x64xf32, #tpu.memory_space<vmem>>, %arg3: memref<1x64xf32, #tpu.memory_space<vmem>>, %arg4: memref<64x3xf32, #tpu.memory_space<vmem>>, %arg5: memref<1x3xf32, #tpu.memory_space<vmem>>, %arg6: memref<2x3xf32, #tpu.memory_space<vmem>>) attributes {dimension_semantics = [#tpu.dimension_semantics<arbitrary>], iteration_bounds = array<i64: 1>, scalar_prefetch = 0 : i64, scratch_operands = 0 : i64, tpu.core_type = #tpu.core_type<tc>, window_params = [{pipeline_mode = #tpu.pipeline_mode<synchronous>, transform_indices = @transform_0, window_bounds = array<i64: 2, 4, 128>}, {pipeline_mode = #tpu.pipeline_mode<synchronous>, transform_indices = @transform_1, window_bounds = array<i64: 512, 64>}, {pipeline_mode = #tpu.pipeline_mode<synchronous>, transform_indices = @transform_2, window_bounds = array<i64: 1, 64>}, {pipeline_mode = #tpu.pipeline_mode<synchronous>, transform_indices = @transform_3, window_bounds = array<i64: 64, 3>}, {pipeline_mode = #tpu.pipeline_mode<synchronous>, transform_indices = @transform_4, window_bounds = array<i64: 1, 3>}, {pipeline_mode = #tpu.pipeline_mode<synchronous>, transform_indices = @transform_5, window_bounds = array<i64: 2, 3>}]} {
    %c0 = arith.constant 0 : index
    %c0_0 = arith.constant 0 : index
    %c0_1 = arith.constant 0 : index
    %0 = vector.load %arg1[%c0, %c0_0, %c0_1] : memref<2x4x128xf32, #tpu.memory_space<vmem>>, vector<2x4x128xf32>
    %1 = vector.extract_strided_slice %0 {offsets = [0, 0, 0], sizes = [1, 2, 128], strides = [1, 1, 1]} : vector<2x4x128xf32> to vector<1x2x128xf32>
    %2 = vector.shape_cast %1 : vector<1x2x128xf32> to vector<2x128xf32>
    %3 = vector.extract_strided_slice %0 {offsets = [0, 2, 0], sizes = [1, 2, 128], strides = [1, 1, 1]} : vector<2x4x128xf32> to vector<1x2x128xf32>
    %4 = vector.shape_cast %3 : vector<1x2x128xf32> to vector<2x128xf32>
    %5 = vector.extract_strided_slice %0 {offsets = [1, 0, 0], sizes = [1, 2, 128], strides = [1, 1, 1]} : vector<2x4x128xf32> to vector<1x2x128xf32>
    %6 = vector.shape_cast %5 : vector<1x2x128xf32> to vector<2x128xf32>
    %7 = vector.extract_strided_slice %0 {offsets = [1, 2, 0], sizes = [1, 2, 128], strides = [1, 1, 1]} : vector<2x4x128xf32> to vector<1x2x128xf32>
    %8 = vector.shape_cast %7 : vector<1x2x128xf32> to vector<2x128xf32>
    %9 = tpu.concatenate %2, %4, %6, %8 in 1 : vector<2x128xf32>, vector<2x128xf32>, vector<2x128xf32>, vector<2x128xf32> -> vector<2x512xf32>
    %c0_2 = arith.constant 0 : index
    %c0_3 = arith.constant 0 : index
    %10 = vector.load %arg2[%c0_2, %c0_3] : memref<512x64xf32, #tpu.memory_space<vmem>>, vector<512x64xf32>
    %cst = arith.constant dense<0.000000e+00> : vector<2x64xf32>
    %11 = tpu.matmul %9, %10, %cst {dimension_numbers = #tpu.dot_dimension_numbers<[1], [0], [0], [1], [0, 0, 1, 1], [], []>} : vector<2x512xf32>, vector<512x64xf32>, vector<2x64xf32> -> vector<2x64xf32>
    %c0_4 = arith.constant 0 : index
    %c0_5 = arith.constant 0 : index
    %12 = vector.load %arg3[%c0_4, %c0_5] : memref<1x64xf32, #tpu.memory_space<vmem>>, vector<1x64xf32>
    %13 = vector.broadcast %12 : vector<1x64xf32> to vector<2x64xf32>
    %14 = arith.addf %11, %13 : vector<2x64xf32>
    %15 = math.tanh %14 : vector<2x64xf32>
    %c0_6 = arith.constant 0 : index
    %c0_7 = arith.constant 0 : index
    %16 = vector.load %arg4[%c0_6, %c0_7] : memref<64x3xf32, #tpu.memory_space<vmem>>, vector<64x3xf32>
    %cst_8 = arith.constant dense<0.000000e+00> : vector<2x3xf32>
    %17 = tpu.matmul %15, %16, %cst_8 {dimension_numbers = #tpu.dot_dimension_numbers<[1], [0], [0], [1], [0, 0, 1, 1], [], []>} : vector<2x64xf32>, vector<64x3xf32>, vector<2x3xf32> -> vector<2x3xf32>
    %c0_9 = arith.constant 0 : index
    %c0_10 = arith.constant 0 : index
    %18 = vector.load %arg5[%c0_9, %c0_10] : memref<1x3xf32, #tpu.memory_space<vmem>>, vector<1x3xf32>
    %19 = vector.broadcast %18 : vector<1x3xf32> to vector<2x3xf32>
    %20 = arith.addf %17, %19 : vector<2x3xf32>
    %c0_11 = arith.constant 0 : index
    %c0_12 = arith.constant 0 : index
    %21 = vector.load %arg6[%c0_11, %c0_12] : memref<2x3xf32, #tpu.memory_space<vmem>>, vector<2x3xf32>
    tpu.vector_store %arg6[%c0_11, %c0_12], %20 {strides = array<i32>} : memref<2x3xf32, #tpu.memory_space<vmem>>, vector<2x3xf32>,
    return
  }
  func.func @transform_0(%arg0: i32) -> (i32, i32, i32) {
    %c0_i32 = arith.constant 0 : i32
    %c0_i32_0 = arith.constant 0 : i32
    %c0_i32_1 = arith.constant 0 : i32
    %c0_i32_2 = arith.constant 0 : i32
    return %c0_i32, %c0_i32_0, %c0_i32_1 : i32, i32, i32
  }
  func.func @transform_1(%arg0: i32) -> (i32, i32) {
    %c0_i32 = arith.constant 0 : i32
    %c0_i32_0 = arith.constant 0 : i32
    %c0_i32_1 = arith.constant 0 : i32
    return %c0_i32, %c0_i32_0 : i32, i32
  }
  func.func @transform_2(%arg0: i32) -> (i32, i32) {
    %c0_i32 = arith.constant 0 : i32
    %c0_i32_0 = arith.constant 0 : i32
    %c0_i32_1 = arith.constant 0 : i32
    return %c0_i32, %c0_i32_0 : i32, i32
  }
  func.func @transform_3(%arg0: i32) -> (i32, i32) {
    %c0_i32 = arith.constant 0 : i32
    %c0_i32_0 = arith.constant 0 : i32
    %c0_i32_1 = arith.constant 0 : i32
    return %c0_i32, %c0_i32_0 : i32, i32
  }
  func.func @transform_4(%arg0: i32) -> (i32, i32) {
    %c0_i32 = arith.constant 0 : i32
    %c0_i32_0 = arith.constant 0 : i32
    %c0_i32_1 = arith.constant 0 : i32
    return %c0_i32, %c0_i32_0 : i32, i32
  }
  func.func @transform_5(%arg0: i32) -> (i32, i32) {
    %c0_i32 = arith.constant 0 : i32
    %c0_i32_0 = arith.constant 0 : i32
    %c0_i32_1 = arith.constant 0 : i32
    return %c0_i32, %c0_i32_0 : i32, i32
  }
}

module attributes {stable_mosaic.version = 11 : i64} {
  func.func @_bigru_pool_kernel(%arg0: i32, %arg1: memref<1x4x8x32xf32, #tpu.memory_space<vmem>>, %arg2: memref<1x8x4x1xf32, #tpu.memory_space<vmem>>, %arg3: memref<1x128x384xf32, #tpu.memory_space<vmem>>, %arg4: memref<1x1x384xf32, #tpu.memory_space<vmem>>, %arg5: memref<1x4x512xf32, #tpu.memory_space<vmem>>, %arg6: memref<1x4x128xf32, #tpu.memory_space<vmem>>) attributes {dimension_semantics = [#tpu.dimension_semantics<parallel>], iteration_bounds = array<i64: 2>, scalar_prefetch = 0 : i64, scratch_operands = 0 : i64, tpu.core_type = #tpu.core_type<tc>, window_params = [{transform_indices = @transform_0, window_bounds = array<i64: 1, 4, 8, 32>}, {transform_indices = @transform_1, window_bounds = array<i64: 1, 8, 4, 1>}, {transform_indices = @transform_2, window_bounds = array<i64: 1, 128, 384>}, {transform_indices = @transform_3, window_bounds = array<i64: 1, 1, 384>}, {transform_indices = @transform_4, window_bounds = array<i64: 1, 4, 512>}, {transform_indices = @transform_5, window_bounds = array<i64: 1, 4, 128>}]} {
    %c0 = arith.constant 0 : index
    %c0_0 = arith.constant 0 : index
    %c0_1 = arith.constant 0 : index
    %c0_2 = arith.constant 0 : index
    %0 = vector.load %arg1[%c0, %c0_0, %c0_1, %c0_2] : memref<1x4x8x32xf32, #tpu.memory_space<vmem>>, vector<1x4x8x32xf32>
    %1 = vector.shape_cast %0 : vector<1x4x8x32xf32> to vector<4x8x32xf32>
    %c0_3 = arith.constant 0 : index
    %c0_4 = arith.constant 0 : index
    %c0_5 = arith.constant 0 : index
    %c0_6 = arith.constant 0 : index
    %2 = vector.load %arg2[%c0_3, %c0_4, %c0_5, %c0_6] : memref<1x8x4x1xf32, #tpu.memory_space<vmem>>, vector<1x8x4x1xf32>
    %3 = vector.shape_cast %2 : vector<1x8x4x1xf32> to vector<8x4x1xf32>
    %c0_7 = arith.constant 0 : index
    %c0_8 = arith.constant 0 : index
    %c0_9 = arith.constant 0 : index
    %4 = vector.load %arg3[%c0_7, %c0_8, %c0_9] : memref<1x128x384xf32, #tpu.memory_space<vmem>>, vector<1x128x384xf32>
    %5 = vector.shape_cast %4 : vector<1x128x384xf32> to vector<128x384xf32>
    %c0_10 = arith.constant 0 : index
    %c0_11 = arith.constant 0 : index
    %c0_12 = arith.constant 0 : index
    %6 = vector.load %arg4[%c0_10, %c0_11, %c0_12] : memref<1x1x384xf32, #tpu.memory_space<vmem>>, vector<1x1x384xf32>
    %7 = vector.shape_cast %6 : vector<1x1x384xf32> to vector<1x384xf32>
    %8 = vector.shape_cast %3 : vector<8x4x1xf32> to vector<8x4x1xf32>
    %9 = vector.broadcast %8 : vector<8x4x1xf32> to vector<8x4x32xf32>
    %cst = arith.constant 1.000000e+00 : f32
    %10 = vector.broadcast %cst : f32 to vector<8x4x32xf32>
    %11 = arith.subf %10, %9 : vector<8x4x32xf32>
    %cst_13 = arith.constant 0.000000e+00 : f32
    %12 = vector.broadcast %cst_13 : f32 to vector<4x32xf32>
    %cst_14 = arith.constant 0.000000e+00 : f32
    %13 = vector.broadcast %cst_14 : f32 to vector<4x32xf32>
    %cst_15 = arith.constant 0.000000e+00 : f32
    %14 = vector.broadcast %cst_15 : f32 to vector<4x32xf32>
    %cst_16 = arith.constant 0.000000e+00 : f32
    %15 = vector.broadcast %cst_16 : f32 to vector<4x32xf32>
    %cst_17 = arith.constant -1.000000e+07 : f32
    %16 = vector.broadcast %cst_17 : f32 to vector<4x32xf32>
    %cst_18 = arith.constant -1.000000e+07 : f32
    %17 = vector.broadcast %cst_18 : f32 to vector<4x32xf32>
    %18 = vector.extract_strided_slice %1 {offsets = [0, 0, 0], sizes = [4, 1, 32], strides = [1, 1, 1]} : vector<4x8x32xf32> to vector<4x1x32xf32>
    %19 = vector.shape_cast %18 : vector<4x1x32xf32> to vector<4x32xf32>
    %20 = vector.extract_strided_slice %1 {offsets = [0, 7, 0], sizes = [4, 1, 32], strides = [1, 1, 1]} : vector<4x8x32xf32> to vector<4x1x32xf32>
    %21 = vector.shape_cast %20 : vector<4x1x32xf32> to vector<4x32xf32>
    %22 = tpu.concatenate %19, %21, %12, %13 in 1 : vector<4x32xf32>, vector<4x32xf32>, vector<4x32xf32>, vector<4x32xf32> -> vector<4x128xf32>
    %cst_19 = arith.constant dense<0.000000e+00> : vector<4x384xf32>
    %23 = tpu.matmul %22, %5, %cst_19 {dimension_numbers = #tpu.dot_dimension_numbers<[1], [0], [0], [1], [0, 0, 1, 1], [], []>} : vector<4x128xf32>, vector<128x384xf32>, vector<4x384xf32> -> vector<4x384xf32>
    %24 = vector.broadcast %7 : vector<1x384xf32> to vector<4x384xf32>
    %25 = arith.addf %23, %24 : vector<4x384xf32>
    %26 = vector.extract_strided_slice %25 {offsets = [0, 0], sizes = [4, 96], strides = [1, 1]} : vector<4x384xf32> to vector<4x96xf32>
    %27 = vector.extract_strided_slice %25 {offsets = [0, 96], sizes = [4, 96], strides = [1, 1]} : vector<4x384xf32> to vector<4x96xf32>
    %28 = vector.extract_strided_slice %9 {offsets = [0, 0, 0], sizes = [1, 4, 32], strides = [1, 1, 1]} : vector<8x4x32xf32> to vector<1x4x32xf32>
    %29 = vector.shape_cast %28 : vector<1x4x32xf32> to vector<4x32xf32>
    %30 = vector.extract_strided_slice %11 {offsets = [0, 0, 0], sizes = [1, 4, 32], strides = [1, 1, 1]} : vector<8x4x32xf32> to vector<1x4x32xf32>
    %31 = vector.shape_cast %30 : vector<1x4x32xf32> to vector<4x32xf32>
    %32 = vector.extract_strided_slice %26 {offsets = [0, 0], sizes = [4, 32], strides = [1, 1]} : vector<4x96xf32> to vector<4x32xf32>
    %33 = vector.extract_strided_slice %27 {offsets = [0, 0], sizes = [4, 32], strides = [1, 1]} : vector<4x96xf32> to vector<4x32xf32>
    %34 = arith.addf %32, %33 : vector<4x32xf32>
    %cst_20 = arith.constant 0.000000e+00 : f32
    %35 = vector.broadcast %cst_20 : f32 to vector<4x32xf32>
    %36 = arith.subf %35, %34 : vector<4x32xf32>
    %37 = math.exp %36 : vector<4x32xf32>
    %cst_21 = arith.constant 1.000000e+00 : f32
    %38 = vector.broadcast %cst_21 : f32 to vector<4x32xf32>
    %39 = arith.addf %38, %37 : vector<4x32xf32>
    %cst_22 = arith.constant 1.000000e+00 : f32
    %40 = vector.broadcast %cst_22 : f32 to vector<4x32xf32>
    %41 = arith.divf %40, %39 : vector<4x32xf32>
    %42 = vector.extract_strided_slice %26 {offsets = [0, 32], sizes = [4, 32], strides = [1, 1]} : vector<4x96xf32> to vector<4x32xf32>
    %43 = vector.extract_strided_slice %27 {offsets = [0, 32], sizes = [4, 32], strides = [1, 1]} : vector<4x96xf32> to vector<4x32xf32>
    %44 = arith.addf %42, %43 : vector<4x32xf32>
    %cst_23 = arith.constant 0.000000e+00 : f32
    %45 = vector.broadcast %cst_23 : f32 to vector<4x32xf32>
    %46 = arith.subf %45, %44 : vector<4x32xf32>
    %47 = math.exp %46 : vector<4x32xf32>
    %cst_24 = arith.constant 1.000000e+00 : f32
    %48 = vector.broadcast %cst_24 : f32 to vector<4x32xf32>
    %49 = arith.addf %48, %47 : vector<4x32xf32>
    %cst_25 = arith.constant 1.000000e+00 : f32
    %50 = vector.broadcast %cst_25 : f32 to vector<4x32xf32>
    %51 = arith.divf %50, %49 : vector<4x32xf32>
    %52 = vector.extract_strided_slice %26 {offsets = [0, 64], sizes = [4, 32], strides = [1, 1]} : vector<4x96xf32> to vector<4x32xf32>
    %53 = vector.extract_strided_slice %27 {offsets = [0, 64], sizes = [4, 32], strides = [1, 1]} : vector<4x96xf32> to vector<4x32xf32>
    %54 = arith.mulf %41, %53 : vector<4x32xf32>
    %55 = arith.addf %52, %54 : vector<4x32xf32>
    %56 = math.tanh %55 : vector<4x32xf32>
    %cst_26 = arith.constant 1.000000e+00 : f32
    %57 = vector.broadcast %cst_26 : f32 to vector<4x32xf32>
    %58 = arith.subf %57, %51 : vector<4x32xf32>
    %59 = arith.mulf %58, %56 : vector<4x32xf32>
    %60 = arith.mulf %51, %12 : vector<4x32xf32>
    %61 = arith.addf %59, %60 : vector<4x32xf32>
    %62 = arith.mulf %29, %61 : vector<4x32xf32>
    %63 = arith.mulf %31, %12 : vector<4x32xf32>
    %64 = arith.addf %62, %63 : vector<4x32xf32>
    %65 = vector.extract_strided_slice %25 {offsets = [0, 192], sizes = [4, 96], strides = [1, 1]} : vector<4x384xf32> to vector<4x96xf32>
    %66 = vector.extract_strided_slice %25 {offsets = [0, 288], sizes = [4, 96], strides = [1, 1]} : vector<4x384xf32> to vector<4x96xf32>
    %67 = vector.extract_strided_slice %9 {offsets = [7, 0, 0], sizes = [1, 4, 32], strides = [1, 1, 1]} : vector<8x4x32xf32> to vector<1x4x32xf32>
    %68 = vector.shape_cast %67 : vector<1x4x32xf32> to vector<4x32xf32>
    %69 = vector.extract_strided_slice %11 {offsets = [7, 0, 0], sizes = [1, 4, 32], strides = [1, 1, 1]} : vector<8x4x32xf32> to vector<1x4x32xf32>
    %70 = vector.shape_cast %69 : vector<1x4x32xf32> to vector<4x32xf32>
    %71 = vector.extract_strided_slice %65 {offsets = [0, 0], sizes = [4, 32], strides = [1, 1]} : vector<4x96xf32> to vector<4x32xf32>
    %72 = vector.extract_strided_slice %66 {offsets = [0, 0], sizes = [4, 32], strides = [1, 1]} : vector<4x96xf32> to vector<4x32xf32>
    %73 = arith.addf %71, %72 : vector<4x32xf32>
    %cst_27 = arith.constant 0.000000e+00 : f32
    %74 = vector.broadcast %cst_27 : f32 to vector<4x32xf32>
    %75 = arith.subf %74, %73 : vector<4x32xf32>
    %76 = math.exp %75 : vector<4x32xf32>
    %cst_28 = arith.constant 1.000000e+00 : f32
    %77 = vector.broadcast %cst_28 : f32 to vector<4x32xf32>
    %78 = arith.addf %77, %76 : vector<4x32xf32>
    %cst_29 = arith.constant 1.000000e+00 : f32
    %79 = vector.broadcast %cst_29 : f32 to vector<4x32xf32>
    %80 = arith.divf %79, %78 : vector<4x32xf32>
    %81 = vector.extract_strided_slice %65 {offsets = [0, 32], sizes = [4, 32], strides = [1, 1]} : vector<4x96xf32> to vector<4x32xf32>
    %82 = vector.extract_strided_slice %66 {offsets = [0, 32], sizes = [4, 32], strides = [1, 1]} : vector<4x96xf32> to vector<4x32xf32>
    %83 = arith.addf %81, %82 : vector<4x32xf32>
    %cst_30 = arith.constant 0.000000e+00 : f32
    %84 = vector.broadcast %cst_30 : f32 to vector<4x32xf32>
    %85 = arith.subf %84, %83 : vector<4x32xf32>
    %86 = math.exp %85 : vector<4x32xf32>
    %cst_31 = arith.constant 1.000000e+00 : f32
    %87 = vector.broadcast %cst_31 : f32 to vector<4x32xf32>
    %88 = arith.addf %87, %86 : vector<4x32xf32>
    %cst_32 = arith.constant 1.000000e+00 : f32
    %89 = vector.broadcast %cst_32 : f32 to vector<4x32xf32>
    %90 = arith.divf %89, %88 : vector<4x32xf32>
    %91 = vector.extract_strided_slice %65 {offsets = [0, 64], sizes = [4, 32], strides = [1, 1]} : vector<4x96xf32> to vector<4x32xf32>
    %92 = vector.extract_strided_slice %66 {offsets = [0, 64], sizes = [4, 32], strides = [1, 1]} : vector<4x96xf32> to vector<4x32xf32>
    %93 = arith.mulf %80, %92 : vector<4x32xf32>
    %94 = arith.addf %91, %93 : vector<4x32xf32>
    %95 = math.tanh %94 : vector<4x32xf32>
    %cst_33 = arith.constant 1.000000e+00 : f32
    %96 = vector.broadcast %cst_33 : f32 to vector<4x32xf32>
    %97 = arith.subf %96, %90 : vector<4x32xf32>
    %98 = arith.mulf %97, %95 : vector<4x32xf32>
    %99 = arith.mulf %90, %13 : vector<4x32xf32>
    %100 = arith.addf %98, %99 : vector<4x32xf32>
    %101 = arith.mulf %68, %100 : vector<4x32xf32>
    %102 = arith.mulf %70, %13 : vector<4x32xf32>
    %103 = arith.addf %101, %102 : vector<4x32xf32>
    %104 = vector.extract_strided_slice %9 {offsets = [0, 0, 0], sizes = [1, 4, 32], strides = [1, 1, 1]} : vector<8x4x32xf32> to vector<1x4x32xf32>
    %105 = vector.shape_cast %104 : vector<1x4x32xf32> to vector<4x32xf32>
    %106 = arith.mulf %64, %105 : vector<4x32xf32>
    %107 = vector.extract_strided_slice %9 {offsets = [7, 0, 0], sizes = [1, 4, 32], strides = [1, 1, 1]} : vector<8x4x32xf32> to vector<1x4x32xf32>
    %108 = vector.shape_cast %107 : vector<1x4x32xf32> to vector<4x32xf32>
    %109 = arith.mulf %103, %108 : vector<4x32xf32>
    %c0_34 = arith.constant 0 : index
    %c0_35 = arith.constant 0 : index
    %c0_36 = arith.constant 0 : index
    %110 = vector.load %arg5[%c0_34, %c0_35, %c0_36] : memref<1x4x512xf32, #tpu.memory_space<vmem>>, vector<1x4x32xf32>
    %111 = vector.shape_cast %110 : vector<1x4x32xf32> to vector<4x32xf32>
    %112 = vector.shape_cast %106 : vector<4x32xf32> to vector<1x4x32xf32>
    tpu.vector_store %arg5[%c0_34, %c0_35, %c0_36], %112 {strides = array<i32>} : memref<1x4x512xf32, #tpu.memory_space<vmem>>, vector<1x4x32xf32>,
    %c0_37 = arith.constant 0 : index
    %c0_38 = arith.constant 0 : index
    %c480 = arith.constant 480 : index
    %113 = vector.load %arg5[%c0_37, %c0_38, %c480] : memref<1x4x512xf32, #tpu.memory_space<vmem>>, vector<1x4x32xf32>
    %114 = vector.shape_cast %113 : vector<1x4x32xf32> to vector<4x32xf32>
    %115 = vector.shape_cast %109 : vector<4x32xf32> to vector<1x4x32xf32>
    tpu.vector_store %arg5[%c0_37, %c0_38, %c480], %115 {strides = array<i32>} : memref<1x4x512xf32, #tpu.memory_space<vmem>>, vector<1x4x32xf32>,
    %116 = arith.addf %14, %106 : vector<4x32xf32>
    %117 = arith.addf %15, %109 : vector<4x32xf32>
    %118 = vector.extract_strided_slice %11 {offsets = [0, 0, 0], sizes = [1, 4, 32], strides = [1, 1, 1]} : vector<8x4x32xf32> to vector<1x4x32xf32>
    %119 = vector.shape_cast %118 : vector<1x4x32xf32> to vector<4x32xf32>
    %cst_39 = arith.constant -1.000000e+07 : f32
    %120 = vector.broadcast %cst_39 : f32 to vector<4x32xf32>
    %121 = arith.mulf %120, %119 : vector<4x32xf32>
    %122 = arith.addf %106, %121 : vector<4x32xf32>
    %123 = arith.maximumf %16, %122 : vector<4x32xf32>
    %124 = vector.extract_strided_slice %11 {offsets = [7, 0, 0], sizes = [1, 4, 32], strides = [1, 1, 1]} : vector<8x4x32xf32> to vector<1x4x32xf32>
    %125 = vector.shape_cast %124 : vector<1x4x32xf32> to vector<4x32xf32>
    %cst_40 = arith.constant -1.000000e+07 : f32
    %126 = vector.broadcast %cst_40 : f32 to vector<4x32xf32>
    %127 = arith.mulf %126, %125 : vector<4x32xf32>
    %128 = arith.addf %109, %127 : vector<4x32xf32>
    %129 = arith.maximumf %17, %128 : vector<4x32xf32>
    %130 = vector.extract_strided_slice %1 {offsets = [0, 1, 0], sizes = [4, 1, 32], strides = [1, 1, 1]} : vector<4x8x32xf32> to vector<4x1x32xf32>
    %131 = vector.shape_cast %130 : vector<4x1x32xf32> to vector<4x32xf32>
    %132 = vector.extract_strided_slice %1 {offsets = [0, 6, 0], sizes = [4, 1, 32], strides = [1, 1, 1]} : vector<4x8x32xf32> to vector<4x1x32xf32>
    %133 = vector.shape_cast %132 : vector<4x1x32xf32> to vector<4x32xf32>
    %134 = tpu.concatenate %131, %133, %64, %103 in 1 : vector<4x32xf32>, vector<4x32xf32>, vector<4x32xf32>, vector<4x32xf32> -> vector<4x128xf32>
    %cst_41 = arith.constant dense<0.000000e+00> : vector<4x384xf32>
    %135 = tpu.matmul %134, %5, %cst_41 {dimension_numbers = #tpu.dot_dimension_numbers<[1], [0], [0], [1], [0, 0, 1, 1], [], []>} : vector<4x128xf32>, vector<128x384xf32>, vector<4x384xf32> -> vector<4x384xf32>
    %136 = vector.broadcast %7 : vector<1x384xf32> to vector<4x384xf32>
    %137 = arith.addf %135, %136 : vector<4x384xf32>
    %138 = vector.extract_strided_slice %137 {offsets = [0, 0], sizes = [4, 96], strides = [1, 1]} : vector<4x384xf32> to vector<4x96xf32>
    %139 = vector.extract_strided_slice %137 {offsets = [0, 96], sizes = [4, 96], strides = [1, 1]} : vector<4x384xf32> to vector<4x96xf32>
    %140 = vector.extract_strided_slice %9 {offsets = [1, 0, 0], sizes = [1, 4, 32], strides = [1, 1, 1]} : vector<8x4x32xf32> to vector<1x4x32xf32>
    %141 = vector.shape_cast %140 : vector<1x4x32xf32> to vector<4x32xf32>
    %142 = vector.extract_strided_slice %11 {offsets = [1, 0, 0], sizes = [1, 4, 32], strides = [1, 1, 1]} : vector<8x4x32xf32> to vector<1x4x32xf32>
    %143 = vector.shape_cast %142 : vector<1x4x32xf32> to vector<4x32xf32>
    %144 = vector.extract_strided_slice %138 {offsets = [0, 0], sizes = [4, 32], strides = [1, 1]} : vector<4x96xf32> to vector<4x32xf32>
    %145 = vector.extract_strided_slice %139 {offsets = [0, 0], sizes = [4, 32], strides = [1, 1]} : vector<4x96xf32> to vector<4x32xf32>
    %146 = arith.addf %144, %145 : vector<4x32xf32>
    %cst_42 = arith.constant 0.000000e+00 : f32
    %147 = vector.broadcast %cst_42 : f32 to vector<4x32xf32>
    %148 = arith.subf %147, %146 : vector<4x32xf32>
    %149 = math.exp %148 : vector<4x32xf32>
    %cst_43 = arith.constant 1.000000e+00 : f32
    %150 = vector.broadcast %cst_43 : f32 to vector<4x32xf32>
    %151 = arith.addf %150, %149 : vector<4x32xf32>
    %cst_44 = arith.constant 1.000000e+00 : f32
    %152 = vector.broadcast %cst_44 : f32 to vector<4x32xf32>
    %153 = arith.divf %152, %151 : vector<4x32xf32>
    %154 = vector.extract_strided_slice %138 {offsets = [0, 32], sizes = [4, 32], strides = [1, 1]} : vector<4x96xf32> to vector<4x32xf32>
    %155 = vector.extract_strided_slice %139 {offsets = [0, 32], sizes = [4, 32], strides = [1, 1]} : vector<4x96xf32> to vector<4x32xf32>
    %156 = arith.addf %154, %155 : vector<4x32xf32>
    %cst_45 = arith.constant 0.000000e+00 : f32
    %157 = vector.broadcast %cst_45 : f32 to vector<4x32xf32>
    %158 = arith.subf %157, %156 : vector<4x32xf32>
    %159 = math.exp %158 : vector<4x32xf32>
    %cst_46 = arith.constant 1.000000e+00 : f32
    %160 = vector.broadcast %cst_46 : f32 to vector<4x32xf32>
    %161 = arith.addf %160, %159 : vector<4x32xf32>
    %cst_47 = arith.constant 1.000000e+00 : f32
    %162 = vector.broadcast %cst_47 : f32 to vector<4x32xf32>
    %163 = arith.divf %162, %161 : vector<4x32xf32>
    %164 = vector.extract_strided_slice %138 {offsets = [0, 64], sizes = [4, 32], strides = [1, 1]} : vector<4x96xf32> to vector<4x32xf32>
    %165 = vector.extract_strided_slice %139 {offsets = [0, 64], sizes = [4, 32], strides = [1, 1]} : vector<4x96xf32> to vector<4x32xf32>
    %166 = arith.mulf %153, %165 : vector<4x32xf32>
    %167 = arith.addf %164, %166 : vector<4x32xf32>
    %168 = math.tanh %167 : vector<4x32xf32>
    %cst_48 = arith.constant 1.000000e+00 : f32
    %169 = vector.broadcast %cst_48 : f32 to vector<4x32xf32>
    %170 = arith.subf %169, %163 : vector<4x32xf32>
    %171 = arith.mulf %170, %168 : vector<4x32xf32>
    %172 = arith.mulf %163, %64 : vector<4x32xf32>
    %173 = arith.addf %171, %172 : vector<4x32xf32>
    %174 = arith.mulf %141, %173 : vector<4x32xf32>
    %175 = arith.mulf %143, %64 : vector<4x32xf32>
    %176 = arith.addf %174, %175 : vector<4x32xf32>
    %177 = vector.extract_strided_slice %137 {offsets = [0, 192], sizes = [4, 96], strides = [1, 1]} : vector<4x384xf32> to vector<4x96xf32>
    %178 = vector.extract_strided_slice %137 {offsets = [0, 288], sizes = [4, 96], strides = [1, 1]} : vector<4x384xf32> to vector<4x96xf32>
    %179 = vector.extract_strided_slice %9 {offsets = [6, 0, 0], sizes = [1, 4, 32], strides = [1, 1, 1]} : vector<8x4x32xf32> to vector<1x4x32xf32>
    %180 = vector.shape_cast %179 : vector<1x4x32xf32> to vector<4x32xf32>
    %181 = vector.extract_strided_slice %11 {offsets = [6, 0, 0], sizes = [1, 4, 32], strides = [1, 1, 1]} : vector<8x4x32xf32> to vector<1x4x32xf32>
    %182 = vector.shape_cast %181 : vector<1x4x32xf32> to vector<4x32xf32>
    %183 = vector.extract_strided_slice %177 {offsets = [0, 0], sizes = [4, 32], strides = [1, 1]} : vector<4x96xf32> to vector<4x32xf32>
    %184 = vector.extract_strided_slice %178 {offsets = [0, 0], sizes = [4, 32], strides = [1, 1]} : vector<4x96xf32> to vector<4x32xf32>
    %185 = arith.addf %183, %184 : vector<4x32xf32>
    %cst_49 = arith.constant 0.000000e+00 : f32
    %186 = vector.broadcast %cst_49 : f32 to vector<4x32xf32>
    %187 = arith.subf %186, %185 : vector<4x32xf32>
    %188 = math.exp %187 : vector<4x32xf32>
    %cst_50 = arith.constant 1.000000e+00 : f32
    %189 = vector.broadcast %cst_50 : f32 to vector<4x32xf32>
    %190 = arith.addf %189, %188 : vector<4x32xf32>
    %cst_51 = arith.constant 1.000000e+00 : f32
    %191 = vector.broadcast %cst_51 : f32 to vector<4x32xf32>
    %192 = arith.divf %191, %190 : vector<4x32xf32>
    %193 = vector.extract_strided_slice %177 {offsets = [0, 32], sizes = [4, 32], strides = [1, 1]} : vector<4x96xf32> to vector<4x32xf32>
    %194 = vector.extract_strided_slice %178 {offsets = [0, 32], sizes = [4, 32], strides = [1, 1]} : vector<4x96xf32> to vector<4x32xf32>
    %195 = arith.addf %193, %194 : vector<4x32xf32>
    %cst_52 = arith.constant 0.000000e+00 : f32
    %196 = vector.broadcast %cst_52 : f32 to vector<4x32xf32>
    %197 = arith.subf %196, %195 : vector<4x32xf32>
    %198 = math.exp %197 : vector<4x32xf32>
    %cst_53 = arith.constant 1.000000e+00 : f32
    %199 = vector.broadcast %cst_53 : f32 to vector<4x32xf32>
    %200 = arith.addf %199, %198 : vector<4x32xf32>
    %cst_54 = arith.constant 1.000000e+00 : f32
    %201 = vector.broadcast %cst_54 : f32 to vector<4x32xf32>
    %202 = arith.divf %201, %200 : vector<4x32xf32>
    %203 = vector.extract_strided_slice %177 {offsets = [0, 64], sizes = [4, 32], strides = [1, 1]} : vector<4x96xf32> to vector<4x32xf32>
    %204 = vector.extract_strided_slice %178 {offsets = [0, 64], sizes = [4, 32], strides = [1, 1]} : vector<4x96xf32> to vector<4x32xf32>
    %205 = arith.mulf %192, %204 : vector<4x32xf32>
    %206 = arith.addf %203, %205 : vector<4x32xf32>
    %207 = math.tanh %206 : vector<4x32xf32>
    %cst_55 = arith.constant 1.000000e+00 : f32
    %208 = vector.broadcast %cst_55 : f32 to vector<4x32xf32>
    %209 = arith.subf %208, %202 : vector<4x32xf32>
    %210 = arith.mulf %209, %207 : vector<4x32xf32>
    %211 = arith.mulf %202, %103 : vector<4x32xf32>
    %212 = arith.addf %210, %211 : vector<4x32xf32>
    %213 = arith.mulf %180, %212 : vector<4x32xf32>
    %214 = arith.mulf %182, %103 : vector<4x32xf32>
    %215 = arith.addf %213, %214 : vector<4x32xf32>
    %216 = vector.extract_strided_slice %9 {offsets = [1, 0, 0], sizes = [1, 4, 32], strides = [1, 1, 1]} : vector<8x4x32xf32> to vector<1x4x32xf32>
    %217 = vector.shape_cast %216 : vector<1x4x32xf32> to vector<4x32xf32>
    %218 = arith.mulf %176, %217 : vector<4x32xf32>
    %219 = vector.extract_strided_slice %9 {offsets = [6, 0, 0], sizes = [1, 4, 32], strides = [1, 1, 1]} : vector<8x4x32xf32> to vector<1x4x32xf32>
    %220 = vector.shape_cast %219 : vector<1x4x32xf32> to vector<4x32xf32>
    %221 = arith.mulf %215, %220 : vector<4x32xf32>
    %c0_56 = arith.constant 0 : index
    %c0_57 = arith.constant 0 : index
    %c64 = arith.constant 64 : index
    %222 = vector.load %arg5[%c0_56, %c0_57, %c64] : memref<1x4x512xf32, #tpu.memory_space<vmem>>, vector<1x4x32xf32>
    %223 = vector.shape_cast %222 : vector<1x4x32xf32> to vector<4x32xf32>
    %224 = vector.shape_cast %218 : vector<4x32xf32> to vector<1x4x32xf32>
    tpu.vector_store %arg5[%c0_56, %c0_57, %c64], %224 {strides = array<i32>} : memref<1x4x512xf32, #tpu.memory_space<vmem>>, vector<1x4x32xf32>,
    %c0_58 = arith.constant 0 : index
    %c0_59 = arith.constant 0 : index
    %c416 = arith.constant 416 : index
    %225 = vector.load %arg5[%c0_58, %c0_59, %c416] : memref<1x4x512xf32, #tpu.memory_space<vmem>>, vector<1x4x32xf32>
    %226 = vector.shape_cast %225 : vector<1x4x32xf32> to vector<4x32xf32>
    %227 = vector.shape_cast %221 : vector<4x32xf32> to vector<1x4x32xf32>
    tpu.vector_store %arg5[%c0_58, %c0_59, %c416], %227 {strides = array<i32>} : memref<1x4x512xf32, #tpu.memory_space<vmem>>, vector<1x4x32xf32>,
    %228 = arith.addf %116, %218 : vector<4x32xf32>
    %229 = arith.addf %117, %221 : vector<4x32xf32>
    %230 = vector.extract_strided_slice %11 {offsets = [1, 0, 0], sizes = [1, 4, 32], strides = [1, 1, 1]} : vector<8x4x32xf32> to vector<1x4x32xf32>
    %231 = vector.shape_cast %230 : vector<1x4x32xf32> to vector<4x32xf32>
    %cst_60 = arith.constant -1.000000e+07 : f32
    %232 = vector.broadcast %cst_60 : f32 to vector<4x32xf32>
    %233 = arith.mulf %232, %231 : vector<4x32xf32>
    %234 = arith.addf %218, %233 : vector<4x32xf32>
    %235 = arith.maximumf %123, %234 : vector<4x32xf32>
    %236 = vector.extract_strided_slice %11 {offsets = [6, 0, 0], sizes = [1, 4, 32], strides = [1, 1, 1]} : vector<8x4x32xf32> to vector<1x4x32xf32>
    %237 = vector.shape_cast %236 : vector<1x4x32xf32> to vector<4x32xf32>
    %cst_61 = arith.constant -1.000000e+07 : f32
    %238 = vector.broadcast %cst_61 : f32 to vector<4x32xf32>
    %239 = arith.mulf %238, %237 : vector<4x32xf32>
    %240 = arith.addf %221, %239 : vector<4x32xf32>
    %241 = arith.maximumf %129, %240 : vector<4x32xf32>
    %242 = vector.extract_strided_slice %1 {offsets = [0, 2, 0], sizes = [4, 1, 32], strides = [1, 1, 1]} : vector<4x8x32xf32> to vector<4x1x32xf32>
    %243 = vector.shape_cast %242 : vector<4x1x32xf32> to vector<4x32xf32>
    %244 = vector.extract_strided_slice %1 {offsets = [0, 5, 0], sizes = [4, 1, 32], strides = [1, 1, 1]} : vector<4x8x32xf32> to vector<4x1x32xf32>
    %245 = vector.shape_cast %244 : vector<4x1x32xf32> to vector<4x32xf32>
    %246 = tpu.concatenate %243, %245, %176, %215 in 1 : vector<4x32xf32>, vector<4x32xf32>, vector<4x32xf32>, vector<4x32xf32> -> vector<4x128xf32>
    %cst_62 = arith.constant dense<0.000000e+00> : vector<4x384xf32>
    %247 = tpu.matmul %246, %5, %cst_62 {dimension_numbers = #tpu.dot_dimension_numbers<[1], [0], [0], [1], [0, 0, 1, 1], [], []>} : vector<4x128xf32>, vector<128x384xf32>, vector<4x384xf32> -> vector<4x384xf32>
    %248 = vector.broadcast %7 : vector<1x384xf32> to vector<4x384xf32>
    %249 = arith.addf %247, %248 : vector<4x384xf32>
    %250 = vector.extract_strided_slice %249 {offsets = [0, 0], sizes = [4, 96], strides = [1, 1]} : vector<4x384xf32> to vector<4x96xf32>
    %251 = vector.extract_strided_slice %249 {offsets = [0, 96], sizes = [4, 96], strides = [1, 1]} : vector<4x384xf32> to vector<4x96xf32>
    %252 = vector.extract_strided_slice %9 {offsets = [2, 0, 0], sizes = [1, 4, 32], strides = [1, 1, 1]} : vector<8x4x32xf32> to vector<1x4x32xf32>
    %253 = vector.shape_cast %252 : vector<1x4x32xf32> to vector<4x32xf32>
    %254 = vector.extract_strided_slice %11 {offsets = [2, 0, 0], sizes = [1, 4, 32], strides = [1, 1, 1]} : vector<8x4x32xf32> to vector<1x4x32xf32>
    %255 = vector.shape_cast %254 : vector<1x4x32xf32> to vector<4x32xf32>
    %256 = vector.extract_strided_slice %250 {offsets = [0, 0], sizes = [4, 32], strides = [1, 1]} : vector<4x96xf32> to vector<4x32xf32>
    %257 = vector.extract_strided_slice %251 {offsets = [0, 0], sizes = [4, 32], strides = [1, 1]} : vector<4x96xf32> to vector<4x32xf32>
    %258 = arith.addf %256, %257 : vector<4x32xf32>
    %cst_63 = arith.constant 0.000000e+00 : f32
    %259 = vector.broadcast %cst_63 : f32 to vector<4x32xf32>
    %260 = arith.subf %259, %258 : vector<4x32xf32>
    %261 = math.exp %260 : vector<4x32xf32>
    %cst_64 = arith.constant 1.000000e+00 : f32
    %262 = vector.broadcast %cst_64 : f32 to vector<4x32xf32>
    %263 = arith.addf %262, %261 : vector<4x32xf32>
    %cst_65 = arith.constant 1.000000e+00 : f32
    %264 = vector.broadcast %cst_65 : f32 to vector<4x32xf32>
    %265 = arith.divf %264, %263 : vector<4x32xf32>
    %266 = vector.extract_strided_slice %250 {offsets = [0, 32], sizes = [4, 32], strides = [1, 1]} : vector<4x96xf32> to vector<4x32xf32>
    %267 = vector.extract_strided_slice %251 {offsets = [0, 32], sizes = [4, 32], strides = [1, 1]} : vector<4x96xf32> to vector<4x32xf32>
    %268 = arith.addf %266, %267 : vector<4x32xf32>
    %cst_66 = arith.constant 0.000000e+00 : f32
    %269 = vector.broadcast %cst_66 : f32 to vector<4x32xf32>
    %270 = arith.subf %269, %268 : vector<4x32xf32>
    %271 = math.exp %270 : vector<4x32xf32>
    %cst_67 = arith.constant 1.000000e+00 : f32
    %272 = vector.broadcast %cst_67 : f32 to vector<4x32xf32>
    %273 = arith.addf %272, %271 : vector<4x32xf32>
    %cst_68 = arith.constant 1.000000e+00 : f32
    %274 = vector.broadcast %cst_68 : f32 to vector<4x32xf32>
    %275 = arith.divf %274, %273 : vector<4x32xf32>
    %276 = vector.extract_strided_slice %250 {offsets = [0, 64], sizes = [4, 32], strides = [1, 1]} : vector<4x96xf32> to vector<4x32xf32>
    %277 = vector.extract_strided_slice %251 {offsets = [0, 64], sizes = [4, 32], strides = [1, 1]} : vector<4x96xf32> to vector<4x32xf32>
    %278 = arith.mulf %265, %277 : vector<4x32xf32>
    %279 = arith.addf %276, %278 : vector<4x32xf32>
    %280 = math.tanh %279 : vector<4x32xf32>
    %cst_69 = arith.constant 1.000000e+00 : f32
    %281 = vector.broadcast %cst_69 : f32 to vector<4x32xf32>
    %282 = arith.subf %281, %275 : vector<4x32xf32>
    %283 = arith.mulf %282, %280 : vector<4x32xf32>
    %284 = arith.mulf %275, %176 : vector<4x32xf32>
    %285 = arith.addf %283, %284 : vector<4x32xf32>
    %286 = arith.mulf %253, %285 : vector<4x32xf32>
    %287 = arith.mulf %255, %176 : vector<4x32xf32>
    %288 = arith.addf %286, %287 : vector<4x32xf32>
    %289 = vector.extract_strided_slice %249 {offsets = [0, 192], sizes = [4, 96], strides = [1, 1]} : vector<4x384xf32> to vector<4x96xf32>
    %290 = vector.extract_strided_slice %249 {offsets = [0, 288], sizes = [4, 96], strides = [1, 1]} : vector<4x384xf32> to vector<4x96xf32>
    %291 = vector.extract_strided_slice %9 {offsets = [5, 0, 0], sizes = [1, 4, 32], strides = [1, 1, 1]} : vector<8x4x32xf32> to vector<1x4x32xf32>
    %292 = vector.shape_cast %291 : vector<1x4x32xf32> to vector<4x32xf32>
    %293 = vector.extract_strided_slice %11 {offsets = [5, 0, 0], sizes = [1, 4, 32], strides = [1, 1, 1]} : vector<8x4x32xf32> to vector<1x4x32xf32>
    %294 = vector.shape_cast %293 : vector<1x4x32xf32> to vector<4x32xf32>
    %295 = vector.extract_strided_slice %289 {offsets = [0, 0], sizes = [4, 32], strides = [1, 1]} : vector<4x96xf32> to vector<4x32xf32>
    %296 = vector.extract_strided_slice %290 {offsets = [0, 0], sizes = [4, 32], strides = [1, 1]} : vector<4x96xf32> to vector<4x32xf32>
    %297 = arith.addf %295, %296 : vector<4x32xf32>
    %cst_70 = arith.constant 0.000000e+00 : f32
    %298 = vector.broadcast %cst_70 : f32 to vector<4x32xf32>
    %299 = arith.subf %298, %297 : vector<4x32xf32>
    %300 = math.exp %299 : vector<4x32xf32>
    %cst_71 = arith.constant 1.000000e+00 : f32
    %301 = vector.broadcast %cst_71 : f32 to vector<4x32xf32>
    %302 = arith.addf %301, %300 : vector<4x32xf32>
    %cst_72 = arith.constant 1.000000e+00 : f32
    %303 = vector.broadcast %cst_72 : f32 to vector<4x32xf32>
    %304 = arith.divf %303, %302 : vector<4x32xf32>
    %305 = vector.extract_strided_slice %289 {offsets = [0, 32], sizes = [4, 32], strides = [1, 1]} : vector<4x96xf32> to vector<4x32xf32>
    %306 = vector.extract_strided_slice %290 {offsets = [0, 32], sizes = [4, 32], strides = [1, 1]} : vector<4x96xf32> to vector<4x32xf32>
    %307 = arith.addf %305, %306 : vector<4x32xf32>
    %cst_73 = arith.constant 0.000000e+00 : f32
    %308 = vector.broadcast %cst_73 : f32 to vector<4x32xf32>
    %309 = arith.subf %308, %307 : vector<4x32xf32>
    %310 = math.exp %309 : vector<4x32xf32>
    %cst_74 = arith.constant 1.000000e+00 : f32
    %311 = vector.broadcast %cst_74 : f32 to vector<4x32xf32>
    %312 = arith.addf %311, %310 : vector<4x32xf32>
    %cst_75 = arith.constant 1.000000e+00 : f32
    %313 = vector.broadcast %cst_75 : f32 to vector<4x32xf32>
    %314 = arith.divf %313, %312 : vector<4x32xf32>
    %315 = vector.extract_strided_slice %289 {offsets = [0, 64], sizes = [4, 32], strides = [1, 1]} : vector<4x96xf32> to vector<4x32xf32>
    %316 = vector.extract_strided_slice %290 {offsets = [0, 64], sizes = [4, 32], strides = [1, 1]} : vector<4x96xf32> to vector<4x32xf32>
    %317 = arith.mulf %304, %316 : vector<4x32xf32>
    %318 = arith.addf %315, %317 : vector<4x32xf32>
    %319 = math.tanh %318 : vector<4x32xf32>
    %cst_76 = arith.constant 1.000000e+00 : f32
    %320 = vector.broadcast %cst_76 : f32 to vector<4x32xf32>
    %321 = arith.subf %320, %314 : vector<4x32xf32>
    %322 = arith.mulf %321, %319 : vector<4x32xf32>
    %323 = arith.mulf %314, %215 : vector<4x32xf32>
    %324 = arith.addf %322, %323 : vector<4x32xf32>
    %325 = arith.mulf %292, %324 : vector<4x32xf32>
    %326 = arith.mulf %294, %215 : vector<4x32xf32>
    %327 = arith.addf %325, %326 : vector<4x32xf32>
    %328 = vector.extract_strided_slice %9 {offsets = [2, 0, 0], sizes = [1, 4, 32], strides = [1, 1, 1]} : vector<8x4x32xf32> to vector<1x4x32xf32>
    %329 = vector.shape_cast %328 : vector<1x4x32xf32> to vector<4x32xf32>
    %330 = arith.mulf %288, %329 : vector<4x32xf32>
    %331 = vector.extract_strided_slice %9 {offsets = [5, 0, 0], sizes = [1, 4, 32], strides = [1, 1, 1]} : vector<8x4x32xf32> to vector<1x4x32xf32>
    %332 = vector.shape_cast %331 : vector<1x4x32xf32> to vector<4x32xf32>
    %333 = arith.mulf %327, %332 : vector<4x32xf32>
    %c0_77 = arith.constant 0 : index
    %c0_78 = arith.constant 0 : index
    %c128 = arith.constant 128 : index
    %334 = vector.load %arg5[%c0_77, %c0_78, %c128] : memref<1x4x512xf32, #tpu.memory_space<vmem>>, vector<1x4x32xf32>
    %335 = vector.shape_cast %334 : vector<1x4x32xf32> to vector<4x32xf32>
    %336 = vector.shape_cast %330 : vector<4x32xf32> to vector<1x4x32xf32>
    tpu.vector_store %arg5[%c0_77, %c0_78, %c128], %336 {strides = array<i32>} : memref<1x4x512xf32, #tpu.memory_space<vmem>>, vector<1x4x32xf32>,
    %c0_79 = arith.constant 0 : index
    %c0_80 = arith.constant 0 : index
    %c352 = arith.constant 352 : index
    %337 = vector.load %arg5[%c0_79, %c0_80, %c352] : memref<1x4x512xf32, #tpu.memory_space<vmem>>, vector<1x4x32xf32>
    %338 = vector.shape_cast %337 : vector<1x4x32xf32> to vector<4x32xf32>
    %339 = vector.shape_cast %333 : vector<4x32xf32> to vector<1x4x32xf32>
    tpu.vector_store %arg5[%c0_79, %c0_80, %c352], %339 {strides = array<i32>} : memref<1x4x512xf32, #tpu.memory_space<vmem>>, vector<1x4x32xf32>,
    %340 = arith.addf %228, %330 : vector<4x32xf32>
    %341 = arith.addf %229, %333 : vector<4x32xf32>
    %342 = vector.extract_strided_slice %11 {offsets = [2, 0, 0], sizes = [1, 4, 32], strides = [1, 1, 1]} : vector<8x4x32xf32> to vector<1x4x32xf32>
    %343 = vector.shape_cast %342 : vector<1x4x32xf32> to vector<4x32xf32>
    %cst_81 = arith.constant -1.000000e+07 : f32
    %344 = vector.broadcast %cst_81 : f32 to vector<4x32xf32>
    %345 = arith.mulf %344, %343 : vector<4x32xf32>
    %346 = arith.addf %330, %345 : vector<4x32xf32>
    %347 = arith.maximumf %235, %346 : vector<4x32xf32>
    %348 = vector.extract_strided_slice %11 {offsets = [5, 0, 0], sizes = [1, 4, 32], strides = [1, 1, 1]} : vector<8x4x32xf32> to vector<1x4x32xf32>
    %349 = vector.shape_cast %348 : vector<1x4x32xf32> to vector<4x32xf32>
    %cst_82 = arith.constant -1.000000e+07 : f32
    %350 = vector.broadcast %cst_82 : f32 to vector<4x32xf32>
    %351 = arith.mulf %350, %349 : vector<4x32xf32>
    %352 = arith.addf %333, %351 : vector<4x32xf32>
    %353 = arith.maximumf %241, %352 : vector<4x32xf32>
    %354 = vector.extract_strided_slice %1 {offsets = [0, 3, 0], sizes = [4, 1, 32], strides = [1, 1, 1]} : vector<4x8x32xf32> to vector<4x1x32xf32>
    %355 = vector.shape_cast %354 : vector<4x1x32xf32> to vector<4x32xf32>
    %356 = vector.extract_strided_slice %1 {offsets = [0, 4, 0], sizes = [4, 1, 32], strides = [1, 1, 1]} : vector<4x8x32xf32> to vector<4x1x32xf32>
    %357 = vector.shape_cast %356 : vector<4x1x32xf32> to vector<4x32xf32>
    %358 = tpu.concatenate %355, %357, %288, %327 in 1 : vector<4x32xf32>, vector<4x32xf32>, vector<4x32xf32>, vector<4x32xf32> -> vector<4x128xf32>
    %cst_83 = arith.constant dense<0.000000e+00> : vector<4x384xf32>
    %359 = tpu.matmul %358, %5, %cst_83 {dimension_numbers = #tpu.dot_dimension_numbers<[1], [0], [0], [1], [0, 0, 1, 1], [], []>} : vector<4x128xf32>, vector<128x384xf32>, vector<4x384xf32> -> vector<4x384xf32>
    %360 = vector.broadcast %7 : vector<1x384xf32> to vector<4x384xf32>
    %361 = arith.addf %359, %360 : vector<4x384xf32>
    %362 = vector.extract_strided_slice %361 {offsets = [0, 0], sizes = [4, 96], strides = [1, 1]} : vector<4x384xf32> to vector<4x96xf32>
    %363 = vector.extract_strided_slice %361 {offsets = [0, 96], sizes = [4, 96], strides = [1, 1]} : vector<4x384xf32> to vector<4x96xf32>
    %364 = vector.extract_strided_slice %9 {offsets = [3, 0, 0], sizes = [1, 4, 32], strides = [1, 1, 1]} : vector<8x4x32xf32> to vector<1x4x32xf32>
    %365 = vector.shape_cast %364 : vector<1x4x32xf32> to vector<4x32xf32>
    %366 = vector.extract_strided_slice %11 {offsets = [3, 0, 0], sizes = [1, 4, 32], strides = [1, 1, 1]} : vector<8x4x32xf32> to vector<1x4x32xf32>
    %367 = vector.shape_cast %366 : vector<1x4x32xf32> to vector<4x32xf32>
    %368 = vector.extract_strided_slice %362 {offsets = [0, 0], sizes = [4, 32], strides = [1, 1]} : vector<4x96xf32> to vector<4x32xf32>
    %369 = vector.extract_strided_slice %363 {offsets = [0, 0], sizes = [4, 32], strides = [1, 1]} : vector<4x96xf32> to vector<4x32xf32>
    %370 = arith.addf %368, %369 : vector<4x32xf32>
    %cst_84 = arith.constant 0.000000e+00 : f32
    %371 = vector.broadcast %cst_84 : f32 to vector<4x32xf32>
    %372 = arith.subf %371, %370 : vector<4x32xf32>
    %373 = math.exp %372 : vector<4x32xf32>
    %cst_85 = arith.constant 1.000000e+00 : f32
    %374 = vector.broadcast %cst_85 : f32 to vector<4x32xf32>
    %375 = arith.addf %374, %373 : vector<4x32xf32>
    %cst_86 = arith.constant 1.000000e+00 : f32
    %376 = vector.broadcast %cst_86 : f32 to vector<4x32xf32>
    %377 = arith.divf %376, %375 : vector<4x32xf32>
    %378 = vector.extract_strided_slice %362 {offsets = [0, 32], sizes = [4, 32], strides = [1, 1]} : vector<4x96xf32> to vector<4x32xf32>
    %379 = vector.extract_strided_slice %363 {offsets = [0, 32], sizes = [4, 32], strides = [1, 1]} : vector<4x96xf32> to vector<4x32xf32>
    %380 = arith.addf %378, %379 : vector<4x32xf32>
    %cst_87 = arith.constant 0.000000e+00 : f32
    %381 = vector.broadcast %cst_87 : f32 to vector<4x32xf32>
    %382 = arith.subf %381, %380 : vector<4x32xf32>
    %383 = math.exp %382 : vector<4x32xf32>
    %cst_88 = arith.constant 1.000000e+00 : f32
    %384 = vector.broadcast %cst_88 : f32 to vector<4x32xf32>
    %385 = arith.addf %384, %383 : vector<4x32xf32>
    %cst_89 = arith.constant 1.000000e+00 : f32
    %386 = vector.broadcast %cst_89 : f32 to vector<4x32xf32>
    %387 = arith.divf %386, %385 : vector<4x32xf32>
    %388 = vector.extract_strided_slice %362 {offsets = [0, 64], sizes = [4, 32], strides = [1, 1]} : vector<4x96xf32> to vector<4x32xf32>
    %389 = vector.extract_strided_slice %363 {offsets = [0, 64], sizes = [4, 32], strides = [1, 1]} : vector<4x96xf32> to vector<4x32xf32>
    %390 = arith.mulf %377, %389 : vector<4x32xf32>
    %391 = arith.addf %388, %390 : vector<4x32xf32>
    %392 = math.tanh %391 : vector<4x32xf32>
    %cst_90 = arith.constant 1.000000e+00 : f32
    %393 = vector.broadcast %cst_90 : f32 to vector<4x32xf32>
    %394 = arith.subf %393, %387 : vector<4x32xf32>
    %395 = arith.mulf %394, %392 : vector<4x32xf32>
    %396 = arith.mulf %387, %288 : vector<4x32xf32>
    %397 = arith.addf %395, %396 : vector<4x32xf32>
    %398 = arith.mulf %365, %397 : vector<4x32xf32>
    %399 = arith.mulf %367, %288 : vector<4x32xf32>
    %400 = arith.addf %398, %399 : vector<4x32xf32>
    %401 = vector.extract_strided_slice %361 {offsets = [0, 192], sizes = [4, 96], strides = [1, 1]} : vector<4x384xf32> to vector<4x96xf32>
    %402 = vector.extract_strided_slice %361 {offsets = [0, 288], sizes = [4, 96], strides = [1, 1]} : vector<4x384xf32> to vector<4x96xf32>
    %403 = vector.extract_strided_slice %9 {offsets = [4, 0, 0], sizes = [1, 4, 32], strides = [1, 1, 1]} : vector<8x4x32xf32> to vector<1x4x32xf32>
    %404 = vector.shape_cast %403 : vector<1x4x32xf32> to vector<4x32xf32>
    %405 = vector.extract_strided_slice %11 {offsets = [4, 0, 0], sizes = [1, 4, 32], strides = [1, 1, 1]} : vector<8x4x32xf32> to vector<1x4x32xf32>
    %406 = vector.shape_cast %405 : vector<1x4x32xf32> to vector<4x32xf32>
    %407 = vector.extract_strided_slice %401 {offsets = [0, 0], sizes = [4, 32], strides = [1, 1]} : vector<4x96xf32> to vector<4x32xf32>
    %408 = vector.extract_strided_slice %402 {offsets = [0, 0], sizes = [4, 32], strides = [1, 1]} : vector<4x96xf32> to vector<4x32xf32>
    %409 = arith.addf %407, %408 : vector<4x32xf32>
    %cst_91 = arith.constant 0.000000e+00 : f32
    %410 = vector.broadcast %cst_91 : f32 to vector<4x32xf32>
    %411 = arith.subf %410, %409 : vector<4x32xf32>
    %412 = math.exp %411 : vector<4x32xf32>
    %cst_92 = arith.constant 1.000000e+00 : f32
    %413 = vector.broadcast %cst_92 : f32 to vector<4x32xf32>
    %414 = arith.addf %413, %412 : vector<4x32xf32>
    %cst_93 = arith.constant 1.000000e+00 : f32
    %415 = vector.broadcast %cst_93 : f32 to vector<4x32xf32>
    %416 = arith.divf %415, %414 : vector<4x32xf32>
    %417 = vector.extract_strided_slice %401 {offsets = [0, 32], sizes = [4, 32], strides = [1, 1]} : vector<4x96xf32> to vector<4x32xf32>
    %418 = vector.extract_strided_slice %402 {offsets = [0, 32], sizes = [4, 32], strides = [1, 1]} : vector<4x96xf32> to vector<4x32xf32>
    %419 = arith.addf %417, %418 : vector<4x32xf32>
    %cst_94 = arith.constant 0.000000e+00 : f32
    %420 = vector.broadcast %cst_94 : f32 to vector<4x32xf32>
    %421 = arith.subf %420, %419 : vector<4x32xf32>
    %422 = math.exp %421 : vector<4x32xf32>
    %cst_95 = arith.constant 1.000000e+00 : f32
    %423 = vector.broadcast %cst_95 : f32 to vector<4x32xf32>
    %424 = arith.addf %423, %422 : vector<4x32xf32>
    %cst_96 = arith.constant 1.000000e+00 : f32
    %425 = vector.broadcast %cst_96 : f32 to vector<4x32xf32>
    %426 = arith.divf %425, %424 : vector<4x32xf32>
    %427 = vector.extract_strided_slice %401 {offsets = [0, 64], sizes = [4, 32], strides = [1, 1]} : vector<4x96xf32> to vector<4x32xf32>
    %428 = vector.extract_strided_slice %402 {offsets = [0, 64], sizes = [4, 32], strides = [1, 1]} : vector<4x96xf32> to vector<4x32xf32>
    %429 = arith.mulf %416, %428 : vector<4x32xf32>
    %430 = arith.addf %427, %429 : vector<4x32xf32>
    %431 = math.tanh %430 : vector<4x32xf32>
    %cst_97 = arith.constant 1.000000e+00 : f32
    %432 = vector.broadcast %cst_97 : f32 to vector<4x32xf32>
    %433 = arith.subf %432, %426 : vector<4x32xf32>
    %434 = arith.mulf %433, %431 : vector<4x32xf32>
    %435 = arith.mulf %426, %327 : vector<4x32xf32>
    %436 = arith.addf %434, %435 : vector<4x32xf32>
    %437 = arith.mulf %404, %436 : vector<4x32xf32>
    %438 = arith.mulf %406, %327 : vector<4x32xf32>
    %439 = arith.addf %437, %438 : vector<4x32xf32>
    %440 = vector.extract_strided_slice %9 {offsets = [3, 0, 0], sizes = [1, 4, 32], strides = [1, 1, 1]} : vector<8x4x32xf32> to vector<1x4x32xf32>
    %441 = vector.shape_cast %440 : vector<1x4x32xf32> to vector<4x32xf32>
    %442 = arith.mulf %400, %441 : vector<4x32xf32>
    %443 = vector.extract_strided_slice %9 {offsets = [4, 0, 0], sizes = [1, 4, 32], strides = [1, 1, 1]} : vector<8x4x32xf32> to vector<1x4x32xf32>
    %444 = vector.shape_cast %443 : vector<1x4x32xf32> to vector<4x32xf32>
    %445 = arith.mulf %439, %444 : vector<4x32xf32>
    %c0_98 = arith.constant 0 : index
    %c0_99 = arith.constant 0 : index
    %c192 = arith.constant 192 : index
    %446 = vector.load %arg5[%c0_98, %c0_99, %c192] : memref<1x4x512xf32, #tpu.memory_space<vmem>>, vector<1x4x32xf32>
    %447 = vector.shape_cast %446 : vector<1x4x32xf32> to vector<4x32xf32>
    %448 = vector.shape_cast %442 : vector<4x32xf32> to vector<1x4x32xf32>
    tpu.vector_store %arg5[%c0_98, %c0_99, %c192], %448 {strides = array<i32>} : memref<1x4x512xf32, #tpu.memory_space<vmem>>, vector<1x4x32xf32>,
    %c0_100 = arith.constant 0 : index
    %c0_101 = arith.constant 0 : index
    %c288 = arith.constant 288 : index
    %449 = vector.load %arg5[%c0_100, %c0_101, %c288] : memref<1x4x512xf32, #tpu.memory_space<vmem>>, vector<1x4x32xf32>
    %450 = vector.shape_cast %449 : vector<1x4x32xf32> to vector<4x32xf32>
    %451 = vector.shape_cast %445 : vector<4x32xf32> to vector<1x4x32xf32>
    tpu.vector_store %arg5[%c0_100, %c0_101, %c288], %451 {strides = array<i32>} : memref<1x4x512xf32, #tpu.memory_space<vmem>>, vector<1x4x32xf32>,
    %452 = arith.addf %340, %442 : vector<4x32xf32>
    %453 = arith.addf %341, %445 : vector<4x32xf32>
    %454 = vector.extract_strided_slice %11 {offsets = [3, 0, 0], sizes = [1, 4, 32], strides = [1, 1, 1]} : vector<8x4x32xf32> to vector<1x4x32xf32>
    %455 = vector.shape_cast %454 : vector<1x4x32xf32> to vector<4x32xf32>
    %cst_102 = arith.constant -1.000000e+07 : f32
    %456 = vector.broadcast %cst_102 : f32 to vector<4x32xf32>
    %457 = arith.mulf %456, %455 : vector<4x32xf32>
    %458 = arith.addf %442, %457 : vector<4x32xf32>
    %459 = arith.maximumf %347, %458 : vector<4x32xf32>
    %460 = vector.extract_strided_slice %11 {offsets = [4, 0, 0], sizes = [1, 4, 32], strides = [1, 1, 1]} : vector<8x4x32xf32> to vector<1x4x32xf32>
    %461 = vector.shape_cast %460 : vector<1x4x32xf32> to vector<4x32xf32>
    %cst_103 = arith.constant -1.000000e+07 : f32
    %462 = vector.broadcast %cst_103 : f32 to vector<4x32xf32>
    %463 = arith.mulf %462, %461 : vector<4x32xf32>
    %464 = arith.addf %445, %463 : vector<4x32xf32>
    %465 = arith.maximumf %353, %464 : vector<4x32xf32>
    %466 = vector.extract_strided_slice %1 {offsets = [0, 4, 0], sizes = [4, 1, 32], strides = [1, 1, 1]} : vector<4x8x32xf32> to vector<4x1x32xf32>
    %467 = vector.shape_cast %466 : vector<4x1x32xf32> to vector<4x32xf32>
    %468 = vector.extract_strided_slice %1 {offsets = [0, 3, 0], sizes = [4, 1, 32], strides = [1, 1, 1]} : vector<4x8x32xf32> to vector<4x1x32xf32>
    %469 = vector.shape_cast %468 : vector<4x1x32xf32> to vector<4x32xf32>
    %470 = tpu.concatenate %467, %469, %400, %439 in 1 : vector<4x32xf32>, vector<4x32xf32>, vector<4x32xf32>, vector<4x32xf32> -> vector<4x128xf32>
    %cst_104 = arith.constant dense<0.000000e+00> : vector<4x384xf32>
    %471 = tpu.matmul %470, %5, %cst_104 {dimension_numbers = #tpu.dot_dimension_numbers<[1], [0], [0], [1], [0, 0, 1, 1], [], []>} : vector<4x128xf32>, vector<128x384xf32>, vector<4x384xf32> -> vector<4x384xf32>
    %472 = vector.broadcast %7 : vector<1x384xf32> to vector<4x384xf32>
    %473 = arith.addf %471, %472 : vector<4x384xf32>
    %474 = vector.extract_strided_slice %473 {offsets = [0, 0], sizes = [4, 96], strides = [1, 1]} : vector<4x384xf32> to vector<4x96xf32>
    %475 = vector.extract_strided_slice %473 {offsets = [0, 96], sizes = [4, 96], strides = [1, 1]} : vector<4x384xf32> to vector<4x96xf32>
    %476 = vector.extract_strided_slice %9 {offsets = [4, 0, 0], sizes = [1, 4, 32], strides = [1, 1, 1]} : vector<8x4x32xf32> to vector<1x4x32xf32>
    %477 = vector.shape_cast %476 : vector<1x4x32xf32> to vector<4x32xf32>
    %478 = vector.extract_strided_slice %11 {offsets = [4, 0, 0], sizes = [1, 4, 32], strides = [1, 1, 1]} : vector<8x4x32xf32> to vector<1x4x32xf32>
    %479 = vector.shape_cast %478 : vector<1x4x32xf32> to vector<4x32xf32>
    %480 = vector.extract_strided_slice %474 {offsets = [0, 0], sizes = [4, 32], strides = [1, 1]} : vector<4x96xf32> to vector<4x32xf32>
    %481 = vector.extract_strided_slice %475 {offsets = [0, 0], sizes = [4, 32], strides = [1, 1]} : vector<4x96xf32> to vector<4x32xf32>
    %482 = arith.addf %480, %481 : vector<4x32xf32>
    %cst_105 = arith.constant 0.000000e+00 : f32
    %483 = vector.broadcast %cst_105 : f32 to vector<4x32xf32>
    %484 = arith.subf %483, %482 : vector<4x32xf32>
    %485 = math.exp %484 : vector<4x32xf32>
    %cst_106 = arith.constant 1.000000e+00 : f32
    %486 = vector.broadcast %cst_106 : f32 to vector<4x32xf32>
    %487 = arith.addf %486, %485 : vector<4x32xf32>
    %cst_107 = arith.constant 1.000000e+00 : f32
    %488 = vector.broadcast %cst_107 : f32 to vector<4x32xf32>
    %489 = arith.divf %488, %487 : vector<4x32xf32>
    %490 = vector.extract_strided_slice %474 {offsets = [0, 32], sizes = [4, 32], strides = [1, 1]} : vector<4x96xf32> to vector<4x32xf32>
    %491 = vector.extract_strided_slice %475 {offsets = [0, 32], sizes = [4, 32], strides = [1, 1]} : vector<4x96xf32> to vector<4x32xf32>
    %492 = arith.addf %490, %491 : vector<4x32xf32>
    %cst_108 = arith.constant 0.000000e+00 : f32
    %493 = vector.broadcast %cst_108 : f32 to vector<4x32xf32>
    %494 = arith.subf %493, %492 : vector<4x32xf32>
    %495 = math.exp %494 : vector<4x32xf32>
    %cst_109 = arith.constant 1.000000e+00 : f32
    %496 = vector.broadcast %cst_109 : f32 to vector<4x32xf32>
    %497 = arith.addf %496, %495 : vector<4x32xf32>
    %cst_110 = arith.constant 1.000000e+00 : f32
    %498 = vector.broadcast %cst_110 : f32 to vector<4x32xf32>
    %499 = arith.divf %498, %497 : vector<4x32xf32>
    %500 = vector.extract_strided_slice %474 {offsets = [0, 64], sizes = [4, 32], strides = [1, 1]} : vector<4x96xf32> to vector<4x32xf32>
    %501 = vector.extract_strided_slice %475 {offsets = [0, 64], sizes = [4, 32], strides = [1, 1]} : vector<4x96xf32> to vector<4x32xf32>
    %502 = arith.mulf %489, %501 : vector<4x32xf32>
    %503 = arith.addf %500, %502 : vector<4x32xf32>
    %504 = math.tanh %503 : vector<4x32xf32>
    %cst_111 = arith.constant 1.000000e+00 : f32
    %505 = vector.broadcast %cst_111 : f32 to vector<4x32xf32>
    %506 = arith.subf %505, %499 : vector<4x32xf32>
    %507 = arith.mulf %506, %504 : vector<4x32xf32>
    %508 = arith.mulf %499, %400 : vector<4x32xf32>
    %509 = arith.addf %507, %508 : vector<4x32xf32>
    %510 = arith.mulf %477, %509 : vector<4x32xf32>
    %511 = arith.mulf %479, %400 : vector<4x32xf32>
    %512 = arith.addf %510, %511 : vector<4x32xf32>
    %513 = vector.extract_strided_slice %473 {offsets = [0, 192], sizes = [4, 96], strides = [1, 1]} : vector<4x384xf32> to vector<4x96xf32>
    %514 = vector.extract_strided_slice %473 {offsets = [0, 288], sizes = [4, 96], strides = [1, 1]} : vector<4x384xf32> to vector<4x96xf32>
    %515 = vector.extract_strided_slice %9 {offsets = [3, 0, 0], sizes = [1, 4, 32], strides = [1, 1, 1]} : vector<8x4x32xf32> to vector<1x4x32xf32>
    %516 = vector.shape_cast %515 : vector<1x4x32xf32> to vector<4x32xf32>
    %517 = vector.extract_strided_slice %11 {offsets = [3, 0, 0], sizes = [1, 4, 32], strides = [1, 1, 1]} : vector<8x4x32xf32> to vector<1x4x32xf32>
    %518 = vector.shape_cast %517 : vector<1x4x32xf32> to vector<4x32xf32>
    %519 = vector.extract_strided_slice %513 {offsets = [0, 0], sizes = [4, 32], strides = [1, 1]} : vector<4x96xf32> to vector<4x32xf32>
    %520 = vector.extract_strided_slice %514 {offsets = [0, 0], sizes = [4, 32], strides = [1, 1]} : vector<4x96xf32> to vector<4x32xf32>
    %521 = arith.addf %519, %520 : vector<4x32xf32>
    %cst_112 = arith.constant 0.000000e+00 : f32
    %522 = vector.broadcast %cst_112 : f32 to vector<4x32xf32>
    %523 = arith.subf %522, %521 : vector<4x32xf32>
    %524 = math.exp %523 : vector<4x32xf32>
    %cst_113 = arith.constant 1.000000e+00 : f32
    %525 = vector.broadcast %cst_113 : f32 to vector<4x32xf32>
    %526 = arith.addf %525, %524 : vector<4x32xf32>
    %cst_114 = arith.constant 1.000000e+00 : f32
    %527 = vector.broadcast %cst_114 : f32 to vector<4x32xf32>
    %528 = arith.divf %527, %526 : vector<4x32xf32>
    %529 = vector.extract_strided_slice %513 {offsets = [0, 32], sizes = [4, 32], strides = [1, 1]} : vector<4x96xf32> to vector<4x32xf32>
    %530 = vector.extract_strided_slice %514 {offsets = [0, 32], sizes = [4, 32], strides = [1, 1]} : vector<4x96xf32> to vector<4x32xf32>
    %531 = arith.addf %529, %530 : vector<4x32xf32>
    %cst_115 = arith.constant 0.000000e+00 : f32
    %532 = vector.broadcast %cst_115 : f32 to vector<4x32xf32>
    %533 = arith.subf %532, %531 : vector<4x32xf32>
    %534 = math.exp %533 : vector<4x32xf32>
    %cst_116 = arith.constant 1.000000e+00 : f32
    %535 = vector.broadcast %cst_116 : f32 to vector<4x32xf32>
    %536 = arith.addf %535, %534 : vector<4x32xf32>
    %cst_117 = arith.constant 1.000000e+00 : f32
    %537 = vector.broadcast %cst_117 : f32 to vector<4x32xf32>
    %538 = arith.divf %537, %536 : vector<4x32xf32>
    %539 = vector.extract_strided_slice %513 {offsets = [0, 64], sizes = [4, 32], strides = [1, 1]} : vector<4x96xf32> to vector<4x32xf32>
    %540 = vector.extract_strided_slice %514 {offsets = [0, 64], sizes = [4, 32], strides = [1, 1]} : vector<4x96xf32> to vector<4x32xf32>
    %541 = arith.mulf %528, %540 : vector<4x32xf32>
    %542 = arith.addf %539, %541 : vector<4x32xf32>
    %543 = math.tanh %542 : vector<4x32xf32>
    %cst_118 = arith.constant 1.000000e+00 : f32
    %544 = vector.broadcast %cst_118 : f32 to vector<4x32xf32>
    %545 = arith.subf %544, %538 : vector<4x32xf32>
    %546 = arith.mulf %545, %543 : vector<4x32xf32>
    %547 = arith.mulf %538, %439 : vector<4x32xf32>
    %548 = arith.addf %546, %547 : vector<4x32xf32>
    %549 = arith.mulf %516, %548 : vector<4x32xf32>
    %550 = arith.mulf %518, %439 : vector<4x32xf32>
    %551 = arith.addf %549, %550 : vector<4x32xf32>
    %552 = vector.extract_strided_slice %9 {offsets = [4, 0, 0], sizes = [1, 4, 32], strides = [1, 1, 1]} : vector<8x4x32xf32> to vector<1x4x32xf32>
    %553 = vector.shape_cast %552 : vector<1x4x32xf32> to vector<4x32xf32>
    %554 = arith.mulf %512, %553 : vector<4x32xf32>
    %555 = vector.extract_strided_slice %9 {offsets = [3, 0, 0], sizes = [1, 4, 32], strides = [1, 1, 1]} : vector<8x4x32xf32> to vector<1x4x32xf32>
    %556 = vector.shape_cast %555 : vector<1x4x32xf32> to vector<4x32xf32>
    %557 = arith.mulf %551, %556 : vector<4x32xf32>
    %c0_119 = arith.constant 0 : index
    %c0_120 = arith.constant 0 : index
    %c256 = arith.constant 256 : index
    %558 = vector.load %arg5[%c0_119, %c0_120, %c256] : memref<1x4x512xf32, #tpu.memory_space<vmem>>, vector<1x4x32xf32>
    %559 = vector.shape_cast %558 : vector<1x4x32xf32> to vector<4x32xf32>
    %560 = vector.shape_cast %554 : vector<4x32xf32> to vector<1x4x32xf32>
    tpu.vector_store %arg5[%c0_119, %c0_120, %c256], %560 {strides = array<i32>} : memref<1x4x512xf32, #tpu.memory_space<vmem>>, vector<1x4x32xf32>,
    %c0_121 = arith.constant 0 : index
    %c0_122 = arith.constant 0 : index
    %c224 = arith.constant 224 : index
    %561 = vector.load %arg5[%c0_121, %c0_122, %c224] : memref<1x4x512xf32, #tpu.memory_space<vmem>>, vector<1x4x32xf32>
    %562 = vector.shape_cast %561 : vector<1x4x32xf32> to vector<4x32xf32>
    %563 = vector.shape_cast %557 : vector<4x32xf32> to vector<1x4x32xf32>
    tpu.vector_store %arg5[%c0_121, %c0_122, %c224], %563 {strides = array<i32>} : memref<1x4x512xf32, #tpu.memory_space<vmem>>, vector<1x4x32xf32>,
    %564 = arith.addf %452, %554 : vector<4x32xf32>
    %565 = arith.addf %453, %557 : vector<4x32xf32>
    %566 = vector.extract_strided_slice %11 {offsets = [4, 0, 0], sizes = [1, 4, 32], strides = [1, 1, 1]} : vector<8x4x32xf32> to vector<1x4x32xf32>
    %567 = vector.shape_cast %566 : vector<1x4x32xf32> to vector<4x32xf32>
    %cst_123 = arith.constant -1.000000e+07 : f32
    %568 = vector.broadcast %cst_123 : f32 to vector<4x32xf32>
    %569 = arith.mulf %568, %567 : vector<4x32xf32>
    %570 = arith.addf %554, %569 : vector<4x32xf32>
    %571 = arith.maximumf %459, %570 : vector<4x32xf32>
    %572 = vector.extract_strided_slice %11 {offsets = [3, 0, 0], sizes = [1, 4, 32], strides = [1, 1, 1]} : vector<8x4x32xf32> to vector<1x4x32xf32>
    %573 = vector.shape_cast %572 : vector<1x4x32xf32> to vector<4x32xf32>
    %cst_124 = arith.constant -1.000000e+07 : f32
    %574 = vector.broadcast %cst_124 : f32 to vector<4x32xf32>
    %575 = arith.mulf %574, %573 : vector<4x32xf32>
    %576 = arith.addf %557, %575 : vector<4x32xf32>
    %577 = arith.maximumf %465, %576 : vector<4x32xf32>
    %578 = vector.extract_strided_slice %1 {offsets = [0, 5, 0], sizes = [4, 1, 32], strides = [1, 1, 1]} : vector<4x8x32xf32> to vector<4x1x32xf32>
    %579 = vector.shape_cast %578 : vector<4x1x32xf32> to vector<4x32xf32>
    %580 = vector.extract_strided_slice %1 {offsets = [0, 2, 0], sizes = [4, 1, 32], strides = [1, 1, 1]} : vector<4x8x32xf32> to vector<4x1x32xf32>
    %581 = vector.shape_cast %580 : vector<4x1x32xf32> to vector<4x32xf32>
    %582 = tpu.concatenate %579, %581, %512, %551 in 1 : vector<4x32xf32>, vector<4x32xf32>, vector<4x32xf32>, vector<4x32xf32> -> vector<4x128xf32>
    %cst_125 = arith.constant dense<0.000000e+00> : vector<4x384xf32>
    %583 = tpu.matmul %582, %5, %cst_125 {dimension_numbers = #tpu.dot_dimension_numbers<[1], [0], [0], [1], [0, 0, 1, 1], [], []>} : vector<4x128xf32>, vector<128x384xf32>, vector<4x384xf32> -> vector<4x384xf32>
    %584 = vector.broadcast %7 : vector<1x384xf32> to vector<4x384xf32>
    %585 = arith.addf %583, %584 : vector<4x384xf32>
    %586 = vector.extract_strided_slice %585 {offsets = [0, 0], sizes = [4, 96], strides = [1, 1]} : vector<4x384xf32> to vector<4x96xf32>
    %587 = vector.extract_strided_slice %585 {offsets = [0, 96], sizes = [4, 96], strides = [1, 1]} : vector<4x384xf32> to vector<4x96xf32>
    %588 = vector.extract_strided_slice %9 {offsets = [5, 0, 0], sizes = [1, 4, 32], strides = [1, 1, 1]} : vector<8x4x32xf32> to vector<1x4x32xf32>
    %589 = vector.shape_cast %588 : vector<1x4x32xf32> to vector<4x32xf32>
    %590 = vector.extract_strided_slice %11 {offsets = [5, 0, 0], sizes = [1, 4, 32], strides = [1, 1, 1]} : vector<8x4x32xf32> to vector<1x4x32xf32>
    %591 = vector.shape_cast %590 : vector<1x4x32xf32> to vector<4x32xf32>
    %592 = vector.extract_strided_slice %586 {offsets = [0, 0], sizes = [4, 32], strides = [1, 1]} : vector<4x96xf32> to vector<4x32xf32>
    %593 = vector.extract_strided_slice %587 {offsets = [0, 0], sizes = [4, 32], strides = [1, 1]} : vector<4x96xf32> to vector<4x32xf32>
    %594 = arith.addf %592, %593 : vector<4x32xf32>
    %cst_126 = arith.constant 0.000000e+00 : f32
    %595 = vector.broadcast %cst_126 : f32 to vector<4x32xf32>
    %596 = arith.subf %595, %594 : vector<4x32xf32>
    %597 = math.exp %596 : vector<4x32xf32>
    %cst_127 = arith.constant 1.000000e+00 : f32
    %598 = vector.broadcast %cst_127 : f32 to vector<4x32xf32>
    %599 = arith.addf %598, %597 : vector<4x32xf32>
    %cst_128 = arith.constant 1.000000e+00 : f32
    %600 = vector.broadcast %cst_128 : f32 to vector<4x32xf32>
    %601 = arith.divf %600, %599 : vector<4x32xf32>
    %602 = vector.extract_strided_slice %586 {offsets = [0, 32], sizes = [4, 32], strides = [1, 1]} : vector<4x96xf32> to vector<4x32xf32>
    %603 = vector.extract_strided_slice %587 {offsets = [0, 32], sizes = [4, 32], strides = [1, 1]} : vector<4x96xf32> to vector<4x32xf32>
    %604 = arith.addf %602, %603 : vector<4x32xf32>
    %cst_129 = arith.constant 0.000000e+00 : f32
    %605 = vector.broadcast %cst_129 : f32 to vector<4x32xf32>
    %606 = arith.subf %605, %604 : vector<4x32xf32>
    %607 = math.exp %606 : vector<4x32xf32>
    %cst_130 = arith.constant 1.000000e+00 : f32
    %608 = vector.broadcast %cst_130 : f32 to vector<4x32xf32>
    %609 = arith.addf %608, %607 : vector<4x32xf32>
    %cst_131 = arith.constant 1.000000e+00 : f32
    %610 = vector.broadcast %cst_131 : f32 to vector<4x32xf32>
    %611 = arith.divf %610, %609 : vector<4x32xf32>
    %612 = vector.extract_strided_slice %586 {offsets = [0, 64], sizes = [4, 32], strides = [1, 1]} : vector<4x96xf32> to vector<4x32xf32>
    %613 = vector.extract_strided_slice %587 {offsets = [0, 64], sizes = [4, 32], strides = [1, 1]} : vector<4x96xf32> to vector<4x32xf32>
    %614 = arith.mulf %601, %613 : vector<4x32xf32>
    %615 = arith.addf %612, %614 : vector<4x32xf32>
    %616 = math.tanh %615 : vector<4x32xf32>
    %cst_132 = arith.constant 1.000000e+00 : f32
    %617 = vector.broadcast %cst_132 : f32 to vector<4x32xf32>
    %618 = arith.subf %617, %611 : vector<4x32xf32>
    %619 = arith.mulf %618, %616 : vector<4x32xf32>
    %620 = arith.mulf %611, %512 : vector<4x32xf32>
    %621 = arith.addf %619, %620 : vector<4x32xf32>
    %622 = arith.mulf %589, %621 : vector<4x32xf32>
    %623 = arith.mulf %591, %512 : vector<4x32xf32>
    %624 = arith.addf %622, %623 : vector<4x32xf32>
    %625 = vector.extract_strided_slice %585 {offsets = [0, 192], sizes = [4, 96], strides = [1, 1]} : vector<4x384xf32> to vector<4x96xf32>
    %626 = vector.extract_strided_slice %585 {offsets = [0, 288], sizes = [4, 96], strides = [1, 1]} : vector<4x384xf32> to vector<4x96xf32>
    %627 = vector.extract_strided_slice %9 {offsets = [2, 0, 0], sizes = [1, 4, 32], strides = [1, 1, 1]} : vector<8x4x32xf32> to vector<1x4x32xf32>
    %628 = vector.shape_cast %627 : vector<1x4x32xf32> to vector<4x32xf32>
    %629 = vector.extract_strided_slice %11 {offsets = [2, 0, 0], sizes = [1, 4, 32], strides = [1, 1, 1]} : vector<8x4x32xf32> to vector<1x4x32xf32>
    %630 = vector.shape_cast %629 : vector<1x4x32xf32> to vector<4x32xf32>
    %631 = vector.extract_strided_slice %625 {offsets = [0, 0], sizes = [4, 32], strides = [1, 1]} : vector<4x96xf32> to vector<4x32xf32>
    %632 = vector.extract_strided_slice %626 {offsets = [0, 0], sizes = [4, 32], strides = [1, 1]} : vector<4x96xf32> to vector<4x32xf32>
    %633 = arith.addf %631, %632 : vector<4x32xf32>
    %cst_133 = arith.constant 0.000000e+00 : f32
    %634 = vector.broadcast %cst_133 : f32 to vector<4x32xf32>
    %635 = arith.subf %634, %633 : vector<4x32xf32>
    %636 = math.exp %635 : vector<4x32xf32>
    %cst_134 = arith.constant 1.000000e+00 : f32
    %637 = vector.broadcast %cst_134 : f32 to vector<4x32xf32>
    %638 = arith.addf %637, %636 : vector<4x32xf32>
    %cst_135 = arith.constant 1.000000e+00 : f32
    %639 = vector.broadcast %cst_135 : f32 to vector<4x32xf32>
    %640 = arith.divf %639, %638 : vector<4x32xf32>
    %641 = vector.extract_strided_slice %625 {offsets = [0, 32], sizes = [4, 32], strides = [1, 1]} : vector<4x96xf32> to vector<4x32xf32>
    %642 = vector.extract_strided_slice %626 {offsets = [0, 32], sizes = [4, 32], strides = [1, 1]} : vector<4x96xf32> to vector<4x32xf32>
    %643 = arith.addf %641, %642 : vector<4x32xf32>
    %cst_136 = arith.constant 0.000000e+00 : f32
    %644 = vector.broadcast %cst_136 : f32 to vector<4x32xf32>
    %645 = arith.subf %644, %643 : vector<4x32xf32>
    %646 = math.exp %645 : vector<4x32xf32>
    %cst_137 = arith.constant 1.000000e+00 : f32
    %647 = vector.broadcast %cst_137 : f32 to vector<4x32xf32>
    %648 = arith.addf %647, %646 : vector<4x32xf32>
    %cst_138 = arith.constant 1.000000e+00 : f32
    %649 = vector.broadcast %cst_138 : f32 to vector<4x32xf32>
    %650 = arith.divf %649, %648 : vector<4x32xf32>
    %651 = vector.extract_strided_slice %625 {offsets = [0, 64], sizes = [4, 32], strides = [1, 1]} : vector<4x96xf32> to vector<4x32xf32>
    %652 = vector.extract_strided_slice %626 {offsets = [0, 64], sizes = [4, 32], strides = [1, 1]} : vector<4x96xf32> to vector<4x32xf32>
    %653 = arith.mulf %640, %652 : vector<4x32xf32>
    %654 = arith.addf %651, %653 : vector<4x32xf32>
    %655 = math.tanh %654 : vector<4x32xf32>
    %cst_139 = arith.constant 1.000000e+00 : f32
    %656 = vector.broadcast %cst_139 : f32 to vector<4x32xf32>
    %657 = arith.subf %656, %650 : vector<4x32xf32>
    %658 = arith.mulf %657, %655 : vector<4x32xf32>
    %659 = arith.mulf %650, %551 : vector<4x32xf32>
    %660 = arith.addf %658, %659 : vector<4x32xf32>
    %661 = arith.mulf %628, %660 : vector<4x32xf32>
    %662 = arith.mulf %630, %551 : vector<4x32xf32>
    %663 = arith.addf %661, %662 : vector<4x32xf32>
    %664 = vector.extract_strided_slice %9 {offsets = [5, 0, 0], sizes = [1, 4, 32], strides = [1, 1, 1]} : vector<8x4x32xf32> to vector<1x4x32xf32>
    %665 = vector.shape_cast %664 : vector<1x4x32xf32> to vector<4x32xf32>
    %666 = arith.mulf %624, %665 : vector<4x32xf32>
    %667 = vector.extract_strided_slice %9 {offsets = [2, 0, 0], sizes = [1, 4, 32], strides = [1, 1, 1]} : vector<8x4x32xf32> to vector<1x4x32xf32>
    %668 = vector.shape_cast %667 : vector<1x4x32xf32> to vector<4x32xf32>
    %669 = arith.mulf %663, %668 : vector<4x32xf32>
    %c0_140 = arith.constant 0 : index
    %c0_141 = arith.constant 0 : index
    %c320 = arith.constant 320 : index
    %670 = vector.load %arg5[%c0_140, %c0_141, %c320] : memref<1x4x512xf32, #tpu.memory_space<vmem>>, vector<1x4x32xf32>
    %671 = vector.shape_cast %670 : vector<1x4x32xf32> to vector<4x32xf32>
    %672 = vector.shape_cast %666 : vector<4x32xf32> to vector<1x4x32xf32>
    tpu.vector_store %arg5[%c0_140, %c0_141, %c320], %672 {strides = array<i32>} : memref<1x4x512xf32, #tpu.memory_space<vmem>>, vector<1x4x32xf32>,
    %c0_142 = arith.constant 0 : index
    %c0_143 = arith.constant 0 : index
    %c160 = arith.constant 160 : index
    %673 = vector.load %arg5[%c0_142, %c0_143, %c160] : memref<1x4x512xf32, #tpu.memory_space<vmem>>, vector<1x4x32xf32>
    %674 = vector.shape_cast %673 : vector<1x4x32xf32> to vector<4x32xf32>
    %675 = vector.shape_cast %669 : vector<4x32xf32> to vector<1x4x32xf32>
    tpu.vector_store %arg5[%c0_142, %c0_143, %c160], %675 {strides = array<i32>} : memref<1x4x512xf32, #tpu.memory_space<vmem>>, vector<1x4x32xf32>,
    %676 = arith.addf %564, %666 : vector<4x32xf32>
    %677 = arith.addf %565, %669 : vector<4x32xf32>
    %678 = vector.extract_strided_slice %11 {offsets = [5, 0, 0], sizes = [1, 4, 32], strides = [1, 1, 1]} : vector<8x4x32xf32> to vector<1x4x32xf32>
    %679 = vector.shape_cast %678 : vector<1x4x32xf32> to vector<4x32xf32>
    %cst_144 = arith.constant -1.000000e+07 : f32
    %680 = vector.broadcast %cst_144 : f32 to vector<4x32xf32>
    %681 = arith.mulf %680, %679 : vector<4x32xf32>
    %682 = arith.addf %666, %681 : vector<4x32xf32>
    %683 = arith.maximumf %571, %682 : vector<4x32xf32>
    %684 = vector.extract_strided_slice %11 {offsets = [2, 0, 0], sizes = [1, 4, 32], strides = [1, 1, 1]} : vector<8x4x32xf32> to vector<1x4x32xf32>
    %685 = vector.shape_cast %684 : vector<1x4x32xf32> to vector<4x32xf32>
    %cst_145 = arith.constant -1.000000e+07 : f32
    %686 = vector.broadcast %cst_145 : f32 to vector<4x32xf32>
    %687 = arith.mulf %686, %685 : vector<4x32xf32>
    %688 = arith.addf %669, %687 : vector<4x32xf32>
    %689 = arith.maximumf %577, %688 : vector<4x32xf32>
    %690 = vector.extract_strided_slice %1 {offsets = [0, 6, 0], sizes = [4, 1, 32], strides = [1, 1, 1]} : vector<4x8x32xf32> to vector<4x1x32xf32>
    %691 = vector.shape_cast %690 : vector<4x1x32xf32> to vector<4x32xf32>
    %692 = vector.extract_strided_slice %1 {offsets = [0, 1, 0], sizes = [4, 1, 32], strides = [1, 1, 1]} : vector<4x8x32xf32> to vector<4x1x32xf32>
    %693 = vector.shape_cast %692 : vector<4x1x32xf32> to vector<4x32xf32>
    %694 = tpu.concatenate %691, %693, %624, %663 in 1 : vector<4x32xf32>, vector<4x32xf32>, vector<4x32xf32>, vector<4x32xf32> -> vector<4x128xf32>
    %cst_146 = arith.constant dense<0.000000e+00> : vector<4x384xf32>
    %695 = tpu.matmul %694, %5, %cst_146 {dimension_numbers = #tpu.dot_dimension_numbers<[1], [0], [0], [1], [0, 0, 1, 1], [], []>} : vector<4x128xf32>, vector<128x384xf32>, vector<4x384xf32> -> vector<4x384xf32>
    %696 = vector.broadcast %7 : vector<1x384xf32> to vector<4x384xf32>
    %697 = arith.addf %695, %696 : vector<4x384xf32>
    %698 = vector.extract_strided_slice %697 {offsets = [0, 0], sizes = [4, 96], strides = [1, 1]} : vector<4x384xf32> to vector<4x96xf32>
    %699 = vector.extract_strided_slice %697 {offsets = [0, 96], sizes = [4, 96], strides = [1, 1]} : vector<4x384xf32> to vector<4x96xf32>
    %700 = vector.extract_strided_slice %9 {offsets = [6, 0, 0], sizes = [1, 4, 32], strides = [1, 1, 1]} : vector<8x4x32xf32> to vector<1x4x32xf32>
    %701 = vector.shape_cast %700 : vector<1x4x32xf32> to vector<4x32xf32>
    %702 = vector.extract_strided_slice %11 {offsets = [6, 0, 0], sizes = [1, 4, 32], strides = [1, 1, 1]} : vector<8x4x32xf32> to vector<1x4x32xf32>
    %703 = vector.shape_cast %702 : vector<1x4x32xf32> to vector<4x32xf32>
    %704 = vector.extract_strided_slice %698 {offsets = [0, 0], sizes = [4, 32], strides = [1, 1]} : vector<4x96xf32> to vector<4x32xf32>
    %705 = vector.extract_strided_slice %699 {offsets = [0, 0], sizes = [4, 32], strides = [1, 1]} : vector<4x96xf32> to vector<4x32xf32>
    %706 = arith.addf %704, %705 : vector<4x32xf32>
    %cst_147 = arith.constant 0.000000e+00 : f32
    %707 = vector.broadcast %cst_147 : f32 to vector<4x32xf32>
    %708 = arith.subf %707, %706 : vector<4x32xf32>
    %709 = math.exp %708 : vector<4x32xf32>
    %cst_148 = arith.constant 1.000000e+00 : f32
    %710 = vector.broadcast %cst_148 : f32 to vector<4x32xf32>
    %711 = arith.addf %710, %709 : vector<4x32xf32>
    %cst_149 = arith.constant 1.000000e+00 : f32
    %712 = vector.broadcast %cst_149 : f32 to vector<4x32xf32>
    %713 = arith.divf %712, %711 : vector<4x32xf32>
    %714 = vector.extract_strided_slice %698 {offsets = [0, 32], sizes = [4, 32], strides = [1, 1]} : vector<4x96xf32> to vector<4x32xf32>
    %715 = vector.extract_strided_slice %699 {offsets = [0, 32], sizes = [4, 32], strides = [1, 1]} : vector<4x96xf32> to vector<4x32xf32>
    %716 = arith.addf %714, %715 : vector<4x32xf32>
    %cst_150 = arith.constant 0.000000e+00 : f32
    %717 = vector.broadcast %cst_150 : f32 to vector<4x32xf32>
    %718 = arith.subf %717, %716 : vector<4x32xf32>
    %719 = math.exp %718 : vector<4x32xf32>
    %cst_151 = arith.constant 1.000000e+00 : f32
    %720 = vector.broadcast %cst_151 : f32 to vector<4x32xf32>
    %721 = arith.addf %720, %719 : vector<4x32xf32>
    %cst_152 = arith.constant 1.000000e+00 : f32
    %722 = vector.broadcast %cst_152 : f32 to vector<4x32xf32>
    %723 = arith.divf %722, %721 : vector<4x32xf32>
    %724 = vector.extract_strided_slice %698 {offsets = [0, 64], sizes = [4, 32], strides = [1, 1]} : vector<4x96xf32> to vector<4x32xf32>
    %725 = vector.extract_strided_slice %699 {offsets = [0, 64], sizes = [4, 32], strides = [1, 1]} : vector<4x96xf32> to vector<4x32xf32>
    %726 = arith.mulf %713, %725 : vector<4x32xf32>
    %727 = arith.addf %724, %726 : vector<4x32xf32>
    %728 = math.tanh %727 : vector<4x32xf32>
    %cst_153 = arith.constant 1.000000e+00 : f32
    %729 = vector.broadcast %cst_153 : f32 to vector<4x32xf32>
    %730 = arith.subf %729, %723 : vector<4x32xf32>
    %731 = arith.mulf %730, %728 : vector<4x32xf32>
    %732 = arith.mulf %723, %624 : vector<4x32xf32>
    %733 = arith.addf %731, %732 : vector<4x32xf32>
    %734 = arith.mulf %701, %733 : vector<4x32xf32>
    %735 = arith.mulf %703, %624 : vector<4x32xf32>
    %736 = arith.addf %734, %735 : vector<4x32xf32>
    %737 = vector.extract_strided_slice %697 {offsets = [0, 192], sizes = [4, 96], strides = [1, 1]} : vector<4x384xf32> to vector<4x96xf32>
    %738 = vector.extract_strided_slice %697 {offsets = [0, 288], sizes = [4, 96], strides = [1, 1]} : vector<4x384xf32> to vector<4x96xf32>
    %739 = vector.extract_strided_slice %9 {offsets = [1, 0, 0], sizes = [1, 4, 32], strides = [1, 1, 1]} : vector<8x4x32xf32> to vector<1x4x32xf32>
    %740 = vector.shape_cast %739 : vector<1x4x32xf32> to vector<4x32xf32>
    %741 = vector.extract_strided_slice %11 {offsets = [1, 0, 0], sizes = [1, 4, 32], strides = [1, 1, 1]} : vector<8x4x32xf32> to vector<1x4x32xf32>
    %742 = vector.shape_cast %741 : vector<1x4x32xf32> to vector<4x32xf32>
    %743 = vector.extract_strided_slice %737 {offsets = [0, 0], sizes = [4, 32], strides = [1, 1]} : vector<4x96xf32> to vector<4x32xf32>
    %744 = vector.extract_strided_slice %738 {offsets = [0, 0], sizes = [4, 32], strides = [1, 1]} : vector<4x96xf32> to vector<4x32xf32>
    %745 = arith.addf %743, %744 : vector<4x32xf32>
    %cst_154 = arith.constant 0.000000e+00 : f32
    %746 = vector.broadcast %cst_154 : f32 to vector<4x32xf32>
    %747 = arith.subf %746, %745 : vector<4x32xf32>
    %748 = math.exp %747 : vector<4x32xf32>
    %cst_155 = arith.constant 1.000000e+00 : f32
    %749 = vector.broadcast %cst_155 : f32 to vector<4x32xf32>
    %750 = arith.addf %749, %748 : vector<4x32xf32>
    %cst_156 = arith.constant 1.000000e+00 : f32
    %751 = vector.broadcast %cst_156 : f32 to vector<4x32xf32>
    %752 = arith.divf %751, %750 : vector<4x32xf32>
    %753 = vector.extract_strided_slice %737 {offsets = [0, 32], sizes = [4, 32], strides = [1, 1]} : vector<4x96xf32> to vector<4x32xf32>
    %754 = vector.extract_strided_slice %738 {offsets = [0, 32], sizes = [4, 32], strides = [1, 1]} : vector<4x96xf32> to vector<4x32xf32>
    %755 = arith.addf %753, %754 : vector<4x32xf32>
    %cst_157 = arith.constant 0.000000e+00 : f32
    %756 = vector.broadcast %cst_157 : f32 to vector<4x32xf32>
    %757 = arith.subf %756, %755 : vector<4x32xf32>
    %758 = math.exp %757 : vector<4x32xf32>
    %cst_158 = arith.constant 1.000000e+00 : f32
    %759 = vector.broadcast %cst_158 : f32 to vector<4x32xf32>
    %760 = arith.addf %759, %758 : vector<4x32xf32>
    %cst_159 = arith.constant 1.000000e+00 : f32
    %761 = vector.broadcast %cst_159 : f32 to vector<4x32xf32>
    %762 = arith.divf %761, %760 : vector<4x32xf32>
    %763 = vector.extract_strided_slice %737 {offsets = [0, 64], sizes = [4, 32], strides = [1, 1]} : vector<4x96xf32> to vector<4x32xf32>
    %764 = vector.extract_strided_slice %738 {offsets = [0, 64], sizes = [4, 32], strides = [1, 1]} : vector<4x96xf32> to vector<4x32xf32>
    %765 = arith.mulf %752, %764 : vector<4x32xf32>
    %766 = arith.addf %763, %765 : vector<4x32xf32>
    %767 = math.tanh %766 : vector<4x32xf32>
    %cst_160 = arith.constant 1.000000e+00 : f32
    %768 = vector.broadcast %cst_160 : f32 to vector<4x32xf32>
    %769 = arith.subf %768, %762 : vector<4x32xf32>
    %770 = arith.mulf %769, %767 : vector<4x32xf32>
    %771 = arith.mulf %762, %663 : vector<4x32xf32>
    %772 = arith.addf %770, %771 : vector<4x32xf32>
    %773 = arith.mulf %740, %772 : vector<4x32xf32>
    %774 = arith.mulf %742, %663 : vector<4x32xf32>
    %775 = arith.addf %773, %774 : vector<4x32xf32>
    %776 = vector.extract_strided_slice %9 {offsets = [6, 0, 0], sizes = [1, 4, 32], strides = [1, 1, 1]} : vector<8x4x32xf32> to vector<1x4x32xf32>
    %777 = vector.shape_cast %776 : vector<1x4x32xf32> to vector<4x32xf32>
    %778 = arith.mulf %736, %777 : vector<4x32xf32>
    %779 = vector.extract_strided_slice %9 {offsets = [1, 0, 0], sizes = [1, 4, 32], strides = [1, 1, 1]} : vector<8x4x32xf32> to vector<1x4x32xf32>
    %780 = vector.shape_cast %779 : vector<1x4x32xf32> to vector<4x32xf32>
    %781 = arith.mulf %775, %780 : vector<4x32xf32>
    %c0_161 = arith.constant 0 : index
    %c0_162 = arith.constant 0 : index
    %c384 = arith.constant 384 : index
    %782 = vector.load %arg5[%c0_161, %c0_162, %c384] : memref<1x4x512xf32, #tpu.memory_space<vmem>>, vector<1x4x32xf32>
    %783 = vector.shape_cast %782 : vector<1x4x32xf32> to vector<4x32xf32>
    %784 = vector.shape_cast %778 : vector<4x32xf32> to vector<1x4x32xf32>
    tpu.vector_store %arg5[%c0_161, %c0_162, %c384], %784 {strides = array<i32>} : memref<1x4x512xf32, #tpu.memory_space<vmem>>, vector<1x4x32xf32>,
    %c0_163 = arith.constant 0 : index
    %c0_164 = arith.constant 0 : index
    %c96 = arith.constant 96 : index
    %785 = vector.load %arg5[%c0_163, %c0_164, %c96] : memref<1x4x512xf32, #tpu.memory_space<vmem>>, vector<1x4x32xf32>
    %786 = vector.shape_cast %785 : vector<1x4x32xf32> to vector<4x32xf32>
    %787 = vector.shape_cast %781 : vector<4x32xf32> to vector<1x4x32xf32>
    tpu.vector_store %arg5[%c0_163, %c0_164, %c96], %787 {strides = array<i32>} : memref<1x4x512xf32, #tpu.memory_space<vmem>>, vector<1x4x32xf32>,
    %788 = arith.addf %676, %778 : vector<4x32xf32>
    %789 = arith.addf %677, %781 : vector<4x32xf32>
    %790 = vector.extract_strided_slice %11 {offsets = [6, 0, 0], sizes = [1, 4, 32], strides = [1, 1, 1]} : vector<8x4x32xf32> to vector<1x4x32xf32>
    %791 = vector.shape_cast %790 : vector<1x4x32xf32> to vector<4x32xf32>
    %cst_165 = arith.constant -1.000000e+07 : f32
    %792 = vector.broadcast %cst_165 : f32 to vector<4x32xf32>
    %793 = arith.mulf %792, %791 : vector<4x32xf32>
    %794 = arith.addf %778, %793 : vector<4x32xf32>
    %795 = arith.maximumf %683, %794 : vector<4x32xf32>
    %796 = vector.extract_strided_slice %11 {offsets = [1, 0, 0], sizes = [1, 4, 32], strides = [1, 1, 1]} : vector<8x4x32xf32> to vector<1x4x32xf32>
    %797 = vector.shape_cast %796 : vector<1x4x32xf32> to vector<4x32xf32>
    %cst_166 = arith.constant -1.000000e+07 : f32
    %798 = vector.broadcast %cst_166 : f32 to vector<4x32xf32>
    %799 = arith.mulf %798, %797 : vector<4x32xf32>
    %800 = arith.addf %781, %799 : vector<4x32xf32>
    %801 = arith.maximumf %689, %800 : vector<4x32xf32>
    %802 = vector.extract_strided_slice %1 {offsets = [0, 7, 0], sizes = [4, 1, 32], strides = [1, 1, 1]} : vector<4x8x32xf32> to vector<4x1x32xf32>
    %803 = vector.shape_cast %802 : vector<4x1x32xf32> to vector<4x32xf32>
    %804 = vector.extract_strided_slice %1 {offsets = [0, 0, 0], sizes = [4, 1, 32], strides = [1, 1, 1]} : vector<4x8x32xf32> to vector<4x1x32xf32>
    %805 = vector.shape_cast %804 : vector<4x1x32xf32> to vector<4x32xf32>
    %806 = tpu.concatenate %803, %805, %736, %775 in 1 : vector<4x32xf32>, vector<4x32xf32>, vector<4x32xf32>, vector<4x32xf32> -> vector<4x128xf32>
    %cst_167 = arith.constant dense<0.000000e+00> : vector<4x384xf32>
    %807 = tpu.matmul %806, %5, %cst_167 {dimension_numbers = #tpu.dot_dimension_numbers<[1], [0], [0], [1], [0, 0, 1, 1], [], []>} : vector<4x128xf32>, vector<128x384xf32>, vector<4x384xf32> -> vector<4x384xf32>
    %808 = vector.broadcast %7 : vector<1x384xf32> to vector<4x384xf32>
    %809 = arith.addf %807, %808 : vector<4x384xf32>
    %810 = vector.extract_strided_slice %809 {offsets = [0, 0], sizes = [4, 96], strides = [1, 1]} : vector<4x384xf32> to vector<4x96xf32>
    %811 = vector.extract_strided_slice %809 {offsets = [0, 96], sizes = [4, 96], strides = [1, 1]} : vector<4x384xf32> to vector<4x96xf32>
    %812 = vector.extract_strided_slice %9 {offsets = [7, 0, 0], sizes = [1, 4, 32], strides = [1, 1, 1]} : vector<8x4x32xf32> to vector<1x4x32xf32>
    %813 = vector.shape_cast %812 : vector<1x4x32xf32> to vector<4x32xf32>
    %814 = vector.extract_strided_slice %11 {offsets = [7, 0, 0], sizes = [1, 4, 32], strides = [1, 1, 1]} : vector<8x4x32xf32> to vector<1x4x32xf32>
    %815 = vector.shape_cast %814 : vector<1x4x32xf32> to vector<4x32xf32>
    %816 = vector.extract_strided_slice %810 {offsets = [0, 0], sizes = [4, 32], strides = [1, 1]} : vector<4x96xf32> to vector<4x32xf32>
    %817 = vector.extract_strided_slice %811 {offsets = [0, 0], sizes = [4, 32], strides = [1, 1]} : vector<4x96xf32> to vector<4x32xf32>
    %818 = arith.addf %816, %817 : vector<4x32xf32>
    %cst_168 = arith.constant 0.000000e+00 : f32
    %819 = vector.broadcast %cst_168 : f32 to vector<4x32xf32>
    %820 = arith.subf %819, %818 : vector<4x32xf32>
    %821 = math.exp %820 : vector<4x32xf32>
    %cst_169 = arith.constant 1.000000e+00 : f32
    %822 = vector.broadcast %cst_169 : f32 to vector<4x32xf32>
    %823 = arith.addf %822, %821 : vector<4x32xf32>
    %cst_170 = arith.constant 1.000000e+00 : f32
    %824 = vector.broadcast %cst_170 : f32 to vector<4x32xf32>
    %825 = arith.divf %824, %823 : vector<4x32xf32>
    %826 = vector.extract_strided_slice %810 {offsets = [0, 32], sizes = [4, 32], strides = [1, 1]} : vector<4x96xf32> to vector<4x32xf32>
    %827 = vector.extract_strided_slice %811 {offsets = [0, 32], sizes = [4, 32], strides = [1, 1]} : vector<4x96xf32> to vector<4x32xf32>
    %828 = arith.addf %826, %827 : vector<4x32xf32>
    %cst_171 = arith.constant 0.000000e+00 : f32
    %829 = vector.broadcast %cst_171 : f32 to vector<4x32xf32>
    %830 = arith.subf %829, %828 : vector<4x32xf32>
    %831 = math.exp %830 : vector<4x32xf32>
    %cst_172 = arith.constant 1.000000e+00 : f32
    %832 = vector.broadcast %cst_172 : f32 to vector<4x32xf32>
    %833 = arith.addf %832, %831 : vector<4x32xf32>
    %cst_173 = arith.constant 1.000000e+00 : f32
    %834 = vector.broadcast %cst_173 : f32 to vector<4x32xf32>
    %835 = arith.divf %834, %833 : vector<4x32xf32>
    %836 = vector.extract_strided_slice %810 {offsets = [0, 64], sizes = [4, 32], strides = [1, 1]} : vector<4x96xf32> to vector<4x32xf32>
    %837 = vector.extract_strided_slice %811 {offsets = [0, 64], sizes = [4, 32], strides = [1, 1]} : vector<4x96xf32> to vector<4x32xf32>
    %838 = arith.mulf %825, %837 : vector<4x32xf32>
    %839 = arith.addf %836, %838 : vector<4x32xf32>
    %840 = math.tanh %839 : vector<4x32xf32>
    %cst_174 = arith.constant 1.000000e+00 : f32
    %841 = vector.broadcast %cst_174 : f32 to vector<4x32xf32>
    %842 = arith.subf %841, %835 : vector<4x32xf32>
    %843 = arith.mulf %842, %840 : vector<4x32xf32>
    %844 = arith.mulf %835, %736 : vector<4x32xf32>
    %845 = arith.addf %843, %844 : vector<4x32xf32>
    %846 = arith.mulf %813, %845 : vector<4x32xf32>
    %847 = arith.mulf %815, %736 : vector<4x32xf32>
    %848 = arith.addf %846, %847 : vector<4x32xf32>
    %849 = vector.extract_strided_slice %809 {offsets = [0, 192], sizes = [4, 96], strides = [1, 1]} : vector<4x384xf32> to vector<4x96xf32>
    %850 = vector.extract_strided_slice %809 {offsets = [0, 288], sizes = [4, 96], strides = [1, 1]} : vector<4x384xf32> to vector<4x96xf32>
    %851 = vector.extract_strided_slice %9 {offsets = [0, 0, 0], sizes = [1, 4, 32], strides = [1, 1, 1]} : vector<8x4x32xf32> to vector<1x4x32xf32>
    %852 = vector.shape_cast %851 : vector<1x4x32xf32> to vector<4x32xf32>
    %853 = vector.extract_strided_slice %11 {offsets = [0, 0, 0], sizes = [1, 4, 32], strides = [1, 1, 1]} : vector<8x4x32xf32> to vector<1x4x32xf32>
    %854 = vector.shape_cast %853 : vector<1x4x32xf32> to vector<4x32xf32>
    %855 = vector.extract_strided_slice %849 {offsets = [0, 0], sizes = [4, 32], strides = [1, 1]} : vector<4x96xf32> to vector<4x32xf32>
    %856 = vector.extract_strided_slice %850 {offsets = [0, 0], sizes = [4, 32], strides = [1, 1]} : vector<4x96xf32> to vector<4x32xf32>
    %857 = arith.addf %855, %856 : vector<4x32xf32>
    %cst_175 = arith.constant 0.000000e+00 : f32
    %858 = vector.broadcast %cst_175 : f32 to vector<4x32xf32>
    %859 = arith.subf %858, %857 : vector<4x32xf32>
    %860 = math.exp %859 : vector<4x32xf32>
    %cst_176 = arith.constant 1.000000e+00 : f32
    %861 = vector.broadcast %cst_176 : f32 to vector<4x32xf32>
    %862 = arith.addf %861, %860 : vector<4x32xf32>
    %cst_177 = arith.constant 1.000000e+00 : f32
    %863 = vector.broadcast %cst_177 : f32 to vector<4x32xf32>
    %864 = arith.divf %863, %862 : vector<4x32xf32>
    %865 = vector.extract_strided_slice %849 {offsets = [0, 32], sizes = [4, 32], strides = [1, 1]} : vector<4x96xf32> to vector<4x32xf32>
    %866 = vector.extract_strided_slice %850 {offsets = [0, 32], sizes = [4, 32], strides = [1, 1]} : vector<4x96xf32> to vector<4x32xf32>
    %867 = arith.addf %865, %866 : vector<4x32xf32>
    %cst_178 = arith.constant 0.000000e+00 : f32
    %868 = vector.broadcast %cst_178 : f32 to vector<4x32xf32>
    %869 = arith.subf %868, %867 : vector<4x32xf32>
    %870 = math.exp %869 : vector<4x32xf32>
    %cst_179 = arith.constant 1.000000e+00 : f32
    %871 = vector.broadcast %cst_179 : f32 to vector<4x32xf32>
    %872 = arith.addf %871, %870 : vector<4x32xf32>
    %cst_180 = arith.constant 1.000000e+00 : f32
    %873 = vector.broadcast %cst_180 : f32 to vector<4x32xf32>
    %874 = arith.divf %873, %872 : vector<4x32xf32>
    %875 = vector.extract_strided_slice %849 {offsets = [0, 64], sizes = [4, 32], strides = [1, 1]} : vector<4x96xf32> to vector<4x32xf32>
    %876 = vector.extract_strided_slice %850 {offsets = [0, 64], sizes = [4, 32], strides = [1, 1]} : vector<4x96xf32> to vector<4x32xf32>
    %877 = arith.mulf %864, %876 : vector<4x32xf32>
    %878 = arith.addf %875, %877 : vector<4x32xf32>
    %879 = math.tanh %878 : vector<4x32xf32>
    %cst_181 = arith.constant 1.000000e+00 : f32
    %880 = vector.broadcast %cst_181 : f32 to vector<4x32xf32>
    %881 = arith.subf %880, %874 : vector<4x32xf32>
    %882 = arith.mulf %881, %879 : vector<4x32xf32>
    %883 = arith.mulf %874, %775 : vector<4x32xf32>
    %884 = arith.addf %882, %883 : vector<4x32xf32>
    %885 = arith.mulf %852, %884 : vector<4x32xf32>
    %886 = arith.mulf %854, %775 : vector<4x32xf32>
    %887 = arith.addf %885, %886 : vector<4x32xf32>
    %888 = vector.extract_strided_slice %9 {offsets = [7, 0, 0], sizes = [1, 4, 32], strides = [1, 1, 1]} : vector<8x4x32xf32> to vector<1x4x32xf32>
    %889 = vector.shape_cast %888 : vector<1x4x32xf32> to vector<4x32xf32>
    %890 = arith.mulf %848, %889 : vector<4x32xf32>
    %891 = vector.extract_strided_slice %9 {offsets = [0, 0, 0], sizes = [1, 4, 32], strides = [1, 1, 1]} : vector<8x4x32xf32> to vector<1x4x32xf32>
    %892 = vector.shape_cast %891 : vector<1x4x32xf32> to vector<4x32xf32>
    %893 = arith.mulf %887, %892 : vector<4x32xf32>
    %c0_182 = arith.constant 0 : index
    %c0_183 = arith.constant 0 : index
    %c448 = arith.constant 448 : index
    %894 = vector.load %arg5[%c0_182, %c0_183, %c448] : memref<1x4x512xf32, #tpu.memory_space<vmem>>, vector<1x4x32xf32>
    %895 = vector.shape_cast %894 : vector<1x4x32xf32> to vector<4x32xf32>
    %896 = vector.shape_cast %890 : vector<4x32xf32> to vector<1x4x32xf32>
    tpu.vector_store %arg5[%c0_182, %c0_183, %c448], %896 {strides = array<i32>} : memref<1x4x512xf32, #tpu.memory_space<vmem>>, vector<1x4x32xf32>,
    %c0_184 = arith.constant 0 : index
    %c0_185 = arith.constant 0 : index
    %c32 = arith.constant 32 : index
    %897 = vector.load %arg5[%c0_184, %c0_185, %c32] : memref<1x4x512xf32, #tpu.memory_space<vmem>>, vector<1x4x32xf32>
    %898 = vector.shape_cast %897 : vector<1x4x32xf32> to vector<4x32xf32>
    %899 = vector.shape_cast %893 : vector<4x32xf32> to vector<1x4x32xf32>
    tpu.vector_store %arg5[%c0_184, %c0_185, %c32], %899 {strides = array<i32>} : memref<1x4x512xf32, #tpu.memory_space<vmem>>, vector<1x4x32xf32>,
    %900 = arith.addf %788, %890 : vector<4x32xf32>
    %901 = arith.addf %789, %893 : vector<4x32xf32>
    %902 = vector.extract_strided_slice %11 {offsets = [7, 0, 0], sizes = [1, 4, 32], strides = [1, 1, 1]} : vector<8x4x32xf32> to vector<1x4x32xf32>
    %903 = vector.shape_cast %902 : vector<1x4x32xf32> to vector<4x32xf32>
    %cst_186 = arith.constant -1.000000e+07 : f32
    %904 = vector.broadcast %cst_186 : f32 to vector<4x32xf32>
    %905 = arith.mulf %904, %903 : vector<4x32xf32>
    %906 = arith.addf %890, %905 : vector<4x32xf32>
    %907 = arith.maximumf %795, %906 : vector<4x32xf32>
    %908 = vector.extract_strided_slice %11 {offsets = [0, 0, 0], sizes = [1, 4, 32], strides = [1, 1, 1]} : vector<8x4x32xf32> to vector<1x4x32xf32>
    %909 = vector.shape_cast %908 : vector<1x4x32xf32> to vector<4x32xf32>
    %cst_187 = arith.constant -1.000000e+07 : f32
    %910 = vector.broadcast %cst_187 : f32 to vector<4x32xf32>
    %911 = arith.mulf %910, %909 : vector<4x32xf32>
    %912 = arith.addf %893, %911 : vector<4x32xf32>
    %913 = arith.maximumf %801, %912 : vector<4x32xf32>
    %cst_188 = arith.constant dense<0.000000e+00> : vector<4x1xf32>
    %914 = vector.multi_reduction <add>, %3, %cst_188 [0] : vector<8x4x1xf32> to vector<4x1xf32>
    %cst_189 = arith.constant 1.000000e+00 : f32
    %915 = vector.broadcast %cst_189 : f32 to vector<4x1xf32>
    %916 = arith.divf %915, %914 : vector<4x1xf32>
    %917 = vector.broadcast %916 : vector<4x1xf32> to vector<4x32xf32>
    %918 = arith.mulf %900, %917 : vector<4x32xf32>
    %c0_190 = arith.constant 0 : index
    %c0_191 = arith.constant 0 : index
    %c0_192 = arith.constant 0 : index
    %919 = vector.load %arg6[%c0_190, %c0_191, %c0_192] : memref<1x4x128xf32, #tpu.memory_space<vmem>>, vector<1x4x32xf32>
    %920 = vector.shape_cast %919 : vector<1x4x32xf32> to vector<4x32xf32>
    %921 = vector.shape_cast %918 : vector<4x32xf32> to vector<1x4x32xf32>
    tpu.vector_store %arg6[%c0_190, %c0_191, %c0_192], %921 {strides = array<i32>} : memref<1x4x128xf32, #tpu.memory_space<vmem>>, vector<1x4x32xf32>,
    %922 = vector.broadcast %916 : vector<4x1xf32> to vector<4x32xf32>
    %923 = arith.mulf %901, %922 : vector<4x32xf32>
    %c0_193 = arith.constant 0 : index
    %c0_194 = arith.constant 0 : index
    %c32_195 = arith.constant 32 : index
    %924 = vector.load %arg6[%c0_193, %c0_194, %c32_195] : memref<1x4x128xf32, #tpu.memory_space<vmem>>, vector<1x4x32xf32>
    %925 = vector.shape_cast %924 : vector<1x4x32xf32> to vector<4x32xf32>
    %926 = vector.shape_cast %923 : vector<4x32xf32> to vector<1x4x32xf32>
    tpu.vector_store %arg6[%c0_193, %c0_194, %c32_195], %926 {strides = array<i32>} : memref<1x4x128xf32, #tpu.memory_space<vmem>>, vector<1x4x32xf32>,
    %c0_196 = arith.constant 0 : index
    %c0_197 = arith.constant 0 : index
    %c64_198 = arith.constant 64 : index
    %927 = vector.load %arg6[%c0_196, %c0_197, %c64_198] : memref<1x4x128xf32, #tpu.memory_space<vmem>>, vector<1x4x32xf32>
    %928 = vector.shape_cast %927 : vector<1x4x32xf32> to vector<4x32xf32>
    %929 = vector.shape_cast %907 : vector<4x32xf32> to vector<1x4x32xf32>
    tpu.vector_store %arg6[%c0_196, %c0_197, %c64_198], %929 {strides = array<i32>} : memref<1x4x128xf32, #tpu.memory_space<vmem>>, vector<1x4x32xf32>,
    %c0_199 = arith.constant 0 : index
    %c0_200 = arith.constant 0 : index
    %c96_201 = arith.constant 96 : index
    %930 = vector.load %arg6[%c0_199, %c0_200, %c96_201] : memref<1x4x128xf32, #tpu.memory_space<vmem>>, vector<1x4x32xf32>
    %931 = vector.shape_cast %930 : vector<1x4x32xf32> to vector<4x32xf32>
    %932 = vector.shape_cast %913 : vector<4x32xf32> to vector<1x4x32xf32>
    tpu.vector_store %arg6[%c0_199, %c0_200, %c96_201], %932 {strides = array<i32>} : memref<1x4x128xf32, #tpu.memory_space<vmem>>, vector<1x4x32xf32>,
    return
  }
  func.func @transform_0(%arg0: i32) -> (i32, i32, i32, i32) {
    %c0_i32 = arith.constant 0 : i32
    %c0_i32_0 = arith.constant 0 : i32
    %c0_i32_1 = arith.constant 0 : i32
    %c0_i32_2 = arith.constant 0 : i32
    return %arg0, %c0_i32, %c0_i32_0, %c0_i32_1 : i32, i32, i32, i32
  }
  func.func @transform_1(%arg0: i32) -> (i32, i32, i32, i32) {
    %c0_i32 = arith.constant 0 : i32
    %c0_i32_0 = arith.constant 0 : i32
    %c0_i32_1 = arith.constant 0 : i32
    %c0_i32_2 = arith.constant 0 : i32
    return %arg0, %c0_i32, %c0_i32_0, %c0_i32_1 : i32, i32, i32, i32
  }
  func.func @transform_2(%arg0: i32) -> (i32, i32, i32) {
    %c0_i32 = arith.constant 0 : i32
    %c0_i32_0 = arith.constant 0 : i32
    %c0_i32_1 = arith.constant 0 : i32
    return %arg0, %c0_i32, %c0_i32_0 : i32, i32, i32
  }
  func.func @transform_3(%arg0: i32) -> (i32, i32, i32) {
    %c0_i32 = arith.constant 0 : i32
    %c0_i32_0 = arith.constant 0 : i32
    %c0_i32_1 = arith.constant 0 : i32
    return %arg0, %c0_i32, %c0_i32_0 : i32, i32, i32
  }
  func.func @transform_4(%arg0: i32) -> (i32, i32, i32) {
    %c0_i32 = arith.constant 0 : i32
    %c0_i32_0 = arith.constant 0 : i32
    %c0_i32_1 = arith.constant 0 : i32
    return %arg0, %c0_i32, %c0_i32_0 : i32, i32, i32
  }
  func.func @transform_5(%arg0: i32) -> (i32, i32, i32) {
    %c0_i32 = arith.constant 0 : i32
    %c0_i32_0 = arith.constant 0 : i32
    %c0_i32_1 = arith.constant 0 : i32
    return %arg0, %c0_i32, %c0_i32_0 : i32, i32, i32
  }
}

</mosaic_0001>

<bundles_post_ra>
// kernel: multi_att_forward.7
= control target key start
LH: loop header
LB: loop body
LE: loop exit
PB: predicated region body
PF: predicated region fallthrough
CT: control target
= control target key end

     0   :  { %s738_s0 = inlined_call_operand.vmem [shape: f32[2,4,128], index: 0, kind: input, shape index: {}]   ;;  %s739_s1 = inlined_call_operand.vmem [shape: f32[512,64], index: 1, kind: input, shape index: {}]   ;;  %s740_s2 = inlined_call_operand.vmem [shape: f32[1,64], index: 2, kind: input, shape index: {}]   ;;  %s741_s3 = inlined_call_operand.vmem [shape: f32[64,3], index: 3, kind: input, shape index: {}]   ;;  %s742_s4 = inlined_call_operand.vmem [shape: f32[1,3], index: 4, kind: input, shape index: {}]   ;;  %s743_s5 = inlined_call_operand.hbm [shape: f32[2,3], index: 5, kind: output, shape index: {}]  }
   0x1   :  { %v60_v0 = vld [vmem:[%s739_s1 + $0xf8] sm:$0xff]  ;;  %v59_v4 = vld [vmem:[%s739_s1 + $0xf0] sm:$0xff]  ;;  %v58_v8 = vld [vmem:[%s739_s1 + $0xe8] sm:$0xff] }
   0x2   :  { %v92_v1 = vld [vmem:[%s739_s1 + $0x1f8] sm:$0xff]  ;;  %349 = vmatprep.subr.mxu0 %v60_v0  ;;  %v91_v5 = vld [vmem:[%s739_s1 + $0x1f0] sm:$0xff]  ;;  %v90_v9 = vld [vmem:[%s739_s1 + $0x1e8] sm:$0xff] }
   0x3   :  { %v44_v2 = vld [vmem:[%s739_s1 + $0x78] sm:$0xff]  ;;  %384 = vmatprep.subr.mxu1 %v92_v1  ;;  %v43_v6 = vld [vmem:[%s739_s1 + $0x70] sm:$0xff]  ;;  %v42_v10 = vld [vmem:[%s739_s1 + $0x68] sm:$0xff] }
   0x4   :  { %v76_v3 = vld [vmem:[%s739_s1 + $0x178] sm:$0xff]  ;;  %350 = vmatpush3.msra.mxu0 %v44_v2  ;;  %v75_v7 = vld [vmem:[%s739_s1 + $0x170] sm:$0xff]  ;;  %v74_v11 = vld [vmem:[%s739_s1 + $0x168] sm:$0xff] }
   0x5   :  { %385 = vmatpush3.msra.mxu1 %v76_v3  ;;  %351 = vmatprep.subr.mxu0 %v59_v4  ;;  %v57_v12 = vld [vmem:[%s739_s1 + $0xe0] sm:$0xff]  ;;  %v56_v16 = vld [vmem:[%s739_s1 + $0xd8] sm:$0xff]  ;;  %v55_v20 = vld [vmem:[%s739_s1 + $0xd0] sm:$0xff] }
   0x6   :  { %386 = vmatprep.subr.mxu1 %v91_v5  ;;  %352 = vmatpush3.msra.mxu0 %v43_v6  ;;  %v89_v13 = vld [vmem:[%s739_s1 + $0x1e0] sm:$0xff]  ;;  %v88_v17 = vld [vmem:[%s739_s1 + $0x1d8] sm:$0xff]  ;;  %v87_v21 = vld [vmem:[%s739_s1 + $0x1d0] sm:$0xff] }
   0x7   :  { %387 = vmatpush3.msra.mxu1 %v75_v7  ;;  %353 = vmatprep.subr.mxu0 %v58_v8  ;;  %v41_v14 = vld [vmem:[%s739_s1 + $0x60] sm:$0xff]  ;;  %v40_v18 = vld [vmem:[%s739_s1 + $0x58] sm:$0xff]  ;;  %v39_v22 = vld [vmem:[%s739_s1 + $0x50] sm:$0xff] }
   0x8   :  { %388 = vmatprep.subr.mxu1 %v90_v9  ;;  %v73_v15 = vld [vmem:[%s739_s1 + $0x160] sm:$0xff]  ;;  %354 = vmatpush3.msra.mxu0 %v42_v10  ;;  %v72_v19 = vld [vmem:[%s739_s1 + $0x158] sm:$0xff]  ;;  %v71_v23 = vld [vmem:[%s739_s1 + $0x150] sm:$0xff] }
   0x9   :  { %389 = vmatpush3.msra.mxu1 %v74_v11  ;;  %355 = vmatprep.subr.mxu0 %v57_v12  ;;  %v54_v24 = vld [vmem:[%s739_s1 + $0xc8] sm:$0xff]  ;;  %v53_v28 = vld [vmem:[%s739_s1 + $0xc0] sm:$0xff]  ;;  %v52_v32 = vld [vmem:[%s739_s1 + $0xb8] sm:$0xff] }
   0xa   :  { %390 = vmatprep.subr.mxu1 %v89_v13  ;;  %356 = vmatpush3.msra.mxu0 %v41_v14  ;;  %v86_v25 = vld [vmem:[%s739_s1 + $0x1c8] sm:$0xff]  ;;  %v85_v29 = vld [vmem:[%s739_s1 + $0x1c0] sm:$0xff]  ;;  %v84_v33 = vld [vmem:[%s739_s1 + $0x1b8] sm:$0xff] }
   0xb   :  { %391 = vmatpush3.msra.mxu1 %v73_v15  ;;  %357 = vmatprep.subr.mxu0 %v56_v16  ;;  %v38_v26 = vld [vmem:[%s739_s1 + $0x48] sm:$0xff]  ;;  %v37_v30 = vld [vmem:[%s739_s1 + $0x40] sm:$0xff]  ;;  %v36_v34 = vld [vmem:[%s739_s1 + $0x38] sm:$0xff] }
   0xc   :  { %392 = vmatprep.subr.mxu1 %v88_v17  ;;  %358 = vmatpush3.msra.mxu0 %v40_v18  ;;  %v70_v27 = vld [vmem:[%s739_s1 + $0x148] sm:$0xff]  ;;  %v69_v31 = vld [vmem:[%s739_s1 + $0x140] sm:$0xff]  ;;  %v68_v35 = vld [vmem:[%s739_s1 + $0x138] sm:$0xff] }
   0xd   :  { %393 = vmatpush3.msra.mxu1 %v72_v19  ;;  %359 = vmatprep.subr.mxu0 %v55_v20  ;;  %v51_v36 = vld [vmem:[%s739_s1 + $0xb0] sm:$0xff]  ;;  %v50_v40 = vld [vmem:[%s739_s1 + $0xa8] sm:$0xff]  ;;  %v49_v44 = vld [vmem:[%s739_s1 + $0xa0] sm:$0xff] }
   0xe   :  { %394 = vmatprep.subr.mxu1 %v87_v21  ;;  %360 = vmatpush3.msra.mxu0 %v39_v22  ;;  %v83_v37 = vld [vmem:[%s739_s1 + $0x1b0] sm:$0xff]  ;;  %v82_v41 = vld [vmem:[%s739_s1 + $0x1a8] sm:$0xff]  ;;  %v81_v45 = vld [vmem:[%s739_s1 + $0x1a0] sm:$0xff] }
   0xf   :  { %395 = vmatpush3.msra.mxu1 %v71_v23  ;;  %361 = vmatprep.subr.mxu0 %v54_v24  ;;  %v35_v38 = vld [vmem:[%s739_s1 + $0x30] sm:$0xff]  ;;  %v34_v42 = vld [vmem:[%s739_s1 + $0x28] sm:$0xff]  ;;  %v33_v46 = vld [vmem:[%s739_s1 + $0x20] sm:$0xff] }
  0x10   :  { %396 = vmatprep.subr.mxu1 %v86_v25  ;;  %362 = vmatpush3.msra.mxu0 %v38_v26  ;;  %v67_v39 = vld [vmem:[%s739_s1 + $0x130] sm:$0xff]  ;;  %v66_v43 = vld [vmem:[%s739_s1 + $0x128] sm:$0xff]  ;;  %v65_v47 = vld [vmem:[%s739_s1 + $0x120] sm:$0xff] }
  0x11   :  { %397 = vmatpush3.msra.mxu1 %v70_v27  ;;  %363 = vmatprep.subr.mxu0 %v53_v28  ;;  %v48_v48 = vld [vmem:[%s739_s1 + $0x98] sm:$0xff] }
  0x12   :  { %398 = vmatprep.subr.mxu1 %v85_v29  ;;  %364 = vmatpush3.msra.mxu0 %v37_v30  ;;  %v80_v49 = vld [vmem:[%s739_s1 + $0x198] sm:$0xff] }
  0x13   :  { %399 = vmatpush3.msra.mxu1 %v69_v31  ;;  %365 = vmatprep.subr.mxu0 %v52_v32 }
  0x14   :  { %400 = vmatprep.subr.mxu1 %v84_v33  ;;  %366 = vmatpush3.msra.mxu0 %v36_v34 }
  0x15   :  { %401 = vmatpush3.msra.mxu1 %v68_v35  ;;  %367 = vmatprep.subr.mxu0 %v51_v36 }
  0x16   :  { %402 = vmatprep.subr.mxu1 %v83_v37  ;;  %368 = vmatpush3.msra.mxu0 %v35_v38 }
  0x17   :  { %403 = vmatpush3.msra.mxu1 %v67_v39  ;;  %369 = vmatprep.subr.mxu0 %v50_v40 }
  0x18   :  { %404 = vmatprep.subr.mxu1 %v82_v41  ;;  %370 = vmatpush3.msra.mxu0 %v34_v42 }
  0x19   :  { %405 = vmatpush3.msra.mxu1 %v66_v43 }
  0x1a   :  { %10 = vsyncpa [#allocation3], 0  ;;  %371 = vmatprep.subr.mxu0 %v49_v44  ;;  %406 = vmatprep.subr.mxu1 %v81_v45  ;;  %v32_v50 = vld [vmem:[%s739_s1 + $0x18] sm:$0xff]  ;;  %v47_v52 = vld [vmem:[%s739_s1 + $0x90] sm:$0xff]  ;;  %v474_v4 = vmov 0.0   ;;  %vm475_vm0 = vmmov 0  }
  0x1b   :  { %v64_v51 = vld [vmem:[%s739_s1 + $0x118] sm:$0xff]  ;;  %372 = vmatpush3.msra.mxu0 %v33_v46  ;;  %407 = vmatpush3.msra.mxu1 %v65_v47  ;;  %v79_v53 = vld [vmem:[%s739_s1 + $0x190] sm:$0xff]  ;;  %v21_v56 = vld [vmem:[%s738_s0] sm:$0xf]  ;;  %vm256_vm1 = vcmask 523264   ;;  %s476_s17 = smov [#allocation2]  }
  0x1c   :  { %373 = vmatprep.subr.mxu0 %v48_v48  ;;  %408 = vmatprep.subr.mxu1 %v80_v49  ;;  %v31_v54 = vld [vmem:[%s739_s1 + $0x10] sm:$0xff]  ;;  %v46_v57 = vld [vmem:[%s739_s1 + $0x88] sm:$0xff]  ;;  %v22_v59 = vld [vmem:[%s738_s0 + $0x4] sm:$0xf]  ;;  %v24_v0 = vrot.slane %v21_v56, 2  ;;  %s338_s18 = sshll.u32 %s476_s17, 4  ;;  %s339_s18 = int_to_ptr.vmem [resolvable:$true] %s338_s18 }
  0x1d   :  { %v63_v55 = vld [vmem:[%s739_s1 + $0x110] sm:$0xff]  ;;  %374 = vmatpush3.msra.mxu0 %v32_v50  ;;  %409 = vmatpush3.msra.mxu1 %v64_v51  ;;  %v78_v58 = vld [vmem:[%s739_s1 + $0x188] sm:$0xff]  ;;  %v45_v62 = vld [vmem:[%s739_s1 + $0x80] sm:$0xff]  ;;  %v27_v2 = vrot.slane %v22_v59, 2  ;;  %vm330_vm2 = vcmask 17408   ;;  %p457_p1 = scmp.lt.s32.totalorder %s339_s18, %s339_s18 }
  0x1e   :  { %375 = vmatprep.subr.mxu0 %v47_v52  ;;  %410 = vmatprep.subr.mxu1 %v79_v53  ;;  %v30_v60 = vld [vmem:[%s739_s1 + $0x8] sm:$0xff]  ;;  %v77_v63 = vld [vmem:[%s739_s1 + $0x180] sm:$0xff]  ;;  %v248_v5 = vld [vmem:[%s741_s3 + $0x38] sm:$0xff] }
  0x1f   :  { %v62_v61 = vld [vmem:[%s739_s1 + $0x108] sm:$0xff]  ;;  %376 = vmatpush3.msra.mxu0 %v31_v54  ;;  %411 = vmatpush3.msra.mxu1 %v63_v55  ;;  %v29_v1 = vld [vmem:[%s739_s1] sm:$0xff]  ;;  %v247_v6 = vld [vmem:[%s741_s3 + $0x30] sm:$0xff] }
  0x20   :  { %377 = vmatprep.subr.mxu0 %v46_v57  ;;  %412 = vmatprep.subr.mxu1 %v78_v58  ;;  %v61_v3 = vld [vmem:[%s739_s1 + $0x100] sm:$0xff]  ;;  %v246_v7 = vld [vmem:[%s741_s3 + $0x28] sm:$0xff]  ;;  %v244_v9 = vld [vmem:[%s741_s3 + $0x18] sm:$0xff] }
  0x21   :  { %378 = vmatpush3.msra.mxu0 %v30_v60  ;;  %413 = vmatpush3.msra.mxu1 %v62_v61  ;;  %v245_v8 = vld [vmem:[%s741_s3 + $0x20] sm:$0xff]  ;;  %v243_v10 = vld [vmem:[%s741_s3 + $0x10] sm:$0xff]  ;;  %v242_v11 = vld [vmem:[%s741_s3 + $0x8] sm:$0xff] }
  0x22   :  { %379 = vmatprep.subr.mxu0 %v45_v62  ;;  %414 = vmatprep.subr.mxu1 %v77_v63  ;;  %v241_v12 = vld [vmem:[%s741_s3] sm:$0xff] }
  0x23   :  { %380 = vmatpush3.msra.mxu0 %v29_v1  ;;  %164 = vmatprep.mubr.f32.mxu0 %v24_v0  ;;  %v346_v15 = vld [vmem:[%s740_s2] ss:$0 sm:$0xff]  ;;  %s452_s2 = scalar_lea.vmem %s339_s18, 32 }
  0x24   :  { %415 = vmatpush3.msra.mxu1 %v61_v3  ;;  %234 = vmatprep.mubr.f32.mxu1 %v27_v2  ;;  %v347_v23 = vld [vmem:[%s742_s4] ss:$0 sm:$0xff]  ;;  %p453_p0 = scmp.ne.s32.totalorder %s339_s18, %s452_s2  ;;  %p458_p2 = scmp.lt.s32.totalorder %s452_s2, %s452_s2 }
  0x25   :  { %165 = vmatmul.mubr.f32.vlgmr.msra.gmra.mxu0 %v21_v56  ;;  %235 = vmatmul.mubr.f32.vlgmr.msra.gmra.mxu1 %v22_v59 }
  0x26   :  { %428 = vmatprep.subr.mxu0 %v474_v4  ;;  %444 = vmatprep.mubr.msk.f32.mxu0 %vm475_vm0, %v474_v4  ;;  %p459_p3 = por %p458_p2, %p457_p1 }
  0x27   :  { %429 = vmatpush3.msra.mxu0 %v248_v5 }
  0x28   :  { %430 = vmatprep.subr.mxu0 %v474_v4  ;;  %p460_p4 = pnand %p459_p3, %p453_p0 }
  0x29   :  { %431 = vmatpush3.msra.mxu0 %v247_v6 }
  0x2a   :  { %432 = vmatprep.subr.mxu0 %v474_v4 }
  0x2b   :  { %433 = vmatpush3.msra.mxu0 %v246_v7 }
  0x2c   :  { %434 = vmatprep.subr.mxu0 %v474_v4 }
  0x2d   :  { %435 = vmatpush3.msra.mxu0 %v245_v8 }
  0x2e   :  { %436 = vmatprep.subr.mxu0 %v474_v4 }
  0x2f   :  { %437 = vmatpush3.msra.mxu0 %v244_v9 }
  0x30   :  { %438 = vmatprep.subr.mxu0 %v474_v4 }
  0x31   :  { %439 = vmatpush3.msra.mxu0 %v243_v10 }
  0x32   :  { %440 = vmatprep.subr.mxu0 %v474_v4 }
  0x33   :  { %441 = vmatpush3.msra.mxu0 %v242_v11 }
  0x34   :  { %442 = vmatprep.subr.mxu0 %v474_v4 }
  0x35   :  { %443 = vmatpush3.msra.mxu0 %v241_v12 }
  0xe5   :  { %v381_v13 = vpop.f32.mrf.mxu0  ;;  %v416_v14 = vpop.f32.mrf.mxu1 }
  0xe7   :  { %v382_v16 = vpop.f32.mrf.mxu0  ;;  %v417_v17 = vpop.f32.mrf.mxu1 }
  0xe8   :  { %v383_v18 = vadd.f32 %v382_v16, %v381_v13  ;;  %v418_v20 = vadd.f32 %v417_v17, %v416_v14 }
  0xea   :  { %v167_v19 = vadd.f32 %v383_v18, %v346_v15 }
  0xec   :  { %v237_v21 = vadd.f32 %v418_v20, %v167_v19 }
  0xee   :  { %450 = vtanh.f32 %v237_v21 }
  0xfb   :  { %v451_v22 = vpop.eup %450 }
  0xfc   :  { %445 = vmatmul.mubr.msk.f32.vlgmr.msra.gmra.mxu0 %vm256_vm1, %v451_v22 }
 0x1bc   :  { %v326_v24 = vpop.f32.mrf.mxu0 }
 0x1bd   :  { %v327_v25 = vadd.f32 %v347_v23, %v326_v24 }
 0x1be   :  { %v446_v26 = vpop.f32.mrf.mxu0 }
 0x1bf   :  { %331 = vst.msk [vmem:[#allocation2] sm:$0x3] %vm330_vm2, %v327_v25 }
 0x1c0   :  { %463 = shalt.err (!%p460_p4)
}
 0x1c1   :  { %341 = dma.vmem_to_hbm [thread:$0]  %s339_s18, 32, %s743_s5, [#allocation3]  }
 0x1c2   :  { %472 = dma.done.wait [#allocation3], 32  }
 0x1c3   :  { %473 = vsyncadd [#allocation3], 4294967264 }
 0x1c4   :  { %345 = vsyncpa [#allocation3], 1 }

// kernel: multi_att_forward.5
= control target key start
LH: loop header
LB: loop body
LE: loop exit
PB: predicated region body
PF: predicated region fallthrough
CT: control target
= control target key end

     0   :  { %s1670_s21 = smov 0   ;;  %s2064_s0 = inlined_call_operand.vmem [shape: f32[2,2,8,64], index: 0, kind: input, shape index: {}]   ;;  %s2065_s1 = inlined_call_operand.vmem [shape: f32[2,2,8,64], index: 1, kind: input, shape index: {}]   ;;  %s2066_s2 = inlined_call_operand.vmem [shape: f32[2,3,64], index: 2, kind: input, shape index: {}]   ;;  %s2067_s3 = inlined_call_operand.vmem [shape: f32[2,192,32], index: 3, kind: input, shape index: {}]   ;;  %s2068_s4 = inlined_call_operand.vmem [shape: f32[2,1,32], index: 4, kind: input, shape index: {}]   ;;  %s2069_s5 = inlined_call_operand.vmem [shape: f32[2,2,8,32], index: 5, kind: output, shape index: {0}]   ;;  %s2070_s6 = inlined_call_operand.vmem [shape: f32[2,2,8,32], index: 6, kind: output, shape index: {1}]  }
   0x1 LB: > { %s1492_s22 = sadd.s32 4294967295, %s1630_s21   ;;  %p1496_p0 = scmp.ge.s32.totalorder %s1630_s21, 1  ;;  %s1630_s21 = sphi %s1670_s21, %s17_s21  }
   0x2   : > { %p252_p1 = scmp.lt.s32.totalorder %s1630_s21, 3 }
   0x4   : > { %p253_p2 = pnand %p1496_p0, %p252_p1 }
   0x5   : > { %p304_p3 = scmp.lt.s32.totalorder (!%p253_p2), %s1492_s22, 1  ;;  %s1634_s14 = smov (!%p253_p2), 64  }
   0x6   : > { %256 = sbr.rel (%p253_p2) target bundleno = 1092 (0x444), region = 40 }
   0xb   : > { %v366_v0 = vlaneseq  ;;  %v1632_v1 = vmov 0.0   ;;  %s2072_s22 = smov (!%p304_p3, %s1492_s22), 1  ;;  %vm1633_vm0 = vmmov 0   ;;  %vm378_vm1 = vcmask 523264  }
   0xc   : > { %1546 = vmatprep.subr.mxu0 %v1632_v1  ;;  %1551 = vmatprep.subr.mxu1 %v1632_v1  ;;  %s1687_s23 = sshll.u32 %s2072_s22, 4  ;;  %s1501_s30 = sshll.u32 %s2072_s22, 2  ;;  %vm691_vm2 = vcmask 64512   ;;  %vm1194_vm3 = vcmask 261120  }
   0xd   : > { %1548 = vmatprep.mubr.msk.f32.mxu0 %vm1633_vm0, %v1632_v1  ;;  %v367_v2 = vshrl.u32 %v366_v0, 7  ;;  %1553 = vmatprep.mubr.msk.f32.mxu1 %vm1633_vm0, %v1632_v1  ;;  %s308_s26 = scalar_lea.vmem %s2064_s0, %s1687_s23  ;;  %s313_s29 = scalar_lea.vmem %s2065_s1, %s1687_s23 }
   0xe   : > { %v1697_v5 = vld [vmem:[%s313_s29] sm:$0xff]  ;;  %v1699_v6 = vld [vmem:[%s313_s29 + $0x8] sm:$0xff]  ;;  %s317_s9 = scalar_lea.vmem %s2066_s2, %s1501_s30  ;;  %s1586_s10 = smul.u32 192, %s2072_s22 }
   0xf   : > { %v368_v3 = vsub.s32 2, %v367_v2  ;;  %v374_v4 = vsub.s32 1, %v367_v2  ;;  %1547 = vmatpush3.xpose.msk.msra.mxu0 %vm378_vm1, %v1697_v5  ;;  %1552 = vmatpush3.xpose.msk.msra.mxu1 %vm378_vm1, %v1699_v6  ;;  %v535_v7 = vsub.s32 0, %v367_v2  ;;  %v1709_v8 = vld [vmem:[%s308_s26] sm:$0xff]  ;;  %v1712_v10 = vld [vmem:[%s308_s26 + $0x8] sm:$0xff]  ;;  %s325_s17 = scalar_lea.vmem %s2068_s4, %s2072_s22  ;;  %s330_s20 = scalar_lea.vmem %s2069_s5, %s1687_s23 }
  0x10   : > { %v340_v9 = vld [vmem:[%s317_s9] sm:$0x7]  ;;  %1556 = vmatprep.subr.mxu0 %v1632_v1  ;;  %1561 = vmatprep.subr.mxu1 %v1632_v1  ;;  %s1765_s13 = scalar_lea.vmem %s2067_s3, %s1586_s10  ;;  %s335_s25 = scalar_lea.vmem %s2070_s6, %s1687_s23 }
  0x11   : > { %v369_v11 = vrot.slane %v340_v9, %v368_v3  ;;  %v375_v12 = vrot.slane %v340_v9, %v374_v4  ;;  %v536_v16 = vrot.slane %v340_v9, %v535_v7  ;;  %v1768_v3 = vld [vmem:[%s1765_s13 + $0x78] sm:$0xff]  ;;  %v1771_v4 = vld [vmem:[%s1765_s13 + $0x70] sm:$0xff]  ;;  %v1778_v7 = vld [vmem:[%s1765_s13 + $0x68] sm:$0xff] }
  0x12   : > { %v1785_v9 = vld [vmem:[%s1765_s13 + $0x60] sm:$0xff] }
  0x13   : > { %v370_v13 = vmul.f32 %v369_v11, %v1709_v8  ;;  %v371_v14 = vmul.f32 %v369_v11, %v1712_v10  ;;  %v531_v15 = vmul.f32 %v369_v11, %v1697_v5  ;;  %v532_v17 = vmul.f32 %v369_v11, %v1699_v6  ;;  %v1792_v11 = vld [vmem:[%s1765_s13 + $0x58] sm:$0xff] }
  0x15   : > { %v376_v18 = vadd.f32 %v375_v12, %v370_v13  ;;  %v377_v19 = vadd.f32 %v375_v12, %v371_v14  ;;  %v537_v20 = vadd.f32 %v536_v16, %v531_v15  ;;  %v538_v21 = vadd.f32 %v536_v16, %v532_v17  ;;  %v1799_v12 = vld [vmem:[%s1765_s13 + $0x50] sm:$0xff]  ;;  %v1806_v13 = vld [vmem:[%s1765_s13 + $0x48] sm:$0xff]  ;;  %v1813_v14 = vld [vmem:[%s1765_s13 + $0x40] sm:$0xff] }
  0x16   : > { %v1820_v15 = vld [vmem:[%s1765_s13 + $0x38] sm:$0xff]  ;;  %v1827_v16 = vld [vmem:[%s1765_s13 + $0x30] sm:$0xff]  ;;  %v1834_v17 = vld [vmem:[%s1765_s13 + $0x28] sm:$0xff] }
  0x17   : > { %1549 = vmatmul.mubr.msk.f32.vlgmr.msra.gmra.mxu0 %vm378_vm1, %v376_v18  ;;  %1554 = vmatmul.mubr.msk.f32.vlgmr.msra.gmra.mxu1 %vm378_vm1, %v377_v19  ;;  %v1841_v18 = vld [vmem:[%s1765_s13 + $0x20] sm:$0xff]  ;;  %v1848_v19 = vld [vmem:[%s1765_s13 + $0x18] sm:$0xff] }
  0x18   : > { %1557 = vmatpush3.xpose.msk.msra.mxu0 %vm378_vm1, %v1709_v8  ;;  %1558 = vmatprep.mubr.msk.f32.mxu0 %vm1633_vm0, %v1632_v1 }
  0x19   : > { %1562 = vmatpush3.xpose.msk.msra.mxu1 %vm378_vm1, %v1712_v10  ;;  %1563 = vmatprep.mubr.msk.f32.mxu1 %vm1633_vm0, %v1632_v1 }
  0x1a   : > { %1566 = vmatprep.subr.mxu0 %v1632_v1  ;;  %1571 = vmatprep.subr.mxu1 %v1632_v1 }
  0x1b   : > { %1559 = vmatmul.mubr.msk.f32.vlgmr.msra.gmra.mxu0 %vm378_vm1, %v537_v20  ;;  %v1855_v20 = vld [vmem:[%s1765_s13 + $0x10] sm:$0xff] }
  0x1c   : > { %1564 = vmatmul.mubr.msk.f32.vlgmr.msra.gmra.mxu1 %vm378_vm1, %v538_v21  ;;  %1567 = vmatpush3.msra.mxu0 %v1697_v5  ;;  %v1862_v21 = vld [vmem:[%s1765_s13 + $0x8] sm:$0xff] }
  0x1d   : > { %1568 = vmatprep.mubr.msk.f32.mxu0 %vm1633_vm0, %v1632_v1  ;;  %1572 = vmatpush3.msra.mxu1 %v1699_v6 }
  0x1e   : > { %1576 = vmatprep.subr.mxu0 %v1632_v1  ;;  %1573 = vmatprep.mubr.msk.f32.mxu1 %vm1633_vm0, %v1632_v1 }
  0x1f   : > { %1581 = vmatprep.subr.mxu1 %v1632_v1 }
  0xd7   : > { %v451_v22 = vpop.f32.mrf.mxu0  ;;  %v527_v23 = vpop.f32.mrf.mxu1 }
  0xd8   : > { %v692_v24 = vsel %vm691_vm2, %v451_v22, -inf  ;;  %v695_v27 = vsel %vm691_vm2, %v527_v23, -inf }
  0xd9   : > { %693 = vmax.xlane.f32.xlu0 %v692_v24  ;;  %v1550_v25 = vpop.f32.mrf.mxu0  ;;  %v1555_v26 = vpop.f32.mrf.mxu1  ;;  %v1883_v24 = vld [vmem:[%s1765_s13 + $0xb0] sm:$0xff] }
  0xda   : > { %v1890_v25 = vld [vmem:[%s1765_s13 + $0xa8] sm:$0xff]  ;;  %v1897_v26 = vld [vmem:[%s1765_s13 + $0xa0] sm:$0xff] }
  0xdb   : > { %v611_v28 = vpop.f32.mrf.mxu0 }
  0xdc   : > { %v860_v29 = vsel %vm691_vm2, %v611_v28, -inf  ;;  %v687_v30 = vpop.f32.mrf.mxu1 }
  0xdd   : > { %696 = vmax.xlane.f32.xlu0 %v695_v27  ;;  %861 = vmax.xlane.f32.xlu1 %v860_v29  ;;  %v1560_v31 = vpop.f32.mrf.mxu0  ;;  %v863_v32 = vsel %vm691_vm2, %v687_v30, -inf  ;;  %v1904_v27 = vld [vmem:[%s1765_s13 + $0x98] sm:$0xff]  ;;  %v1918_v29 = vld [vmem:[%s1765_s13 + $0x88] sm:$0xff] }
  0xde   : > { %v1565_v33 = vpop.f32.mrf.mxu1 }
  0xe1   : > { %864 = vmax.xlane.f32.xlu1 %v863_v32 }
 0x162   : > { %v694_v34 = vpop.xlane.xlu0 %693 }
 0x163   : > { %v698_v35 = vsub.f32 %v451_v22, %v694_v34  ;;  %v1869_v22 = vld [vmem:[%s1765_s13] sm:$0xff] }
 0x165   : > { %v700_v36 = vmul.f32 1.442695, %v698_v35 }
 0x166   : > { %v697_v37 = vpop.xlane.xlu0 %696  ;;  %v862_v38 = vpop.xlane.xlu1 %861 }
 0x167   : > { %1608 = vpow2.f32 %v700_v36  ;;  %v699_v39 = vsub.f32 %v527_v23, %v697_v37  ;;  %v866_v40 = vsub.f32 %v611_v28, %v862_v38  ;;  %v1876_v23 = vld [vmem:[%s1765_s13 + $0xb8] sm:$0xff]  ;;  %v1911_v28 = vld [vmem:[%s1765_s13 + $0x90] sm:$0xff] }
 0x169   : > { %v702_v41 = vmul.f32 1.442695, %v699_v39  ;;  %v868_v42 = vmul.f32 1.442695, %v866_v40 }
 0x16a   : > { %v865_v43 = vpop.xlane.xlu1 %864 }
 0x16b   : > { %1610 = vpow2.f32 %v702_v41  ;;  %v867_v44 = vsub.f32 %v687_v30, %v865_v43  ;;  %v1929_v30 = vld [vmem:[%s1765_s13 + $0x80] sm:$0xff] }
 0x16c   : > { %1612 = vpow2.f32 %v868_v42 }
 0x16d   : > { %v870_v45 = vmul.f32 1.442695, %v867_v44 }
 0x16f   : > { %1614 = vpow2.f32 %v870_v45 }
 0x174   : > { %v1609_v46 = vpop.eup %1608 }
 0x175   : > { %v704_v47 = vsel %vm691_vm2, %v1609_v46, 0.0 }
 0x176   : > { %705 = vadd.xlane.f32.xlu0 %v704_v47 }
 0x178   : > { %v1611_v48 = vpop.eup %1610 }
 0x179   : > { %v1613_v49 = vpop.eup %1612  ;;  %v707_v50 = vsel %vm691_vm2, %v1611_v48, 0.0 }
 0x17a   : > { %708 = vadd.xlane.f32.xlu1 %v707_v50  ;;  %v872_v51 = vsel %vm691_vm2, %v1613_v49, 0.0 }
 0x17b   : > { %873 = vadd.xlane.f32.xlu0 %v872_v51 }
 0x17c   : > { %v1615_v52 = vpop.eup %1614 }
 0x17d   : > { %v875_v53 = vsel %vm691_vm2, %v1615_v52, 0.0 }
 0x17e   : > { %876 = vadd.xlane.f32.xlu1 %v875_v53  ;;  %v1519_v53 = vld [vmem:[%s325_s17] ss:$0 sm:$0xff] }
 0x1ff   : > { %v706_v54 = vpop.xlane.xlu0 %705 }
 0x200   : > { %1616 = vrcp.f32 %v706_v54 }
 0x203   : > { %v709_v55 = vpop.xlane.xlu1 %708 }
 0x204   : > { %v874_v56 = vpop.xlane.xlu0 %873  ;;  %1618 = vrcp.f32 %v709_v55 }
 0x205   : > { %1620 = vrcp.f32 %v874_v56 }
 0x207   : > { %v877_v57 = vpop.xlane.xlu1 %876 }
 0x208   : > { %1622 = vrcp.f32 %v877_v57 }
 0x20d   : > { %v1617_v58 = vpop.eup %1616 }
 0x20e   : > { %v711_v59 = vmul.f32 %v1617_v58, %v1609_v46 }
 0x210   : > { %1569 = vmatmul.mubr.msk.f32.vlgmr.msra.gmra.mxu0 %vm691_vm2, %v711_v59 }
 0x211   : > { %v1619_v60 = vpop.eup %1618  ;;  %1577 = vmatpush3.msra.mxu0 %v1709_v8  ;;  %1578 = vmatprep.mubr.msk.f32.mxu0 %vm1633_vm0, %v1632_v1 }
 0x212   : > { %v1621_v61 = vpop.eup %1620  ;;  %v713_v62 = vmul.f32 %v1619_v60, %v1611_v48  ;;  %1049 = vmatprep.subr.mxu0 %v1632_v1 }
 0x213   : > { %v879_v63 = vmul.f32 %v1621_v61, %v1613_v49 }
 0x214   : > { %1574 = vmatmul.mubr.msk.f32.vlgmr.msra.gmra.mxu1 %vm691_vm2, %v713_v62 }
 0x215   : > { %v1623_v0 = vpop.eup %1622  ;;  %1579 = vmatmul.mubr.msk.f32.vlgmr.msra.gmra.mxu0 %vm691_vm2, %v879_v63  ;;  %1582 = vmatpush3.msra.mxu1 %v1712_v10 }
 0x216   : > { %1583 = vmatprep.mubr.msk.f32.mxu1 %vm1633_vm0, %v1632_v1  ;;  %v881_v2 = vmul.f32 %v1623_v0, %v1615_v52  ;;  %1122 = vmatprep.subr.mxu1 %v1632_v1 }
 0x217   : > { %1050 = vmatpush1.msra.mxu0 %v1768_v3 }
 0x218   : > { %1584 = vmatmul.mubr.msk.f32.vlgmr.msra.gmra.mxu1 %vm691_vm2, %v881_v2  ;;  %1051 = vmatprep.subr.mxu0 %v1632_v1 }
 0x219   : > { %1123 = vmatpush1.msra.mxu1 %v1768_v3  ;;  %1052 = vmatpush1.msra.mxu0 %v1771_v4 }
 0x21a   : > { %1124 = vmatprep.subr.mxu1 %v1632_v1  ;;  %1053 = vmatprep.subr.mxu0 %v1632_v1 }
 0x21b   : > { %1125 = vmatpush1.msra.mxu1 %v1771_v4  ;;  %1054 = vmatpush1.msra.mxu0 %v1778_v7 }
 0x21c   : > { %1126 = vmatprep.subr.mxu1 %v1632_v1  ;;  %1055 = vmatprep.subr.mxu0 %v1632_v1 }
 0x21d   : > { %1127 = vmatpush1.msra.mxu1 %v1778_v7  ;;  %1056 = vmatpush1.msra.mxu0 %v1785_v9 }
 0x21e   : > { %1128 = vmatprep.subr.mxu1 %v1632_v1  ;;  %1057 = vmatprep.subr.mxu0 %v1632_v1 }
 0x21f   : > { %1129 = vmatpush1.msra.mxu1 %v1785_v9  ;;  %1058 = vmatpush1.msra.mxu0 %v1792_v11 }
 0x220   : > { %1130 = vmatprep.subr.mxu1 %v1632_v1  ;;  %1059 = vmatprep.subr.mxu0 %v1632_v1 }
 0x221   : > { %1131 = vmatpush1.msra.mxu1 %v1792_v11  ;;  %1060 = vmatpush1.msra.mxu0 %v1799_v12 }
 0x222   : > { %1132 = vmatprep.subr.mxu1 %v1632_v1  ;;  %1061 = vmatprep.subr.mxu0 %v1632_v1 }
 0x223   : > { %1133 = vmatpush1.msra.mxu1 %v1799_v12  ;;  %1062 = vmatpush1.msra.mxu0 %v1806_v13 }
 0x224   : > { %1134 = vmatprep.subr.mxu1 %v1632_v1  ;;  %1063 = vmatprep.subr.mxu0 %v1632_v1 }
 0x225   : > { %1135 = vmatpush1.msra.mxu1 %v1806_v13  ;;  %1064 = vmatpush1.msra.mxu0 %v1813_v14 }
 0x226   : > { %1136 = vmatprep.subr.mxu1 %v1632_v1  ;;  %1065 = vmatprep.subr.mxu0 %v1632_v1 }
 0x227   : > { %1137 = vmatpush1.msra.mxu1 %v1813_v14  ;;  %1066 = vmatpush1.msra.mxu0 %v1820_v15 }
 0x228   : > { %1138 = vmatprep.subr.mxu1 %v1632_v1  ;;  %1067 = vmatprep.subr.mxu0 %v1632_v1 }
 0x229   : > { %1139 = vmatpush1.msra.mxu1 %v1820_v15  ;;  %1068 = vmatpush1.msra.mxu0 %v1827_v16 }
 0x22a   : > { %1140 = vmatprep.subr.mxu1 %v1632_v1  ;;  %1069 = vmatprep.subr.mxu0 %v1632_v1 }
 0x22b   : > { %1141 = vmatpush1.msra.mxu1 %v1827_v16  ;;  %1070 = vmatpush1.msra.mxu0 %v1834_v17 }
 0x22c   : > { %1142 = vmatprep.subr.mxu1 %v1632_v1  ;;  %1071 = vmatprep.subr.mxu0 %v1632_v1 }
 0x22d   : > { %1143 = vmatpush1.msra.mxu1 %v1834_v17  ;;  %1072 = vmatpush1.msra.mxu0 %v1841_v18 }
 0x22e   : > { %1144 = vmatprep.subr.mxu1 %v1632_v1  ;;  %1073 = vmatprep.subr.mxu0 %v1632_v1 }
 0x22f   : > { %1145 = vmatpush1.msra.mxu1 %v1841_v18  ;;  %1074 = vmatpush1.msra.mxu0 %v1848_v19 }
 0x230   : > { %1146 = vmatprep.subr.mxu1 %v1632_v1  ;;  %1075 = vmatprep.subr.mxu0 %v1632_v1 }
 0x231   : > { %1147 = vmatpush1.msra.mxu1 %v1848_v19  ;;  %1076 = vmatpush1.msra.mxu0 %v1855_v20 }
 0x232   : > { %1148 = vmatprep.subr.mxu1 %v1632_v1  ;;  %1077 = vmatprep.subr.mxu0 %v1632_v1 }
 0x233   : > { %1149 = vmatpush1.msra.mxu1 %v1855_v20  ;;  %1078 = vmatpush1.msra.mxu0 %v1862_v21 }
 0x234   : > { %1150 = vmatprep.subr.mxu1 %v1632_v1  ;;  %1079 = vmatprep.subr.mxu0 %v1632_v1 }
 0x235   : > { %1151 = vmatpush1.msra.mxu1 %v1862_v21  ;;  %1080 = vmatpush1.msra.mxu0 %v1869_v22 }
 0x236   : > { %1152 = vmatprep.subr.mxu1 %v1632_v1  ;;  %1097 = vmatprep.subr.mxu0 %v1632_v1 }
 0x237   : > { %1153 = vmatpush1.msra.mxu1 %v1869_v22  ;;  %1098 = vmatpush2.msra.mxu0 %v1876_v23 }
 0x238   : > { %1170 = vmatprep.subr.mxu1 %v1632_v1  ;;  %1099 = vmatprep.subr.mxu0 %v1632_v1 }
 0x239   : > { %1171 = vmatpush2.msra.mxu1 %v1876_v23  ;;  %1100 = vmatpush2.msra.mxu0 %v1883_v24 }
 0x23a   : > { %1172 = vmatprep.subr.mxu1 %v1632_v1  ;;  %1101 = vmatprep.subr.mxu0 %v1632_v1 }
 0x23b   : > { %1173 = vmatpush2.msra.mxu1 %v1883_v24  ;;  %1102 = vmatpush2.msra.mxu0 %v1890_v25 }
 0x23c   : > { %1174 = vmatprep.subr.mxu1 %v1632_v1  ;;  %1103 = vmatprep.subr.mxu0 %v1632_v1 }
 0x23d   : > { %1175 = vmatpush2.msra.mxu1 %v1890_v25  ;;  %1104 = vmatpush2.msra.mxu0 %v1897_v26 }
 0x23e   : > { %1176 = vmatprep.subr.mxu1 %v1632_v1  ;;  %1105 = vmatprep.subr.mxu0 %v1632_v1 }
 0x23f   : > { %1177 = vmatpush2.msra.mxu1 %v1897_v26  ;;  %1106 = vmatpush2.msra.mxu0 %v1904_v27 }
 0x240   : > { %1178 = vmatprep.subr.mxu1 %v1632_v1  ;;  %1107 = vmatprep.subr.mxu0 %v1632_v1 }
 0x241   : > { %1179 = vmatpush2.msra.mxu1 %v1904_v27  ;;  %1108 = vmatpush2.msra.mxu0 %v1911_v28 }
 0x242   : > { %1180 = vmatprep.subr.mxu1 %v1632_v1  ;;  %1109 = vmatprep.subr.mxu0 %v1632_v1 }
 0x243   : > { %1181 = vmatpush2.msra.mxu1 %v1911_v28  ;;  %1110 = vmatpush2.msra.mxu0 %v1918_v29 }
 0x244   : > { %1182 = vmatprep.subr.mxu1 %v1632_v1  ;;  %1111 = vmatprep.subr.mxu0 %v1632_v1 }
 0x245   : > { %1183 = vmatpush2.msra.mxu1 %v1918_v29  ;;  %1112 = vmatpush2.msra.mxu0 %v1929_v30 }
 0x246   : > { %1184 = vmatprep.subr.mxu1 %v1632_v1  ;;  %1212 = vmatprep.subr.mxu0 %v1632_v1 }
 0x247   : > { %1185 = vmatpush2.msra.mxu1 %v1929_v30 }
 0x248   : > { %1285 = vmatprep.subr.mxu1 %v1632_v1 }
 0x2d0   : > { %v783_v31 = vpop.f32.mrf.mxu0 }
 0x2d1   : > { %v1028_v32 = vmul.f32 %v783_v31, %v1709_v8 }
 0x2d2   : > { %v1570_v33 = vpop.f32.mrf.mxu0 }
 0x2d3   : > { %1520 = vmatprep.mubr.msk.f32.mxu0 %vm378_vm1, %v1028_v32 }
 0x2d4   : > { %v856_v34 = vpop.f32.mrf.mxu1 }
 0x2d5   : > { %v1029_v35 = vmul.f32 %v856_v34, %v1712_v10  ;;  %v1598_v36 = vpack.i.bf16 %v856_v34, %v783_v31  ;;  %v951_v37 = vpop.f32.mrf.mxu0 }
 0x2d6   : > { %v1575_v38 = vpop.f32.mrf.mxu1  ;;  %v1197_v48 = vmul.f32 %v951_v37, %v1697_v5 }
 0x2d7   : > { %v1580_v39 = vpop.f32.mrf.mxu0  ;;  %1521 = vmatprep.mubr.msk.f32.mxu1 %vm378_vm1, %v1029_v35  ;;  %1599 = vrot.lane.b32.xlu0 %v1598_v36, %s1634_s14 }
 0x2d8   : > { %v1024_v40 = vpop.f32.mrf.mxu1 }
 0x2d9   : > { %v1603_v41 = vpack.i.bf16 %v1024_v40, %v951_v37  ;;  %v1198_v49 = vmul.f32 %v1024_v40, %v1699_v6 }
 0x2da   : > { %v1585_v42 = vpop.f32.mrf.mxu1 }
 0x2db   : > { %1604 = vrot.lane.b32.xlu1 %v1603_v41, %s1634_s14 }
 0x349   : > { %v1600_v43 = vpop.permute.xlu0 %1599 }
 0x34a   : > { %v1602_v44 = vunpack.i.h.bf16 %v1600_v43  ;;  %v1601_v45 = vunpack.i.l.bf16 %v1600_v43 }
 0x34c   : > { %v1038_v46 = vsel %vm378_vm1, %v1709_v8, %v1601_v45  ;;  %v1039_v47 = vsel %vm378_vm1, %v1712_v10, %v1602_v44 }
 0x34d   : > { %1114 = vmatmul.mubr.f32.vlgmr.msra.gmra.mxu0 %v1038_v46  ;;  %1187 = vmatmul.mubr.f32.vlgmr.msra.gmra.mxu1 %v1039_v47  ;;  %v1605_v8 = vpop.permute.xlu1 %1604 }
 0x34e   : > { %1213 = vmatpush1.msra.mxu0 %v1768_v3  ;;  %1286 = vmatpush1.msra.mxu1 %v1768_v3  ;;  %v1607_v10 = vunpack.i.h.bf16 %v1605_v8  ;;  %v1606_v50 = vunpack.i.l.bf16 %v1605_v8 }
 0x34f   : > { %1214 = vmatprep.subr.mxu0 %v1632_v1  ;;  %1522 = vmatprep.mubr.msk.f32.mxu0 %vm378_vm1, %v1197_v48 }
 0x350   : > { %1287 = vmatprep.subr.mxu1 %v1632_v1  ;;  %1523 = vmatprep.mubr.msk.f32.mxu1 %vm378_vm1, %v1198_v49  ;;  %v1207_v51 = vsel %vm378_vm1, %v1697_v5, %v1606_v50  ;;  %v1208_v52 = vsel %vm378_vm1, %v1699_v6, %v1607_v10 }
 0x351   : > { %1215 = vmatpush1.msra.mxu0 %v1771_v4  ;;  %1288 = vmatpush1.msra.mxu1 %v1771_v4 }
 0x352   : > { %1216 = vmatprep.subr.mxu0 %v1632_v1  ;;  %1289 = vmatprep.subr.mxu1 %v1632_v1 }
 0x353   : > { %1217 = vmatpush1.msra.mxu0 %v1778_v7  ;;  %1290 = vmatpush1.msra.mxu1 %v1778_v7 }
 0x354   : > { %1218 = vmatprep.subr.mxu0 %v1632_v1  ;;  %1291 = vmatprep.subr.mxu1 %v1632_v1 }
 0x355   : > { %1219 = vmatpush1.msra.mxu0 %v1785_v9  ;;  %1292 = vmatpush1.msra.mxu1 %v1785_v9 }
 0x356   : > { %1220 = vmatprep.subr.mxu0 %v1632_v1  ;;  %1293 = vmatprep.subr.mxu1 %v1632_v1 }
 0x357   : > { %1221 = vmatpush1.msra.mxu0 %v1792_v11  ;;  %1294 = vmatpush1.msra.mxu1 %v1792_v11 }
 0x358   : > { %1222 = vmatprep.subr.mxu0 %v1632_v1  ;;  %1295 = vmatprep.subr.mxu1 %v1632_v1 }
 0x359   : > { %1223 = vmatpush1.msra.mxu0 %v1799_v12  ;;  %1296 = vmatpush1.msra.mxu1 %v1799_v12 }
 0x35a   : > { %1224 = vmatprep.subr.mxu0 %v1632_v1  ;;  %1297 = vmatprep.subr.mxu1 %v1632_v1 }
 0x35b   : > { %1225 = vmatpush1.msra.mxu0 %v1806_v13  ;;  %1298 = vmatpush1.msra.mxu1 %v1806_v13 }
 0x35c   : > { %1226 = vmatprep.subr.mxu0 %v1632_v1  ;;  %1299 = vmatprep.subr.mxu1 %v1632_v1 }
 0x35d   : > { %1227 = vmatpush1.msra.mxu0 %v1813_v14  ;;  %1300 = vmatpush1.msra.mxu1 %v1813_v14 }
 0x35e   : > { %1228 = vmatprep.subr.mxu0 %v1632_v1  ;;  %1301 = vmatprep.subr.mxu1 %v1632_v1 }
 0x35f   : > { %1229 = vmatpush1.msra.mxu0 %v1820_v15  ;;  %1302 = vmatpush1.msra.mxu1 %v1820_v15 }
 0x360   : > { %1230 = vmatprep.subr.mxu0 %v1632_v1  ;;  %1303 = vmatprep.subr.mxu1 %v1632_v1 }
 0x361   : > { %1231 = vmatpush1.msra.mxu0 %v1827_v16  ;;  %1304 = vmatpush1.msra.mxu1 %v1827_v16 }
 0x362   : > { %1232 = vmatprep.subr.mxu0 %v1632_v1  ;;  %1305 = vmatprep.subr.mxu1 %v1632_v1 }
 0x363   : > { %1233 = vmatpush1.msra.mxu0 %v1834_v17  ;;  %1306 = vmatpush1.msra.mxu1 %v1834_v17 }
 0x364   : > { %1234 = vmatprep.subr.mxu0 %v1632_v1  ;;  %1307 = vmatprep.subr.mxu1 %v1632_v1 }
 0x365   : > { %1235 = vmatpush1.msra.mxu0 %v1841_v18  ;;  %1308 = vmatpush1.msra.mxu1 %v1841_v18 }
 0x366   : > { %1236 = vmatprep.subr.mxu0 %v1632_v1  ;;  %1309 = vmatprep.subr.mxu1 %v1632_v1 }
 0x367   : > { %1237 = vmatpush1.msra.mxu0 %v1848_v19  ;;  %1310 = vmatpush1.msra.mxu1 %v1848_v19 }
 0x368   : > { %1238 = vmatprep.subr.mxu0 %v1632_v1  ;;  %1311 = vmatprep.subr.mxu1 %v1632_v1 }
 0x369   : > { %1239 = vmatpush1.msra.mxu0 %v1855_v20  ;;  %1312 = vmatpush1.msra.mxu1 %v1855_v20 }
 0x36a   : > { %1240 = vmatprep.subr.mxu0 %v1632_v1  ;;  %1313 = vmatprep.subr.mxu1 %v1632_v1 }
 0x36b   : > { %1241 = vmatpush1.msra.mxu0 %v1862_v21  ;;  %1314 = vmatpush1.msra.mxu1 %v1862_v21 }
 0x36c   : > { %1242 = vmatprep.subr.mxu0 %v1632_v1  ;;  %1315 = vmatprep.subr.mxu1 %v1632_v1 }
 0x36d   : > { %1243 = vmatpush1.msra.mxu0 %v1869_v22  ;;  %1316 = vmatpush1.msra.mxu1 %v1869_v22 }
 0x36e   : > { %1260 = vmatprep.subr.mxu0 %v1632_v1  ;;  %1333 = vmatprep.subr.mxu1 %v1632_v1 }
 0x36f   : > { %1261 = vmatpush2.msra.mxu0 %v1876_v23  ;;  %1334 = vmatpush2.msra.mxu1 %v1876_v23 }
 0x370   : > { %1262 = vmatprep.subr.mxu0 %v1632_v1  ;;  %1335 = vmatprep.subr.mxu1 %v1632_v1 }
 0x371   : > { %1263 = vmatpush2.msra.mxu0 %v1883_v24  ;;  %1336 = vmatpush2.msra.mxu1 %v1883_v24 }
 0x372   : > { %1264 = vmatprep.subr.mxu0 %v1632_v1  ;;  %1337 = vmatprep.subr.mxu1 %v1632_v1 }
 0x373   : > { %1265 = vmatpush2.msra.mxu0 %v1890_v25  ;;  %1338 = vmatpush2.msra.mxu1 %v1890_v25 }
 0x374   : > { %1266 = vmatprep.subr.mxu0 %v1632_v1  ;;  %1339 = vmatprep.subr.mxu1 %v1632_v1 }
 0x375   : > { %1267 = vmatpush2.msra.mxu0 %v1897_v26  ;;  %1340 = vmatpush2.msra.mxu1 %v1897_v26 }
 0x376   : > { %1268 = vmatprep.subr.mxu0 %v1632_v1  ;;  %1341 = vmatprep.subr.mxu1 %v1632_v1 }
 0x377   : > { %1269 = vmatpush2.msra.mxu0 %v1904_v27  ;;  %1342 = vmatpush2.msra.mxu1 %v1904_v27 }
 0x378   : > { %1270 = vmatprep.subr.mxu0 %v1632_v1  ;;  %1343 = vmatprep.subr.mxu1 %v1632_v1 }
 0x379   : > { %1271 = vmatpush2.msra.mxu0 %v1911_v28  ;;  %1344 = vmatpush2.msra.mxu1 %v1911_v28 }
 0x37a   : > { %1272 = vmatprep.subr.mxu0 %v1632_v1  ;;  %1345 = vmatprep.subr.mxu1 %v1632_v1 }
 0x37b   : > { %1273 = vmatpush2.msra.mxu0 %v1918_v29  ;;  %1346 = vmatpush2.msra.mxu1 %v1918_v29 }
 0x37c   : > { %1274 = vmatprep.subr.mxu0 %v1632_v1  ;;  %1347 = vmatprep.subr.mxu1 %v1632_v1 }
 0x37d   : > { %1275 = vmatpush2.msra.mxu0 %v1929_v30  ;;  %1348 = vmatpush2.msra.mxu1 %v1929_v30 }
 0x37e   : > { %1277 = vmatmul.mubr.f32.vlgmr.msra.gmra.mxu0 %v1207_v51  ;;  %1350 = vmatmul.mubr.f32.vlgmr.msra.gmra.mxu1 %v1208_v52 }
 0x40d   : > { %v1115_v54 = vpop.f32.mrf.mxu0  ;;  %v1188_v1 = vpop.f32.mrf.mxu1 }
 0x40e   : > { %v1116_v55 = vadd.f32 %v1519_v53, %v1115_v54  ;;  %v1189_v56 = vadd.f32 %v1519_v53, %v1188_v1 }
 0x40f   : > { %v1117_v5 = vpop.f32.mrf.mxu0  ;;  %v1190_v57 = vpop.f32.mrf.mxu1 }
 0x410   : > { %v1192_v6 = vmax.f32 %v1116_v55, 0.0  ;;  %v1193_v58 = vmax.f32 %v1189_v56, 0.0 }
 0x412   : > { %1195 = vst.msk [vmem:[%s330_s20] sm:$0xff] %vm1194_vm3, %v1192_v6  ;;  %1196 = vst.msk [vmem:[%s330_s20 + $0x8] sm:$0xff] %vm1194_vm3, %v1193_v58 }
 0x43e   : > { %v1278_v59 = vpop.f32.mrf.mxu0  ;;  %v1351_v60 = vpop.f32.mrf.mxu1 }
 0x43f   : > { %v1279_v61 = vadd.f32 %v1519_v53, %v1278_v59  ;;  %v1352_v62 = vadd.f32 %v1519_v53, %v1351_v60 }
 0x440   : > { %v1280_v63 = vpop.f32.mrf.mxu0  ;;  %v1353_v0 = vpop.f32.mrf.mxu1 }
 0x441   : > { %v1355_v2 = vmax.f32 %v1279_v61, 0.0  ;;  %v1356_v3 = vmax.f32 %v1352_v62, 0.0 }
 0x443   : > { %1357 = vst.msk [vmem:[%s335_s25] sm:$0xff] %vm1194_vm3, %v1355_v2  ;;  %1358 = vst.msk [vmem:[%s335_s25 + $0x8] sm:$0xff] %vm1194_vm3, %v1356_v3 }
 0x444 PF: > { %s17_s21 = sadd.s32 1, %s1630_s21  }
 0x445   : > { %p14_p4 = scmp.ge.s32.totalorder %s17_s21, 4  }
 0x447   :  { %16 = sbr.rel (!%p14_p4) target bundleno = 1 (0x1), region = 94 }

// kernel: multi_att_forward.4
= control target key start
LH: loop header
LB: loop body
LE: loop exit
PB: predicated region body
PF: predicated region fallthrough
CT: control target
= control target key end

     0   :  { %11 = vsyncpa [#allocation3], 0  ;;  %s5124_s0 = inlined_call_operand.vmem [shape: f32[2,4,8,32], index: 0, kind: input, shape index: {}]   ;;  %s5125_s1 = inlined_call_operand.vmem [shape: f32[2,8,4,1], index: 1, kind: input, shape index: {}]   ;;  %s5126_s2 = inlined_call_operand.vmem [shape: f32[2,128,384], index: 2, kind: input, shape index: {}]   ;;  %s5127_s3 = inlined_call_operand.vmem [shape: f32[2,1,384], index: 3, kind: input, shape index: {}]   ;;  %s5128_s4 = inlined_call_operand.vmem [shape: f32[2,4,512], index: 4, kind: output, shape index: {0}]   ;;  %s5129_s5 = inlined_call_operand.hbm [shape: f32[2,4,128], index: 5, kind: output, shape index: {1}]  }
   0x1   :  { %13 = vsyncpa [#allocation3 + $0x1], 0  ;;  %s3520_s18 = smov 0   ;;  %s3522_s19 = smov 0  }
   0x2   :  { %s3524_s20 = smov 0   ;;  %s3526_s21 = smov 0  }
   0x3 LB: > { %s3541_s22 = sadd.s32 4294967295, %s3481_s21   ;;  %s2708_s23 = sadd.s32 4294967294, %s3481_s21   ;;  %s3481_s21 = sphi %s3526_s21, %s5446_s21   ;;  %s3477_s20 = sphi %s3524_s20, %s5445_s20   ;;  %s3473_s19 = sphi %s3522_s19, %s5444_s19   ;;  %s3469_s18 = sphi %s3520_s18, %s5443_s18  }
   0x4   : > { %s3545_s24 = sadd.s32 1, %s3481_s21   ;;  %s156_s25 = sadd.s32 1, %s3477_s20 }
   0x5   : > { %s153_s26 = ssub.s32 %s3481_s21, %s3545_s24  ;;  %p166_p0 = scmp.ne.s32.totalorder %s3477_s20, %s3473_s19 }
   0x6   : > { %p154_p1 = scmp.eq.s32.totalorder %s153_s26, 0  ;;  %p167_p2 = scmp.eq.s32.totalorder %s3541_s22, 1 }
   0x7   : > { %p172_p3 = scmp.ne.s32.totalorder %s3473_s19, %s3469_s18  ;;  %p173_p4 = scmp.eq.s32.totalorder %s2708_s23, 1 }
   0x8   : > { %s3556_s27 = scalar_select %p154_p1, %s3477_s20, %s156_s25  }
   0x9   : > { %p3558_p5 = por %p167_p2, %p166_p0  ;;  %p3562_p6 = por %p173_p4, %p172_p3 }
   0xa   : > { %p2711_p7 = scmp.ge.s32.totalorder %s3481_s21, 1  ;;  %p222_p8 = scmp.lt.s32.totalorder %s3481_s21, 3 }
   0xc   : > { %p223_p9 = pnand %p2711_p7, %p222_p8 }
   0xe   : > { %226 = sbr.rel (%p223_p9) target bundleno = 5976 (0x1758), region = 36 }
  0x13   : > { %p269_p10 = scmp.lt.s32.totalorder %s3541_s22, 1  ;;  %v5139_v0 = vmov 0.0   ;;  %vm3484_vm0 = vmmov 0   ;;  %vm407_vm1 = vcmask 1041409   ;;  %vm410_vm2 = vcmask 1042434   ;;  %s3485_s14 = smov 32  }
  0x14   : > { %2865 = vmatprep.subr.mxu1 %v5139_v0  ;;  %512 = vmatprep.mubr.f32.mxu0 %v5139_v0  ;;  %vm413_vm3 = vcmask 1043459   ;;  %vm426_vm4 = vcmask 261120   ;;  %vm428_vm5 = vcmask 523264   ;;  %vm430_vm6 = vcmask 785408   ;;  %s3486_s25 = smov 96   ;;  %s3488_s9 = smov 64  }
  0x15   : > { %s3572_s30 = scalar_select %p269_p10, %s3541_s22, 1  ;;  %2897 = vmatprep.mubr.msk.f32.mxu1 %vm3484_vm0, %v5139_v0  ;;  %vm684_vm7 = vcmask 1044484   ;;  %vm672_vm8 = vcmask 1044224   ;;  %vm951_vm9 = vcmask 1045509   ;;  %vm1211_vm10 = vcmask 1046534  }
  0x16   : > { %vm1475_vm11 = vcmask 1047559   ;;  %vm1756_vm12 = vcmask 1042432   ;;  %vm2023_vm13 = vcmask 1041408   ;;  %vm2286_vm14 = vcmask 1040384  }
  0x17   : > { %s2726_s6 = sshll.u32 %s3572_s30, 5  ;;  %s3145_s7 = smul.u32 384, %s3572_s30  ;;  %vm2525_vm15 = vcmask 3072  }
  0x18   : > { %s3583_s10 = scalar_lea.vmem %s5124_s0, %s2726_s6  ;;  %s3146_s15 = smul.u32 3, %s3572_s30 }
  0x19   : > { %s3588_s13 = scalar_lea.vmem %s5126_s2, %s3145_s7  ;;  %v3591_v1 = vld [vmem:[%s3583_s10] sm:$0xff]  ;;  %v3594_v2 = vld [vmem:[%s3583_s10 + $0x8] sm:$0xff]  ;;  %v3597_v3 = vld [vmem:[%s3583_s10 + $0x10] sm:$0xff]  ;;  %s3937_s8 = scalar_lea.vmem %s5125_s1, %s2726_s6 }
  0x1a   : > { %5259 = vst [vmem:[#allocation5_spill] sm:$0xff] %v3594_v2  ;;  %v3600_v4 = vld [vmem:[%s3583_s10 + $0x18] sm:$0xff]  ;;  %v5133_v5 = vrot.slane %v3591_v1, 7  ;;  %v5132_v6 = vrot.slane %v3594_v2, 6  ;;  %v3605_v7 = vld [vmem:[%s3588_s13 + $0x170] sm:$0xff]  ;;  %v5131_v8 = vrot.slane %v3597_v3, 5  ;;  %s287_s23 = scalar_lea.vmem %s5127_s3, %s3146_s15 }
  0x1b   : > { %5260 = vst [vmem:[#allocation6_spill] sm:$0xff] %v3605_v7  ;;  %v5130_v9 = vrot.slane %v3600_v4, 4  ;;  %448 = vmatprep.subr.mxu0 %v3605_v7  ;;  %v3611_v10 = vld [vmem:[%s3588_s13 + $0x168] sm:$0xff]  ;;  %v3614_v11 = vld [vmem:[%s3588_s13 + $0x178] sm:$0xff]  ;;  %v3627_v14 = vld [vmem:[%s3588_s13 + $0x150] sm:$0xff]  ;;  %v3828_v60 = vrot.slane %v3594_v2, 7 }
  0x1c   : > { %v3617_v12 = vld [vmem:[%s3588_s13 + $0x158] sm:$0xff]  ;;  %v418_v13 = vsel %vm407_vm1, %v5132_v6, %v5133_v5  ;;  %449 = vmatpush1.msra.mxu0 %v3611_v10  ;;  %2866 = vmatpush3.msra.mxu1 %v3614_v11  ;;  %v3630_v15 = vld [vmem:[%s3588_s13 + $0x160] sm:$0xff]  ;;  %v3649_v20 = vld [vmem:[%s3588_s13 + $0x148] sm:$0xff]  ;;  %v3831_v61 = vrot.slane %v3597_v3, 6  ;;  %v3837_v63 = vrot.slane %v3600_v4, 5  ;;  %s2728_s6 = sshll.u32 %s3572_s30, 4 }
  0x1d   : > { %v3633_v16 = vld [vmem:[%s3588_s13 + $0x140] sm:$0xff]  ;;  %v420_v17 = vsel %vm410_vm2, %v5131_v8, %v418_v13  ;;  %450 = vmatprep.subr.mxu0 %v3617_v12  ;;  %2867 = vmatprep.subr.mxu1 %v5139_v0  ;;  %v3641_v18 = vld [vmem:[%s3588_s13 + $0x138] sm:$0xff]  ;;  %v3652_v21 = vld [vmem:[%s3588_s13 + $0x128] sm:$0xff]  ;;  %v408_v62 = vsel %vm407_vm1, %v3828_v60, %v3591_v1  ;;  %s3984_s15 = scalar_lea.vmem %s5128_s4, %s2728_s6  ;;  %s266_s30 = sand.u32 1, %s3473_s19  }
  0x1e   : > { %v422_v19 = vsel %vm413_vm3, %v5130_v9, %v420_v17  ;;  %451 = vmatpush1.msra.mxu0 %v3627_v14  ;;  %2868 = vmatpush3.msra.mxu1 %v3630_v15  ;;  %v3657_v22 = vld [vmem:[%s3588_s13 + $0x120] sm:$0xff]  ;;  %v3662_v23 = vld [vmem:[%s3588_s13 + $0x130] sm:$0xff]  ;;  %v3670_v25 = vld [vmem:[%s3588_s13 + $0x108] sm:$0xff]  ;;  %v411_v13 = vsel %vm410_vm2, %v3831_v61, %v408_v62  ;;  %s3489_s7 = smov [#allocation2]  }
  0x1f   : > { %423 = vrot.lane.b32.xlu0 %v422_v19, %s3485_s14  ;;  %452 = vmatprep.subr.mxu0 %v3633_v16  ;;  %v3665_v24 = vld [vmem:[%s3588_s13 + $0x110] sm:$0xff]  ;;  %v3675_v26 = vld [vmem:[%s3588_s13 + $0x118] sm:$0xff]  ;;  %v3688_v29 = vld [vmem:[%s3588_s13 + $0x100] sm:$0xff]  ;;  %v414_v17 = vsel %vm413_vm3, %v3837_v63, %v411_v13 }
  0x20   : > { %2869 = vmatprep.subr.mxu1 %v5139_v0  ;;  %453 = vmatpush1.msra.mxu0 %v3641_v18  ;;  %v3678_v27 = vld [vmem:[%s3588_s13 + $0xf8] sm:$0xff]  ;;  %v3683_v28 = vld [vmem:[%s3588_s13 + $0xf0] sm:$0xff]  ;;  %v3691_v30 = vld [vmem:[%s3588_s13 + $0xe0] sm:$0xff] }
  0x21   : > { %2870 = vmatpush3.msra.mxu1 %v3649_v20  ;;  %454 = vmatprep.subr.mxu0 %v3652_v21  ;;  %v3696_v31 = vld [vmem:[%s3588_s13 + $0xd8] sm:$0xff]  ;;  %v3701_v32 = vld [vmem:[%s3588_s13 + $0xe8] sm:$0xff]  ;;  %v3709_v34 = vld [vmem:[%s3588_s13 + $0xc0] sm:$0xff] }
  0x22   : > { %2871 = vmatprep.subr.mxu1 %v5139_v0  ;;  %455 = vmatpush1.msra.mxu0 %v3657_v22  ;;  %v3704_v33 = vld [vmem:[%s3588_s13 + $0xc8] sm:$0xff]  ;;  %v3714_v35 = vld [vmem:[%s3588_s13 + $0xd0] sm:$0xff]  ;;  %v3727_v38 = vld [vmem:[%s3588_s13 + $0xb8] sm:$0xff] }
  0x23   : > { %2872 = vmatpush3.msra.mxu1 %v3662_v23  ;;  %456 = vmatprep.subr.mxu0 %v3665_v24  ;;  %v3717_v36 = vld [vmem:[%s3588_s13 + $0xb0] sm:$0xff]  ;;  %v3722_v37 = vld [vmem:[%s3588_s13 + $0xa8] sm:$0xff]  ;;  %v3730_v39 = vld [vmem:[%s3588_s13 + $0x98] sm:$0xff] }
  0x24   : > { %2873 = vmatprep.subr.mxu1 %v5139_v0  ;;  %457 = vmatpush1.msra.mxu0 %v3670_v25  ;;  %v3735_v40 = vld [vmem:[%s3588_s13 + $0x90] sm:$0xff]  ;;  %v3740_v41 = vld [vmem:[%s3588_s13 + $0xa0] sm:$0xff]  ;;  %v3748_v43 = vld [vmem:[%s3588_s13 + $0x78] sm:$0xff] }
  0x25   : > { %2874 = vmatpush3.msra.mxu1 %v3675_v26  ;;  %458 = vmatprep.subr.mxu0 %v3678_v27  ;;  %v3743_v42 = vld [vmem:[%s3588_s13 + $0x80] sm:$0xff]  ;;  %v3753_v44 = vld [vmem:[%s3588_s13 + $0x88] sm:$0xff]  ;;  %v3766_v47 = vld [vmem:[%s3588_s13 + $0x70] sm:$0xff] }
  0x26   : > { %2875 = vmatprep.subr.mxu1 %v5139_v0  ;;  %459 = vmatpush1.msra.mxu0 %v3683_v28  ;;  %v3756_v45 = vld [vmem:[%s3588_s13 + $0x68] sm:$0xff]  ;;  %v3761_v46 = vld [vmem:[%s3588_s13 + $0x60] sm:$0xff]  ;;  %v3769_v48 = vld [vmem:[%s3588_s13 + $0x50] sm:$0xff] }
  0x27   : > { %2876 = vmatpush3.msra.mxu1 %v3688_v29  ;;  %460 = vmatprep.subr.mxu0 %v3691_v30  ;;  %v3774_v49 = vld [vmem:[%s3588_s13 + $0x48] sm:$0xff]  ;;  %v3779_v50 = vld [vmem:[%s3588_s13 + $0x58] sm:$0xff]  ;;  %v3787_v52 = vld [vmem:[%s3588_s13 + $0x30] sm:$0xff] }
  0x28   : > { %2877 = vmatprep.subr.mxu1 %v5139_v0  ;;  %461 = vmatpush1.msra.mxu0 %v3696_v31  ;;  %5261 = vst [vmem:[#allocation7_spill] sm:$0xff] %v3774_v49  ;;  %5262 = vst [vmem:[#allocation8_spill] sm:$0xff] %v3779_v50  ;;  %v3782_v51 = vld [vmem:[%s3588_s13 + $0x38] sm:$0xff]  ;;  %v3792_v53 = vld [vmem:[%s3588_s13 + $0x40] sm:$0xff] }
  0x29   : > { %2878 = vmatpush3.msra.mxu1 %v3701_v32  ;;  %462 = vmatprep.subr.mxu0 %v3704_v33  ;;  %5263 = vst [vmem:[#allocation9_spill] sm:$0xff] %v3782_v51  ;;  %5264 = vst [vmem:[#allocation10_spill] sm:$0xff] %v3787_v52  ;;  %v3795_v54 = vld [vmem:[%s3588_s13 + $0x20] sm:$0xff]  ;;  %v3800_v55 = vld [vmem:[%s3588_s13 + $0x18] sm:$0xff] }
  0x2a   : > { %2879 = vmatprep.subr.mxu1 %v5139_v0  ;;  %463 = vmatpush1.msra.mxu0 %v3709_v34  ;;  %5265 = vst [vmem:[#allocation11_spill] sm:$0xff] %v3792_v53  ;;  %5266 = vst [vmem:[#allocation12_spill] sm:$0xff] %v3795_v54  ;;  %v3805_v56 = vld [vmem:[%s3588_s13 + $0x28] sm:$0xff]  ;;  %v3813_v58 = vld [vmem:[%s3588_s13] sm:$0xff] }
  0x2b   : > { %2880 = vmatpush3.msra.mxu1 %v3714_v35  ;;  %464 = vmatprep.subr.mxu0 %v3717_v36  ;;  %5267 = vst [vmem:[#allocation13_spill] sm:$0xff] %v3800_v55  ;;  %5268 = vst [vmem:[#allocation14_spill] sm:$0xff] %v3805_v56  ;;  %v3808_v57 = vld [vmem:[%s3588_s13 + $0x8] sm:$0xff]  ;;  %v3818_v59 = vld [vmem:[%s3588_s13 + $0x10] sm:$0xff] }
  0x2c   : > { %2881 = vmatprep.subr.mxu1 %v5139_v0  ;;  %465 = vmatpush1.msra.mxu0 %v3722_v37  ;;  %5269 = vst [vmem:[#allocation15_spill] sm:$0xff] %v3808_v57  ;;  %5270 = vst [vmem:[#allocation16_spill] sm:$0xff] %v3813_v58  ;;  %v353_v13 = vld [vmem:[%s287_s23] sm:$0x7] }
  0x2d   : > { %2882 = vmatpush3.msra.mxu1 %v3727_v38  ;;  %466 = vmatprep.subr.mxu0 %v3730_v39  ;;  %5271 = vst [vmem:[#allocation17_spill] sm:$0xff] %v3818_v59 }
  0x2e   : > { %2883 = vmatprep.subr.mxu1 %v5139_v0  ;;  %467 = vmatpush1.msra.mxu0 %v3735_v40 }
  0x2f   : > { %2884 = vmatpush3.msra.mxu1 %v3740_v41  ;;  %468 = vmatprep.subr.mxu0 %v3743_v42 }
  0x30   : > { %2885 = vmatprep.subr.mxu1 %v5139_v0  ;;  %469 = vmatpush1.msra.mxu0 %v3748_v43 }
  0x31   : > { %2886 = vmatpush3.msra.mxu1 %v3753_v44  ;;  %470 = vmatprep.subr.mxu0 %v3756_v45 }
  0x32   : > { %2887 = vmatprep.subr.mxu1 %v5139_v0  ;;  %471 = vmatpush1.msra.mxu0 %v3761_v46 }
  0x33   : > { %2888 = vmatpush3.msra.mxu1 %v3766_v47  ;;  %472 = vmatprep.subr.mxu0 %v3769_v48 }
  0x34   : > { %2889 = vmatprep.subr.mxu1 %v5139_v0  ;;  %473 = vmatpush1.msra.mxu0 %v3774_v49 }
  0x35   : > { %2890 = vmatpush3.msra.mxu1 %v3779_v50  ;;  %474 = vmatprep.subr.mxu0 %v3782_v51 }
  0x36   : > { %2891 = vmatprep.subr.mxu1 %v5139_v0  ;;  %475 = vmatpush1.msra.mxu0 %v3787_v52 }
  0x37   : > { %2892 = vmatpush3.msra.mxu1 %v3792_v53  ;;  %476 = vmatprep.subr.mxu0 %v3795_v54 }
  0x38   : > { %2893 = vmatprep.subr.mxu1 %v5139_v0  ;;  %477 = vmatpush1.msra.mxu0 %v3800_v55 }
  0x39   : > { %2894 = vmatpush3.msra.mxu1 %v3805_v56  ;;  %478 = vmatprep.subr.mxu0 %v3808_v57 }
  0x3a   : > { %2895 = vmatprep.subr.mxu1 %v5139_v0  ;;  %479 = vmatpush1.msra.mxu0 %v3813_v58 }
  0x3b   : > { %2896 = vmatpush3.msra.mxu1 %v3818_v59  ;;  %711 = vmatprep.subr.mxu0 %v3605_v7 }
  0x3c   : > { %2900 = vmatprep.subr.mxu1 %v5139_v0 }
  0x91   : > { %v424_v19 = vpop.permute.xlu0 %423 }
  0x92   : > { %v427_v9 = vsel %vm426_vm4, %v414_v17, %v424_v19 }
  0x93   : > { %v429_v8 = vsel %vm428_vm5, %v427_v9, 0.0 }
  0x94   : > { %2720 = vmatmul.mubr.msk.f32.vlgmr.msra.gmra.mxu0 %vm430_vm6, %v429_v8  ;;  %2898 = vmatmul.mubr.msk.f32.vlgmr.msra.gmra.mxu1 %vm430_vm6, %v429_v8  ;;  %v433_v8 = vlaneseq }
  0x95   : > { %712 = vmatpush1.msra.mxu0 %v3611_v10  ;;  %2901 = vmatpush3.msra.mxu1 %v3614_v11 }
  0x96   : > { %713 = vmatprep.subr.mxu0 %v3617_v12  ;;  %2902 = vmatprep.subr.mxu1 %v5139_v0  ;;  %v434_v9 = vshrl.u32 %v433_v8, 7 }
  0x97   : > { %714 = vmatpush1.msra.mxu0 %v3627_v14  ;;  %2903 = vmatpush3.msra.mxu1 %v3630_v15 }
  0x98   : > { %715 = vmatprep.subr.mxu0 %v3633_v16  ;;  %2904 = vmatprep.subr.mxu1 %v5139_v0  ;;  %v435_v62 = vsub.s32 0, %v434_v9  ;;  %v439_v17 = vsub.s32 1, %v434_v9  ;;  %v443_v6 = vsub.s32 2, %v434_v9 }
  0x99   : > { %716 = vmatpush1.msra.mxu0 %v3641_v18  ;;  %2905 = vmatpush3.msra.mxu1 %v3649_v20 }
  0x9a   : > { %717 = vmatprep.subr.mxu0 %v3652_v21  ;;  %2906 = vmatprep.subr.mxu1 %v5139_v0  ;;  %v3918_v19 = vrot.slane %v353_v13, %v435_v62  ;;  %v3920_v5 = vrot.slane %v353_v13, %v439_v17 }
  0x9b   : > { %718 = vmatpush1.msra.mxu0 %v3657_v22  ;;  %2907 = vmatpush3.msra.mxu1 %v3662_v23 }
  0x9c   : > { %719 = vmatprep.subr.mxu0 %v3665_v24  ;;  %2908 = vmatprep.subr.mxu1 %v5139_v0  ;;  %5272 = vst [vmem:[#allocation18_spill] sm:$0xff] %v3918_v19  ;;  %5273 = vst [vmem:[#allocation19_spill] sm:$0xff] %v3920_v5 }
  0x9d   : > { %720 = vmatpush1.msra.mxu0 %v3670_v25  ;;  %2909 = vmatpush3.msra.mxu1 %v3675_v26 }
  0x9e   : > { %721 = vmatprep.subr.mxu0 %v3678_v27  ;;  %2910 = vmatprep.subr.mxu1 %v5139_v0 }
  0x9f   : > { %722 = vmatpush1.msra.mxu0 %v3683_v28  ;;  %2911 = vmatpush3.msra.mxu1 %v3688_v29 }
  0xa0   : > { %723 = vmatprep.subr.mxu0 %v3691_v30  ;;  %2912 = vmatprep.subr.mxu1 %v5139_v0 }
  0xa1   : > { %724 = vmatpush1.msra.mxu0 %v3696_v31  ;;  %2913 = vmatpush3.msra.mxu1 %v3701_v32 }
  0xa2   : > { %725 = vmatprep.subr.mxu0 %v3704_v33  ;;  %2914 = vmatprep.subr.mxu1 %v5139_v0 }
  0xa3   : > { %726 = vmatpush1.msra.mxu0 %v3709_v34  ;;  %2915 = vmatpush3.msra.mxu1 %v3714_v35 }
  0xa4   : > { %727 = vmatprep.subr.mxu0 %v3717_v36  ;;  %2916 = vmatprep.subr.mxu1 %v5139_v0 }
  0xa5   : > { %728 = vmatpush1.msra.mxu0 %v3722_v37  ;;  %2917 = vmatpush3.msra.mxu1 %v3727_v38 }
  0xa6   : > { %729 = vmatprep.subr.mxu0 %v3730_v39  ;;  %2918 = vmatprep.subr.mxu1 %v5139_v0 }
  0xa7   : > { %730 = vmatpush1.msra.mxu0 %v3735_v40  ;;  %2919 = vmatpush3.msra.mxu1 %v3740_v41 }
  0xa8   : > { %731 = vmatprep.subr.mxu0 %v3743_v42  ;;  %2920 = vmatprep.subr.mxu1 %v5139_v0 }
  0xa9   : > { %732 = vmatpush1.msra.mxu0 %v3748_v43  ;;  %2921 = vmatpush3.msra.mxu1 %v3753_v44 }
  0xaa   : > { %733 = vmatprep.subr.mxu0 %v3756_v45  ;;  %2922 = vmatprep.subr.mxu1 %v5139_v0 }
  0xab   : > { %734 = vmatpush1.msra.mxu0 %v3761_v46  ;;  %2923 = vmatpush3.msra.mxu1 %v3766_v47 }
  0xac   : > { %735 = vmatprep.subr.mxu0 %v3769_v48  ;;  %2924 = vmatprep.subr.mxu1 %v5139_v0 }
  0xad   : > { %736 = vmatpush1.msra.mxu0 %v3774_v49  ;;  %2925 = vmatpush3.msra.mxu1 %v3779_v50 }
  0xae   : > { %737 = vmatprep.subr.mxu0 %v3782_v51  ;;  %2926 = vmatprep.subr.mxu1 %v5139_v0 }
  0xaf   : > { %738 = vmatpush1.msra.mxu0 %v3787_v52  ;;  %2927 = vmatpush3.msra.mxu1 %v3792_v53 }
  0xb0   : > { %739 = vmatprep.subr.mxu0 %v3795_v54  ;;  %2928 = vmatprep.subr.mxu1 %v5139_v0 }
  0xb1   : > { %740 = vmatpush1.msra.mxu0 %v3800_v55  ;;  %2929 = vmatpush3.msra.mxu1 %v3805_v56 }
  0xb2   : > { %741 = vmatprep.subr.mxu0 %v3808_v57  ;;  %2930 = vmatprep.subr.mxu1 %v5139_v0 }
  0xb3   : > { %742 = vmatpush1.msra.mxu0 %v3813_v58  ;;  %775 = vmatprep.mubr.f32.mxu0 %v5139_v0 }
  0xb4   : > { %2931 = vmatpush3.msra.mxu1 %v3818_v59  ;;  %2932 = vmatprep.mubr.msk.f32.mxu1 %vm3484_vm0, %v5139_v0 }
  0xb5   : > { %977 = vmatprep.subr.mxu0 %v3605_v7  ;;  %2935 = vmatprep.subr.mxu1 %v5139_v0  ;;  %v3923_v0 = vrot.slane %v353_v13, %v443_v6 }
  0xb7   : > { %5274 = vst [vmem:[#allocation20_spill] sm:$0xff] %v3923_v0 }
 0x154   : > { %v514_v59 = vpop.f32.mrf.mxu0  ;;  %v585_v58 = vpop.f32.mrf.mxu1 }
 0x155   : > { %v515_v7 = vadd.f32 %v514_v59, %v3918_v19  ;;  %v586_v55 = vadd.f32 %v585_v58, %v3923_v0 }
 0x156   : > { %v516_v57 = vpop.f32.mrf.mxu0  ;;  %v2899_v8 = vpop.f32.mrf.mxu1 }
 0x157   : > { %v517_v56 = vadd.f32 %v516_v57, %v3920_v5  ;;  %590 = vrot.lane.b32.xlu0 %v515_v7, %s3485_s14 }
 0x159   : > { %611 = vrot.lane.b32.xlu1 %v517_v56, %s3486_s25 }
 0x15b   : > { %643 = vrot.lane.b32.xlu0 %v586_v55, %s3486_s25 }
 0x15d   : > { %633 = vrot.lane.b32.xlu1 %v586_v55, %s3485_s14 }
 0x15f   : > { %601 = vrot.lane.b32.xlu0 %v517_v56, %s3485_s14 }
 0x1c9   : > { %v591_v59 = vpop.permute.xlu0 %590 }
 0x1ca   : > { %v593_v6 = vadd.f32 %v591_v59, %v515_v7  ;;  %v3487_v59 = vmov 0  }
 0x1cb   : > { %v612_v9 = vpop.permute.xlu1 %611  ;;  %3192 = vset.pattern.permute.xlu0 %v3487_v59  ;;  %3193 = vset.pattern.permute.xlu1 %v3487_v59 }
 0x1cc   : > { %v594_v62 = vsub.f32 0.0, %v593_v6  ;;  %v297_v6 = vld [vmem:[%s3937_s8] sm:$0xf] }
 0x1cd   : > { %356 = vperm.xlu0 %3192, %v297_v6  }
 0x1ce   : > { %v595_v13 = vmul.f32 1.442695, %v594_v62 }
 0x1cf   : > { %v634_v57 = vpop.permute.xlu1 %633 }
 0x1d0   : > { %3229 = vpow2.f32 %v595_v13  ;;  %v636_v17 = vadd.f32 %v634_v57, %v517_v56 }
 0x1d2   : > { %v637_v8 = vsub.f32 0.0, %v636_v17 }
 0x1d4   : > { %v638_v58 = vmul.f32 1.442695, %v637_v8 }
 0x1d6   : > { %3231 = vpow2.f32 %v638_v58  ;;  %v304_v58 = vld [vmem:[%s3937_s8 + $0x1c] sm:$0xf] }
 0x1dd   : > { %v3230_v0 = vpop.eup %3229 }
 0x1de   : > { %v597_v5 = vadd.f32 1.0, %v3230_v0 }
 0x1e0   : > { %3233 = vrcp.f32 %v597_v5  ;;  %v644_v5 = vpop.permute.xlu0 %643 }
 0x1e3   : > { %v3232_v19 = vpop.eup %3231 }
 0x1e4   : > { %v640_v54 = vadd.f32 1.0, %v3232_v19  ;;  %v602_v59 = vpop.permute.xlu0 %601 }
 0x1e5   : > { %v604_v6 = vadd.f32 %v602_v59, %v515_v7  ;;  %v5163_v59 = vrot.slane %v3597_v3, 3 }
 0x1e6   : > { %3235 = vrcp.f32 %v640_v54 }
 0x1ed   : > { %v3234_v56 = vpop.eup %3233 }
 0x1ee   : > { %v614_v62 = vmul.f32 %v3234_v56, %v612_v9  ;;  %v605_v56 = vsub.f32 0.0, %v604_v6 }
 0x1f0   : > { %616 = vrot.lane.b32.xlu1 %v614_v62, %s3488_s9  ;;  %v606_v62 = vmul.f32 1.442695, %v605_v56 }
 0x1f3   : > { %v3236_v0 = vpop.eup %3235 }
 0x1f4   : > { %v646_v54 = vmul.f32 %v3236_v0, %v644_v5  ;;  %v653_v53 = vsub.f32 1.0, %v3236_v0 }
 0x1f6   : > { %648 = vrot.lane.b32.xlu1 %v646_v54, %s3488_s9 }
 0x262   : > { %v617_v19 = vpop.permute.xlu1 %616 }
 0x263   : > { %v619_v13 = vadd.f32 %v617_v19, %v515_v7 }
 0x265   : > { %3237 = vtanh.f32 %v619_v13  ;;  %v3945_v13 = vpop.permute.xlu0 %356 }
 0x266   : > { %5275 = vst [vmem:[#allocation21_spill] sm:$0xff] %v3945_v13 }
 0x268   : > { %v649_v57 = vpop.permute.xlu1 %648 }
 0x269   : > { %v651_v17 = vadd.f32 %v649_v57, %v586_v55  ;;  %v5158_v55 = vrot.slane %v3591_v1, 5  ;;  %v5157_v57 = vrot.slane %v3594_v2, 4 }
 0x26b   : > { %3239 = vtanh.f32 %v651_v17  ;;  %v689_v6 = vsel %vm410_vm2, %v5157_v57, %v5158_v55 }
 0x26c   : > { %3241 = vpow2.f32 %v606_v62 }
 0x272   : > { %v3238_v8 = vpop.eup %3237 }
 0x273   : > { %623 = vrot.lane.b32.xlu1 %v3238_v8, %s3486_s25  ;;  %v3950_v8 = vsub.f32 1.0, %v3945_v13 }
 0x275   : > { %5276 = vst [vmem:[#allocation22_spill] sm:$0xff] %v3950_v8  ;;  %v630_v62 = vmul.f32 0.0, %v3950_v8  ;;  %v659_v8 = vmul.f32 0.0, %v3236_v0  ;;  %v682_v0 = vsel %vm410_vm2, %v3828_v60, %v3591_v1 }
 0x277   : > { %391 = vperm.xlu1 %3193, %v304_v58  }
 0x278   : > { %v3240_v9 = vpop.eup %3239 }
 0x279   : > { %655 = vrot.lane.b32.xlu0 %v3240_v9, %s3486_s25  ;;  %v3242_v5 = vpop.eup %3241 }
 0x27a   : > { %v608_v54 = vadd.f32 1.0, %v3242_v5  ;;  %v5164_v5 = vrot.slane %v3600_v4, 2 }
 0x27c   : > { %3243 = vrcp.f32 %v608_v54 }
 0x289   : > { %v3244_v19 = vpop.eup %3243 }
 0x28a   : > { %v621_v17 = vsub.f32 1.0, %v3244_v19  ;;  %v627_v7 = vmul.f32 0.0, %v3244_v19  ;;  %v691_v19 = vsel %vm413_vm3, %v5163_v59, %v689_v6 }
 0x2e5   : > { %v624_v58 = vpop.permute.xlu1 %623 }
 0x2e6   : > { %v626_v9 = vmul.f32 %v624_v58, %v621_v17 }
 0x2e8   : > { %v628_v56 = vadd.f32 %v627_v7, %v626_v9  ;;  %v693_v9 = vsel %vm684_vm7, %v5164_v5, %v691_v19  ;;  %v5290_v5 = vld [vmem:[#allocation18_spill] sm:$0xff] }
 0x2ea   : > { %v629_v54 = vmul.f32 %v628_v56, %v3945_v13  ;;  %v5291_v13 = vld [vmem:[#allocation19_spill] sm:$0xff] }
 0x2eb   : > { %v656_v58 = vpop.permute.xlu0 %655 }
 0x2ec   : > { %v3964_v17 = vadd.f32 %v630_v62, %v629_v54  ;;  %v658_v57 = vmul.f32 %v656_v58, %v653_v53 }
 0x2ee   : > { %5277 = vst [vmem:[#allocation23_spill] sm:$0xff] %v3964_v17  ;;  %v698_v7 = vrot.slane %v3964_v17, 7  ;;  %v660_v56 = vadd.f32 %v659_v8, %v658_v57 }
 0x2f0   : > { %v3194_v55 = vpack.i.bf16 %v698_v7, %v693_v9 }
 0x2f2   : > { %v3970_v2 = vpop.permute.xlu1 %391  ;;  %3195 = vrot.lane.b32.xlu1 %v3194_v55, %s3485_s14  ;;  %v683_v55 = vsel %vm413_vm3, %v3831_v61, %v682_v0  ;;  %v5281_v0 = vmov 0.0  }
 0x2f3   : > { %5278 = vst [vmem:[#allocation24_spill] sm:$0xff] %v3970_v2  ;;  %v3974_v6 = vsub.f32 1.0, %v3970_v2  ;;  %v661_v62 = vmul.f32 %v660_v56, %v3970_v2  ;;  %v685_v57 = vsel %vm684_vm7, %v3837_v63, %v683_v55  ;;  %v5282_v55 = vld [vmem:[#allocation11_spill] sm:$0xff] }
 0x2f5   : > { %5279 = vst [vmem:[#allocation25_spill] sm:$0xff] %v3974_v6  ;;  %v662_v54 = vmul.f32 0.0, %v3974_v6 }
 0x2f7   : > { %v3979_v59 = vadd.f32 %v662_v54, %v661_v62 }
 0x2f9   : > { %v3988_v53 = vmul.f32 %v3979_v59, %v3970_v2  ;;  %v703_v7 = vrot.slane %v3979_v59, 7 }
 0x2fb   : > { %5280 = vst [vmem:[#allocation26_spill] sm:$0xff] %v3988_v53  ;;  %673 = vst.msk [vmem:[%s3984_s15 + $0xc] sm:$0xf] %vm672_vm8, %v3988_v53 }
 0x364   : > { %v3196_v8 = vpop.permute.xlu1 %3195 }
 0x365   : > { %v3198_v19 = vunpack.i.h.bf16 %v3196_v8  ;;  %v3197_v58 = vunpack.i.l.bf16 %v3196_v8  ;;  %v5284_v8 = vld [vmem:[#allocation13_spill] sm:$0xff] }
 0x367   : > { %v705_v9 = vsel %vm426_vm4, %v685_v57, %v3197_v58  ;;  %v5283_v57 = vld [vmem:[#allocation12_spill] sm:$0xff]  ;;  %v5286_v58 = vld [vmem:[#allocation15_spill] sm:$0xff] }
 0x368   : > { %v706_v56 = vsel %vm428_vm5, %v705_v9, %v3198_v19  ;;  %v5285_v19 = vld [vmem:[#allocation14_spill] sm:$0xff]  ;;  %v5287_v9 = vld [vmem:[#allocation16_spill] sm:$0xff] }
 0x369   : > { %v707_v62 = vsel %vm430_vm6, %v706_v56, %v703_v7  ;;  %v5288_v7 = vld [vmem:[#allocation17_spill] sm:$0xff]  ;;  %v5289_v56 = vld [vmem:[#allocation6_spill] sm:$0xff] }
 0x36a   : > { %v709_v54 = vrot.slane %v707_v62, 1 }
 0x36c   : > { %776 = vmatmul.mubr.f32.vlgmr.msra.gmra.mxu0 %v709_v54  ;;  %2933 = vmatmul.mubr.f32.vlgmr.msra.gmra.mxu1 %v709_v54 }
 0x36d   : > { %978 = vmatpush1.msra.mxu0 %v3611_v10  ;;  %2936 = vmatpush3.msra.mxu1 %v3614_v11 }
 0x36e   : > { %979 = vmatprep.subr.mxu0 %v3617_v12  ;;  %2937 = vmatprep.subr.mxu1 %v5281_v0 }
 0x36f   : > { %980 = vmatpush1.msra.mxu0 %v3627_v14  ;;  %2938 = vmatpush3.msra.mxu1 %v3630_v15 }
 0x370   : > { %981 = vmatprep.subr.mxu0 %v3633_v16  ;;  %2939 = vmatprep.subr.mxu1 %v5281_v0 }
 0x371   : > { %982 = vmatpush1.msra.mxu0 %v3641_v18  ;;  %2940 = vmatpush3.msra.mxu1 %v3649_v20 }
 0x372   : > { %983 = vmatprep.subr.mxu0 %v3652_v21  ;;  %2941 = vmatprep.subr.mxu1 %v5281_v0 }
 0x373   : > { %984 = vmatpush1.msra.mxu0 %v3657_v22  ;;  %2942 = vmatpush3.msra.mxu1 %v3662_v23 }
 0x374   : > { %985 = vmatprep.subr.mxu0 %v3665_v24  ;;  %2943 = vmatprep.subr.mxu1 %v5281_v0 }
 0x375   : > { %986 = vmatpush1.msra.mxu0 %v3670_v25  ;;  %2944 = vmatpush3.msra.mxu1 %v3675_v26 }
 0x376   : > { %987 = vmatprep.subr.mxu0 %v3678_v27  ;;  %2945 = vmatprep.subr.mxu1 %v5281_v0 }
 0x377   : > { %988 = vmatpush1.msra.mxu0 %v3683_v28  ;;  %2946 = vmatpush3.msra.mxu1 %v3688_v29 }
 0x378   : > { %989 = vmatprep.subr.mxu0 %v3691_v30  ;;  %2947 = vmatprep.subr.mxu1 %v5281_v0 }
 0x379   : > { %990 = vmatpush1.msra.mxu0 %v3696_v31  ;;  %2948 = vmatpush3.msra.mxu1 %v3701_v32 }
 0x37a   : > { %991 = vmatprep.subr.mxu0 %v3704_v33  ;;  %2949 = vmatprep.subr.mxu1 %v5281_v0 }
 0x37b   : > { %992 = vmatpush1.msra.mxu0 %v3709_v34  ;;  %2950 = vmatpush3.msra.mxu1 %v3714_v35 }
 0x37c   : > { %993 = vmatprep.subr.mxu0 %v3717_v36  ;;  %2951 = vmatprep.subr.mxu1 %v5281_v0 }
 0x37d   : > { %994 = vmatpush1.msra.mxu0 %v3722_v37  ;;  %2952 = vmatpush3.msra.mxu1 %v3727_v38 }
 0x37e   : > { %995 = vmatprep.subr.mxu0 %v3730_v39  ;;  %2953 = vmatprep.subr.mxu1 %v5281_v0 }
 0x37f   : > { %996 = vmatpush1.msra.mxu0 %v3735_v40  ;;  %2954 = vmatpush3.msra.mxu1 %v3740_v41 }
 0x380   : > { %997 = vmatprep.subr.mxu0 %v3743_v42  ;;  %2955 = vmatprep.subr.mxu1 %v5281_v0 }
 0x381   : > { %998 = vmatpush1.msra.mxu0 %v3748_v43  ;;  %2956 = vmatpush3.msra.mxu1 %v3753_v44 }
 0x382   : > { %999 = vmatprep.subr.mxu0 %v3756_v45  ;;  %2957 = vmatprep.subr.mxu1 %v5281_v0 }
 0x383   : > { %1000 = vmatpush1.msra.mxu0 %v3761_v46  ;;  %2958 = vmatpush3.msra.mxu1 %v3766_v47 }
 0x384   : > { %1001 = vmatprep.subr.mxu0 %v3769_v48  ;;  %2959 = vmatprep.subr.mxu1 %v5281_v0 }
 0x385   : > { %1002 = vmatpush1.msra.mxu0 %v3774_v49  ;;  %2960 = vmatpush3.msra.mxu1 %v3779_v50 }
 0x386   : > { %1003 = vmatprep.subr.mxu0 %v3782_v51  ;;  %2961 = vmatprep.subr.mxu1 %v5281_v0 }
 0x387   : > { %1004 = vmatpush1.msra.mxu0 %v3787_v52  ;;  %2962 = vmatpush3.msra.mxu1 %v5282_v55 }
 0x388   : > { %1005 = vmatprep.subr.mxu0 %v5283_v57  ;;  %2963 = vmatprep.subr.mxu1 %v5281_v0 }
 0x389   : > { %1006 = vmatpush1.msra.mxu0 %v5284_v8  ;;  %2964 = vmatpush3.msra.mxu1 %v5285_v19  ;;  %v303_v19 = vld [vmem:[%s3937_s8 + $0x18] sm:$0xf] }
 0x38a   : > { %1007 = vmatprep.subr.mxu0 %v5286_v58  ;;  %2965 = vmatprep.subr.mxu1 %v5281_v0 }
 0x38b   : > { %1008 = vmatpush1.msra.mxu0 %v5287_v9  ;;  %1041 = vmatprep.mubr.f32.mxu0 %v5281_v0 }
 0x38c   : > { %2966 = vmatpush3.msra.mxu1 %v5288_v7  ;;  %2967 = vmatprep.mubr.msk.f32.mxu1 %vm3484_vm0, %v5281_v0  ;;  %v5292_v7 = vld [vmem:[#allocation20_spill] sm:$0xff] }
 0x38d   : > { %1237 = vmatprep.subr.mxu0 %v5289_v56  ;;  %2970 = vmatprep.subr.mxu1 %v5281_v0  ;;  %v298_v56 = vld [vmem:[%s3937_s8 + $0x4] sm:$0xf] }
 0x42c   : > { %v777_v62 = vpop.f32.mrf.mxu0  ;;  %v848_v54 = vpop.f32.mrf.mxu1 }
 0x42d   : > { %v778_v2 = vadd.f32 %v777_v62, %v5290_v5  ;;  %v849_v58 = vadd.f32 %v848_v54, %v5292_v7 }
 0x42e   : > { %v779_v53 = vpop.f32.mrf.mxu0  ;;  %v2934_v6 = vpop.f32.mrf.mxu1 }
 0x42f   : > { %v780_v9 = vadd.f32 %v779_v53, %v5291_v13  ;;  %853 = vrot.lane.b32.xlu0 %v778_v2, %s3485_s14 }
 0x431   : > { %874 = vrot.lane.b32.xlu1 %v780_v9, %s3486_s25 }
 0x433   : > { %896 = vrot.lane.b32.xlu0 %v849_v58, %s3485_s14 }
 0x435   : > { %906 = vrot.lane.b32.xlu1 %v849_v58, %s3486_s25 }
 0x439   : > { %864 = vrot.lane.b32.xlu1 %v780_v9, %s3485_s14 }
 0x43d   : > { %361 = vperm.xlu1 %3193, %v298_v56  }
 0x441   : > { %386 = vperm.xlu1 %3193, %v303_v19  }
 0x4a1   : > { %v854_v62 = vpop.permute.xlu0 %853 }
 0x4a2   : > { %v856_v6 = vadd.f32 %v854_v62, %v778_v2 }
 0x4a3   : > { %v875_v50 = vpop.permute.xlu1 %874 }
 0x4a4   : > { %v857_v5 = vsub.f32 0.0, %v856_v6 }
 0x4a5   : > { %v897_v53 = vpop.permute.xlu0 %896 }
 0x4a6   : > { %v858_v13 = vmul.f32 1.442695, %v857_v5  ;;  %v899_v8 = vadd.f32 %v897_v53, %v780_v9 }
 0x4a7   : > { %v907_v62 = vpop.permute.xlu1 %906 }
 0x4a8   : > { %3245 = vpow2.f32 %v858_v13  ;;  %v900_v54 = vsub.f32 0.0, %v899_v8 }
 0x4aa   : > { %v901_v7 = vmul.f32 1.442695, %v900_v54 }
 0x4ac   : > { %3247 = vpow2.f32 %v901_v7 }
 0x4b5   : > { %v3246_v57 = vpop.eup %3245 }
 0x4b6   : > { %v860_v55 = vadd.f32 1.0, %v3246_v57 }
 0x4b8   : > { %3249 = vrcp.f32 %v860_v55 }
 0x4b9   : > { %v3248_v52 = vpop.eup %3247 }
 0x4ba   : > { %v903_v51 = vadd.f32 1.0, %v3248_v52 }
 0x4bc   : > { %3251 = vrcp.f32 %v903_v51 }
 0x4c5   : > { %v3250_v56 = vpop.eup %3249 }
 0x4c6   : > { %v877_v49 = vmul.f32 %v3250_v56, %v875_v50  ;;  %v865_v50 = vpop.permute.xlu1 %864 }
 0x4c7   : > { %v867_v52 = vadd.f32 %v865_v50, %v778_v2 }
 0x4c8   : > { %879 = vrot.lane.b32.xlu0 %v877_v49, %s3488_s9 }
 0x4c9   : > { %v3252_v19 = vpop.eup %3251  ;;  %v868_v49 = vsub.f32 0.0, %v867_v52 }
 0x4ca   : > { %v909_v6 = vmul.f32 %v3252_v19, %v907_v62  ;;  %v4085_v56 = vpop.permute.xlu1 %361  ;;  %v5294_v62 = vld [vmem:[#allocation5_spill] sm:$0xff] }
 0x4cb   : > { %v869_v57 = vmul.f32 1.442695, %v868_v49  ;;  %5293 = vst [vmem:[#allocation6_spill] sm:$0xff] %v4085_v56 }
 0x4cc   : > { %911 = vrot.lane.b32.xlu0 %v909_v6, %s3488_s9  ;;  %v5177_v6 = vrot.slane %v5294_v62, 2 }
 0x53a   : > { %v880_v13 = vpop.permute.xlu0 %879 }
 0x53b   : > { %v882_v5 = vadd.f32 %v880_v13, %v778_v2 }
 0x53d   : > { %3253 = vtanh.f32 %v882_v5 }
 0x53e   : > { %v912_v8 = vpop.permute.xlu0 %911 }
 0x53f   : > { %v914_v9 = vadd.f32 %v912_v8, %v849_v58  ;;  %v5178_v58 = vrot.slane %v3591_v1, 3  ;;  %v4090_v8 = vsub.f32 1.0, %v4085_v56 }
 0x541   : > { %3255 = vtanh.f32 %v914_v9  ;;  %5295 = vst [vmem:[#allocation5_spill] sm:$0xff] %v4090_v8  ;;  %v893_v52 = vmul.f32 %v3964_v17, %v4090_v8  ;;  %v4451_v8 = vld [vmem:[%s3588_s13 + $0x30] sm:$0xff] }
 0x542   : > { %3257 = vpow2.f32 %v869_v57  ;;  %5333 = vst [vmem:[#allocation39_spill] sm:$0xff] %v4451_v8 }
 0x54a   : > { %v3254_v55 = vpop.eup %3253 }
 0x54b   : > { %886 = vrot.lane.b32.xlu0 %v3254_v55, %s3486_s25  ;;  %v5179_v55 = vrot.slane %v3597_v3, 1 }
 0x54e   : > { %v3256_v51 = vpop.eup %3255 }
 0x54f   : > { %918 = vrot.lane.b32.xlu0 %v3256_v51, %s3486_s25  ;;  %v3258_v7 = vpop.eup %3257  ;;  %v956_v51 = vsel %vm413_vm3, %v5177_v6, %v5178_v58  ;;  %v4112_v6 = vpop.permute.xlu1 %386 }
 0x550   : > { %v871_v53 = vadd.f32 1.0, %v3258_v7  ;;  %v958_v57 = vsel %vm684_vm7, %v5179_v55, %v956_v51  ;;  %5297 = vst [vmem:[#allocation28_spill] sm:$0xff] %v4112_v6  ;;  %v4115_v51 = vsub.f32 1.0, %v4112_v6 }
 0x552   : > { %3259 = vrcp.f32 %v871_v53  ;;  %v959_v53 = vsel %vm951_vm9, %v3600_v4, %v958_v57  ;;  %5298 = vst [vmem:[#allocation29_spill] sm:$0xff] %v4115_v51  ;;  %v925_v57 = vmul.f32 %v3979_v59, %v4115_v51  ;;  %v4464_v51 = vld [vmem:[%s3588_s13 + $0x18] sm:$0xff] }
 0x553   : > { %5336 = vst [vmem:[#allocation42_spill] sm:$0xff] %v4464_v51 }
 0x55f   : > { %v3260_v54 = vpop.eup %3259 }
 0x560   : > { %v884_v13 = vsub.f32 1.0, %v3260_v54  ;;  %v890_v2 = vmul.f32 %v3260_v54, %v3964_v17  ;;  %v4442_v17 = vld [vmem:[%s3588_s13 + $0x58] sm:$0xff] }
 0x561   : > { %5331 = vst [vmem:[#allocation37_spill] sm:$0xff] %v4442_v17 }
 0x5bd   : > { %v887_v5 = vpop.permute.xlu0 %886 }
 0x5be   : > { %v889_v9 = vmul.f32 %v887_v5, %v884_v13 }
 0x5c0   : > { %v891_v50 = vadd.f32 %v890_v2, %v889_v9  ;;  %v916_v9 = vsub.f32 1.0, %v3252_v19 }
 0x5c1   : > { %v919_v5 = vpop.permute.xlu0 %918 }
 0x5c2   : > { %v892_v49 = vmul.f32 %v891_v50, %v4085_v56  ;;  %v921_v2 = vmul.f32 %v919_v5, %v916_v9  ;;  %v922_v50 = vmul.f32 %v3252_v19, %v3979_v59  ;;  %v4455_v56 = vld [vmem:[%s3588_s13 + $0x40] sm:$0xff] }
 0x5c3   : > { %5334 = vst [vmem:[#allocation40_spill] sm:$0xff] %v4455_v56 }
 0x5c4   : > { %v4105_v7 = vadd.f32 %v893_v52, %v892_v49  ;;  %v923_v58 = vadd.f32 %v922_v50, %v921_v2  ;;  %v949_v52 = vsel %vm413_vm3, %v3828_v60, %v3591_v1 }
 0x5c6   : > { %5296 = vst [vmem:[#allocation27_spill] sm:$0xff] %v4105_v7  ;;  %v964_v54 = vrot.slane %v4105_v7, 6  ;;  %v924_v49 = vmul.f32 %v923_v58, %v4112_v6  ;;  %v4459_v6 = vld [vmem:[%s3588_s13 + $0x20] sm:$0xff] }
 0x5c7   : > { %5335 = vst [vmem:[#allocation41_spill] sm:$0xff] %v4459_v6 }
 0x5c8   : > { %v3199_v13 = vpack.i.bf16 %v964_v54, %v959_v53  ;;  %v950_v53 = vsel %vm684_vm7, %v3831_v61, %v949_v52  ;;  %v4125_v54 = vadd.f32 %v925_v57, %v924_v49 }
 0x5c9   : > { %v952_v19 = vsel %vm951_vm9, %v3837_v63, %v950_v53 }
 0x5ca   : > { %3200 = vrot.lane.b32.xlu1 %v3199_v13, %s3485_s14  ;;  %5299 = vst [vmem:[#allocation30_spill] sm:$0xff] %v4125_v54  ;;  %v969_v50 = vrot.slane %v4125_v54, 6 }
 0x63c   : > { %v3201_v13 = vpop.permute.xlu1 %3200 }
 0x63d   : > { %v3203_v5 = vunpack.i.h.bf16 %v3201_v13  ;;  %v3202_v9 = vunpack.i.l.bf16 %v3201_v13 }
 0x63f   : > { %v971_v2 = vsel %vm426_vm4, %v952_v19, %v3202_v9 }
 0x640   : > { %v972_v58 = vsel %vm428_vm5, %v971_v2, %v3203_v5 }
 0x641   : > { %v973_v55 = vsel %vm430_vm6, %v972_v58, %v969_v50 }
 0x642   : > { %v975_v59 = vrot.slane %v973_v55, 2 }
 0x644   : > { %1042 = vmatmul.mubr.f32.vlgmr.msra.gmra.mxu0 %v975_v59  ;;  %2968 = vmatmul.mubr.f32.vlgmr.msra.gmra.mxu1 %v975_v59 }
 0x645   : > { %1238 = vmatpush1.msra.mxu0 %v3611_v10  ;;  %2971 = vmatpush3.msra.mxu1 %v3614_v11  ;;  %v5300_v10 = vld [vmem:[#allocation7_spill] sm:$0xff]  ;;  %v5301_v11 = vld [vmem:[#allocation8_spill] sm:$0xff] }
 0x646   : > { %1239 = vmatprep.subr.mxu0 %v3617_v12  ;;  %2972 = vmatprep.subr.mxu1 %v5281_v0  ;;  %v5302_v12 = vld [vmem:[#allocation9_spill] sm:$0xff] }
 0x647   : > { %1240 = vmatpush1.msra.mxu0 %v3627_v14  ;;  %2973 = vmatpush3.msra.mxu1 %v3630_v15  ;;  %v5303_v14 = vld [vmem:[#allocation10_spill] sm:$0xff]  ;;  %v5304_v15 = vld [vmem:[#allocation11_spill] sm:$0xff] }
 0x648   : > { %1241 = vmatprep.subr.mxu0 %v3633_v16  ;;  %2974 = vmatprep.subr.mxu1 %v5281_v0  ;;  %v5305_v16 = vld [vmem:[#allocation12_spill] sm:$0xff] }
 0x649   : > { %1242 = vmatpush1.msra.mxu0 %v3641_v18  ;;  %2975 = vmatpush3.msra.mxu1 %v3649_v20  ;;  %v5306_v18 = vld [vmem:[#allocation13_spill] sm:$0xff]  ;;  %v5307_v20 = vld [vmem:[#allocation14_spill] sm:$0xff] }
 0x64a   : > { %1243 = vmatprep.subr.mxu0 %v3652_v21  ;;  %2976 = vmatprep.subr.mxu1 %v5281_v0  ;;  %v5308_v21 = vld [vmem:[#allocation15_spill] sm:$0xff] }
 0x64b   : > { %1244 = vmatpush1.msra.mxu0 %v3657_v22  ;;  %2977 = vmatpush3.msra.mxu1 %v3662_v23  ;;  %v5309_v22 = vld [vmem:[#allocation16_spill] sm:$0xff]  ;;  %v5310_v23 = vld [vmem:[#allocation17_spill] sm:$0xff] }
 0x64c   : > { %1245 = vmatprep.subr.mxu0 %v3665_v24  ;;  %2978 = vmatprep.subr.mxu1 %v5281_v0  ;;  %v4199_v24 = vld [vmem:[%s3588_s13 + $0x170] sm:$0xff] }
 0x64d   : > { %1246 = vmatpush1.msra.mxu0 %v3670_v25  ;;  %2979 = vmatpush3.msra.mxu1 %v3675_v26  ;;  %5311 = vst [vmem:[#allocation7_spill] sm:$0xff] %v4199_v24 }
 0x64e   : > { %1247 = vmatprep.subr.mxu0 %v3678_v27  ;;  %2980 = vmatprep.subr.mxu1 %v5281_v0  ;;  %v5312_v27 = vld [vmem:[#allocation18_spill] sm:$0xff] }
 0x64f   : > { %1248 = vmatpush1.msra.mxu0 %v3683_v28  ;;  %2981 = vmatpush3.msra.mxu1 %v3688_v29 }
 0x650   : > { %1249 = vmatprep.subr.mxu0 %v3691_v30  ;;  %2982 = vmatprep.subr.mxu1 %v5281_v0 }
 0x651   : > { %1250 = vmatpush1.msra.mxu0 %v3696_v31  ;;  %2983 = vmatpush3.msra.mxu1 %v3701_v32  ;;  %v5313_v31 = vld [vmem:[#allocation19_spill] sm:$0xff] }
 0x652   : > { %1251 = vmatprep.subr.mxu0 %v3704_v33  ;;  %2984 = vmatprep.subr.mxu1 %v5281_v0  ;;  %v5314_v33 = vld [vmem:[#allocation20_spill] sm:$0xff] }
 0x653   : > { %1252 = vmatpush1.msra.mxu0 %v3709_v34  ;;  %2985 = vmatpush3.msra.mxu1 %v3714_v35  ;;  %v299_v35 = vld [vmem:[%s3937_s8 + $0x8] sm:$0xf] }
 0x654   : > { %1253 = vmatprep.subr.mxu0 %v3717_v36  ;;  %2986 = vmatprep.subr.mxu1 %v5281_v0  ;;  %v302_v36 = vld [vmem:[%s3937_s8 + $0x14] sm:$0xf] }
 0x655   : > { %1254 = vmatpush1.msra.mxu0 %v3722_v37  ;;  %2987 = vmatpush3.msra.mxu1 %v3727_v38 }
 0x656   : > { %1255 = vmatprep.subr.mxu0 %v3730_v39  ;;  %2988 = vmatprep.subr.mxu1 %v5281_v0 }
 0x657   : > { %1256 = vmatpush1.msra.mxu0 %v3735_v40  ;;  %2989 = vmatpush3.msra.mxu1 %v3740_v41 }
 0x658   : > { %1257 = vmatprep.subr.mxu0 %v3743_v42  ;;  %2990 = vmatprep.subr.mxu1 %v5281_v0 }
 0x659   : > { %1258 = vmatpush1.msra.mxu0 %v3748_v43  ;;  %2991 = vmatpush3.msra.mxu1 %v3753_v44 }
 0x65a   : > { %1259 = vmatprep.subr.mxu0 %v3756_v45  ;;  %2992 = vmatprep.subr.mxu1 %v5281_v0 }
 0x65b   : > { %1260 = vmatpush1.msra.mxu0 %v3761_v46  ;;  %2993 = vmatpush3.msra.mxu1 %v3766_v47 }
 0x65c   : > { %1261 = vmatprep.subr.mxu0 %v3769_v48  ;;  %2994 = vmatprep.subr.mxu1 %v5281_v0 }
 0x65d   : > { %1262 = vmatpush1.msra.mxu0 %v5300_v10  ;;  %2995 = vmatpush3.msra.mxu1 %v5301_v11 }
 0x65e   : > { %1263 = vmatprep.subr.mxu0 %v5302_v12  ;;  %2996 = vmatprep.subr.mxu1 %v5281_v0 }
 0x65f   : > { %1264 = vmatpush1.msra.mxu0 %v5303_v14  ;;  %2997 = vmatpush3.msra.mxu1 %v5304_v15 }
 0x660   : > { %1265 = vmatprep.subr.mxu0 %v5305_v16  ;;  %2998 = vmatprep.subr.mxu1 %v5281_v0 }
 0x661   : > { %1266 = vmatpush1.msra.mxu0 %v5306_v18  ;;  %2999 = vmatpush3.msra.mxu1 %v5307_v20  ;;  %v4220_v20 = vld [vmem:[%s3583_s10] sm:$0xff] }
 0x662   : > { %1267 = vmatprep.subr.mxu0 %v5308_v21  ;;  %3000 = vmatprep.subr.mxu1 %v5281_v0  ;;  %5316 = vst [vmem:[#allocation9_spill] sm:$0xff] %v4220_v20  ;;  %v5180_v21 = vrot.slane %v4220_v20, 1 }
 0x663   : > { %1268 = vmatpush1.msra.mxu0 %v5309_v22  ;;  %1301 = vmatprep.mubr.f32.mxu0 %v5281_v0 }
 0x664   : > { %3001 = vmatpush3.msra.mxu1 %v5310_v23  ;;  %3002 = vmatprep.mubr.msk.f32.mxu1 %vm3484_vm0, %v5281_v0 }
 0x665   : > { %1498 = vmatprep.subr.mxu0 %v4199_v24  ;;  %3005 = vmatprep.subr.mxu1 %v5281_v0 }
 0x704   : > { %v1043_v25 = vpop.f32.mrf.mxu0  ;;  %v1114_v26 = vpop.f32.mrf.mxu1 }
 0x705   : > { %v1044_v28 = vadd.f32 %v1043_v25, %v5312_v27  ;;  %v1115_v34 = vadd.f32 %v1114_v26, %v5314_v33 }
 0x706   : > { %v1045_v29 = vpop.f32.mrf.mxu0  ;;  %v2969_v30 = vpop.f32.mrf.mxu1 }
 0x707   : > { %v1046_v32 = vadd.f32 %v1045_v29, %v5313_v31  ;;  %1119 = vrot.lane.b32.xlu0 %v1044_v28, %s3485_s14  ;;  %v4230_v30 = vld [vmem:[%s3583_s10 + $0x10] sm:$0xff] }
 0x708   : > { %5319 = vst [vmem:[#allocation12_spill] sm:$0xff] %v4230_v30 }
 0x709   : > { %1140 = vrot.lane.b32.xlu1 %v1046_v32, %s3486_s25 }
 0x70b   : > { %1162 = vrot.lane.b32.xlu0 %v1115_v34, %s3485_s14 }
 0x70d   : > { %1172 = vrot.lane.b32.xlu1 %v1115_v34, %s3486_s25 }
 0x711   : > { %1130 = vrot.lane.b32.xlu1 %v1046_v32, %s3485_s14 }
 0x715   : > { %366 = vperm.xlu1 %3193, %v299_v35  }
 0x719   : > { %381 = vperm.xlu1 %3193, %v302_v36  }
 0x779   : > { %v1120_v37 = vpop.permute.xlu0 %1119 }
 0x77a   : > { %v1122_v38 = vadd.f32 %v1120_v37, %v1044_v28 }
 0x77b   : > { %v1141_v55 = vpop.permute.xlu1 %1140 }
 0x77c   : > { %v1123_v39 = vsub.f32 0.0, %v1122_v38 }
 0x77d   : > { %v1163_v40 = vpop.permute.xlu0 %1162 }
 0x77e   : > { %v1124_v41 = vmul.f32 1.442695, %v1123_v39  ;;  %v1165_v42 = vadd.f32 %v1163_v40, %v1046_v32  ;;  %v5182_v32 = vrot.slane %v4230_v30, 7  ;;  %v4468_v30 = vld [vmem:[%s3588_s13 + $0x28] sm:$0xff] }
 0x77f   : > { %v1173_v53 = vpop.permute.xlu1 %1172  ;;  %5337 = vst [vmem:[#allocation43_spill] sm:$0xff] %v4468_v30 }
 0x780   : > { %3261 = vpow2.f32 %v1124_v41  ;;  %v1166_v43 = vsub.f32 0.0, %v1165_v42  ;;  %v4244_v42 = vld [vmem:[%s3583_s10 + $0x18] sm:$0xff] }
 0x781   : > { %5321 = vst [vmem:[#allocation14_spill] sm:$0xff] %v4244_v42 }
 0x782   : > { %v1167_v44 = vmul.f32 1.442695, %v1166_v43  ;;  %v5181_v43 = vrot.slane %v4244_v42, 6 }
 0x783   : > { %v1131_v59 = vpop.permute.xlu1 %1130 }
 0x784   : > { %3263 = vpow2.f32 %v1167_v44  ;;  %v1133_v10 = vadd.f32 %v1131_v59, %v1044_v28 }
 0x786   : > { %v1134_v11 = vsub.f32 0.0, %v1133_v10 }
 0x788   : > { %v1135_v12 = vmul.f32 1.442695, %v1134_v11 }
 0x78d   : > { %v3262_v45 = vpop.eup %3261 }
 0x78e   : > { %v1126_v46 = vadd.f32 1.0, %v3262_v45 }
 0x790   : > { %3265 = vrcp.f32 %v1126_v46  ;;  %v4217_v16 = vpop.permute.xlu1 %366 }
 0x791   : > { %v3264_v47 = vpop.eup %3263  ;;  %5315 = vst [vmem:[#allocation8_spill] sm:$0xff] %v4217_v16  ;;  %v4224_v23 = vsub.f32 1.0, %v4217_v16 }
 0x792   : > { %v1169_v48 = vadd.f32 1.0, %v3264_v47 }
 0x793   : > { %5317 = vst [vmem:[#allocation10_spill] sm:$0xff] %v4224_v23  ;;  %v1159_v39 = vmul.f32 %v4105_v7, %v4224_v23  ;;  %v4472_v23 = vld [vmem:[%s3588_s13 + $0x8] sm:$0xff] }
 0x794   : > { %3267 = vrcp.f32 %v1169_v48  ;;  %v4226_v26 = vpop.permute.xlu1 %381  ;;  %5338 = vst [vmem:[#allocation44_spill] sm:$0xff] %v4472_v23 }
 0x795   : > { %5318 = vst [vmem:[#allocation11_spill] sm:$0xff] %v4226_v26  ;;  %v4238_v38 = vsub.f32 1.0, %v4226_v26 }
 0x797   : > { %5320 = vst [vmem:[#allocation13_spill] sm:$0xff] %v4238_v38 }
 0x79d   : > { %v3266_v52 = vpop.eup %3265 }
 0x79e   : > { %v1143_v49 = vmul.f32 %v3266_v52, %v1141_v55  ;;  %v1191_v52 = vmul.f32 %v4125_v54, %v4238_v38 }
 0x7a0   : > { %1145 = vrot.lane.b32.xlu0 %v1143_v49, %s3488_s9 }
 0x7a1   : > { %v3268_v57 = vpop.eup %3267 }
 0x7a2   : > { %v1175_v19 = vmul.f32 %v3268_v57, %v1173_v53  ;;  %v1182_v37 = vsub.f32 1.0, %v3268_v57  ;;  %v1188_v40 = vmul.f32 %v3268_v57, %v4125_v54  ;;  %v4438_v54 = vld [vmem:[%s3588_s13 + $0x48] sm:$0xff] }
 0x7a3   : > { %5330 = vst [vmem:[#allocation36_spill] sm:$0xff] %v4438_v54 }
 0x7a4   : > { %1177 = vrot.lane.b32.xlu0 %v1175_v19, %s3488_s9 }
 0x812   : > { %v1146_v13 = vpop.permute.xlu0 %1145 }
 0x813   : > { %v1148_v5 = vadd.f32 %v1146_v13, %v1044_v28 }
 0x815   : > { %3269 = vtanh.f32 %v1148_v5  ;;  %v1209_v5 = vsel %vm684_vm7, %v3828_v60, %v4220_v20 }
 0x816   : > { %v1178_v9 = vpop.permute.xlu0 %1177 }
 0x817   : > { %v1180_v2 = vadd.f32 %v1178_v9, %v1115_v34  ;;  %v3362_v34 = vld [vmem:[%s3583_s10 + $0x8] sm:$0xff]  ;;  %v1210_v9 = vsel %vm951_vm9, %v3831_v61, %v1209_v5  ;;  %v4373_v5 = vld [vmem:[%s3588_s13 + $0xc0] sm:$0xff] }
 0x818   : > { %v1215_v35 = vsel %vm684_vm7, %v3362_v34, %v5180_v21  ;;  %v4303_v34 = vld [vmem:[%s3588_s13 + $0x140] sm:$0xff]  ;;  %v4420_v21 = vld [vmem:[%s3588_s13 + $0x68] sm:$0xff] }
 0x819   : > { %3271 = vtanh.f32 %v1180_v2  ;;  %v1217_v46 = vsel %vm951_vm9, %v5182_v32, %v1215_v35  ;;  %v1212_v2 = vsel %vm1211_vm10, %v3837_v63, %v1210_v9  ;;  %v4308_v35 = vld [vmem:[%s3588_s13 + $0x138] sm:$0xff]  ;;  %v4377_v9 = vld [vmem:[%s3588_s13 + $0xd0] sm:$0xff]  ;;  %5326 = vst [vmem:[#allocation32_spill] sm:$0xff] %v4420_v21 }
 0x81a   : > { %3273 = vpow2.f32 %v1135_v12  ;;  %v1219_v55 = vsel %vm1211_vm10, %v5181_v43, %v1217_v46  ;;  %v4342_v46 = vld [vmem:[%s3588_s13 + $0xf8] sm:$0xff]  ;;  %v4425_v43 = vld [vmem:[%s3588_s13 + $0x60] sm:$0xff]  ;;  %v4429_v32 = vld [vmem:[%s3588_s13 + $0x70] sm:$0xff] }
 0x81b   : > { %5327 = vst [vmem:[#allocation33_spill] sm:$0xff] %v4425_v43  ;;  %5328 = vst [vmem:[#allocation34_spill] sm:$0xff] %v4429_v32 }
 0x822   : > { %v3270_v50 = vpop.eup %3269 }
 0x823   : > { %1152 = vrot.lane.b32.xlu0 %v3270_v50, %s3486_s25 }
 0x826   : > { %v3272_v58 = vpop.eup %3271 }
 0x827   : > { %1184 = vrot.lane.b32.xlu0 %v3272_v58, %s3486_s25  ;;  %v3274_v14 = vpop.eup %3273 }
 0x828   : > { %v1137_v15 = vadd.f32 1.0, %v3274_v14 }
 0x82a   : > { %3275 = vrcp.f32 %v1137_v15 }
 0x837   : > { %v3276_v18 = vpop.eup %3275 }
 0x838   : > { %v1150_v22 = vsub.f32 1.0, %v3276_v18  ;;  %v1156_v29 = vmul.f32 %v3276_v18, %v4105_v7  ;;  %v4282_v18 = vld [vmem:[%s3588_s13 + $0x168] sm:$0xff]  ;;  %v4446_v7 = vld [vmem:[%s3588_s13 + $0x38] sm:$0xff] }
 0x839   : > { %5332 = vst [vmem:[#allocation38_spill] sm:$0xff] %v4446_v7 }
 0x895   : > { %v1153_v25 = vpop.permute.xlu0 %1152 }
 0x896   : > { %v1155_v28 = vmul.f32 %v1153_v25, %v1150_v22  ;;  %v4286_v22 = vld [vmem:[%s3588_s13 + $0x178] sm:$0xff] }
 0x897   : > { %v4290_v25 = vld [vmem:[%s3588_s13 + $0x158] sm:$0xff] }
 0x898   : > { %v1157_v36 = vadd.f32 %v1156_v29, %v1155_v28  ;;  %v4295_v28 = vld [vmem:[%s3588_s13 + $0x150] sm:$0xff]  ;;  %v4299_v29 = vld [vmem:[%s3588_s13 + $0x160] sm:$0xff] }
 0x899   : > { %v1185_v41 = vpop.permute.xlu0 %1184 }
 0x89a   : > { %v1158_v44 = vmul.f32 %v1157_v36, %v4217_v16  ;;  %v1187_v45 = vmul.f32 %v1185_v41, %v1182_v37  ;;  %v4312_v36 = vld [vmem:[%s3588_s13 + $0x148] sm:$0xff]  ;;  %v4329_v41 = vld [vmem:[%s3588_s13 + $0x110] sm:$0xff]  ;;  %v4477_v16 = vld [vmem:[%s3588_s13] sm:$0xff] }
 0x89b   : > { %v4316_v37 = vld [vmem:[%s3588_s13 + $0x128] sm:$0xff]  ;;  %5339 = vst [vmem:[#allocation45_spill] sm:$0xff] %v4477_v16 }
 0x89c   : > { %v4251_v47 = vadd.f32 %v1159_v39, %v1158_v44  ;;  %v1189_v48 = vadd.f32 %v1188_v40, %v1187_v45  ;;  %v4321_v39 = vld [vmem:[%s3588_s13 + $0x120] sm:$0xff]  ;;  %v4325_v40 = vld [vmem:[%s3588_s13 + $0x130] sm:$0xff]  ;;  %v4334_v44 = vld [vmem:[%s3588_s13 + $0x108] sm:$0xff] }
 0x89d   : > { %v4338_v45 = vld [vmem:[%s3588_s13 + $0x118] sm:$0xff] }
 0x89e   : > { %5322 = vst [vmem:[#allocation15_spill] sm:$0xff] %v4251_v47  ;;  %v1190_v49 = vmul.f32 %v1189_v48, %v4226_v26  ;;  %v1224_v57 = vrot.slane %v4251_v47, 5  ;;  %v4347_v48 = vld [vmem:[%s3588_s13 + $0xf0] sm:$0xff] }
 0x8a0   : > { %v4260_v53 = vadd.f32 %v1191_v52, %v1190_v49  ;;  %v3204_v19 = vpack.i.bf16 %v1224_v57, %v1219_v55  ;;  %v4351_v55 = vld [vmem:[%s3588_s13 + $0x100] sm:$0xff]  ;;  %v4360_v49 = vld [vmem:[%s3588_s13 + $0xd8] sm:$0xff]  ;;  %v4364_v57 = vld [vmem:[%s3588_s13 + $0xe8] sm:$0xff] }
 0x8a1   : > { %v4355_v52 = vld [vmem:[%s3588_s13 + $0xe0] sm:$0xff] }
 0x8a2   : > { %v4264_v13 = vmul.f32 %v4260_v53, %v4226_v26  ;;  %3205 = vrot.lane.b32.xlu1 %v3204_v19, %s3485_s14  ;;  %v1229_v11 = vrot.slane %v4260_v53, 5  ;;  %v4368_v19 = vld [vmem:[%s3588_s13 + $0xc8] sm:$0xff]  ;;  %v4482_v26 = vld [vmem:[%s3588_s13 + $0x10] sm:$0xff] }
 0x8a3   : > { %5340 = vst [vmem:[#allocation46_spill] sm:$0xff] %v4482_v26 }
 0x8a4   : > { %5323 = vst [vmem:[#allocation16_spill] sm:$0xff] %v4264_v13  ;;  %1200 = vst.msk [vmem:[%s3984_s15 + $0x8] sm:$0xf] %vm672_vm8, %v4264_v13  ;;  %v4433_v13 = vld [vmem:[%s3588_s13 + $0x50] sm:$0xff] }
 0x8a5   : > { %5329 = vst [vmem:[#allocation35_spill] sm:$0xff] %v4433_v13 }
 0x914   : > { %v3206_v50 = vpop.permute.xlu1 %3205 }
 0x915   : > { %v3208_v58 = vunpack.i.h.bf16 %v3206_v50  ;;  %v3207_v59 = vunpack.i.l.bf16 %v3206_v50  ;;  %v4386_v50 = vld [vmem:[%s3588_s13 + $0xa8] sm:$0xff] }
 0x917   : > { %v1231_v10 = vsel %vm426_vm4, %v1212_v2, %v3207_v59  ;;  %v4381_v2 = vld [vmem:[%s3588_s13 + $0xb0] sm:$0xff]  ;;  %v4394_v59 = vld [vmem:[%s3588_s13 + $0x98] sm:$0xff] }
 0x918   : > { %v1232_v12 = vsel %vm428_vm5, %v1231_v10, %v3208_v58  ;;  %v4390_v58 = vld [vmem:[%s3588_s13 + $0xb8] sm:$0xff]  ;;  %v4399_v10 = vld [vmem:[%s3588_s13 + $0x90] sm:$0xff] }
 0x919   : > { %v1233_v14 = vsel %vm430_vm6, %v1232_v12, %v1229_v11  ;;  %v4403_v11 = vld [vmem:[%s3588_s13 + $0xa0] sm:$0xff] }
 0x91a   : > { %v1235_v15 = vrot.slane %v1233_v14, 3  ;;  %v4407_v12 = vld [vmem:[%s3588_s13 + $0x80] sm:$0xff]  ;;  %v4412_v14 = vld [vmem:[%s3588_s13 + $0x78] sm:$0xff] }
 0x91b   : > { %5324 = vst [vmem:[#allocation17_spill] sm:$0xff] %v4412_v14 }
 0x91c   : > { %1302 = vmatmul.mubr.f32.vlgmr.msra.gmra.mxu0 %v1235_v15  ;;  %3003 = vmatmul.mubr.f32.vlgmr.msra.gmra.mxu1 %v1235_v15  ;;  %v4416_v15 = vld [vmem:[%s3588_s13 + $0x88] sm:$0xff] }
 0x91d   : > { %1499 = vmatpush1.msra.mxu0 %v4282_v18  ;;  %3006 = vmatpush3.msra.mxu1 %v4286_v22  ;;  %5325 = vst [vmem:[#allocation31_spill] sm:$0xff] %v4416_v15 }
 0x91e   : > { %1500 = vmatprep.subr.mxu0 %v4290_v25  ;;  %3007 = vmatprep.subr.mxu1 %v5281_v0 }
 0x91f   : > { %1501 = vmatpush1.msra.mxu0 %v4295_v28  ;;  %3008 = vmatpush3.msra.mxu1 %v4299_v29 }
 0x920   : > { %1502 = vmatprep.subr.mxu0 %v4303_v34  ;;  %3009 = vmatprep.subr.mxu1 %v5281_v0 }
 0x921   : > { %1503 = vmatpush1.msra.mxu0 %v4308_v35  ;;  %3010 = vmatpush3.msra.mxu1 %v4312_v36 }
 0x922   : > { %1504 = vmatprep.subr.mxu0 %v4316_v37  ;;  %3011 = vmatprep.subr.mxu1 %v5281_v0 }
 0x923   : > { %1505 = vmatpush1.msra.mxu0 %v4321_v39  ;;  %3012 = vmatpush3.msra.mxu1 %v4325_v40 }
 0x924   : > { %1506 = vmatprep.subr.mxu0 %v4329_v41  ;;  %3013 = vmatprep.subr.mxu1 %v5281_v0 }
 0x925   : > { %1507 = vmatpush1.msra.mxu0 %v4334_v44  ;;  %3014 = vmatpush3.msra.mxu1 %v4338_v45 }
 0x926   : > { %1508 = vmatprep.subr.mxu0 %v4342_v46  ;;  %3015 = vmatprep.subr.mxu1 %v5281_v0 }
 0x927   : > { %1509 = vmatpush1.msra.mxu0 %v4347_v48  ;;  %3016 = vmatpush3.msra.mxu1 %v4351_v55 }
 0x928   : > { %1510 = vmatprep.subr.mxu0 %v4355_v52  ;;  %3017 = vmatprep.subr.mxu1 %v5281_v0 }
 0x929   : > { %1511 = vmatpush1.msra.mxu0 %v4360_v49  ;;  %3018 = vmatpush3.msra.mxu1 %v4364_v57 }
 0x92a   : > { %1512 = vmatprep.subr.mxu0 %v4368_v19  ;;  %3019 = vmatprep.subr.mxu1 %v5281_v0 }
 0x92b   : > { %1513 = vmatpush1.msra.mxu0 %v4373_v5  ;;  %3020 = vmatpush3.msra.mxu1 %v4377_v9 }
 0x92c   : > { %1514 = vmatprep.subr.mxu0 %v4381_v2  ;;  %3021 = vmatprep.subr.mxu1 %v5281_v0 }
 0x92d   : > { %1515 = vmatpush1.msra.mxu0 %v4386_v50  ;;  %3022 = vmatpush3.msra.mxu1 %v4390_v58 }
 0x92e   : > { %1516 = vmatprep.subr.mxu0 %v4394_v59  ;;  %3023 = vmatprep.subr.mxu1 %v5281_v0 }
 0x92f   : > { %1517 = vmatpush1.msra.mxu0 %v4399_v10  ;;  %3024 = vmatpush3.msra.mxu1 %v4403_v11 }
 0x930   : > { %1518 = vmatprep.subr.mxu0 %v4407_v12  ;;  %3025 = vmatprep.subr.mxu1 %v5281_v0 }
 0x931   : > { %1519 = vmatpush1.msra.mxu0 %v4412_v14  ;;  %3026 = vmatpush3.msra.mxu1 %v4416_v15 }
 0x932   : > { %1520 = vmatprep.subr.mxu0 %v4420_v21  ;;  %3027 = vmatprep.subr.mxu1 %v5281_v0 }
 0x933   : > { %1521 = vmatpush1.msra.mxu0 %v4425_v43  ;;  %3028 = vmatpush3.msra.mxu1 %v4429_v32 }
 0x934   : > { %1522 = vmatprep.subr.mxu0 %v4433_v13  ;;  %3029 = vmatprep.subr.mxu1 %v5281_v0 }
 0x935   : > { %1523 = vmatpush1.msra.mxu0 %v4438_v54  ;;  %3030 = vmatpush3.msra.mxu1 %v4442_v17 }
 0x936   : > { %1524 = vmatprep.subr.mxu0 %v4446_v7  ;;  %3031 = vmatprep.subr.mxu1 %v5281_v0 }
 0x937   : > { %1525 = vmatpush1.msra.mxu0 %v4451_v8  ;;  %3032 = vmatpush3.msra.mxu1 %v4455_v56 }
 0x938   : > { %1526 = vmatprep.subr.mxu0 %v4459_v6  ;;  %3033 = vmatprep.subr.mxu1 %v5281_v0  ;;  %v301_v6 = vld [vmem:[%s3937_s8 + $0x10] sm:$0xf] }
 0x939   : > { %1527 = vmatpush1.msra.mxu0 %v4464_v51  ;;  %3034 = vmatpush3.msra.mxu1 %v4468_v30 }
 0x93a   : > { %1528 = vmatprep.subr.mxu0 %v4472_v23  ;;  %3035 = vmatprep.subr.mxu1 %v5281_v0 }
 0x93b   : > { %1529 = vmatpush1.msra.mxu0 %v4477_v16  ;;  %1562 = vmatprep.mubr.f32.mxu0 %v5281_v0 }
 0x93c   : > { %3036 = vmatpush3.msra.mxu1 %v4482_v26  ;;  %3037 = vmatprep.mubr.msk.f32.mxu1 %vm3484_vm0, %v5281_v0 }
 0x93d   : > { %1761 = vmatprep.subr.mxu0 %v4199_v24  ;;  %3040 = vmatprep.subr.mxu1 %v5281_v0  ;;  %v300_v24 = vld [vmem:[%s3937_s8 + $0xc] sm:$0xf] }
 0x9dc   : > { %v1303_v38 = vpop.f32.mrf.mxu0  ;;  %v1374_v42 = vpop.f32.mrf.mxu1 }
 0x9dd   : > { %v1304_v23 = vadd.f32 %v1303_v38, %v5312_v27  ;;  %v1375_v26 = vadd.f32 %v1374_v42, %v5314_v33 }
 0x9de   : > { %v1305_v16 = vpop.f32.mrf.mxu0  ;;  %v3004_v30 = vpop.f32.mrf.mxu1 }
 0x9df   : > { %v1306_v51 = vadd.f32 %v1305_v16, %v5313_v31  ;;  %1379 = vrot.lane.b32.xlu0 %v1304_v23, %s3485_s14 }
 0x9e1   : > { %1400 = vrot.lane.b32.xlu1 %v1306_v51, %s3486_s25 }
 0x9e3   : > { %1422 = vrot.lane.b32.xlu0 %v1375_v26, %s3485_s14 }
 0x9e5   : > { %1432 = vrot.lane.b32.xlu1 %v1375_v26, %s3486_s25 }
 0x9e9   : > { %1390 = vrot.lane.b32.xlu1 %v1306_v51, %s3485_s14 }
 0x9ed   : > { %371 = vperm.xlu1 %3193, %v300_v24  }
 0x9f1   : > { %376 = vperm.xlu1 %3193, %v301_v6  }
 0xa51   : > { %v1380_v38 = vpop.permute.xlu0 %1379 }
 0xa52   : > { %v1382_v30 = vadd.f32 %v1380_v38, %v1304_v23 }
 0xa53   : > { %v1401_v13 = vpop.permute.xlu1 %1400 }
 0xa54   : > { %v1383_v27 = vsub.f32 0.0, %v1382_v30 }
 0xa55   : > { %v1423_v16 = vpop.permute.xlu0 %1422 }
 0xa56   : > { %v1384_v31 = vmul.f32 1.442695, %v1383_v27  ;;  %v1425_v56 = vadd.f32 %v1423_v16, %v1306_v51 }
 0xa57   : > { %v1433_v38 = vpop.permute.xlu1 %1432 }
 0xa58   : > { %3277 = vpow2.f32 %v1384_v31  ;;  %v1426_v42 = vsub.f32 0.0, %v1425_v56 }
 0xa5a   : > { %v1427_v33 = vmul.f32 1.442695, %v1426_v42 }
 0xa5c   : > { %3279 = vpow2.f32 %v1427_v33 }
 0xa65   : > { %v3278_v8 = vpop.eup %3277 }
 0xa66   : > { %v1386_v7 = vadd.f32 1.0, %v3278_v8 }
 0xa68   : > { %3281 = vrcp.f32 %v1386_v7  ;;  %v1391_v7 = vpop.permute.xlu1 %1390 }
 0xa69   : > { %v3280_v17 = vpop.eup %3279 }
 0xa6a   : > { %v1429_v54 = vadd.f32 1.0, %v3280_v17 }
 0xa6c   : > { %3283 = vrcp.f32 %v1429_v54  ;;  %v1393_v54 = vadd.f32 %v1391_v7, %v1304_v23 }
 0xa6e   : > { %v1394_v33 = vsub.f32 0.0, %v1393_v54  ;;  %v5345_v54 = vrot.slane %v3597_v3, 5 }
 0xa75   : > { %v3282_v24 = vpop.eup %3281 }
 0xa76   : > { %v1403_v32 = vmul.f32 %v3282_v24, %v1401_v13  ;;  %v4503_v24 = vpop.permute.xlu1 %371 }
 0xa77   : > { %5341 = vst [vmem:[#allocation47_spill] sm:$0xff] %v4503_v24 }
 0xa78   : > { %1405 = vrot.lane.b32.xlu0 %v1403_v32, %s3488_s9  ;;  %v1395_v32 = vmul.f32 1.442695, %v1394_v33 }
 0xa79   : > { %v3284_v6 = vpop.eup %3283 }
 0xa7a   : > { %v1435_v30 = vmul.f32 %v3284_v6, %v1433_v38 }
 0xa7c   : > { %1437 = vrot.lane.b32.xlu0 %v1435_v30, %s3488_s9  ;;  %v4506_v30 = vsub.f32 1.0, %v4503_v24 }
 0xa7e   : > { %5342 = vst [vmem:[#allocation48_spill] sm:$0xff] %v4506_v30 }
 0xaea   : > { %v1406_v51 = vpop.permute.xlu0 %1405 }
 0xaeb   : > { %v1408_v56 = vadd.f32 %v1406_v51, %v1304_v23  ;;  %v5344_v23 = vrot.slane %v5294_v62, 6 }
 0xaed   : > { %3285 = vtanh.f32 %v1408_v56 }
 0xaee   : > { %v1438_v27 = vpop.permute.xlu0 %1437 }
 0xaef   : > { %v1440_v31 = vadd.f32 %v1438_v27, %v1375_v26  ;;  %v5343_v27 = vrot.slane %v3591_v1, 7 }
 0xaf1   : > { %3287 = vtanh.f32 %v1440_v31  ;;  %v1478_v31 = vsel %vm951_vm9, %v5344_v23, %v5343_v27  ;;  %v1448_v27 = vmul.f32 %v3284_v6, %v4260_v53  ;;  %v4528_v23 = vpop.permute.xlu1 %376 }
 0xaf2   : > { %3289 = vpow2.f32 %v1395_v32  ;;  %v1479_v33 = vsel %vm1211_vm10, %v5345_v54, %v1478_v31  ;;  %5348 = vst [vmem:[#allocation50_spill] sm:$0xff] %v4528_v23  ;;  %v4531_v31 = vsub.f32 1.0, %v4528_v23 }
 0xaf4   : > { %5349 = vst [vmem:[#allocation51_spill] sm:$0xff] %v4531_v31  ;;  %v1451_v54 = vmul.f32 %v4260_v53, %v4531_v31 }
 0xafa   : > { %v3286_v8 = vpop.eup %3285 }
 0xafb   : > { %1412 = vrot.lane.b32.xlu0 %v3286_v8, %s3486_s25 }
 0xafe   : > { %v3288_v17 = vpop.eup %3287 }
 0xaff   : > { %1444 = vrot.lane.b32.xlu0 %v3288_v17, %s3486_s25  ;;  %v3290_v13 = vpop.eup %3289  ;;  %v1419_v17 = vmul.f32 %v4251_v47, %v4506_v30 }
 0xb00   : > { %v1397_v16 = vadd.f32 1.0, %v3290_v13  ;;  %v5347_v13 = vrot.slane %v3600_v4, 4 }
 0xb02   : > { %3291 = vrcp.f32 %v1397_v16  ;;  %v1480_v16 = vsel %vm1475_vm11, %v5347_v13, %v1479_v33 }
 0xb0f   : > { %v3292_v42 = vpop.eup %3291 }
 0xb10   : > { %v1410_v38 = vsub.f32 1.0, %v3292_v42  ;;  %v1416_v56 = vmul.f32 %v3292_v42, %v4251_v47 }
 0xb6d   : > { %v1413_v26 = vpop.permute.xlu0 %1412 }
 0xb6e   : > { %v1415_v51 = vmul.f32 %v1413_v26, %v1410_v38 }
 0xb70   : > { %v1417_v8 = vadd.f32 %v1416_v56, %v1415_v51  ;;  %v1442_v51 = vsub.f32 1.0, %v3284_v6 }
 0xb71   : > { %v1445_v26 = vpop.permute.xlu0 %1444 }
 0xb72   : > { %v1418_v7 = vmul.f32 %v1417_v8, %v4503_v24  ;;  %v1447_v56 = vmul.f32 %v1445_v26, %v1442_v51 }
 0xb74   : > { %v4520_v32 = vadd.f32 %v1419_v17, %v1418_v7  ;;  %v1449_v8 = vadd.f32 %v1448_v27, %v1447_v56  ;;  %v1473_v17 = vsel %vm951_vm9, %v3828_v60, %v4220_v20 }
 0xb75   : > { %v1474_v33 = vsel %vm1211_vm10, %v3831_v61, %v1473_v17  ;;  %v5352_v17 = vld [vmem:[#allocation35_spill] sm:$0xff] }
 0xb76   : > { %5346 = vst [vmem:[#allocation49_spill] sm:$0xff] %v4520_v32  ;;  %v1485_v42 = vrot.slane %v4520_v32, 4  ;;  %v1450_v7 = vmul.f32 %v1449_v8, %v4528_v23  ;;  %v1476_v6 = vsel %vm1475_vm11, %v3837_v63, %v1474_v33  ;;  %v5351_v8 = vld [vmem:[#allocation34_spill] sm:$0xff] }
 0xb77   : > { %v5355_v33 = vld [vmem:[#allocation38_spill] sm:$0xff] }
 0xb78   : > { %v3209_v38 = vpack.i.bf16 %v1485_v42, %v1480_v16  ;;  %v4541_v13 = vadd.f32 %v1451_v54, %v1450_v7  ;;  %v5353_v7 = vld [vmem:[#allocation36_spill] sm:$0xff]  ;;  %v5354_v54 = vld [vmem:[#allocation37_spill] sm:$0xff] }
 0xb7a   : > { %3210 = vrot.lane.b32.xlu1 %v3209_v38, %s3485_s14  ;;  %5350 = vst [vmem:[#allocation52_spill] sm:$0xff] %v4541_v13  ;;  %v1490_v51 = vrot.slane %v4541_v13, 4 }
 0xbec   : > { %v3211_v16 = vpop.permute.xlu1 %3210 }
 0xbed   : > { %v3213_v42 = vunpack.i.h.bf16 %v3211_v16  ;;  %v3212_v38 = vunpack.i.l.bf16 %v3211_v16  ;;  %v5357_v16 = vld [vmem:[#allocation40_spill] sm:$0xff] }
 0xbef   : > { %v1492_v26 = vsel %vm426_vm4, %v1476_v6, %v3212_v38  ;;  %v5356_v6 = vld [vmem:[#allocation39_spill] sm:$0xff]  ;;  %v5359_v38 = vld [vmem:[#allocation42_spill] sm:$0xff] }
 0xbf0   : > { %v1493_v56 = vsel %vm428_vm5, %v1492_v26, %v3213_v42  ;;  %v5358_v42 = vld [vmem:[#allocation41_spill] sm:$0xff]  ;;  %v5360_v26 = vld [vmem:[#allocation43_spill] sm:$0xff] }
 0xbf1   : > { %v1494_v27 = vsel %vm430_vm6, %v1493_v56, %v1490_v51  ;;  %v5361_v51 = vld [vmem:[#allocation44_spill] sm:$0xff]  ;;  %v5362_v56 = vld [vmem:[#allocation45_spill] sm:$0xff] }
 0xbf2   : > { %v1496_v53 = vrot.slane %v1494_v27, 4  ;;  %v5363_v27 = vld [vmem:[#allocation46_spill] sm:$0xff] }
 0xbf4   : > { %1563 = vmatmul.mubr.f32.vlgmr.msra.gmra.mxu0 %v1496_v53  ;;  %3038 = vmatmul.mubr.f32.vlgmr.msra.gmra.mxu1 %v1496_v53  ;;  %v5364_v53 = vld [vmem:[#allocation7_spill] sm:$0xff] }
 0xbf5   : > { %1762 = vmatpush1.msra.mxu0 %v4282_v18  ;;  %3041 = vmatpush3.msra.mxu1 %v4286_v22 }
 0xbf6   : > { %1763 = vmatprep.subr.mxu0 %v4290_v25  ;;  %3042 = vmatprep.subr.mxu1 %v5281_v0 }
 0xbf7   : > { %1764 = vmatpush1.msra.mxu0 %v4295_v28  ;;  %3043 = vmatpush3.msra.mxu1 %v4299_v29 }
 0xbf8   : > { %1765 = vmatprep.subr.mxu0 %v4303_v34  ;;  %3044 = vmatprep.subr.mxu1 %v5281_v0 }
 0xbf9   : > { %1766 = vmatpush1.msra.mxu0 %v4308_v35  ;;  %3045 = vmatpush3.msra.mxu1 %v4312_v36 }
 0xbfa   : > { %1767 = vmatprep.subr.mxu0 %v4316_v37  ;;  %3046 = vmatprep.subr.mxu1 %v5281_v0 }
 0xbfb   : > { %1768 = vmatpush1.msra.mxu0 %v4321_v39  ;;  %3047 = vmatpush3.msra.mxu1 %v4325_v40 }
 0xbfc   : > { %1769 = vmatprep.subr.mxu0 %v4329_v41  ;;  %3048 = vmatprep.subr.mxu1 %v5281_v0 }
 0xbfd   : > { %1770 = vmatpush1.msra.mxu0 %v4334_v44  ;;  %3049 = vmatpush3.msra.mxu1 %v4338_v45 }
 0xbfe   : > { %1771 = vmatprep.subr.mxu0 %v4342_v46  ;;  %3050 = vmatprep.subr.mxu1 %v5281_v0 }
 0xbff   : > { %1772 = vmatpush1.msra.mxu0 %v4347_v48  ;;  %3051 = vmatpush3.msra.mxu1 %v4351_v55 }
 0xc00   : > { %1773 = vmatprep.subr.mxu0 %v4355_v52  ;;  %3052 = vmatprep.subr.mxu1 %v5281_v0 }
 0xc01   : > { %1774 = vmatpush1.msra.mxu0 %v4360_v49  ;;  %3053 = vmatpush3.msra.mxu1 %v4364_v57 }
 0xc02   : > { %1775 = vmatprep.subr.mxu0 %v4368_v19  ;;  %3054 = vmatprep.subr.mxu1 %v5281_v0 }
 0xc03   : > { %1776 = vmatpush1.msra.mxu0 %v4373_v5  ;;  %3055 = vmatpush3.msra.mxu1 %v4377_v9 }
 0xc04   : > { %1777 = vmatprep.subr.mxu0 %v4381_v2  ;;  %3056 = vmatprep.subr.mxu1 %v5281_v0 }
 0xc05   : > { %1778 = vmatpush1.msra.mxu0 %v4386_v50  ;;  %3057 = vmatpush3.msra.mxu1 %v4390_v58 }
 0xc06   : > { %1779 = vmatprep.subr.mxu0 %v4394_v59  ;;  %3058 = vmatprep.subr.mxu1 %v5281_v0 }
 0xc07   : > { %1780 = vmatpush1.msra.mxu0 %v4399_v10  ;;  %3059 = vmatpush3.msra.mxu1 %v4403_v11 }
 0xc08   : > { %1781 = vmatprep.subr.mxu0 %v4407_v12  ;;  %3060 = vmatprep.subr.mxu1 %v5281_v0 }
 0xc09   : > { %1782 = vmatpush1.msra.mxu0 %v4412_v14  ;;  %3061 = vmatpush3.msra.mxu1 %v4416_v15 }
 0xc0a   : > { %1783 = vmatprep.subr.mxu0 %v4420_v21  ;;  %3062 = vmatprep.subr.mxu1 %v5281_v0 }
 0xc0b   : > { %1784 = vmatpush1.msra.mxu0 %v4425_v43  ;;  %3063 = vmatpush3.msra.mxu1 %v5351_v8 }
 0xc0c   : > { %1785 = vmatprep.subr.mxu0 %v5352_v17  ;;  %3064 = vmatprep.subr.mxu1 %v5281_v0 }
 0xc0d   : > { %1786 = vmatpush1.msra.mxu0 %v5353_v7  ;;  %3065 = vmatpush3.msra.mxu1 %v5354_v54 }
 0xc0e   : > { %1787 = vmatprep.subr.mxu0 %v5355_v33  ;;  %3066 = vmatprep.subr.mxu1 %v5281_v0 }
 0xc0f   : > { %1788 = vmatpush1.msra.mxu0 %v5356_v6  ;;  %3067 = vmatpush3.msra.mxu1 %v5357_v16  ;;  %v5366_v6 = vld [vmem:[#allocation19_spill] sm:$0xff] }
 0xc10   : > { %1789 = vmatprep.subr.mxu0 %v5358_v42  ;;  %3068 = vmatprep.subr.mxu1 %v5281_v0 }
 0xc11   : > { %1790 = vmatpush1.msra.mxu0 %v5359_v38  ;;  %3069 = vmatpush3.msra.mxu1 %v5360_v26  ;;  %v5365_v26 = vld [vmem:[#allocation18_spill] sm:$0xff] }
 0xc12   : > { %1791 = vmatprep.subr.mxu0 %v5361_v51  ;;  %3070 = vmatprep.subr.mxu1 %v5281_v0 }
 0xc13   : > { %1792 = vmatpush1.msra.mxu0 %v5362_v56  ;;  %1825 = vmatprep.mubr.f32.mxu0 %v5281_v0  ;;  %v5367_v56 = vld [vmem:[#allocation20_spill] sm:$0xff] }
 0xc14   : > { %3071 = vmatpush3.msra.mxu1 %v5363_v27  ;;  %3072 = vmatprep.mubr.msk.f32.mxu1 %vm3484_vm0, %v5281_v0 }
 0xc15   : > { %2028 = vmatprep.subr.mxu0 %v5364_v53  ;;  %3075 = vmatprep.subr.mxu1 %v5281_v0 }
 0xcb4   : > { %v1564_v47 = vpop.f32.mrf.mxu0  ;;  %v1635_v38 = vpop.f32.mrf.mxu1 }
 0xcb5   : > { %v1565_v42 = vadd.f32 %v1564_v47, %v5365_v26  ;;  %v1636_v54 = vadd.f32 %v1635_v38, %v5367_v56 }
 0xcb6   : > { %v1566_v51 = vpop.f32.mrf.mxu0  ;;  %v3039_v16 = vpop.f32.mrf.mxu1 }
 0xcb7   : > { %v1567_v33 = vadd.f32 %v1566_v51, %v5366_v6  ;;  %1640 = vrot.lane.b32.xlu0 %v1565_v42, %s3485_s14 }
 0xcb9   : > { %1661 = vrot.lane.b32.xlu1 %v1567_v33, %s3486_s25 }
 0xcbb   : > { %1683 = vrot.lane.b32.xlu0 %v1636_v54, %s3485_s14 }
 0xcbd   : > { %1693 = vrot.lane.b32.xlu1 %v1636_v54, %s3486_s25 }
 0xcc1   : > { %1651 = vrot.lane.b32.xlu1 %v1567_v33, %s3485_s14 }
 0xd29   : > { %v1641_v53 = vpop.permute.xlu0 %1640 }
 0xd2a   : > { %v1643_v27 = vadd.f32 %v1641_v53, %v1565_v42 }
 0xd2b   : > { %v1662_v43 = vpop.permute.xlu1 %1661 }
 0xd2c   : > { %v1644_v7 = vsub.f32 0.0, %v1643_v27 }
 0xd2d   : > { %v1684_v47 = vpop.permute.xlu0 %1683 }
 0xd2e   : > { %v1645_v26 = vmul.f32 1.442695, %v1644_v7  ;;  %v1686_v16 = vadd.f32 %v1684_v47, %v1567_v33 }
 0xd2f   : > { %v1694_v27 = vpop.permute.xlu1 %1693 }
 0xd30   : > { %3293 = vpow2.f32 %v1645_v26  ;;  %v1687_v51 = vsub.f32 0.0, %v1686_v16 }
 0xd32   : > { %v1688_v6 = vmul.f32 1.442695, %v1687_v51 }
 0xd34   : > { %3295 = vpow2.f32 %v1688_v6 }
 0xd3d   : > { %v3294_v17 = vpop.eup %3293 }
 0xd3e   : > { %v1647_v38 = vadd.f32 1.0, %v3294_v17  ;;  %v5368_v17 = vrot.slane %v3591_v1, 5 }
 0xd40   : > { %3297 = vrcp.f32 %v1647_v38 }
 0xd41   : > { %v3296_v56 = vpop.eup %3295 }
 0xd42   : > { %v1690_v8 = vadd.f32 1.0, %v3296_v56 }
 0xd44   : > { %3299 = vrcp.f32 %v1690_v8  ;;  %v5369_v8 = vrot.slane %v5294_v62, 4 }
 0xd46   : > { %v1732_v56 = vsel %vm1211_vm10, %v5369_v8, %v5368_v17 }
 0xd4d   : > { %v3298_v21 = vpop.eup %3297 }
 0xd4e   : > { %v1664_v15 = vmul.f32 %v3298_v21, %v1662_v43  ;;  %v5370_v21 = vrot.slane %v3597_v3, 3 }
 0xd50   : > { %1666 = vrot.lane.b32.xlu0 %v1664_v15, %s3488_s9  ;;  %v1733_v43 = vsel %vm1475_vm11, %v5370_v21, %v1732_v56  ;;  %v1680_v21 = vmul.f32 %v4520_v32, %v4531_v31 }
 0xd51   : > { %v3300_v53 = vpop.eup %3299 }
 0xd52   : > { %v1696_v14 = vmul.f32 %v3300_v53, %v1694_v27 }
 0xd54   : > { %1698 = vrot.lane.b32.xlu0 %v1696_v14, %s3488_s9  ;;  %v5371_v14 = vrot.slane %v3600_v4, 2 }
 0xd56   : > { %v3214_v47 = vpack.i.bf16 %v5371_v14, %v1733_v43 }
 0xdc2   : > { %v1667_v7 = vpop.permute.xlu0 %1666 }
 0xdc3   : > { %v1669_v33 = vadd.f32 %v1667_v7, %v1565_v42 }
 0xdc5   : > { %3301 = vtanh.f32 %v1669_v33 }
 0xdc6   : > { %v1699_v6 = vpop.permute.xlu0 %1698 }
 0xdc7   : > { %v1701_v26 = vadd.f32 %v1699_v6, %v1636_v54  ;;  %v1652_v54 = vpop.permute.xlu1 %1651 }
 0xdc8   : > { %v1654_v51 = vadd.f32 %v1652_v54, %v1565_v42  ;;  %v1709_v54 = vmul.f32 %v3300_v53, %v4541_v13 }
 0xdc9   : > { %3303 = vtanh.f32 %v1701_v26 }
 0xdca   : > { %v1655_v38 = vsub.f32 0.0, %v1654_v51 }
 0xdcc   : > { %v1656_v27 = vmul.f32 1.442695, %v1655_v38 }
 0xdce   : > { %3305 = vpow2.f32 %v1656_v27 }
 0xdd2   : > { %v3302_v15 = vpop.eup %3301 }
 0xdd3   : > { %1673 = vrot.lane.b32.xlu1 %v3302_v15, %s3486_s25 }
 0xdd6   : > { %v3304_v16 = vpop.eup %3303 }
 0xdd7   : > { %1705 = vrot.lane.b32.xlu0 %v3304_v16, %s3486_s25  ;;  %3215 = vrot.lane.b32.xlu1 %v3214_v47, %s3485_s14  ;;  %v1703_v47 = vsub.f32 1.0, %v3300_v53 }
 0xddb   : > { %v3306_v7 = vpop.eup %3305 }
 0xddc   : > { %v1658_v33 = vadd.f32 1.0, %v3306_v7  ;;  %v1728_v7 = vsel %vm1211_vm10, %v3828_v60, %v4220_v20  ;;  %v5392_v20 = vld [vmem:[#allocation19_spill] sm:$0xff] }
 0xdde   : > { %3307 = vrcp.f32 %v1658_v33  ;;  %v1712_v33 = vmul.f32 %v4541_v13, %v4506_v30  ;;  %v5391_v13 = vld [vmem:[#allocation18_spill] sm:$0xff] }
 0xdeb   : > { %v3308_v6 = vpop.eup %3307 }
 0xdec   : > { %v1671_v26 = vsub.f32 1.0, %v3308_v6  ;;  %v1677_v4 = vmul.f32 %v3308_v6, %v4520_v32 }
 0xe45   : > { %v1674_v17 = vpop.permute.xlu1 %1673 }
 0xe46   : > { %v1676_v8 = vmul.f32 %v1674_v17, %v1671_v26  ;;  %v1729_v17 = vsel %vm1475_vm11, %v3831_v61, %v1728_v7  ;;  %v5375_v7 = vld [vmem:[#allocation32_spill] sm:$0xff] }
 0xe48   : > { %v1678_v56 = vadd.f32 %v1677_v4, %v1676_v8 }
 0xe49   : > { %v1706_v14 = vpop.permute.xlu0 %1705  ;;  %v3216_v38 = vpop.permute.xlu1 %3215 }
 0xe4a   : > { %v1679_v43 = vmul.f32 %v1678_v56, %v4528_v23  ;;  %v1708_v16 = vmul.f32 %v1706_v14, %v1703_v47  ;;  %v3218_v6 = vunpack.i.h.bf16 %v3216_v38  ;;  %v3217_v26 = vunpack.i.l.bf16 %v3216_v38  ;;  %v5373_v38 = vld [vmem:[#allocation17_spill] sm:$0xff] }
 0xe4c   : > { %v4643_v15 = vadd.f32 %v1680_v21, %v1679_v43  ;;  %v1710_v51 = vadd.f32 %v1709_v54, %v1708_v16  ;;  %v1748_v53 = vsel %vm426_vm4, %v1729_v17, %v3217_v26  ;;  %v1749_v4 = vsel %vm426_vm4, %v3837_v63, %v3218_v6  ;;  %v5377_v6 = vld [vmem:[#allocation34_spill] sm:$0xff]  ;;  %v5378_v26 = vld [vmem:[#allocation35_spill] sm:$0xff]  ;;  %v5379_v17 = vld [vmem:[#allocation36_spill] sm:$0xff] }
 0xe4e   : > { %v1741_v42 = vrot.slane %v4643_v15, 3  ;;  %v1711_v27 = vmul.f32 %v1710_v51, %v4503_v24 }
 0xe50   : > { %1742 = vrot.lane.b32.xlu0 %v1741_v42, %s3485_s14  ;;  %v4656_v8 = vadd.f32 %v1712_v33, %v1711_v27  ;;  %v5374_v27 = vld [vmem:[#allocation31_spill] sm:$0xff]  ;;  %v5376_v33 = vld [vmem:[#allocation33_spill] sm:$0xff] }
 0xe52   : > { %5372 = vst [vmem:[#allocation53_spill] sm:$0xff] %v4656_v8  ;;  %v1746_v56 = vrot.slane %v4656_v8, 3 }
 0xec2   : > { %v1743_v21 = vpop.permute.xlu0 %1742 }
 0xec3   : > { %v1750_v43 = vsel %vm428_vm5, %v1748_v53, %v1743_v21  ;;  %v1751_v42 = vsel %vm428_vm5, %v1749_v4, %v1743_v21  ;;  %v5380_v53 = vld [vmem:[#allocation37_spill] sm:$0xff]  ;;  %v5381_v4 = vld [vmem:[#allocation38_spill] sm:$0xff]  ;;  %v5383_v21 = vld [vmem:[#allocation40_spill] sm:$0xff] }
 0xec4   : > { %v1752_v14 = vsel %vm430_vm6, %v1750_v43, %v1746_v56  ;;  %v1753_v47 = vsel %vm430_vm6, %v1751_v42, %v1746_v56  ;;  %v5382_v56 = vld [vmem:[#allocation39_spill] sm:$0xff]  ;;  %v5384_v43 = vld [vmem:[#allocation41_spill] sm:$0xff]  ;;  %v5385_v42 = vld [vmem:[#allocation42_spill] sm:$0xff] }
 0xec5   : > { %v1757_v16 = vrot.slane %v1752_v14, 5  ;;  %v1758_v54 = vrot.slane %v1753_v47, 5  ;;  %v5386_v14 = vld [vmem:[#allocation43_spill] sm:$0xff]  ;;  %v5387_v47 = vld [vmem:[#allocation44_spill] sm:$0xff] }
 0xec7   : > { %v1759_v51 = vsel %vm1756_vm12, %v1757_v16, %v1758_v54  ;;  %v5388_v16 = vld [vmem:[#allocation45_spill] sm:$0xff]  ;;  %v5389_v54 = vld [vmem:[#allocation46_spill] sm:$0xff] }
 0xec8   : > { %1826 = vmatmul.mubr.f32.vlgmr.msra.gmra.mxu0 %v1759_v51  ;;  %3073 = vmatmul.mubr.f32.vlgmr.msra.gmra.mxu1 %v1759_v51  ;;  %v5390_v51 = vld [vmem:[#allocation7_spill] sm:$0xff] }
 0xec9   : > { %2029 = vmatpush1.msra.mxu0 %v4282_v18  ;;  %3076 = vmatpush3.msra.mxu1 %v4286_v22 }
 0xeca   : > { %2030 = vmatprep.subr.mxu0 %v4290_v25  ;;  %3077 = vmatprep.subr.mxu1 %v5281_v0 }
 0xecb   : > { %2031 = vmatpush1.msra.mxu0 %v4295_v28  ;;  %3078 = vmatpush3.msra.mxu1 %v4299_v29 }
 0xecc   : > { %2032 = vmatprep.subr.mxu0 %v4303_v34  ;;  %3079 = vmatprep.subr.mxu1 %v5281_v0 }
 0xecd   : > { %2033 = vmatpush1.msra.mxu0 %v4308_v35  ;;  %3080 = vmatpush3.msra.mxu1 %v4312_v36 }
 0xece   : > { %2034 = vmatprep.subr.mxu0 %v4316_v37  ;;  %3081 = vmatprep.subr.mxu1 %v5281_v0 }
 0xecf   : > { %2035 = vmatpush1.msra.mxu0 %v4321_v39  ;;  %3082 = vmatpush3.msra.mxu1 %v4325_v40 }
 0xed0   : > { %2036 = vmatprep.subr.mxu0 %v4329_v41  ;;  %3083 = vmatprep.subr.mxu1 %v5281_v0 }
 0xed1   : > { %2037 = vmatpush1.msra.mxu0 %v4334_v44  ;;  %3084 = vmatpush3.msra.mxu1 %v4338_v45 }
 0xed2   : > { %2038 = vmatprep.subr.mxu0 %v4342_v46  ;;  %3085 = vmatprep.subr.mxu1 %v5281_v0 }
 0xed3   : > { %2039 = vmatpush1.msra.mxu0 %v4347_v48  ;;  %3086 = vmatpush3.msra.mxu1 %v4351_v55 }
 0xed4   : > { %2040 = vmatprep.subr.mxu0 %v4355_v52  ;;  %3087 = vmatprep.subr.mxu1 %v5281_v0 }
 0xed5   : > { %2041 = vmatpush1.msra.mxu0 %v4360_v49  ;;  %3088 = vmatpush3.msra.mxu1 %v4364_v57 }
 0xed6   : > { %2042 = vmatprep.subr.mxu0 %v4368_v19  ;;  %3089 = vmatprep.subr.mxu1 %v5281_v0 }
 0xed7   : > { %2043 = vmatpush1.msra.mxu0 %v4373_v5  ;;  %3090 = vmatpush3.msra.mxu1 %v4377_v9 }
 0xed8   : > { %2044 = vmatprep.subr.mxu0 %v4381_v2  ;;  %3091 = vmatprep.subr.mxu1 %v5281_v0 }
 0xed9   : > { %2045 = vmatpush1.msra.mxu0 %v4386_v50  ;;  %3092 = vmatpush3.msra.mxu1 %v4390_v58 }
 0xeda   : > { %2046 = vmatprep.subr.mxu0 %v4394_v59  ;;  %3093 = vmatprep.subr.mxu1 %v5281_v0 }
 0xedb   : > { %2047 = vmatpush1.msra.mxu0 %v4399_v10  ;;  %3094 = vmatpush3.msra.mxu1 %v4403_v11 }
 0xedc   : > { %2048 = vmatprep.subr.mxu0 %v4407_v12  ;;  %3095 = vmatprep.subr.mxu1 %v5281_v0 }
 0xedd   : > { %2049 = vmatpush1.msra.mxu0 %v5373_v38  ;;  %3096 = vmatpush3.msra.mxu1 %v5374_v27 }
 0xede   : > { %2050 = vmatprep.subr.mxu0 %v5375_v7  ;;  %3097 = vmatprep.subr.mxu1 %v5281_v0 }
 0xedf   : > { %2051 = vmatpush1.msra.mxu0 %v5376_v33  ;;  %3098 = vmatpush3.msra.mxu1 %v5377_v6 }
 0xee0   : > { %2052 = vmatprep.subr.mxu0 %v5378_v26  ;;  %3099 = vmatprep.subr.mxu1 %v5281_v0 }
 0xee1   : > { %2053 = vmatpush1.msra.mxu0 %v5379_v17  ;;  %3100 = vmatpush3.msra.mxu1 %v5380_v53 }
 0xee2   : > { %2054 = vmatprep.subr.mxu0 %v5381_v4  ;;  %3101 = vmatprep.subr.mxu1 %v5281_v0 }
 0xee3   : > { %2055 = vmatpush1.msra.mxu0 %v5382_v56  ;;  %3102 = vmatpush3.msra.mxu1 %v5383_v21 }
 0xee4   : > { %2056 = vmatprep.subr.mxu0 %v5384_v43  ;;  %3103 = vmatprep.subr.mxu1 %v5281_v0 }
 0xee5   : > { %2057 = vmatpush1.msra.mxu0 %v5385_v42  ;;  %3104 = vmatpush3.msra.mxu1 %v5386_v14 }
 0xee6   : > { %2058 = vmatprep.subr.mxu0 %v5387_v47  ;;  %3105 = vmatprep.subr.mxu1 %v5281_v0 }
 0xee7   : > { %2059 = vmatpush1.msra.mxu0 %v5388_v16  ;;  %2092 = vmatprep.mubr.f32.mxu0 %v5281_v0  ;;  %v5393_v16 = vld [vmem:[#allocation20_spill] sm:$0xff] }
 0xee8   : > { %3106 = vmatpush3.msra.mxu1 %v5389_v54  ;;  %3107 = vmatprep.mubr.msk.f32.mxu1 %vm3484_vm0, %v5281_v0 }
 0xee9   : > { %2291 = vmatprep.subr.mxu0 %v5390_v51  ;;  %3110 = vmatprep.subr.mxu1 %v5281_v0 }
 0xf88   : > { %v1827_v30 = vpop.f32.mrf.mxu0  ;;  %v1898_v31 = vpop.f32.mrf.mxu1 }
 0xf89   : > { %v1828_v23 = vadd.f32 %v1827_v30, %v5391_v13  ;;  %v1899_v14 = vadd.f32 %v1898_v31, %v5393_v16 }
 0xf8a   : > { %v1829_v32 = vpop.f32.mrf.mxu0  ;;  %v3074_v24 = vpop.f32.mrf.mxu1 }
 0xf8b   : > { %v1830_v47 = vadd.f32 %v1829_v32, %v5392_v20  ;;  %1903 = vrot.lane.b32.xlu1 %v1828_v23, %s3485_s14 }
 0xf8d   : > { %1924 = vrot.lane.b32.xlu0 %v1830_v47, %s3486_s25 }
 0xf8f   : > { %1946 = vrot.lane.b32.xlu1 %v1899_v14, %s3485_s14 }
 0xf91   : > { %1956 = vrot.lane.b32.xlu0 %v1899_v14, %s3486_s25 }
 0xf95   : > { %1914 = vrot.lane.b32.xlu0 %v1830_v47, %s3485_s14 }
 0xffd   : > { %v1904_v51 = vpop.permute.xlu1 %1903 }
 0xffe   : > { %v1906_v54 = vadd.f32 %v1904_v51, %v1828_v23 }
 0xfff   : > { %v1925_v56 = vpop.permute.xlu0 %1924 }
0x1000   : > { %v1907_v42 = vsub.f32 0.0, %v1906_v54 }
0x1001   : > { %v1947_v30 = vpop.permute.xlu1 %1946 }
0x1002   : > { %v1908_v13 = vmul.f32 1.442695, %v1907_v42  ;;  %v1949_v24 = vadd.f32 %v1947_v30, %v1830_v47 }
0x1003   : > { %v1957_v54 = vpop.permute.xlu0 %1956 }
0x1004   : > { %3309 = vpow2.f32 %v1908_v13  ;;  %v1950_v32 = vsub.f32 0.0, %v1949_v24 }
0x1006   : > { %v1951_v20 = vmul.f32 1.442695, %v1950_v32 }
0x1008   : > { %3311 = vpow2.f32 %v1951_v20 }
0x1011   : > { %v3310_v43 = vpop.eup %3309 }
0x1012   : > { %v1910_v31 = vadd.f32 1.0, %v3310_v43  ;;  %v5394_v43 = vrot.slane %v3591_v1, 3 }
0x1014   : > { %3313 = vrcp.f32 %v1910_v31 }
0x1015   : > { %v3312_v16 = vpop.eup %3311 }
0x1016   : > { %v1953_v21 = vadd.f32 1.0, %v3312_v16 }
0x1018   : > { %3315 = vrcp.f32 %v1953_v21  ;;  %v5395_v21 = vrot.slane %v5294_v62, 2 }
0x101a   : > { %v1999_v16 = vsel %vm1475_vm11, %v5395_v21, %v5394_v43  ;;  %v5398_v21 = vld [vmem:[#allocation13_spill] sm:$0xff] }
0x1021   : > { %v3314_v4 = vpop.eup %3313 }
0x1022   : > { %v1927_v53 = vmul.f32 %v3314_v4, %v1925_v56  ;;  %v5396_v4 = vrot.slane %v3597_v3, 1 }
0x1024   : > { %1929 = vrot.lane.b32.xlu1 %v1927_v53, %s3488_s9  ;;  %v5397_v53 = vld [vmem:[#allocation14_spill] sm:$0xff] }
0x1025   : > { %v3316_v51 = vpop.eup %3315  ;;  %v2000_v56 = vsel %vm407_vm1, %v5397_v53, %v5396_v4  ;;  %v5399_v4 = vld [vmem:[#allocation11_spill] sm:$0xff] }
0x1026   : > { %v1959_v17 = vmul.f32 %v3316_v51, %v1957_v54 }
0x1028   : > { %1961 = vrot.lane.b32.xlu1 %v1959_v17, %s3488_s9  ;;  %v3219_v17 = vpack.i.bf16 %v2000_v56, %v1999_v16  ;;  %v1943_v16 = vmul.f32 %v4643_v15, %v5398_v21 }
0x1096   : > { %v1930_v13 = vpop.permute.xlu1 %1929 }
0x1097   : > { %v1932_v42 = vadd.f32 %v1930_v13, %v1828_v23 }
0x1099   : > { %3317 = vtanh.f32 %v1932_v42 }
0x109a   : > { %v1962_v20 = vpop.permute.xlu1 %1961 }
0x109b   : > { %v1964_v47 = vadd.f32 %v1962_v20, %v1899_v14  ;;  %v1915_v14 = vpop.permute.xlu0 %1914 }
0x109c   : > { %v1917_v1 = vadd.f32 %v1915_v14, %v1828_v23 }
0x109d   : > { %3319 = vtanh.f32 %v1964_v47 }
0x109e   : > { %v1918_v32 = vsub.f32 0.0, %v1917_v1  ;;  %v1972_v1 = vmul.f32 %v3316_v51, %v4656_v8 }
0x10a0   : > { %v1919_v62 = vmul.f32 1.442695, %v1918_v32 }
0x10a2   : > { %3321 = vpow2.f32 %v1919_v62 }
0x10a6   : > { %v3318_v30 = vpop.eup %3317 }
0x10a7   : > { %1936 = vrot.lane.b32.xlu0 %v3318_v30, %s3486_s25 }
0x10aa   : > { %v3320_v24 = vpop.eup %3319 }
0x10ab   : > { %1968 = vrot.lane.b32.xlu1 %v3320_v24, %s3486_s25  ;;  %3220 = vrot.lane.b32.xlu0 %v3219_v17, %s3485_s14  ;;  %v1966_v24 = vsub.f32 1.0, %v3316_v51 }
0x10af   : > { %v3322_v31 = vpop.eup %3321 }
0x10b0   : > { %v1921_v54 = vadd.f32 1.0, %v3322_v31  ;;  %v5400_v31 = vld [vmem:[#allocation8_spill] sm:$0xff] }
0x10b2   : > { %3323 = vrcp.f32 %v1921_v54 }
0x10bf   : > { %v3324_v3 = vpop.eup %3323 }
0x10c0   : > { %v1934_v13 = vsub.f32 1.0, %v3324_v3  ;;  %v1940_v47 = vmul.f32 %v3324_v3, %v4643_v15  ;;  %v5401_v3 = vld [vmem:[#allocation10_spill] sm:$0xff] }
0x1119   : > { %v1937_v42 = vpop.permute.xlu0 %1936 }
0x111a   : > { %v1939_v20 = vmul.f32 %v1937_v42, %v1934_v13  ;;  %v1975_v13 = vmul.f32 %v4656_v8, %v5401_v3 }
0x111c   : > { %v1941_v43 = vadd.f32 %v1940_v47, %v1939_v20  ;;  %v4768_v47 = vld [vmem:[%s3583_s10] sm:$0xff] }
0x111d   : > { %v1969_v17 = vpop.permute.xlu1 %1968  ;;  %v3221_v62 = vpop.permute.xlu0 %3220 }
0x111e   : > { %v1942_v56 = vmul.f32 %v1941_v43, %v5399_v4  ;;  %v1971_v14 = vmul.f32 %v1969_v17, %v1966_v24  ;;  %v3223_v42 = vunpack.i.h.bf16 %v3221_v62  ;;  %v3222_v20 = vunpack.i.l.bf16 %v3221_v62 }
0x111f   : > { %v1995_v43 = vsel %vm1475_vm11, %v3828_v60, %v4768_v47 }
0x1120   : > { %v4759_v23 = vadd.f32 %v1943_v16, %v1942_v56  ;;  %v1973_v32 = vadd.f32 %v1972_v1, %v1971_v14  ;;  %v1996_v16 = vsel %vm407_vm1, %v3837_v63, %v3831_v61  ;;  %v2015_v56 = vsel %vm426_vm4, %v1995_v43, %v3222_v20 }
0x1122   : > { %v2008_v30 = vrot.slane %v4759_v23, 2  ;;  %v1974_v54 = vmul.f32 %v1973_v32, %v5400_v31 }
0x1124   : > { %2009 = vrot.lane.b32.xlu1 %v2008_v30, %s3485_s14  ;;  %v4776_v51 = vadd.f32 %v1975_v13, %v1974_v54  ;;  %v2016_v30 = vsel %vm426_vm4, %v1996_v16, %v3223_v42  ;;  %v3412_v16 = vld [vmem:[%s3583_s10 + $0x8] sm:$0xff]  ;;  %s2712_s10 = sshll.u32 %s266_s30, 2 }
0x1125   : > { %s268_s13 = scalar_lea.vmem [#allocation2], %s2712_s10 }
0x1126   : > { %v2013_v17 = vrot.slane %v4776_v51, 2  ;;  %s2588_s16 = sshll.u32 %s268_s13, 4  ;;  %s5079_s16 = int_to_ptr.vmem [resolvable:$true] %s2588_s16 }
0x1127   : > { %s3421_s26 = scalar_lea.vmem %s5079_s16, 64 }
0x1128   : > { %p3422_p11 = scmp.ne.s32.totalorder %s5079_s16, %s3421_s26 }
0x112a   : > { %p3423_p12 = pnand %p3422_p11, %p3558_p5 }
0x112c   : > { %p3424_p13 = pneg %p3423_p12 }
0x1196   : > { %v2010_v24 = vpop.permute.xlu1 %2009 }
0x1197   : > { %v2017_v14 = vsel %vm428_vm5, %v2015_v56, %v2010_v24  ;;  %v2018_v1 = vsel %vm428_vm5, %v2016_v30, %v2010_v24  ;;  %v5416_v56 = vld [vmem:[#allocation12_spill] sm:$0xff]  ;;  %v5418_v24 = vrot.slane %v5397_v53, 6 }
0x1198   : > { %v2019_v32 = vsel %vm430_vm6, %v2017_v14, %v2013_v17  ;;  %v2020_v62 = vsel %vm430_vm6, %v2018_v1, %v2013_v17  ;;  %v5417_v30 = vrot.slane %v5416_v56, 7 }
0x1199   : > { %v2024_v3 = vrot.slane %v2019_v32, 6  ;;  %v2025_v8 = vrot.slane %v2020_v62, 6  ;;  %v5419_v32 = vld [vmem:[#allocation9_spill] sm:$0xff] }
0x119a   : > { %v2262_v17 = vsel %vm407_vm1, %v5417_v30, %v3412_v16  ;;  %v5420_v62 = vrot.slane %v5419_v32, 1 }
0x119b   : > { %v2026_v54 = vsel %vm2023_vm13, %v2024_v3, %v2025_v8  ;;  %v2263_v14 = vsel %vm410_vm2, %v5418_v24, %v2262_v17 }
0x119c   : > { %2093 = vmatmul.mubr.f32.vlgmr.msra.gmra.mxu0 %v2026_v54  ;;  %3108 = vmatmul.mubr.f32.vlgmr.msra.gmra.mxu1 %v2026_v54  ;;  %v3224_v54 = vpack.i.bf16 %v2263_v14, %v5420_v62 }
0x119d   : > { %2292 = vmatpush1.msra.mxu0 %v4282_v18  ;;  %3111 = vmatpush3.msra.mxu1 %v4286_v22  ;;  %v5402_v18 = vld [vmem:[#allocation36_spill] sm:$0xff]  ;;  %v5403_v22 = vld [vmem:[#allocation37_spill] sm:$0xff] }
0x119e   : > { %2293 = vmatprep.subr.mxu0 %v4290_v25  ;;  %3112 = vmatprep.subr.mxu1 %v5281_v0  ;;  %v5404_v25 = vld [vmem:[#allocation38_spill] sm:$0xff] }
0x119f   : > { %2294 = vmatpush1.msra.mxu0 %v4295_v28  ;;  %3113 = vmatpush3.msra.mxu1 %v4299_v29  ;;  %v5405_v28 = vld [vmem:[#allocation39_spill] sm:$0xff]  ;;  %v5406_v29 = vld [vmem:[#allocation40_spill] sm:$0xff] }
0x11a0   : > { %2295 = vmatprep.subr.mxu0 %v4303_v34  ;;  %3114 = vmatprep.subr.mxu1 %v5281_v0  ;;  %v5407_v34 = vld [vmem:[#allocation41_spill] sm:$0xff] }
0x11a1   : > { %2296 = vmatpush1.msra.mxu0 %v4308_v35  ;;  %3115 = vmatpush3.msra.mxu1 %v4312_v36  ;;  %v5408_v35 = vld [vmem:[#allocation42_spill] sm:$0xff]  ;;  %v5409_v36 = vld [vmem:[#allocation43_spill] sm:$0xff] }
0x11a2   : > { %2297 = vmatprep.subr.mxu0 %v4316_v37  ;;  %3116 = vmatprep.subr.mxu1 %v5281_v0  ;;  %v5410_v37 = vld [vmem:[#allocation44_spill] sm:$0xff] }
0x11a3   : > { %2298 = vmatpush1.msra.mxu0 %v4321_v39  ;;  %3117 = vmatpush3.msra.mxu1 %v4325_v40  ;;  %v5411_v39 = vld [vmem:[#allocation45_spill] sm:$0xff]  ;;  %v5412_v40 = vld [vmem:[#allocation46_spill] sm:$0xff] }
0x11a4   : > { %2299 = vmatprep.subr.mxu0 %v4329_v41  ;;  %3118 = vmatprep.subr.mxu1 %v5281_v0 }
0x11a5   : > { %2300 = vmatpush1.msra.mxu0 %v4334_v44  ;;  %3119 = vmatpush3.msra.mxu1 %v4338_v45  ;;  %v5413_v45 = vld [vmem:[#allocation18_spill] sm:$0xff] }
0x11a6   : > { %2301 = vmatprep.subr.mxu0 %v4342_v46  ;;  %3120 = vmatprep.subr.mxu1 %v5281_v0 }
0x11a7   : > { %2302 = vmatpush1.msra.mxu0 %v4347_v48  ;;  %3121 = vmatpush3.msra.mxu1 %v4351_v55 }
0x11a8   : > { %2303 = vmatprep.subr.mxu0 %v4355_v52  ;;  %3122 = vmatprep.subr.mxu1 %v5281_v0  ;;  %v5414_v52 = vld [vmem:[#allocation19_spill] sm:$0xff] }
0x11a9   : > { %2304 = vmatpush1.msra.mxu0 %v4360_v49  ;;  %3123 = vmatpush3.msra.mxu1 %v4364_v57  ;;  %v5415_v57 = vld [vmem:[#allocation20_spill] sm:$0xff] }
0x11aa   : > { %2305 = vmatprep.subr.mxu0 %v4368_v19  ;;  %3124 = vmatprep.subr.mxu1 %v5281_v0 }
0x11ab   : > { %2306 = vmatpush1.msra.mxu0 %v4373_v5  ;;  %3125 = vmatpush3.msra.mxu1 %v4377_v9 }
0x11ac   : > { %2307 = vmatprep.subr.mxu0 %v4381_v2  ;;  %3126 = vmatprep.subr.mxu1 %v5281_v0 }
0x11ad   : > { %2308 = vmatpush1.msra.mxu0 %v4386_v50  ;;  %3127 = vmatpush3.msra.mxu1 %v4390_v58 }
0x11ae   : > { %2309 = vmatprep.subr.mxu0 %v4394_v59  ;;  %3128 = vmatprep.subr.mxu1 %v5281_v0 }
0x11af   : > { %2310 = vmatpush1.msra.mxu0 %v4399_v10  ;;  %3129 = vmatpush3.msra.mxu1 %v4403_v11 }
0x11b0   : > { %2311 = vmatprep.subr.mxu0 %v4407_v12  ;;  %3130 = vmatprep.subr.mxu1 %v5281_v0 }
0x11b1   : > { %2312 = vmatpush1.msra.mxu0 %v5373_v38  ;;  %3131 = vmatpush3.msra.mxu1 %v5374_v27 }
0x11b2   : > { %2313 = vmatprep.subr.mxu0 %v5375_v7  ;;  %3132 = vmatprep.subr.mxu1 %v5281_v0 }
0x11b3   : > { %2314 = vmatpush1.msra.mxu0 %v5376_v33  ;;  %3133 = vmatpush3.msra.mxu1 %v5377_v6 }
0x11b4   : > { %2315 = vmatprep.subr.mxu0 %v5378_v26  ;;  %3134 = vmatprep.subr.mxu1 %v5281_v0 }
0x11b5   : > { %2316 = vmatpush1.msra.mxu0 %v5402_v18  ;;  %3135 = vmatpush3.msra.mxu1 %v5403_v22 }
0x11b6   : > { %2317 = vmatprep.subr.mxu0 %v5404_v25  ;;  %3136 = vmatprep.subr.mxu1 %v5281_v0 }
0x11b7   : > { %2318 = vmatpush1.msra.mxu0 %v5405_v28  ;;  %3137 = vmatpush3.msra.mxu1 %v5406_v29 }
0x11b8   : > { %2319 = vmatprep.subr.mxu0 %v5407_v34  ;;  %3138 = vmatprep.subr.mxu1 %v5281_v0 }
0x11b9   : > { %2320 = vmatpush1.msra.mxu0 %v5408_v35  ;;  %3139 = vmatpush3.msra.mxu1 %v5409_v36 }
0x11ba   : > { %2321 = vmatprep.subr.mxu0 %v5410_v37  ;;  %3140 = vmatprep.subr.mxu1 %v5281_v0 }
0x11bb   : > { %2322 = vmatpush1.msra.mxu0 %v5411_v39  ;;  %2355 = vmatprep.mubr.f32.mxu0 %v5281_v0 }
0x11bc   : > { %3141 = vmatpush3.msra.mxu1 %v5412_v40  ;;  %3142 = vmatprep.mubr.msk.f32.mxu1 %vm3484_vm0, %v5281_v0  ;;  %vm670_vm0 = vcmask 257024  }
0x125c   : > { %v2094_v41 = vpop.f32.mrf.mxu0  ;;  %v2165_v44 = vpop.f32.mrf.mxu1 }
0x125d   : > { %v2095_v46 = vadd.f32 %v2094_v41, %v5413_v45  ;;  %v2166_v19 = vadd.f32 %v2165_v44, %v5415_v57  ;;  %v5421_v44 = vld [vmem:[#allocation29_spill] sm:$0xff] }
0x125e   : > { %v2096_v48 = vpop.f32.mrf.mxu0  ;;  %v3109_v55 = vpop.f32.mrf.mxu1 }
0x125f   : > { %v2097_v49 = vadd.f32 %v2096_v48, %v5414_v52  ;;  %2170 = vrot.lane.b32.xlu0 %v2095_v46, %s3485_s14  ;;  %v2210_v48 = vmul.f32 %v4759_v23, %v5421_v44  ;;  %v5422_v55 = vld [vmem:[#allocation28_spill] sm:$0xff] }
0x1261   : > { %2191 = vrot.lane.b32.xlu1 %v2097_v49, %s3486_s25 }
0x1263   : > { %2213 = vrot.lane.b32.xlu0 %v2166_v19, %s3485_s14 }
0x1265   : > { %2223 = vrot.lane.b32.xlu1 %v2166_v19, %s3486_s25 }
0x1269   : > { %2181 = vrot.lane.b32.xlu1 %v2097_v49, %s3485_s14 }
0x12d1   : > { %v2171_v0 = vpop.permute.xlu0 %2170 }
0x12d2   : > { %v2173_v5 = vadd.f32 %v2171_v0, %v2095_v46 }
0x12d3   : > { %v2192_v27 = vpop.permute.xlu1 %2191 }
0x12d4   : > { %v2174_v9 = vsub.f32 0.0, %v2173_v5 }
0x12d5   : > { %v2214_v2 = vpop.permute.xlu0 %2213 }
0x12d6   : > { %v2175_v50 = vmul.f32 1.442695, %v2174_v9  ;;  %v2216_v58 = vadd.f32 %v2214_v2, %v2097_v49 }
0x12d7   : > { %v2224_v26 = vpop.permute.xlu1 %2223 }
0x12d8   : > { %3325 = vpow2.f32 %v2175_v50  ;;  %v2217_v59 = vsub.f32 0.0, %v2216_v58 }
0x12da   : > { %v2218_v10 = vmul.f32 1.442695, %v2217_v59  ;;  %v5423_v59 = vld [vmem:[#allocation6_spill] sm:$0xff] }
0x12db   : > { %v2182_v22 = vpop.permute.xlu1 %2181 }
0x12dc   : > { %3327 = vpow2.f32 %v2218_v10  ;;  %v2184_v25 = vadd.f32 %v2182_v22, %v2095_v46 }
0x12de   : > { %v2185_v28 = vsub.f32 0.0, %v2184_v25 }
0x12e0   : > { %v2186_v29 = vmul.f32 1.442695, %v2185_v28 }
0x12e5   : > { %v3326_v11 = vpop.eup %3325 }
0x12e6   : > { %v2177_v12 = vadd.f32 1.0, %v3326_v11  ;;  %v2258_v11 = vsel %vm407_vm1, %v3831_v61, %v3828_v60  ;;  %vm933_vm1 = vcmask 781824  }
0x12e8   : > { %3329 = vrcp.f32 %v2177_v12  ;;  %v5424_v12 = vld [vmem:[#allocation5_spill] sm:$0xff] }
0x12e9   : > { %v3328_v8 = vpop.eup %3327 }
0x12ea   : > { %v2220_v38 = vadd.f32 1.0, %v3328_v8  ;;  %v2242_v8 = vmul.f32 %v4776_v51, %v5424_v12 }
0x12ec   : > { %3331 = vrcp.f32 %v2220_v38 }
0x12f5   : > { %v3330_v7 = vpop.eup %3329 }
0x12f6   : > { %v2194_v33 = vmul.f32 %v3330_v7, %v2192_v27  ;;  %v2259_v7 = vsel %vm410_vm2, %v3837_v63, %v2258_v11  ;;  %v3417_v11 = vld [vmem:[%s3937_s8 + $0x10] sm:$0xf]  ;;  %vm939_vm2 = vcmask 519424  }
0x12f8   : > { %2196 = vrot.lane.b32.xlu0 %v2194_v33, %s3488_s9 }
0x12f9   : > { %v3332_v6 = vpop.eup %3331 }
0x12fa   : > { %v2226_v3 = vmul.f32 %v3332_v6, %v2224_v26  ;;  %v2233_v5 = vsub.f32 1.0, %v3332_v6  ;;  %v2239_v2 = vmul.f32 %v3332_v6, %v4776_v51 }
0x12fc   : > { %2228 = vrot.lane.b32.xlu0 %v2226_v3, %s3488_s9 }
0x136a   : > { %v2197_v13 = vpop.permute.xlu0 %2196 }
0x136b   : > { %v2199_v42 = vadd.f32 %v2197_v13, %v2095_v46 }
0x136d   : > { %3333 = vtanh.f32 %v2199_v42 }
0x136e   : > { %v2229_v20 = vpop.permute.xlu0 %2228 }
0x136f   : > { %v2231_v43 = vadd.f32 %v2229_v20, %v2166_v19 }
0x1371   : > { %3335 = vtanh.f32 %v2231_v43 }
0x1372   : > { %3337 = vpow2.f32 %v2186_v29 }
0x137a   : > { %v3334_v1 = vpop.eup %3333 }
0x137b   : > { %2203 = vrot.lane.b32.xlu1 %v3334_v1, %s3486_s25 }
0x137e   : > { %v3336_v18 = vpop.eup %3335 }
0x137f   : > { %2235 = vrot.lane.b32.xlu0 %v3336_v18, %s3486_s25  ;;  %3225 = vrot.lane.b32.xlu1 %v3224_v54, %s3485_s14  ;;  %v3338_v34 = vpop.eup %3337 }
0x1380   : > { %v2188_v53 = vadd.f32 1.0, %v3338_v34 }
0x1382   : > { %3339 = vrcp.f32 %v2188_v53 }
0x138f   : > { %v3340_v35 = vpop.eup %3339 }
0x1390   : > { %v2201_v36 = vsub.f32 1.0, %v3340_v35  ;;  %v2207_v40 = vmul.f32 %v3340_v35, %v4759_v23 }
0x13ed   : > { %v2204_v37 = vpop.permute.xlu1 %2203 }
0x13ee   : > { %v2206_v39 = vmul.f32 %v2204_v37, %v2201_v36 }
0x13f0   : > { %v2208_v41 = vadd.f32 %v2207_v40, %v2206_v39 }
0x13f1   : > { %v2236_v0 = vpop.permute.xlu0 %2235  ;;  %v3226_v58 = vpop.permute.xlu1 %3225 }
0x13f2   : > { %v2209_v49 = vmul.f32 %v2208_v41, %v5422_v55  ;;  %v2238_v9 = vmul.f32 %v2236_v0, %v2233_v5  ;;  %v3228_v38 = vunpack.i.h.bf16 %v3226_v58  ;;  %v3227_v27 = vunpack.i.l.bf16 %v3226_v58  ;;  %v3413_v41 = vld [vmem:[%s3937_s8] sm:$0xf]  ;;  %v3415_v5 = vld [vmem:[%s3937_s8 + $0x8] sm:$0xf] }
0x13f4   : > { %v4876_v19 = vadd.f32 %v2210_v48, %v2209_v49  ;;  %v2240_v50 = vadd.f32 %v2239_v2, %v2238_v9  ;;  %v2278_v6 = vsel %vm426_vm4, %v4768_v47, %v3227_v27  ;;  %v2279_v26 = vsel %vm426_vm4, %v2259_v7, %v3228_v38  ;;  %v3414_v49 = vld [vmem:[%s3937_s8 + $0x4] sm:$0xf]  ;;  %v3418_v27 = vld [vmem:[%s3937_s8 + $0x14] sm:$0xf] }
0x13f5   : > { %v2526_v48 = vsel %vm2525_vm15, %v3413_v41, 0.0  ;;  %v2529_v9 = vsel %vm2525_vm15, %v3415_v5, 0.0  ;;  %v2535_v7 = vsel %vm2525_vm15, %v3418_v27, 0.0  ;;  %v4993_v5 = vmul.f32 -10000000.0, %v5421_v44  ;;  %v5439_v44 = vld [vmem:[#allocation53_spill] sm:$0xff] }
0x13f6   : > { %v2271_v46 = vrot.slane %v4876_v19, 1  ;;  %v2241_v10 = vmul.f32 %v2240_v50, %v5423_v59  ;;  %v3416_v50 = vld [vmem:[%s3937_s8 + $0xc] sm:$0xf] }
0x13f7   : > { %v2531_v58 = vsel %vm2525_vm15, %v3416_v50, 0.0 }
0x13f8   : > { %2272 = vrot.lane.b32.xlu0 %v2271_v46, %s3485_s14  ;;  %v4889_v33 = vadd.f32 %v2242_v8, %v2241_v10  ;;  %v2527_v46 = vsel %vm2525_vm15, %v3414_v49, 0.0  ;;  %v2533_v8 = vsel %vm2525_vm15, %v3417_v11, 0.0 }
0x13f9   : > { %v2528_v0 = vadd.f32 %v2527_v46, %v2526_v48  ;;  %v5434_v48 = vld [vmem:[#allocation25_spill] sm:$0xff]  ;;  %v5435_v46 = vld [vmem:[#allocation22_spill] sm:$0xff] }
0x13fa   : > { %v2276_v3 = vrot.slane %v4889_v33, 1  ;;  %v4985_v49 = vmul.f32 -10000000.0, %v5434_v48 }
0x13fb   : > { %v2530_v2 = vadd.f32 %v2529_v9, %v2528_v0  ;;  %v4988_v0 = vmul.f32 -10000000.0, %v5435_v46 }
0x13fd   : > { %v2532_v10 = vadd.f32 %v2531_v58, %v2530_v2  ;;  %v1206_v58 = vmul.f32 -10000000.0, %v5398_v21 }
0x13ff   : > { %v2534_v38 = vadd.f32 %v2533_v8, %v2532_v10 }
0x146a   : > { %v2273_v13 = vpop.permute.xlu0 %2272 }
0x146b   : > { %v2280_v60 = vsel %vm428_vm5, %v2278_v6, %v2273_v13  ;;  %v2281_v61 = vsel %vm428_vm5, %v2279_v26, %v2273_v13  ;;  %v2536_v6 = vadd.f32 %v2535_v7, %v2534_v38  ;;  %v3419_v26 = vld [vmem:[%s3937_s8 + $0x18] sm:$0xf]  ;;  %v5437_v7 = vld [vmem:[#allocation16_spill] sm:$0xff] }
0x146c   : > { %v2282_v42 = vsel %vm430_vm6, %v2280_v60, %v2276_v3  ;;  %v2283_v20 = vsel %vm430_vm6, %v2281_v61, %v2276_v3  ;;  %v2537_v3 = vsel %vm2525_vm15, %v3419_v26, 0.0  ;;  %v3420_v60 = vld [vmem:[%s3937_s8 + $0x1c] sm:$0xf]  ;;  %s3425_s8 = sshll.u32 %s3489_s7, 4  ;;  %s3426_s8 = int_to_ptr.vmem [resolvable:$false] %s3425_s8 }
0x146d   : > { %v2287_v63 = vrot.slane %v2282_v42, 7  ;;  %v2288_v43 = vrot.slane %v2283_v20, 7  ;;  %v2538_v13 = vadd.f32 %v2537_v3, %v2536_v6  ;;  %v2539_v61 = vsel %vm2525_vm15, %v3420_v60, 0.0  ;;  %v5438_v26 = vld [vmem:[#allocation51_spill] sm:$0xff]  ;;  %p3428_p0 = scmp.lt.s32.totalorder %s5079_s16, %s3426_s8 }
0x146e   : > { %v1207_v6 = vadd.f32 %v1206_v58, %v5437_v7 }
0x146f   : > { %v2289_v16 = vsel %vm2286_vm14, %v2287_v63, %v2288_v43  ;;  %v2540_v43 = vadd.f32 %v2539_v61, %v2538_v13 }
0x1470   : > { %2356 = vmatmul.mubr.f32.vlgmr.msra.gmra.mxu0 %v2289_v16  ;;  %3143 = vmatmul.mubr.f32.vlgmr.msra.gmra.mxu1 %v2289_v16 }
0x1530   : > { %v2357_v47 = vpop.f32.mrf.mxu0  ;;  %v2428_v56 = vpop.f32.mrf.mxu1 }
0x1531   : > { %v4900_v30 = vadd.f32 %v2357_v47, %v5413_v45  ;;  %v2429_v17 = vadd.f32 %v2428_v56, %v5415_v57 }
0x1532   : > { %v2359_v24 = vpop.f32.mrf.mxu0  ;;  %v3144_v14 = vpop.f32.mrf.mxu1 }
0x1533   : > { %2476 = vrot.lane.b32.xlu0 %v2429_v17, %s3485_s14  ;;  %2433 = vrot.lane.b32.xlu1 %v4900_v30, %s3485_s14  ;;  %v2360_v1 = vadd.f32 %v2359_v24, %v5414_v52  ;;  %v5425_v14 = vld [vmem:[#allocation15_spill] sm:$0xff] }
0x1537   : > { %2486 = vrot.lane.b32.xlu0 %v2429_v17, %s3486_s25  ;;  %2454 = vrot.lane.b32.xlu1 %v2360_v1, %s3486_s25 }
0x15a5   : > { %v2477_v32 = vpop.permute.xlu0 %2476  ;;  %v2434_v62 = vpop.permute.xlu1 %2433 }
0x15a6   : > { %v2479_v54 = vadd.f32 %v2477_v32, %v2360_v1  ;;  %v2436_v45 = vadd.f32 %v2434_v62, %v4900_v30  ;;  %v5427_v62 = vld [vmem:[#allocation21_spill] sm:$0xff] }
0x15a8   : > { %v2480_v18 = vsub.f32 0.0, %v2479_v54  ;;  %v2437_v57 = vsub.f32 0.0, %v2436_v45  ;;  %v5428_v54 = vld [vmem:[#allocation23_spill] sm:$0xff] }
0x15a9   : > { %v2487_v35 = vpop.permute.xlu0 %2486  ;;  %v2455_v39 = vpop.permute.xlu1 %2454  ;;  %v664_v45 = vmul.f32 %v5428_v54, %v5427_v62 }
0x15aa   : > { %v2481_v22 = vmul.f32 1.442695, %v2480_v18  ;;  %v2438_v25 = vmul.f32 1.442695, %v2437_v57  ;;  %v5429_v18 = vld [vmem:[#allocation47_spill] sm:$0xff]  ;;  %v5430_v57 = vld [vmem:[#allocation49_spill] sm:$0xff] }
0x15ab   : > { %v5003_v3 = vmul.f32 %v5439_v44, %v5429_v18 }
0x15ac   : > { %3341 = vpow2.f32 %v2481_v22  ;;  %v4949_v22 = vmul.f32 %v5430_v57, %v5429_v18 }
0x15ad   : > { %3343 = vpow2.f32 %v2438_v25  ;;  %v5431_v25 = vld [vmem:[#allocation30_spill] sm:$0xff] }
0x15b9   : > { %v3342_v28 = vpop.eup %3341 }
0x15ba   : > { %v3344_v29 = vpop.eup %3343  ;;  %v2483_v34 = vadd.f32 1.0, %v3342_v28  ;;  %v928_v28 = vmul.f32 %v5431_v25, %v5422_v55 }
0x15bb   : > { %v2440_v52 = vadd.f32 1.0, %v3344_v29  ;;  %v4958_v29 = vmul.f32 %v4876_v19, %v5422_v55  ;;  %v4979_v55 = vmul.f32 %v4759_v23, %v5399_v4  ;;  %v677_v4 = vadd.f32 %v4988_v0, %v664_v45 }
0x15bc   : > { %3345 = vrcp.f32 %v2483_v34  ;;  %v5432_v34 = vld [vmem:[#allocation50_spill] sm:$0xff]  ;;  %v943_v23 = vmul.f32 -10000000.0, %v5424_v12  ;;  %v947_v50 = vadd.f32 %v4993_v5, %v928_v28  ;;  %v1470_v12 = vmul.f32 -10000000.0, %v5438_v26 }
0x15bd   : > { %3347 = vrcp.f32 %v2440_v52  ;;  %v5433_v52 = vld [vmem:[#allocation52_spill] sm:$0xff]  ;;  %v678_v10 = vmax.f32 %v677_v4, -10000000.0 }
0x15be   : > { %v5442_v4 = vld [vmem:[#allocation24_spill] sm:$0xff] }
0x15c9   : > { %v4910_v53 = vpop.eup %3345 }
0x15ca   : > { %v3348_v36 = vpop.eup %3347  ;;  %v2489_v37 = vmul.f32 %v4910_v53, %v2487_v35  ;;  %v1454_v35 = vmul.f32 %v5433_v52, %v5432_v34  ;;  %v2496_v61 = vsub.f32 1.0, %v4910_v53 }
0x15cb   : > { %v2457_v40 = vmul.f32 %v3348_v36, %v2455_v39  ;;  %v4967_v36 = vmul.f32 %v4776_v51, %v5400_v31 }
0x15cc   : > { %2491 = vrot.lane.b32.xlu0 %v2489_v37, %s3488_s9  ;;  %v4971_v37 = vmul.f32 %v4643_v15, %v5432_v34  ;;  %v2245_v34 = vmul.f32 %v4889_v33, %v5423_v59 }
0x15cd   : > { %2459 = vrot.lane.b32.xlu1 %v2457_v40, %s3488_s9 }
0x15d1   : > { %2444 = vrot.lane.b32.xlu1 %v2360_v1, %s3485_s14  ;;  %v4937_v1 = vmul.f32 %v5425_v14, %v5400_v31 }
0x163e   : > { %v2492_v42 = vpop.permute.xlu0 %2491 }
0x163f   : > { %v2494_v20 = vadd.f32 %v2492_v42, %v2429_v17  ;;  %v2460_v63 = vpop.permute.xlu1 %2459  ;;  %v5426_v17 = vld [vmem:[#allocation27_spill] sm:$0xff]  ;;  %v5440_v42 = vld [vmem:[#allocation10_spill] sm:$0xff] }
0x1640   : > { %v2462_v16 = vadd.f32 %v2460_v63, %v4900_v30  ;;  %v927_v32 = vmul.f32 %v5426_v17, %v5423_v59  ;;  %v1203_v21 = vmul.f32 -10000000.0, %v5440_v42  ;;  %v1471_v63 = vadd.f32 %v1470_v12, %v1454_v35 }
0x1641   : > { %3349 = vtanh.f32 %v2494_v20  ;;  %v2502_v17 = vmul.f32 %v4910_v53, %v4889_v33 }
0x1642   : > { %3351 = vtanh.f32 %v2462_v16  ;;  %v944_v2 = vadd.f32 %v943_v23, %v927_v32  ;;  %v941_v38 = vadd.f32 %v927_v32, %v664_v45  ;;  %v1204_v52 = vadd.f32 %v1203_v21, %v4937_v1 }
0x1643   : > { %3353 = vrcp.f32 %v2540_v43  ;;  %v2445_v39 = vpop.permute.xlu1 %2444 }
0x1644   : > { %v2447_v31 = vadd.f32 %v2445_v39, %v4900_v30  ;;  %v5436_v30 = vld [vmem:[#allocation26_spill] sm:$0xff]  ;;  %v945_v27 = vmax.f32 %v678_v10, %v944_v2  ;;  %v1201_v20 = vadd.f32 %v4937_v1, %v941_v38  ;;  %v2256_v10 = vadd.f32 %v2245_v34, %v943_v23 }
0x1645   : > { %v680_v9 = vadd.f32 %v4985_v49, %v5436_v30  ;;  %v942_v13 = vadd.f32 %v928_v28, %v5436_v30 }
0x1646   : > { %v2448_v51 = vsub.f32 0.0, %v2447_v31  ;;  %v1465_v39 = vadd.f32 %v4949_v22, %v1201_v20 }
0x1647   : > { %v681_v8 = vmax.f32 %v680_v9, -10000000.0 }
0x1648   : > { %v2449_v40 = vmul.f32 1.442695, %v2448_v51  ;;  %v1722_v9 = vadd.f32 %v4971_v37, %v1465_v39 }
0x1649   : > { %v948_v60 = vmax.f32 %v681_v8, %v947_v50 }
0x164a   : > { %3355 = vpow2.f32 %v2449_v40  ;;  %v1993_v40 = vadd.f32 %v4967_v36, %v1203_v21  ;;  %v1989_v38 = vadd.f32 %v4979_v55, %v1722_v9 }
0x164b   : > { %v1208_v54 = vmax.f32 %v948_v60, %v1207_v6 }
0x164c   : > { %v2252_v26 = vadd.f32 %v4958_v29, %v1989_v38 }
0x164d   : > { %v1472_v31 = vmax.f32 %v1208_v54, %v1471_v63 }
0x164e   : > { %v3350_v47 = vpop.eup %3349 }
0x164f   : > { %v3352_v56 = vpop.eup %3351  ;;  %2498 = vrot.lane.b32.xlu1 %v3350_v47, %s3486_s25  ;;  %v5441_v47 = vld [vmem:[#allocation48_spill] sm:$0xff] }
0x1650   : > { %2466 = vrot.lane.b32.xlu0 %v3352_v56, %s3486_s25  ;;  %v3354_v24 = vpop.eup %3353  ;;  %v1467_v56 = vmul.f32 -10000000.0, %v5441_v47 }
0x1652   : > { %v1726_v57 = vadd.f32 %v5003_v3, %v1467_v56  ;;  %v1468_v59 = vadd.f32 %v1467_v56, %v4949_v22 }
0x1653   : > { %1196 = vrot.lane.b32.xlu1 %v4937_v1, %s3486_s25  ;;  %v2473_v1 = vmul.f32 %v4876_v19, %v5434_v48 }
0x1654   : > { %2545 = vperm.xlu0 %3192, %v3354_v24   ;;  %v1202_v24 = vadd.f32 %v5437_v7, %v942_v13  ;;  %v1727_v2 = vmax.f32 %v1472_v31, %v1726_v57 }
0x1656   : > { %v1466_v25 = vadd.f32 %v1454_v35, %v1202_v24  ;;  %v1994_v7 = vmax.f32 %v1727_v2, %v1993_v40 }
0x1657   : > { %930 = vrot.lane.b32.xlu1 %v927_v32, %s3485_s14  ;;  %v3356_v15 = vpop.eup %3355 }
0x1658   : > { %667 = vrot.lane.b32.xlu0 %v664_v45, %s3486_s25  ;;  %v2451_v41 = vadd.f32 1.0, %v3356_v15  ;;  %v2505_v15 = vmul.f32 %v4889_v33, %v5435_v46  ;;  %v1205_v46 = vmax.f32 %v945_v27, %v1204_v52  ;;  %v2257_v13 = vmax.f32 %v1994_v7, %v2256_v10 }
0x165a   : > { %3357 = vrcp.f32 %v2451_v41  ;;  %v1469_v48 = vmax.f32 %v1205_v46, %v1468_v59 }
0x165b   : > { %1456 = vrot.lane.b32.xlu1 %v4949_v22, %s3485_s14  ;;  %v1724_v22 = vadd.f32 %v4971_v37, %v1470_v12 }
0x165c   : > { %936 = vrot.lane.b32.xlu0 %v928_v28, %s3488_s9 }
0x165f   : > { %2247 = vrot.lane.b32.xlu1 %v4958_v29, %s3486_s25 }
0x1660   : > { %1461 = vrot.lane.b32.xlu0 %v1454_v35, %s3488_s9  ;;  %v1723_v35 = vadd.f32 %v5003_v3, %v1466_v25 }
0x1662   : > { %v1990_v33 = vadd.f32 %v4967_v36, %v1723_v35 }
0x1663   : > { %1985 = vrot.lane.b32.xlu1 %v4967_v36, %s3488_s9  ;;  %v1991_v36 = vadd.f32 %v4979_v55, %v1206_v58 }
0x1664   : > { %1717 = vrot.lane.b32.xlu0 %v4971_v37, %s3486_s25  ;;  %v2253_v6 = vadd.f32 %v2245_v34, %v1990_v33  ;;  %v1725_v37 = vmax.f32 %v1469_v48, %v1724_v22 }
0x1666   : > { %v1992_v58 = vmax.f32 %v1725_v37, %v1991_v36 }
0x1667   : > { %v3358_v11 = vpop.eup %3357 }
0x1668   : > { %1980 = vrot.lane.b32.xlu0 %v4979_v55, %s3485_s14  ;;  %v2464_v43 = vsub.f32 1.0, %v3358_v11  ;;  %v2470_v18 = vmul.f32 %v3358_v11, %v4876_v19 }
0x16c1   : > { %v2499_v16 = vpop.permute.xlu1 %2498 }
0x16c2   : > { %v2467_v14 = vpop.permute.xlu0 %2466  ;;  %v2501_v32 = vmul.f32 %v2499_v16, %v2496_v61 }
0x16c3   : > { %v2469_v45 = vmul.f32 %v2467_v14, %v2464_v43 }
0x16c4   : > { %v2503_v28 = vadd.f32 %v2502_v17, %v2501_v32 }
0x16c5   : > { %v2471_v53 = vadd.f32 %v2470_v18, %v2469_v45  ;;  %v1197_v51 = vpop.permute.xlu1 %1196 }
0x16c6   : > { %v2504_v41 = vmul.f32 %v2503_v28, %v5427_v62  ;;  %1199 = vst.msk [vmem:[%s3984_s15 + $0x4] sm:$0xf] %vm670_vm0, %v1197_v51 }
0x16c7   : > { %v2472_v30 = vmul.f32 %v2471_v53, %v5442_v4 }
0x16c8   : > { %v2506_v50 = vadd.f32 %v2505_v15, %v2504_v41 }
0x16c9   : > { %v2474_v11 = vadd.f32 %v2473_v1, %v2472_v30  ;;  %v931_v8 = vpop.permute.xlu1 %930 }
0x16ca   : > { %v2508_v19 = vmul.f32 %v2506_v50, %v5427_v62  ;;  %v2254_v62 = vadd.f32 %v4958_v29, %v4993_v5 }
0x16cb   : > { %v2507_v23 = vmul.f32 %v2474_v11, %v5442_v4 }
0x16cc   : > { %v2520_v27 = vadd.f32 %v2508_v19, %v2253_v6  ;;  %v2523_v44 = vadd.f32 %v2508_v19, %v4988_v0  ;;  %v2255_v29 = vmax.f32 %v1992_v58, %v2254_v62 }
0x16cd   : > { %v1457_v60 = vpop.permute.xlu1 %1456  ;;  %v2519_v61 = vadd.f32 %v2507_v23, %v2252_v26  ;;  %v2521_v21 = vadd.f32 %v2507_v23, %v4985_v49 }
0x16ce   : > { %1459 = vst.msk [vmem:[%s3984_s15 + $0x4] sm:$0xf] %vm933_vm1, %v1457_v60  ;;  %v2524_v12 = vmax.f32 %v2257_v13, %v2523_v44 }
0x16cf   : > { %v2546_v42 = vpop.permute.xlu0 %2545  ;;  %1721 = vst.msk [vmem:[%s3984_s15 + $0x4] sm:$0xf] %vm672_vm8, %v5003_v3  ;;  %v2522_v3 = vmax.f32 %v2255_v29, %v2521_v21 }
0x16d0   : > { %v2548_v55 = vmul.f32 %v2546_v42, %v2519_v61  ;;  %v2554_v0 = vmul.f32 %v2546_v42, %v2520_v27 }
0x16d1   : > { %v2248_v20 = vpop.permute.xlu1 %2247 }
0x16d2   : > { %2550 = vrot.lane.b32.xlu1 %v2548_v55, %s3486_s25  ;;  %2556 = vrot.lane.b32.xlu0 %v2554_v0, %s3488_s9 }
0x16d3   : > { %v668_v5 = vpop.permute.xlu0 %667 }
0x16d4   : > { %671 = vst.msk [vmem:[%s3984_s15] sm:$0xf] %vm670_vm0, %v668_v5 }
0x16d5   : > { %934 = vst.msk [vmem:[%s3984_s15] sm:$0xf] %vm933_vm1, %v931_v8  ;;  %v1986_v49 = vpop.permute.xlu1 %1985 }
0x16d6   : > { %1988 = vst.msk [vmem:[%s3984_s15 + $0x4] sm:$0xf] %vm939_vm2, %v1986_v49  ;;  %2561 = vrot.lane.b32.xlu1 %v2522_v3, %s3485_s14  ;;  %2510 = vrot.lane.b32.xlu0 %v2507_v23, %s3485_s14  ;;  %s2723_s14 = sshll.u32 %s3541_s22, 6  ;;  %s2572_s22 = scalar_lea.sflag [#allocation3], %s266_s30 }
0x16d7   : > { %2251 = vst.msk [vmem:[%s3984_s15] sm:$0xf] %vm672_vm8, %v2245_v34  ;;  %v937_v63 = vpop.permute.xlu0 %936  ;;  %s5077_s25 = scalar_lea.hbm %s5129_s5, %s2723_s14 }
0x16d8   : > { %940 = vst.msk [vmem:[%s3984_s15 + $0xc] sm:$0xf] %vm939_vm2, %v937_v63 }
0x16d9   : > { %2250 = vst.msk [vmem:[%s3984_s15 + $0xc] sm:$0xf] %vm670_vm0, %v2248_v20 }
0x16da   : > { %2515 = vrot.lane.b32.xlu1 %v2508_v19, %s3488_s9  ;;  %s3427_s9 = scalar_lea.vmem %s3426_s8, 128 }
0x16db   : > { %v1462_v43 = vpop.permute.xlu0 %1461  ;;  %p3429_p1 = scmp.lt.s32.totalorder %s3427_s9, %s3421_s26 }
0x16dc   : > { %1464 = vst.msk [vmem:[%s3984_s15 + $0x8] sm:$0xf] %vm939_vm2, %v1462_v43 }
0x16dd   : > { %p3430_p2 = por %p3429_p1, %p3428_p0 }
0x16df   : > { %v1718_v16 = vpop.permute.xlu0 %1717  ;;  %p3431_p3 = pnand %p3430_p2, %p3424_p13 }
0x16e0   : > { %1720 = vst.msk [vmem:[%s3984_s15 + $0x8] sm:$0xf] %vm670_vm0, %v1718_v16 }
0x16e3   : > { %v1981_v47 = vpop.permute.xlu0 %1980 }
0x16e4   : > { %1983 = vst.msk [vmem:[%s3984_s15 + $0x8] sm:$0xf] %vm933_vm1, %v1981_v47 }
0x1744   : > { %v2551_v56 = vpop.permute.xlu1 %2550  ;;  %v2557_v24 = vpop.permute.xlu0 %2556 }
0x1745   : > { %2553 = vst.msk [vmem:[%s268_s13] sm:$0xf] %vm670_vm0, %v2551_v56 }
0x1746   : > { %2559 = vst.msk [vmem:[%s268_s13] sm:$0xf] %vm939_vm2, %v2557_v24 }
0x1748   : > { %v2562_v14 = vpop.permute.xlu1 %2561  ;;  %v2511_v17 = vpop.permute.xlu0 %2510 }
0x1749   : > { %2564 = vst.msk [vmem:[%s268_s13] sm:$0xf] %vm933_vm1, %v2562_v14  ;;  %2513 = vst.msk [vmem:[%s3984_s15 + $0xc] sm:$0xf] %vm933_vm1, %v2511_v17 }
0x174a   : > { %2565 = vst.msk [vmem:[%s268_s13] sm:$0xf] %vm672_vm8, %v2524_v12 }
0x174b   : > { %3434 = shalt.err (!%p3431_p3)
}
0x174c   : > { %s3435_s6 = scalar_lea.hbm %s5077_s25, 64  ;;  %s3439_s30 = scalar_lea.hbm %s5129_s5, 128 }
0x174d   : > { %p3436_p4 = scmp.ne.s32.totalorder %s5077_s25, %s3435_s6  ;;  %p3440_p9 = scmp.lt.s32.totalorder %s5077_s25, %s5129_s5 }
0x174e   : > { %p3441_p10 = scmp.lt.s32.totalorder %s3439_s30, %s3435_s6 }
0x174f   : > { %p3437_p7 = pnand %p3436_p4, %p3558_p5 }
0x1750   : > { %p3442_p11 = por %p3441_p10, %p3440_p9 }
0x1751   : > { %p3438_p8 = pneg %p3437_p7 }
0x1753   : > { %p3443_p12 = pnand %p3442_p11, %p3438_p8 }
0x1755   : > { %3446 = shalt.err (!%p3443_p12)
}
0x1756   : > { %3147 = dma.vmem_to_hbm [thread:$0]  (%p3558_p5), %s5079_s16, 64, %s5077_s25, %s2572_s22   ;;  %v2516_v32 = vpop.permute.xlu1 %2515 }
0x1757   : > { %2518 = vst.msk [vmem:[%s3984_s15] sm:$0xf] %vm939_vm2, %v2516_v32 }
0x1758 PF: > { %p3153_p13 = scmp.ge.s32.totalorder %s3481_s21, 2  ;;  %s2608_s14 = sand.u32 1, %s3469_s18  }
0x1759   : > { %s2609_s17 = scalar_lea.sflag [#allocation3], %s2608_s14 }
0x175a   : > { %p3150_p0 = pnand %p3153_p13, %p3562_p6 }
0x175c   : > { %p3151_p1 = pneg %p3150_p0 }
0x175e   : > { %3464 = dma.done.wait (%p3151_p1), %s2609_s17, 64  }
0x175f   : > { %3466 = vsyncadd (%p3151_p1), %s2609_s17, 4294967232  ;;  %p16_p5 = scmp.ge.s32.totalorder %s3545_s24, 4   ;;  %s5443_s18 = smov %s3473_s19 }
0x1760   : > { %s5444_s19 = smov %s3477_s20  ;;  %s5445_s20 = smov %s3556_s27 }
0x1761   : > { %s5446_s21 = smov %s3545_s24  ;;  %18 = sbr.rel (!%p16_p5) target bundleno = 3 (0x3), region = 92 }
0x1766   :  { %2614 = vsyncpa [#allocation3], 1 }
0x1767   :  { %2616 = vsyncpa [#allocation3 + $0x1], 1 }

// kernel: multi_att_forward.6
= control target key start
LH: loop header
LB: loop body
LE: loop exit
PB: predicated region body
PF: predicated region fallthrough
CT: control target
= control target key end

     0   :  { %11 = vsyncpa [#allocation3], 0  ;;  %s5116_s0 = inlined_call_operand.vmem [shape: f32[2,4,8,32], index: 0, kind: input, shape index: {}]   ;;  %s5117_s1 = inlined_call_operand.vmem [shape: f32[2,8,4,1], index: 1, kind: input, shape index: {}]   ;;  %s5118_s2 = inlined_call_operand.vmem [shape: f32[2,128,384], index: 2, kind: input, shape index: {}]   ;;  %s5119_s3 = inlined_call_operand.vmem [shape: f32[2,1,384], index: 3, kind: input, shape index: {}]   ;;  %s5120_s4 = inlined_call_operand.hbm [shape: f32[2,4,512], index: 4, kind: output, shape index: {0}]   ;;  %s5121_s5 = inlined_call_operand.vmem [shape: f32[2,4,128], index: 5, kind: output, shape index: {1}]  }
   0x1   :  { %13 = vsyncpa [#allocation3 + $0x1], 0  ;;  %s3517_s18 = smov 0   ;;  %s3519_s19 = smov 0  }
   0x2   :  { %s3521_s20 = smov 0   ;;  %s3523_s21 = smov 0  }
   0x3 LB: > { %s3538_s22 = sadd.s32 4294967295, %s3478_s21   ;;  %s2705_s23 = sadd.s32 4294967294, %s3478_s21   ;;  %s3478_s21 = sphi %s3523_s21, %s5436_s21   ;;  %s3474_s20 = sphi %s3521_s20, %s5435_s20   ;;  %s3470_s19 = sphi %s3519_s19, %s5434_s19   ;;  %s3466_s18 = sphi %s3517_s18, %s5433_s18  }
   0x4   : > { %s3542_s24 = sadd.s32 1, %s3478_s21   ;;  %s130_s25 = sadd.s32 1, %s3474_s20 }
   0x5   : > { %s127_s26 = ssub.s32 %s3478_s21, %s3542_s24  ;;  %p140_p0 = scmp.ne.s32.totalorder %s3474_s20, %s3470_s19 }
   0x6   : > { %p128_p1 = scmp.eq.s32.totalorder %s127_s26, 0  ;;  %p141_p2 = scmp.eq.s32.totalorder %s3538_s22, 1 }
   0x7   : > { %p146_p3 = scmp.ne.s32.totalorder %s3470_s19, %s3466_s18  ;;  %p147_p4 = scmp.eq.s32.totalorder %s2705_s23, 1 }
   0x8   : > { %s3553_s27 = scalar_select %p128_p1, %s3474_s20, %s130_s25  }
   0x9   : > { %p3555_p5 = por %p141_p2, %p140_p0  ;;  %p3559_p6 = por %p147_p4, %p146_p3 }
   0xa   : > { %p2708_p7 = scmp.ge.s32.totalorder %s3478_s21, 1  ;;  %p222_p8 = scmp.lt.s32.totalorder %s3478_s21, 3 }
   0xc   : > { %p223_p9 = pnand %p2708_p7, %p222_p8 }
   0xe   : > { %226 = sbr.rel (%p223_p9) target bundleno = 5976 (0x1758), region = 36 }
  0x13   : > { %p268_p10 = scmp.lt.s32.totalorder %s3538_s22, 1  ;;  %v5131_v0 = vmov 0.0   ;;  %vm3481_vm0 = vmmov 0   ;;  %vm405_vm1 = vcmask 1041409   ;;  %vm408_vm2 = vcmask 1042434   ;;  %s3482_s14 = smov 32  }
  0x14   : > { %2862 = vmatprep.subr.mxu1 %v5131_v0  ;;  %510 = vmatprep.mubr.f32.mxu0 %v5131_v0  ;;  %vm411_vm3 = vcmask 1043459   ;;  %vm424_vm4 = vcmask 261120   ;;  %vm426_vm5 = vcmask 523264   ;;  %vm428_vm6 = vcmask 785408   ;;  %s3483_s25 = smov 96   ;;  %s3485_s9 = smov 64  }
  0x15   : > { %s3569_s30 = scalar_select %p268_p10, %s3538_s22, 1  ;;  %2894 = vmatprep.mubr.msk.f32.mxu1 %vm3481_vm0, %v5131_v0  ;;  %vm682_vm7 = vcmask 1044484   ;;  %vm670_vm8 = vcmask 1044224   ;;  %vm949_vm9 = vcmask 1045509   ;;  %vm1209_vm10 = vcmask 1046534  }
  0x16   : > { %vm1473_vm11 = vcmask 1047559   ;;  %vm1754_vm12 = vcmask 1042432   ;;  %vm2021_vm13 = vcmask 1041408   ;;  %vm2284_vm14 = vcmask 1040384   ;;  %s2725_s16 = sshll.u32 %s3538_s22, 8 }
  0x17   : > { %s2723_s6 = sshll.u32 %s3569_s30, 5  ;;  %s3142_s7 = smul.u32 384, %s3569_s30  ;;  %vm2523_vm15 = vcmask 3072  }
  0x18   : > { %s3580_s10 = scalar_lea.vmem %s5116_s0, %s2723_s6  ;;  %s3143_s15 = smul.u32 3, %s3569_s30 }
  0x19   : > { %s3585_s13 = scalar_lea.vmem %s5118_s2, %s3142_s7  ;;  %v3588_v1 = vld [vmem:[%s3580_s10] sm:$0xff]  ;;  %v3591_v2 = vld [vmem:[%s3580_s10 + $0x8] sm:$0xff]  ;;  %v3594_v3 = vld [vmem:[%s3580_s10 + $0x10] sm:$0xff]  ;;  %s3934_s8 = scalar_lea.vmem %s5117_s1, %s2723_s6 }
  0x1a   : > { %5250 = vst [vmem:[#allocation5_spill] sm:$0xff] %v3591_v2  ;;  %v3597_v4 = vld [vmem:[%s3580_s10 + $0x18] sm:$0xff]  ;;  %v5125_v5 = vrot.slane %v3588_v1, 7  ;;  %v5124_v6 = vrot.slane %v3591_v2, 6  ;;  %v3602_v7 = vld [vmem:[%s3585_s13 + $0x170] sm:$0xff]  ;;  %v5123_v8 = vrot.slane %v3594_v3, 5  ;;  %s286_s23 = scalar_lea.vmem %s5119_s3, %s3143_s15 }
  0x1b   : > { %5251 = vst [vmem:[#allocation6_spill] sm:$0xff] %v3602_v7  ;;  %v5122_v9 = vrot.slane %v3597_v4, 4  ;;  %446 = vmatprep.subr.mxu0 %v3602_v7  ;;  %v3608_v10 = vld [vmem:[%s3585_s13 + $0x168] sm:$0xff]  ;;  %v3611_v11 = vld [vmem:[%s3585_s13 + $0x178] sm:$0xff]  ;;  %v3624_v14 = vld [vmem:[%s3585_s13 + $0x150] sm:$0xff]  ;;  %v3825_v60 = vrot.slane %v3591_v2, 7 }
  0x1c   : > { %v3614_v12 = vld [vmem:[%s3585_s13 + $0x158] sm:$0xff]  ;;  %v416_v13 = vsel %vm405_vm1, %v5124_v6, %v5125_v5  ;;  %447 = vmatpush1.msra.mxu0 %v3608_v10  ;;  %2863 = vmatpush3.msra.mxu1 %v3611_v11  ;;  %v3627_v15 = vld [vmem:[%s3585_s13 + $0x160] sm:$0xff]  ;;  %v3646_v20 = vld [vmem:[%s3585_s13 + $0x148] sm:$0xff]  ;;  %v3828_v61 = vrot.slane %v3594_v3, 6  ;;  %v3834_v63 = vrot.slane %v3597_v4, 5  ;;  %s259_s6 = sand.u32 1, %s3470_s19  }
  0x1d   : > { %v3630_v16 = vld [vmem:[%s3585_s13 + $0x140] sm:$0xff]  ;;  %v418_v17 = vsel %vm408_vm2, %v5123_v8, %v416_v13  ;;  %448 = vmatprep.subr.mxu0 %v3614_v12  ;;  %2864 = vmatprep.subr.mxu1 %v5131_v0  ;;  %v3638_v18 = vld [vmem:[%s3585_s13 + $0x138] sm:$0xff]  ;;  %v3649_v21 = vld [vmem:[%s3585_s13 + $0x128] sm:$0xff]  ;;  %v406_v62 = vsel %vm405_vm1, %v3825_v60, %v3588_v1  ;;  %s2709_s11 = sshll.u32 %s259_s6, 4  ;;  %s2565_s22 = scalar_lea.sflag [#allocation3], %s259_s6 }
  0x1e   : > { %v420_v19 = vsel %vm411_vm3, %v5122_v9, %v418_v17  ;;  %449 = vmatpush1.msra.mxu0 %v3624_v14  ;;  %2865 = vmatpush3.msra.mxu1 %v3627_v15  ;;  %v3654_v22 = vld [vmem:[%s3585_s13 + $0x120] sm:$0xff]  ;;  %v3659_v23 = vld [vmem:[%s3585_s13 + $0x130] sm:$0xff]  ;;  %v3667_v25 = vld [vmem:[%s3585_s13 + $0x108] sm:$0xff]  ;;  %v409_v13 = vsel %vm408_vm2, %v3828_v61, %v406_v62  ;;  %s3984_s12 = scalar_lea.vmem [#allocation2], %s2709_s11  ;;  %s3486_s7 = smov [#allocation2]  }
  0x1f   : > { %421 = vrot.lane.b32.xlu0 %v420_v19, %s3482_s14  ;;  %450 = vmatprep.subr.mxu0 %v3630_v16  ;;  %v3662_v24 = vld [vmem:[%s3585_s13 + $0x110] sm:$0xff]  ;;  %v3672_v26 = vld [vmem:[%s3585_s13 + $0x118] sm:$0xff]  ;;  %v3685_v29 = vld [vmem:[%s3585_s13 + $0x100] sm:$0xff]  ;;  %v412_v17 = vsel %vm411_vm3, %v3834_v63, %v409_v13  ;;  %s2583_s17 = sshll.u32 %s3984_s12, 4  ;;  %s5071_s17 = int_to_ptr.vmem [resolvable:$true] %s2583_s17 }
  0x20   : > { %2866 = vmatprep.subr.mxu1 %v5131_v0  ;;  %451 = vmatpush1.msra.mxu0 %v3638_v18  ;;  %v3675_v27 = vld [vmem:[%s3585_s13 + $0xf8] sm:$0xff]  ;;  %v3680_v28 = vld [vmem:[%s3585_s13 + $0xf0] sm:$0xff]  ;;  %v3688_v30 = vld [vmem:[%s3585_s13 + $0xe0] sm:$0xff]  ;;  %s3418_s26 = scalar_lea.vmem %s5071_s17, 256 }
  0x21   : > { %2867 = vmatpush3.msra.mxu1 %v3646_v20  ;;  %452 = vmatprep.subr.mxu0 %v3649_v21  ;;  %v3693_v31 = vld [vmem:[%s3585_s13 + $0xd8] sm:$0xff]  ;;  %v3698_v32 = vld [vmem:[%s3585_s13 + $0xe8] sm:$0xff]  ;;  %v3706_v34 = vld [vmem:[%s3585_s13 + $0xc0] sm:$0xff]  ;;  %p3419_p11 = scmp.ne.s32.totalorder %s5071_s17, %s3418_s26 }
  0x22   : > { %2868 = vmatprep.subr.mxu1 %v5131_v0  ;;  %453 = vmatpush1.msra.mxu0 %v3654_v22  ;;  %v3701_v33 = vld [vmem:[%s3585_s13 + $0xc8] sm:$0xff]  ;;  %v3711_v35 = vld [vmem:[%s3585_s13 + $0xd0] sm:$0xff]  ;;  %v3724_v38 = vld [vmem:[%s3585_s13 + $0xb8] sm:$0xff] }
  0x23   : > { %2869 = vmatpush3.msra.mxu1 %v3659_v23  ;;  %454 = vmatprep.subr.mxu0 %v3662_v24  ;;  %v3714_v36 = vld [vmem:[%s3585_s13 + $0xb0] sm:$0xff]  ;;  %v3719_v37 = vld [vmem:[%s3585_s13 + $0xa8] sm:$0xff]  ;;  %v3727_v39 = vld [vmem:[%s3585_s13 + $0x98] sm:$0xff]  ;;  %p3420_p12 = pnand %p3419_p11, %p3555_p5 }
  0x24   : > { %2870 = vmatprep.subr.mxu1 %v5131_v0  ;;  %455 = vmatpush1.msra.mxu0 %v3667_v25  ;;  %v3732_v40 = vld [vmem:[%s3585_s13 + $0x90] sm:$0xff]  ;;  %v3737_v41 = vld [vmem:[%s3585_s13 + $0xa0] sm:$0xff]  ;;  %v3745_v43 = vld [vmem:[%s3585_s13 + $0x78] sm:$0xff] }
  0x25   : > { %2871 = vmatpush3.msra.mxu1 %v3672_v26  ;;  %456 = vmatprep.subr.mxu0 %v3675_v27  ;;  %v3740_v42 = vld [vmem:[%s3585_s13 + $0x80] sm:$0xff]  ;;  %v3750_v44 = vld [vmem:[%s3585_s13 + $0x88] sm:$0xff]  ;;  %v3763_v47 = vld [vmem:[%s3585_s13 + $0x70] sm:$0xff]  ;;  %p3421_p13 = pneg %p3420_p12 }
  0x26   : > { %2872 = vmatprep.subr.mxu1 %v5131_v0  ;;  %457 = vmatpush1.msra.mxu0 %v3680_v28  ;;  %v3753_v45 = vld [vmem:[%s3585_s13 + $0x68] sm:$0xff]  ;;  %v3758_v46 = vld [vmem:[%s3585_s13 + $0x60] sm:$0xff]  ;;  %v3766_v48 = vld [vmem:[%s3585_s13 + $0x50] sm:$0xff] }
  0x27   : > { %2873 = vmatpush3.msra.mxu1 %v3685_v29  ;;  %458 = vmatprep.subr.mxu0 %v3688_v30  ;;  %v3771_v49 = vld [vmem:[%s3585_s13 + $0x48] sm:$0xff]  ;;  %v3776_v50 = vld [vmem:[%s3585_s13 + $0x58] sm:$0xff]  ;;  %v3784_v52 = vld [vmem:[%s3585_s13 + $0x30] sm:$0xff] }
  0x28   : > { %2874 = vmatprep.subr.mxu1 %v5131_v0  ;;  %459 = vmatpush1.msra.mxu0 %v3693_v31  ;;  %5252 = vst [vmem:[#allocation7_spill] sm:$0xff] %v3771_v49  ;;  %5253 = vst [vmem:[#allocation8_spill] sm:$0xff] %v3776_v50  ;;  %v3779_v51 = vld [vmem:[%s3585_s13 + $0x38] sm:$0xff]  ;;  %v3789_v53 = vld [vmem:[%s3585_s13 + $0x40] sm:$0xff] }
  0x29   : > { %2875 = vmatpush3.msra.mxu1 %v3698_v32  ;;  %460 = vmatprep.subr.mxu0 %v3701_v33  ;;  %5254 = vst [vmem:[#allocation9_spill] sm:$0xff] %v3779_v51  ;;  %5255 = vst [vmem:[#allocation10_spill] sm:$0xff] %v3784_v52  ;;  %v3792_v54 = vld [vmem:[%s3585_s13 + $0x20] sm:$0xff]  ;;  %v3797_v55 = vld [vmem:[%s3585_s13 + $0x18] sm:$0xff] }
  0x2a   : > { %2876 = vmatprep.subr.mxu1 %v5131_v0  ;;  %461 = vmatpush1.msra.mxu0 %v3706_v34  ;;  %5256 = vst [vmem:[#allocation11_spill] sm:$0xff] %v3789_v53  ;;  %5257 = vst [vmem:[#allocation12_spill] sm:$0xff] %v3792_v54  ;;  %v3802_v56 = vld [vmem:[%s3585_s13 + $0x28] sm:$0xff]  ;;  %v3810_v58 = vld [vmem:[%s3585_s13] sm:$0xff] }
  0x2b   : > { %2877 = vmatpush3.msra.mxu1 %v3711_v35  ;;  %462 = vmatprep.subr.mxu0 %v3714_v36  ;;  %5258 = vst [vmem:[#allocation13_spill] sm:$0xff] %v3797_v55  ;;  %5259 = vst [vmem:[#allocation14_spill] sm:$0xff] %v3802_v56  ;;  %v3805_v57 = vld [vmem:[%s3585_s13 + $0x8] sm:$0xff]  ;;  %v3815_v59 = vld [vmem:[%s3585_s13 + $0x10] sm:$0xff] }
  0x2c   : > { %2878 = vmatprep.subr.mxu1 %v5131_v0  ;;  %463 = vmatpush1.msra.mxu0 %v3719_v37  ;;  %5260 = vst [vmem:[#allocation15_spill] sm:$0xff] %v3805_v57  ;;  %5261 = vst [vmem:[#allocation16_spill] sm:$0xff] %v3810_v58  ;;  %v351_v13 = vld [vmem:[%s286_s23] sm:$0x7] }
  0x2d   : > { %2879 = vmatpush3.msra.mxu1 %v3724_v38  ;;  %464 = vmatprep.subr.mxu0 %v3727_v39  ;;  %5262 = vst [vmem:[#allocation17_spill] sm:$0xff] %v3815_v59 }
  0x2e   : > { %2880 = vmatprep.subr.mxu1 %v5131_v0  ;;  %465 = vmatpush1.msra.mxu0 %v3732_v40 }
  0x2f   : > { %2881 = vmatpush3.msra.mxu1 %v3737_v41  ;;  %466 = vmatprep.subr.mxu0 %v3740_v42 }
  0x30   : > { %2882 = vmatprep.subr.mxu1 %v5131_v0  ;;  %467 = vmatpush1.msra.mxu0 %v3745_v43 }
  0x31   : > { %2883 = vmatpush3.msra.mxu1 %v3750_v44  ;;  %468 = vmatprep.subr.mxu0 %v3753_v45 }
  0x32   : > { %2884 = vmatprep.subr.mxu1 %v5131_v0  ;;  %469 = vmatpush1.msra.mxu0 %v3758_v46 }
  0x33   : > { %2885 = vmatpush3.msra.mxu1 %v3763_v47  ;;  %470 = vmatprep.subr.mxu0 %v3766_v48 }
  0x34   : > { %2886 = vmatprep.subr.mxu1 %v5131_v0  ;;  %471 = vmatpush1.msra.mxu0 %v3771_v49 }
  0x35   : > { %2887 = vmatpush3.msra.mxu1 %v3776_v50  ;;  %472 = vmatprep.subr.mxu0 %v3779_v51 }
  0x36   : > { %2888 = vmatprep.subr.mxu1 %v5131_v0  ;;  %473 = vmatpush1.msra.mxu0 %v3784_v52 }
  0x37   : > { %2889 = vmatpush3.msra.mxu1 %v3789_v53  ;;  %474 = vmatprep.subr.mxu0 %v3792_v54 }
  0x38   : > { %2890 = vmatprep.subr.mxu1 %v5131_v0  ;;  %475 = vmatpush1.msra.mxu0 %v3797_v55 }
  0x39   : > { %2891 = vmatpush3.msra.mxu1 %v3802_v56  ;;  %476 = vmatprep.subr.mxu0 %v3805_v57 }
  0x3a   : > { %2892 = vmatprep.subr.mxu1 %v5131_v0  ;;  %477 = vmatpush1.msra.mxu0 %v3810_v58 }
  0x3b   : > { %2893 = vmatpush3.msra.mxu1 %v3815_v59  ;;  %709 = vmatprep.subr.mxu0 %v3602_v7 }
  0x3c   : > { %2897 = vmatprep.subr.mxu1 %v5131_v0 }
  0x91   : > { %v422_v19 = vpop.permute.xlu0 %421 }
  0x92   : > { %v425_v9 = vsel %vm424_vm4, %v412_v17, %v422_v19 }
  0x93   : > { %v427_v8 = vsel %vm426_vm5, %v425_v9, 0.0 }
  0x94   : > { %2716 = vmatmul.mubr.msk.f32.vlgmr.msra.gmra.mxu0 %vm428_vm6, %v427_v8  ;;  %2895 = vmatmul.mubr.msk.f32.vlgmr.msra.gmra.mxu1 %vm428_vm6, %v427_v8  ;;  %v431_v8 = vlaneseq }
  0x95   : > { %710 = vmatpush1.msra.mxu0 %v3608_v10  ;;  %2898 = vmatpush3.msra.mxu1 %v3611_v11 }
  0x96   : > { %711 = vmatprep.subr.mxu0 %v3614_v12  ;;  %2899 = vmatprep.subr.mxu1 %v5131_v0  ;;  %v432_v9 = vshrl.u32 %v431_v8, 7 }
  0x97   : > { %712 = vmatpush1.msra.mxu0 %v3624_v14  ;;  %2900 = vmatpush3.msra.mxu1 %v3627_v15 }
  0x98   : > { %713 = vmatprep.subr.mxu0 %v3630_v16  ;;  %2901 = vmatprep.subr.mxu1 %v5131_v0  ;;  %v433_v62 = vsub.s32 0, %v432_v9  ;;  %v437_v17 = vsub.s32 1, %v432_v9  ;;  %v441_v6 = vsub.s32 2, %v432_v9 }
  0x99   : > { %714 = vmatpush1.msra.mxu0 %v3638_v18  ;;  %2902 = vmatpush3.msra.mxu1 %v3646_v20 }
  0x9a   : > { %715 = vmatprep.subr.mxu0 %v3649_v21  ;;  %2903 = vmatprep.subr.mxu1 %v5131_v0  ;;  %v3915_v19 = vrot.slane %v351_v13, %v433_v62  ;;  %v3917_v5 = vrot.slane %v351_v13, %v437_v17 }
  0x9b   : > { %716 = vmatpush1.msra.mxu0 %v3654_v22  ;;  %2904 = vmatpush3.msra.mxu1 %v3659_v23 }
  0x9c   : > { %717 = vmatprep.subr.mxu0 %v3662_v24  ;;  %2905 = vmatprep.subr.mxu1 %v5131_v0  ;;  %5263 = vst [vmem:[#allocation18_spill] sm:$0xff] %v3915_v19  ;;  %5264 = vst [vmem:[#allocation19_spill] sm:$0xff] %v3917_v5 }
  0x9d   : > { %718 = vmatpush1.msra.mxu0 %v3667_v25  ;;  %2906 = vmatpush3.msra.mxu1 %v3672_v26 }
  0x9e   : > { %719 = vmatprep.subr.mxu0 %v3675_v27  ;;  %2907 = vmatprep.subr.mxu1 %v5131_v0 }
  0x9f   : > { %720 = vmatpush1.msra.mxu0 %v3680_v28  ;;  %2908 = vmatpush3.msra.mxu1 %v3685_v29 }
  0xa0   : > { %721 = vmatprep.subr.mxu0 %v3688_v30  ;;  %2909 = vmatprep.subr.mxu1 %v5131_v0 }
  0xa1   : > { %722 = vmatpush1.msra.mxu0 %v3693_v31  ;;  %2910 = vmatpush3.msra.mxu1 %v3698_v32 }
  0xa2   : > { %723 = vmatprep.subr.mxu0 %v3701_v33  ;;  %2911 = vmatprep.subr.mxu1 %v5131_v0 }
  0xa3   : > { %724 = vmatpush1.msra.mxu0 %v3706_v34  ;;  %2912 = vmatpush3.msra.mxu1 %v3711_v35 }
  0xa4   : > { %725 = vmatprep.subr.mxu0 %v3714_v36  ;;  %2913 = vmatprep.subr.mxu1 %v5131_v0 }
  0xa5   : > { %726 = vmatpush1.msra.mxu0 %v3719_v37  ;;  %2914 = vmatpush3.msra.mxu1 %v3724_v38 }
  0xa6   : > { %727 = vmatprep.subr.mxu0 %v3727_v39  ;;  %2915 = vmatprep.subr.mxu1 %v5131_v0 }
  0xa7   : > { %728 = vmatpush1.msra.mxu0 %v3732_v40  ;;  %2916 = vmatpush3.msra.mxu1 %v3737_v41 }
  0xa8   : > { %729 = vmatprep.subr.mxu0 %v3740_v42  ;;  %2917 = vmatprep.subr.mxu1 %v5131_v0 }
  0xa9   : > { %730 = vmatpush1.msra.mxu0 %v3745_v43  ;;  %2918 = vmatpush3.msra.mxu1 %v3750_v44 }
  0xaa   : > { %731 = vmatprep.subr.mxu0 %v3753_v45  ;;  %2919 = vmatprep.subr.mxu1 %v5131_v0 }
  0xab   : > { %732 = vmatpush1.msra.mxu0 %v3758_v46  ;;  %2920 = vmatpush3.msra.mxu1 %v3763_v47 }
  0xac   : > { %733 = vmatprep.subr.mxu0 %v3766_v48  ;;  %2921 = vmatprep.subr.mxu1 %v5131_v0 }
  0xad   : > { %734 = vmatpush1.msra.mxu0 %v3771_v49  ;;  %2922 = vmatpush3.msra.mxu1 %v3776_v50 }
  0xae   : > { %735 = vmatprep.subr.mxu0 %v3779_v51  ;;  %2923 = vmatprep.subr.mxu1 %v5131_v0 }
  0xaf   : > { %736 = vmatpush1.msra.mxu0 %v3784_v52  ;;  %2924 = vmatpush3.msra.mxu1 %v3789_v53 }
  0xb0   : > { %737 = vmatprep.subr.mxu0 %v3792_v54  ;;  %2925 = vmatprep.subr.mxu1 %v5131_v0 }
  0xb1   : > { %738 = vmatpush1.msra.mxu0 %v3797_v55  ;;  %2926 = vmatpush3.msra.mxu1 %v3802_v56 }
  0xb2   : > { %739 = vmatprep.subr.mxu0 %v3805_v57  ;;  %2927 = vmatprep.subr.mxu1 %v5131_v0 }
  0xb3   : > { %740 = vmatpush1.msra.mxu0 %v3810_v58  ;;  %773 = vmatprep.mubr.f32.mxu0 %v5131_v0 }
  0xb4   : > { %2928 = vmatpush3.msra.mxu1 %v3815_v59  ;;  %2929 = vmatprep.mubr.msk.f32.mxu1 %vm3481_vm0, %v5131_v0 }
  0xb5   : > { %975 = vmatprep.subr.mxu0 %v3602_v7  ;;  %2932 = vmatprep.subr.mxu1 %v5131_v0  ;;  %v3920_v0 = vrot.slane %v351_v13, %v441_v6 }
  0xb7   : > { %5265 = vst [vmem:[#allocation20_spill] sm:$0xff] %v3920_v0 }
 0x154   : > { %v512_v59 = vpop.f32.mrf.mxu0  ;;  %v583_v58 = vpop.f32.mrf.mxu1 }
 0x155   : > { %v513_v7 = vadd.f32 %v512_v59, %v3915_v19  ;;  %v584_v55 = vadd.f32 %v583_v58, %v3920_v0 }
 0x156   : > { %v514_v57 = vpop.f32.mrf.mxu0  ;;  %v2896_v8 = vpop.f32.mrf.mxu1 }
 0x157   : > { %v515_v56 = vadd.f32 %v514_v57, %v3917_v5  ;;  %588 = vrot.lane.b32.xlu0 %v513_v7, %s3482_s14 }
 0x159   : > { %609 = vrot.lane.b32.xlu1 %v515_v56, %s3483_s25 }
 0x15b   : > { %641 = vrot.lane.b32.xlu0 %v584_v55, %s3483_s25 }
 0x15d   : > { %631 = vrot.lane.b32.xlu1 %v584_v55, %s3482_s14 }
 0x15f   : > { %599 = vrot.lane.b32.xlu0 %v515_v56, %s3482_s14 }
 0x1c9   : > { %v589_v59 = vpop.permute.xlu0 %588 }
 0x1ca   : > { %v591_v6 = vadd.f32 %v589_v59, %v513_v7  ;;  %v3484_v59 = vmov 0  }
 0x1cb   : > { %v610_v9 = vpop.permute.xlu1 %609  ;;  %3189 = vset.pattern.permute.xlu0 %v3484_v59  ;;  %3190 = vset.pattern.permute.xlu1 %v3484_v59 }
 0x1cc   : > { %v592_v62 = vsub.f32 0.0, %v591_v6  ;;  %v295_v6 = vld [vmem:[%s3934_s8] sm:$0xf] }
 0x1cd   : > { %354 = vperm.xlu0 %3189, %v295_v6  }
 0x1ce   : > { %v593_v13 = vmul.f32 1.442695, %v592_v62 }
 0x1cf   : > { %v632_v57 = vpop.permute.xlu1 %631 }
 0x1d0   : > { %3226 = vpow2.f32 %v593_v13  ;;  %v634_v17 = vadd.f32 %v632_v57, %v515_v56 }
 0x1d2   : > { %v635_v8 = vsub.f32 0.0, %v634_v17 }
 0x1d4   : > { %v636_v58 = vmul.f32 1.442695, %v635_v8 }
 0x1d6   : > { %3228 = vpow2.f32 %v636_v58  ;;  %v302_v58 = vld [vmem:[%s3934_s8 + $0x1c] sm:$0xf] }
 0x1dd   : > { %v3227_v0 = vpop.eup %3226 }
 0x1de   : > { %v595_v5 = vadd.f32 1.0, %v3227_v0 }
 0x1e0   : > { %3230 = vrcp.f32 %v595_v5  ;;  %v642_v5 = vpop.permute.xlu0 %641 }
 0x1e3   : > { %v3229_v19 = vpop.eup %3228 }
 0x1e4   : > { %v638_v54 = vadd.f32 1.0, %v3229_v19  ;;  %v600_v59 = vpop.permute.xlu0 %599 }
 0x1e5   : > { %v602_v6 = vadd.f32 %v600_v59, %v513_v7  ;;  %v5153_v59 = vrot.slane %v3594_v3, 3 }
 0x1e6   : > { %3232 = vrcp.f32 %v638_v54 }
 0x1ed   : > { %v3231_v56 = vpop.eup %3230 }
 0x1ee   : > { %v612_v62 = vmul.f32 %v3231_v56, %v610_v9  ;;  %v603_v56 = vsub.f32 0.0, %v602_v6 }
 0x1f0   : > { %614 = vrot.lane.b32.xlu1 %v612_v62, %s3485_s9  ;;  %v604_v62 = vmul.f32 1.442695, %v603_v56 }
 0x1f3   : > { %v3233_v0 = vpop.eup %3232 }
 0x1f4   : > { %v644_v54 = vmul.f32 %v3233_v0, %v642_v5 }
 0x1f6   : > { %646 = vrot.lane.b32.xlu1 %v644_v54, %s3485_s9 }
 0x262   : > { %v615_v19 = vpop.permute.xlu1 %614 }
 0x263   : > { %v617_v13 = vadd.f32 %v615_v19, %v513_v7 }
 0x265   : > { %3234 = vtanh.f32 %v617_v13  ;;  %v3942_v13 = vpop.permute.xlu0 %354 }
 0x266   : > { %5266 = vst [vmem:[#allocation21_spill] sm:$0xff] %v3942_v13 }
 0x268   : > { %v647_v57 = vpop.permute.xlu1 %646 }
 0x269   : > { %v649_v17 = vadd.f32 %v647_v57, %v584_v55  ;;  %v5150_v55 = vrot.slane %v3588_v1, 5  ;;  %v5149_v57 = vrot.slane %v3591_v2, 4  ;;  %v651_v2 = vsub.f32 1.0, %v3233_v0 }
 0x26b   : > { %3236 = vtanh.f32 %v649_v17  ;;  %v687_v6 = vsel %vm408_vm2, %v5149_v57, %v5150_v55 }
 0x26c   : > { %3238 = vpow2.f32 %v604_v62 }
 0x272   : > { %v3235_v8 = vpop.eup %3234 }
 0x273   : > { %621 = vrot.lane.b32.xlu1 %v3235_v8, %s3483_s25  ;;  %v3947_v8 = vsub.f32 1.0, %v3942_v13 }
 0x275   : > { %5267 = vst [vmem:[#allocation22_spill] sm:$0xff] %v3947_v8  ;;  %v628_v62 = vmul.f32 0.0, %v3947_v8  ;;  %v657_v8 = vmul.f32 0.0, %v3233_v0  ;;  %v680_v0 = vsel %vm408_vm2, %v3825_v60, %v3588_v1 }
 0x277   : > { %389 = vperm.xlu1 %3190, %v302_v58  }
 0x278   : > { %v3237_v9 = vpop.eup %3236 }
 0x279   : > { %653 = vrot.lane.b32.xlu0 %v3237_v9, %s3483_s25  ;;  %v3239_v5 = vpop.eup %3238 }
 0x27a   : > { %v606_v54 = vadd.f32 1.0, %v3239_v5  ;;  %v5154_v5 = vrot.slane %v3597_v4, 2 }
 0x27c   : > { %3240 = vrcp.f32 %v606_v54 }
 0x289   : > { %v3241_v19 = vpop.eup %3240 }
 0x28a   : > { %v619_v17 = vsub.f32 1.0, %v3241_v19  ;;  %v625_v7 = vmul.f32 0.0, %v3241_v19  ;;  %v689_v19 = vsel %vm411_vm3, %v5153_v59, %v687_v6 }
 0x2e5   : > { %v622_v58 = vpop.permute.xlu1 %621 }
 0x2e6   : > { %v624_v9 = vmul.f32 %v622_v58, %v619_v17 }
 0x2e8   : > { %v626_v56 = vadd.f32 %v625_v7, %v624_v9  ;;  %v691_v9 = vsel %vm682_vm7, %v5154_v5, %v689_v19 }
 0x2ea   : > { %v627_v54 = vmul.f32 %v626_v56, %v3942_v13  ;;  %v5281_v13 = vld [vmem:[#allocation19_spill] sm:$0xff] }
 0x2eb   : > { %v654_v58 = vpop.permute.xlu0 %653 }
 0x2ec   : > { %v3961_v17 = vadd.f32 %v628_v62, %v627_v54  ;;  %v656_v57 = vmul.f32 %v654_v58, %v651_v2 }
 0x2ee   : > { %5268 = vst [vmem:[#allocation23_spill] sm:$0xff] %v3961_v17  ;;  %v696_v7 = vrot.slane %v3961_v17, 7  ;;  %v658_v6 = vadd.f32 %v657_v8, %v656_v57 }
 0x2f0   : > { %v3191_v55 = vpack.i.bf16 %v696_v7, %v691_v9 }
 0x2f2   : > { %v3967_v56 = vpop.permute.xlu1 %389  ;;  %3192 = vrot.lane.b32.xlu1 %v3191_v55, %s3482_s14  ;;  %v681_v55 = vsel %vm411_vm3, %v3828_v61, %v680_v0  ;;  %v5272_v0 = vmov 0.0  }
 0x2f3   : > { %5269 = vst [vmem:[#allocation24_spill] sm:$0xff] %v3967_v56  ;;  %v3972_v62 = vsub.f32 1.0, %v3967_v56  ;;  %v659_v54 = vmul.f32 %v658_v6, %v3967_v56  ;;  %v683_v57 = vsel %vm682_vm7, %v3834_v63, %v681_v55  ;;  %v5274_v55 = vld [vmem:[#allocation13_spill] sm:$0xff] }
 0x2f5   : > { %5270 = vst [vmem:[#allocation25_spill] sm:$0xff] %v3972_v62  ;;  %v660_v59 = vmul.f32 0.0, %v3972_v62 }
 0x2f7   : > { %v3978_v19 = vadd.f32 %v660_v59, %v659_v54 }
 0x2f9   : > { %v3982_v2 = vmul.f32 %v3978_v19, %v3967_v56  ;;  %v701_v7 = vrot.slane %v3978_v19, 7 }
 0x2fb   : > { %5271 = vst [vmem:[#allocation26_spill] sm:$0xff] %v3982_v2  ;;  %671 = vst.msk [vmem:[%s3984_s12 + $0xc] sm:$0xf] %vm670_vm8, %v3982_v2 }
 0x364   : > { %v3193_v8 = vpop.permute.xlu1 %3192 }
 0x365   : > { %v3195_v59 = vunpack.i.h.bf16 %v3193_v8  ;;  %v3194_v58 = vunpack.i.l.bf16 %v3193_v8  ;;  %v5276_v8 = vld [vmem:[#allocation15_spill] sm:$0xff] }
 0x367   : > { %v703_v9 = vsel %vm424_vm4, %v683_v57, %v3194_v58  ;;  %v5275_v57 = vld [vmem:[#allocation14_spill] sm:$0xff]  ;;  %v5278_v58 = vld [vmem:[#allocation17_spill] sm:$0xff] }
 0x368   : > { %v704_v6 = vsel %vm426_vm5, %v703_v9, %v3195_v59  ;;  %v5277_v59 = vld [vmem:[#allocation16_spill] sm:$0xff]  ;;  %v5279_v9 = vld [vmem:[#allocation6_spill] sm:$0xff] }
 0x369   : > { %v705_v54 = vsel %vm428_vm6, %v704_v6, %v701_v7 }
 0x36a   : > { %v707_v5 = vrot.slane %v705_v54, 1  ;;  %v5280_v54 = vld [vmem:[#allocation18_spill] sm:$0xff] }
 0x36c   : > { %774 = vmatmul.mubr.f32.vlgmr.msra.gmra.mxu0 %v707_v5  ;;  %2930 = vmatmul.mubr.f32.vlgmr.msra.gmra.mxu1 %v707_v5  ;;  %v5273_v5 = vld [vmem:[#allocation12_spill] sm:$0xff] }
 0x36d   : > { %976 = vmatpush1.msra.mxu0 %v3608_v10  ;;  %2933 = vmatpush3.msra.mxu1 %v3611_v11 }
 0x36e   : > { %977 = vmatprep.subr.mxu0 %v3614_v12  ;;  %2934 = vmatprep.subr.mxu1 %v5272_v0 }
 0x36f   : > { %978 = vmatpush1.msra.mxu0 %v3624_v14  ;;  %2935 = vmatpush3.msra.mxu1 %v3627_v15 }
 0x370   : > { %979 = vmatprep.subr.mxu0 %v3630_v16  ;;  %2936 = vmatprep.subr.mxu1 %v5272_v0 }
 0x371   : > { %980 = vmatpush1.msra.mxu0 %v3638_v18  ;;  %2937 = vmatpush3.msra.mxu1 %v3646_v20 }
 0x372   : > { %981 = vmatprep.subr.mxu0 %v3649_v21  ;;  %2938 = vmatprep.subr.mxu1 %v5272_v0 }
 0x373   : > { %982 = vmatpush1.msra.mxu0 %v3654_v22  ;;  %2939 = vmatpush3.msra.mxu1 %v3659_v23 }
 0x374   : > { %983 = vmatprep.subr.mxu0 %v3662_v24  ;;  %2940 = vmatprep.subr.mxu1 %v5272_v0 }
 0x375   : > { %984 = vmatpush1.msra.mxu0 %v3667_v25  ;;  %2941 = vmatpush3.msra.mxu1 %v3672_v26 }
 0x376   : > { %985 = vmatprep.subr.mxu0 %v3675_v27  ;;  %2942 = vmatprep.subr.mxu1 %v5272_v0 }
 0x377   : > { %986 = vmatpush1.msra.mxu0 %v3680_v28  ;;  %2943 = vmatpush3.msra.mxu1 %v3685_v29 }
 0x378   : > { %987 = vmatprep.subr.mxu0 %v3688_v30  ;;  %2944 = vmatprep.subr.mxu1 %v5272_v0 }
 0x379   : > { %988 = vmatpush1.msra.mxu0 %v3693_v31  ;;  %2945 = vmatpush3.msra.mxu1 %v3698_v32 }
 0x37a   : > { %989 = vmatprep.subr.mxu0 %v3701_v33  ;;  %2946 = vmatprep.subr.mxu1 %v5272_v0 }
 0x37b   : > { %990 = vmatpush1.msra.mxu0 %v3706_v34  ;;  %2947 = vmatpush3.msra.mxu1 %v3711_v35 }
 0x37c   : > { %991 = vmatprep.subr.mxu0 %v3714_v36  ;;  %2948 = vmatprep.subr.mxu1 %v5272_v0 }
 0x37d   : > { %992 = vmatpush1.msra.mxu0 %v3719_v37  ;;  %2949 = vmatpush3.msra.mxu1 %v3724_v38 }
 0x37e   : > { %993 = vmatprep.subr.mxu0 %v3727_v39  ;;  %2950 = vmatprep.subr.mxu1 %v5272_v0 }
 0x37f   : > { %994 = vmatpush1.msra.mxu0 %v3732_v40  ;;  %2951 = vmatpush3.msra.mxu1 %v3737_v41 }
 0x380   : > { %995 = vmatprep.subr.mxu0 %v3740_v42  ;;  %2952 = vmatprep.subr.mxu1 %v5272_v0 }
 0x381   : > { %996 = vmatpush1.msra.mxu0 %v3745_v43  ;;  %2953 = vmatpush3.msra.mxu1 %v3750_v44 }
 0x382   : > { %997 = vmatprep.subr.mxu0 %v3753_v45  ;;  %2954 = vmatprep.subr.mxu1 %v5272_v0 }
 0x383   : > { %998 = vmatpush1.msra.mxu0 %v3758_v46  ;;  %2955 = vmatpush3.msra.mxu1 %v3763_v47 }
 0x384   : > { %999 = vmatprep.subr.mxu0 %v3766_v48  ;;  %2956 = vmatprep.subr.mxu1 %v5272_v0 }
 0x385   : > { %1000 = vmatpush1.msra.mxu0 %v3771_v49  ;;  %2957 = vmatpush3.msra.mxu1 %v3776_v50 }
 0x386   : > { %1001 = vmatprep.subr.mxu0 %v3779_v51  ;;  %2958 = vmatprep.subr.mxu1 %v5272_v0 }
 0x387   : > { %1002 = vmatpush1.msra.mxu0 %v3784_v52  ;;  %2959 = vmatpush3.msra.mxu1 %v3789_v53 }
 0x388   : > { %1003 = vmatprep.subr.mxu0 %v5273_v5  ;;  %2960 = vmatprep.subr.mxu1 %v5272_v0 }
 0x389   : > { %1004 = vmatpush1.msra.mxu0 %v5274_v55  ;;  %2961 = vmatpush3.msra.mxu1 %v5275_v57  ;;  %v301_v57 = vld [vmem:[%s3934_s8 + $0x18] sm:$0xf] }
 0x38a   : > { %1005 = vmatprep.subr.mxu0 %v5276_v8  ;;  %2962 = vmatprep.subr.mxu1 %v5272_v0 }
 0x38b   : > { %1006 = vmatpush1.msra.mxu0 %v5277_v59  ;;  %1039 = vmatprep.mubr.f32.mxu0 %v5272_v0 }
 0x38c   : > { %2963 = vmatpush3.msra.mxu1 %v5278_v58  ;;  %2964 = vmatprep.mubr.msk.f32.mxu1 %vm3481_vm0, %v5272_v0  ;;  %v5282_v58 = vld [vmem:[#allocation20_spill] sm:$0xff] }
 0x38d   : > { %1235 = vmatprep.subr.mxu0 %v5279_v9  ;;  %2967 = vmatprep.subr.mxu1 %v5272_v0  ;;  %v296_v9 = vld [vmem:[%s3934_s8 + $0x4] sm:$0xf] }
 0x42c   : > { %v775_v7 = vpop.f32.mrf.mxu0  ;;  %v846_v6 = vpop.f32.mrf.mxu1 }
 0x42d   : > { %v776_v56 = vadd.f32 %v775_v7, %v5280_v54  ;;  %v847_v8 = vadd.f32 %v846_v6, %v5282_v58 }
 0x42e   : > { %v777_v2 = vpop.f32.mrf.mxu0  ;;  %v2931_v62 = vpop.f32.mrf.mxu1 }
 0x42f   : > { %v778_v59 = vadd.f32 %v777_v2, %v5281_v13  ;;  %851 = vrot.lane.b32.xlu0 %v776_v56, %s3482_s14 }
 0x431   : > { %872 = vrot.lane.b32.xlu1 %v778_v59, %s3483_s25 }
 0x433   : > { %894 = vrot.lane.b32.xlu0 %v847_v8, %s3482_s14 }
 0x435   : > { %904 = vrot.lane.b32.xlu1 %v847_v8, %s3483_s25 }
 0x439   : > { %862 = vrot.lane.b32.xlu1 %v778_v59, %s3482_s14 }
 0x43d   : > { %359 = vperm.xlu1 %3190, %v296_v9  }
 0x441   : > { %384 = vperm.xlu1 %3190, %v301_v57  }
 0x4a1   : > { %v852_v7 = vpop.permute.xlu0 %851 }
 0x4a2   : > { %v854_v62 = vadd.f32 %v852_v7, %v776_v56 }
 0x4a3   : > { %v873_v50 = vpop.permute.xlu1 %872 }
 0x4a4   : > { %v855_v54 = vsub.f32 0.0, %v854_v62 }
 0x4a5   : > { %v895_v2 = vpop.permute.xlu0 %894 }
 0x4a6   : > { %v856_v13 = vmul.f32 1.442695, %v855_v54  ;;  %v897_v55 = vadd.f32 %v895_v2, %v778_v59 }
 0x4a7   : > { %v905_v7 = vpop.permute.xlu1 %904 }
 0x4a8   : > { %3242 = vpow2.f32 %v856_v13  ;;  %v898_v6 = vsub.f32 0.0, %v897_v55 }
 0x4aa   : > { %v899_v58 = vmul.f32 1.442695, %v898_v6 }
 0x4ac   : > { %3244 = vpow2.f32 %v899_v58 }
 0x4b5   : > { %v3243_v5 = vpop.eup %3242 }
 0x4b6   : > { %v858_v53 = vadd.f32 1.0, %v3243_v5 }
 0x4b8   : > { %3246 = vrcp.f32 %v858_v53 }
 0x4b9   : > { %v3245_v52 = vpop.eup %3244 }
 0x4ba   : > { %v901_v51 = vadd.f32 1.0, %v3245_v52 }
 0x4bc   : > { %3248 = vrcp.f32 %v901_v51 }
 0x4c5   : > { %v3247_v9 = vpop.eup %3246 }
 0x4c6   : > { %v875_v49 = vmul.f32 %v3247_v9, %v873_v50  ;;  %v863_v50 = vpop.permute.xlu1 %862 }
 0x4c7   : > { %v865_v52 = vadd.f32 %v863_v50, %v776_v56 }
 0x4c8   : > { %877 = vrot.lane.b32.xlu0 %v875_v49, %s3485_s9 }
 0x4c9   : > { %v3249_v57 = vpop.eup %3248  ;;  %v866_v49 = vsub.f32 0.0, %v865_v52 }
 0x4ca   : > { %v907_v62 = vmul.f32 %v3249_v57, %v905_v7  ;;  %v4081_v9 = vpop.permute.xlu1 %359  ;;  %v5284_v7 = vld [vmem:[#allocation5_spill] sm:$0xff] }
 0x4cb   : > { %v867_v5 = vmul.f32 1.442695, %v866_v49  ;;  %5283 = vst [vmem:[#allocation6_spill] sm:$0xff] %v4081_v9 }
 0x4cc   : > { %909 = vrot.lane.b32.xlu0 %v907_v62, %s3485_s9  ;;  %v5168_v62 = vrot.slane %v5284_v7, 2 }
 0x53a   : > { %v878_v13 = vpop.permute.xlu0 %877 }
 0x53b   : > { %v880_v55 = vadd.f32 %v878_v13, %v776_v56 }
 0x53d   : > { %3250 = vtanh.f32 %v880_v55 }
 0x53e   : > { %v910_v59 = vpop.permute.xlu0 %909 }
 0x53f   : > { %v912_v58 = vadd.f32 %v910_v59, %v847_v8  ;;  %v5169_v8 = vrot.slane %v3588_v1, 3  ;;  %v4086_v59 = vsub.f32 1.0, %v4081_v9 }
 0x541   : > { %3252 = vtanh.f32 %v912_v58  ;;  %5285 = vst [vmem:[#allocation5_spill] sm:$0xff] %v4086_v59  ;;  %v891_v52 = vmul.f32 %v3961_v17, %v4086_v59  ;;  %v4447_v59 = vld [vmem:[%s3585_s13 + $0x30] sm:$0xff] }
 0x542   : > { %3254 = vpow2.f32 %v867_v5  ;;  %5323 = vst [vmem:[#allocation39_spill] sm:$0xff] %v4447_v59 }
 0x54a   : > { %v3251_v53 = vpop.eup %3250 }
 0x54b   : > { %884 = vrot.lane.b32.xlu0 %v3251_v53, %s3483_s25  ;;  %v5170_v53 = vrot.slane %v3594_v3, 1 }
 0x54e   : > { %v3253_v51 = vpop.eup %3252 }
 0x54f   : > { %916 = vrot.lane.b32.xlu0 %v3253_v51, %s3483_s25  ;;  %v3255_v54 = vpop.eup %3254  ;;  %v954_v51 = vsel %vm411_vm3, %v5168_v62, %v5169_v8  ;;  %v4108_v62 = vpop.permute.xlu1 %384 }
 0x550   : > { %v869_v2 = vadd.f32 1.0, %v3255_v54  ;;  %v956_v5 = vsel %vm682_vm7, %v5170_v53, %v954_v51  ;;  %5287 = vst [vmem:[#allocation28_spill] sm:$0xff] %v4108_v62  ;;  %v4111_v51 = vsub.f32 1.0, %v4108_v62 }
 0x552   : > { %3256 = vrcp.f32 %v869_v2  ;;  %v957_v2 = vsel %vm949_vm9, %v3597_v4, %v956_v5  ;;  %5288 = vst [vmem:[#allocation29_spill] sm:$0xff] %v4111_v51  ;;  %v923_v5 = vmul.f32 %v3978_v19, %v4111_v51  ;;  %v4460_v51 = vld [vmem:[%s3585_s13 + $0x18] sm:$0xff] }
 0x553   : > { %5326 = vst [vmem:[#allocation42_spill] sm:$0xff] %v4460_v51 }
 0x55f   : > { %v3257_v6 = vpop.eup %3256 }
 0x560   : > { %v882_v13 = vsub.f32 1.0, %v3257_v6  ;;  %v888_v56 = vmul.f32 %v3257_v6, %v3961_v17  ;;  %v4442_v17 = vld [vmem:[%s3585_s13 + $0x38] sm:$0xff] }
 0x561   : > { %5322 = vst [vmem:[#allocation38_spill] sm:$0xff] %v4442_v17 }
 0x5bd   : > { %v885_v55 = vpop.permute.xlu0 %884 }
 0x5be   : > { %v887_v58 = vmul.f32 %v885_v55, %v882_v13 }
 0x5c0   : > { %v889_v50 = vadd.f32 %v888_v56, %v887_v58  ;;  %v914_v58 = vsub.f32 1.0, %v3249_v57 }
 0x5c1   : > { %v917_v55 = vpop.permute.xlu0 %916 }
 0x5c2   : > { %v890_v49 = vmul.f32 %v889_v50, %v4081_v9  ;;  %v919_v56 = vmul.f32 %v917_v55, %v914_v58  ;;  %v920_v50 = vmul.f32 %v3249_v57, %v3978_v19  ;;  %v4451_v9 = vld [vmem:[%s3585_s13 + $0x40] sm:$0xff] }
 0x5c3   : > { %5324 = vst [vmem:[#allocation40_spill] sm:$0xff] %v4451_v9 }
 0x5c4   : > { %v4101_v54 = vadd.f32 %v891_v52, %v890_v49  ;;  %v921_v8 = vadd.f32 %v920_v50, %v919_v56  ;;  %v947_v52 = vsel %vm411_vm3, %v3825_v60, %v3588_v1 }
 0x5c6   : > { %5286 = vst [vmem:[#allocation27_spill] sm:$0xff] %v4101_v54  ;;  %v962_v6 = vrot.slane %v4101_v54, 6  ;;  %v922_v49 = vmul.f32 %v921_v8, %v4108_v62  ;;  %v4455_v62 = vld [vmem:[%s3585_s13 + $0x20] sm:$0xff] }
 0x5c7   : > { %5325 = vst [vmem:[#allocation41_spill] sm:$0xff] %v4455_v62 }
 0x5c8   : > { %v3196_v13 = vpack.i.bf16 %v962_v6, %v957_v2  ;;  %v948_v2 = vsel %vm682_vm7, %v3828_v61, %v947_v52  ;;  %v4121_v6 = vadd.f32 %v923_v5, %v922_v49 }
 0x5c9   : > { %v950_v57 = vsel %vm949_vm9, %v3834_v63, %v948_v2 }
 0x5ca   : > { %3197 = vrot.lane.b32.xlu1 %v3196_v13, %s3482_s14  ;;  %5289 = vst [vmem:[#allocation30_spill] sm:$0xff] %v4121_v6  ;;  %v967_v50 = vrot.slane %v4121_v6, 6 }
 0x63c   : > { %v3198_v13 = vpop.permute.xlu1 %3197 }
 0x63d   : > { %v3200_v55 = vunpack.i.h.bf16 %v3198_v13  ;;  %v3199_v58 = vunpack.i.l.bf16 %v3198_v13 }
 0x63f   : > { %v969_v56 = vsel %vm424_vm4, %v950_v57, %v3199_v58 }
 0x640   : > { %v970_v8 = vsel %vm426_vm5, %v969_v56, %v3200_v55 }
 0x641   : > { %v971_v53 = vsel %vm428_vm6, %v970_v8, %v967_v50 }
 0x642   : > { %v973_v19 = vrot.slane %v971_v53, 2 }
 0x644   : > { %1040 = vmatmul.mubr.f32.vlgmr.msra.gmra.mxu0 %v973_v19  ;;  %2965 = vmatmul.mubr.f32.vlgmr.msra.gmra.mxu1 %v973_v19 }
 0x645   : > { %1236 = vmatpush1.msra.mxu0 %v3608_v10  ;;  %2968 = vmatpush3.msra.mxu1 %v3611_v11  ;;  %v5290_v10 = vld [vmem:[#allocation7_spill] sm:$0xff]  ;;  %v5291_v11 = vld [vmem:[#allocation8_spill] sm:$0xff] }
 0x646   : > { %1237 = vmatprep.subr.mxu0 %v3614_v12  ;;  %2969 = vmatprep.subr.mxu1 %v5272_v0  ;;  %v5292_v12 = vld [vmem:[#allocation9_spill] sm:$0xff] }
 0x647   : > { %1238 = vmatpush1.msra.mxu0 %v3624_v14  ;;  %2970 = vmatpush3.msra.mxu1 %v3627_v15  ;;  %v5293_v14 = vld [vmem:[#allocation10_spill] sm:$0xff]  ;;  %v5294_v15 = vld [vmem:[#allocation11_spill] sm:$0xff] }
 0x648   : > { %1239 = vmatprep.subr.mxu0 %v3630_v16  ;;  %2971 = vmatprep.subr.mxu1 %v5272_v0  ;;  %v5295_v16 = vld [vmem:[#allocation12_spill] sm:$0xff] }
 0x649   : > { %1240 = vmatpush1.msra.mxu0 %v3638_v18  ;;  %2972 = vmatpush3.msra.mxu1 %v3646_v20  ;;  %v5296_v18 = vld [vmem:[#allocation13_spill] sm:$0xff]  ;;  %v5297_v20 = vld [vmem:[#allocation14_spill] sm:$0xff] }
 0x64a   : > { %1241 = vmatprep.subr.mxu0 %v3649_v21  ;;  %2973 = vmatprep.subr.mxu1 %v5272_v0  ;;  %v5298_v21 = vld [vmem:[#allocation15_spill] sm:$0xff] }
 0x64b   : > { %1242 = vmatpush1.msra.mxu0 %v3654_v22  ;;  %2974 = vmatpush3.msra.mxu1 %v3659_v23  ;;  %v5299_v22 = vld [vmem:[#allocation16_spill] sm:$0xff]  ;;  %v5300_v23 = vld [vmem:[#allocation17_spill] sm:$0xff] }
 0x64c   : > { %1243 = vmatprep.subr.mxu0 %v3662_v24  ;;  %2975 = vmatprep.subr.mxu1 %v5272_v0  ;;  %v4195_v24 = vld [vmem:[%s3585_s13 + $0x170] sm:$0xff] }
 0x64d   : > { %1244 = vmatpush1.msra.mxu0 %v3667_v25  ;;  %2976 = vmatpush3.msra.mxu1 %v3672_v26  ;;  %5301 = vst [vmem:[#allocation7_spill] sm:$0xff] %v4195_v24 }
 0x64e   : > { %1245 = vmatprep.subr.mxu0 %v3675_v27  ;;  %2977 = vmatprep.subr.mxu1 %v5272_v0  ;;  %v5302_v27 = vld [vmem:[#allocation18_spill] sm:$0xff] }
 0x64f   : > { %1246 = vmatpush1.msra.mxu0 %v3680_v28  ;;  %2978 = vmatpush3.msra.mxu1 %v3685_v29 }
 0x650   : > { %1247 = vmatprep.subr.mxu0 %v3688_v30  ;;  %2979 = vmatprep.subr.mxu1 %v5272_v0 }
 0x651   : > { %1248 = vmatpush1.msra.mxu0 %v3693_v31  ;;  %2980 = vmatpush3.msra.mxu1 %v3698_v32  ;;  %v5303_v31 = vld [vmem:[#allocation19_spill] sm:$0xff] }
 0x652   : > { %1249 = vmatprep.subr.mxu0 %v3701_v33  ;;  %2981 = vmatprep.subr.mxu1 %v5272_v0  ;;  %v5304_v33 = vld [vmem:[#allocation20_spill] sm:$0xff] }
 0x653   : > { %1250 = vmatpush1.msra.mxu0 %v3706_v34  ;;  %2982 = vmatpush3.msra.mxu1 %v3711_v35  ;;  %v297_v35 = vld [vmem:[%s3934_s8 + $0x8] sm:$0xf] }
 0x654   : > { %1251 = vmatprep.subr.mxu0 %v3714_v36  ;;  %2983 = vmatprep.subr.mxu1 %v5272_v0  ;;  %v300_v36 = vld [vmem:[%s3934_s8 + $0x14] sm:$0xf] }
 0x655   : > { %1252 = vmatpush1.msra.mxu0 %v3719_v37  ;;  %2984 = vmatpush3.msra.mxu1 %v3724_v38 }
 0x656   : > { %1253 = vmatprep.subr.mxu0 %v3727_v39  ;;  %2985 = vmatprep.subr.mxu1 %v5272_v0 }
 0x657   : > { %1254 = vmatpush1.msra.mxu0 %v3732_v40  ;;  %2986 = vmatpush3.msra.mxu1 %v3737_v41 }
 0x658   : > { %1255 = vmatprep.subr.mxu0 %v3740_v42  ;;  %2987 = vmatprep.subr.mxu1 %v5272_v0 }
 0x659   : > { %1256 = vmatpush1.msra.mxu0 %v3745_v43  ;;  %2988 = vmatpush3.msra.mxu1 %v3750_v44 }
 0x65a   : > { %1257 = vmatprep.subr.mxu0 %v3753_v45  ;;  %2989 = vmatprep.subr.mxu1 %v5272_v0 }
 0x65b   : > { %1258 = vmatpush1.msra.mxu0 %v3758_v46  ;;  %2990 = vmatpush3.msra.mxu1 %v3763_v47 }
 0x65c   : > { %1259 = vmatprep.subr.mxu0 %v3766_v48  ;;  %2991 = vmatprep.subr.mxu1 %v5272_v0 }
 0x65d   : > { %1260 = vmatpush1.msra.mxu0 %v5290_v10  ;;  %2992 = vmatpush3.msra.mxu1 %v5291_v11 }
 0x65e   : > { %1261 = vmatprep.subr.mxu0 %v5292_v12  ;;  %2993 = vmatprep.subr.mxu1 %v5272_v0 }
 0x65f   : > { %1262 = vmatpush1.msra.mxu0 %v5293_v14  ;;  %2994 = vmatpush3.msra.mxu1 %v5294_v15 }
 0x660   : > { %1263 = vmatprep.subr.mxu0 %v5295_v16  ;;  %2995 = vmatprep.subr.mxu1 %v5272_v0 }
 0x661   : > { %1264 = vmatpush1.msra.mxu0 %v5296_v18  ;;  %2996 = vmatpush3.msra.mxu1 %v5297_v20  ;;  %v4216_v20 = vld [vmem:[%s3580_s10] sm:$0xff] }
 0x662   : > { %1265 = vmatprep.subr.mxu0 %v5298_v21  ;;  %2997 = vmatprep.subr.mxu1 %v5272_v0  ;;  %5306 = vst [vmem:[#allocation9_spill] sm:$0xff] %v4216_v20  ;;  %v5171_v21 = vrot.slane %v4216_v20, 1 }
 0x663   : > { %1266 = vmatpush1.msra.mxu0 %v5299_v22  ;;  %1299 = vmatprep.mubr.f32.mxu0 %v5272_v0 }
 0x664   : > { %2998 = vmatpush3.msra.mxu1 %v5300_v23  ;;  %2999 = vmatprep.mubr.msk.f32.mxu1 %vm3481_vm0, %v5272_v0 }
 0x665   : > { %1496 = vmatprep.subr.mxu0 %v4195_v24  ;;  %3002 = vmatprep.subr.mxu1 %v5272_v0 }
 0x704   : > { %v1041_v25 = vpop.f32.mrf.mxu0  ;;  %v1112_v26 = vpop.f32.mrf.mxu1 }
 0x705   : > { %v1042_v28 = vadd.f32 %v1041_v25, %v5302_v27  ;;  %v1113_v34 = vadd.f32 %v1112_v26, %v5304_v33 }
 0x706   : > { %v1043_v29 = vpop.f32.mrf.mxu0  ;;  %v2966_v30 = vpop.f32.mrf.mxu1 }
 0x707   : > { %v1044_v32 = vadd.f32 %v1043_v29, %v5303_v31  ;;  %1117 = vrot.lane.b32.xlu0 %v1042_v28, %s3482_s14  ;;  %v4226_v30 = vld [vmem:[%s3580_s10 + $0x10] sm:$0xff] }
 0x708   : > { %5309 = vst [vmem:[#allocation12_spill] sm:$0xff] %v4226_v30 }
 0x709   : > { %1138 = vrot.lane.b32.xlu1 %v1044_v32, %s3483_s25 }
 0x70b   : > { %1160 = vrot.lane.b32.xlu0 %v1113_v34, %s3482_s14 }
 0x70d   : > { %1170 = vrot.lane.b32.xlu1 %v1113_v34, %s3483_s25 }
 0x711   : > { %1128 = vrot.lane.b32.xlu1 %v1044_v32, %s3482_s14 }
 0x715   : > { %364 = vperm.xlu1 %3190, %v297_v35  }
 0x719   : > { %379 = vperm.xlu1 %3190, %v300_v36  }
 0x779   : > { %v1118_v37 = vpop.permute.xlu0 %1117 }
 0x77a   : > { %v1120_v38 = vadd.f32 %v1118_v37, %v1042_v28 }
 0x77b   : > { %v1139_v53 = vpop.permute.xlu1 %1138 }
 0x77c   : > { %v1121_v39 = vsub.f32 0.0, %v1120_v38 }
 0x77d   : > { %v1161_v40 = vpop.permute.xlu0 %1160 }
 0x77e   : > { %v1122_v41 = vmul.f32 1.442695, %v1121_v39  ;;  %v1163_v42 = vadd.f32 %v1161_v40, %v1044_v32  ;;  %v5173_v32 = vrot.slane %v4226_v30, 7  ;;  %v4464_v30 = vld [vmem:[%s3585_s13 + $0x28] sm:$0xff] }
 0x77f   : > { %v1171_v2 = vpop.permute.xlu1 %1170  ;;  %5327 = vst [vmem:[#allocation43_spill] sm:$0xff] %v4464_v30 }
 0x780   : > { %3258 = vpow2.f32 %v1122_v41  ;;  %v1164_v43 = vsub.f32 0.0, %v1163_v42  ;;  %v4240_v42 = vld [vmem:[%s3580_s10 + $0x18] sm:$0xff] }
 0x781   : > { %5311 = vst [vmem:[#allocation14_spill] sm:$0xff] %v4240_v42 }
 0x782   : > { %v1165_v44 = vmul.f32 1.442695, %v1164_v43  ;;  %v5172_v43 = vrot.slane %v4240_v42, 6 }
 0x783   : > { %v1129_v19 = vpop.permute.xlu1 %1128 }
 0x784   : > { %3260 = vpow2.f32 %v1165_v44  ;;  %v1131_v10 = vadd.f32 %v1129_v19, %v1042_v28 }
 0x786   : > { %v1132_v11 = vsub.f32 0.0, %v1131_v10 }
 0x788   : > { %v1133_v12 = vmul.f32 1.442695, %v1132_v11 }
 0x78d   : > { %v3259_v45 = vpop.eup %3258 }
 0x78e   : > { %v1124_v46 = vadd.f32 1.0, %v3259_v45 }
 0x790   : > { %3262 = vrcp.f32 %v1124_v46  ;;  %v4213_v16 = vpop.permute.xlu1 %364 }
 0x791   : > { %v3261_v47 = vpop.eup %3260  ;;  %5305 = vst [vmem:[#allocation8_spill] sm:$0xff] %v4213_v16  ;;  %v4220_v23 = vsub.f32 1.0, %v4213_v16 }
 0x792   : > { %v1167_v48 = vadd.f32 1.0, %v3261_v47 }
 0x793   : > { %5307 = vst [vmem:[#allocation10_spill] sm:$0xff] %v4220_v23  ;;  %v1157_v39 = vmul.f32 %v4101_v54, %v4220_v23  ;;  %v4468_v23 = vld [vmem:[%s3585_s13 + $0x8] sm:$0xff] }
 0x794   : > { %3264 = vrcp.f32 %v1167_v48  ;;  %v4222_v26 = vpop.permute.xlu1 %379  ;;  %5328 = vst [vmem:[#allocation44_spill] sm:$0xff] %v4468_v23 }
 0x795   : > { %5308 = vst [vmem:[#allocation11_spill] sm:$0xff] %v4222_v26  ;;  %v4234_v38 = vsub.f32 1.0, %v4222_v26 }
 0x797   : > { %5310 = vst [vmem:[#allocation13_spill] sm:$0xff] %v4234_v38 }
 0x79d   : > { %v3263_v52 = vpop.eup %3262 }
 0x79e   : > { %v1141_v49 = vmul.f32 %v3263_v52, %v1139_v53  ;;  %v1189_v52 = vmul.f32 %v4121_v6, %v4234_v38 }
 0x7a0   : > { %1143 = vrot.lane.b32.xlu0 %v1141_v49, %s3485_s9 }
 0x7a1   : > { %v3265_v5 = vpop.eup %3264 }
 0x7a2   : > { %v1173_v57 = vmul.f32 %v3265_v5, %v1171_v2  ;;  %v1180_v37 = vsub.f32 1.0, %v3265_v5  ;;  %v1186_v40 = vmul.f32 %v3265_v5, %v4121_v6  ;;  %v4434_v6 = vld [vmem:[%s3585_s13 + $0x48] sm:$0xff] }
 0x7a3   : > { %5320 = vst [vmem:[#allocation36_spill] sm:$0xff] %v4434_v6 }
 0x7a4   : > { %1175 = vrot.lane.b32.xlu0 %v1173_v57, %s3485_s9 }
 0x812   : > { %v1144_v13 = vpop.permute.xlu0 %1143 }
 0x813   : > { %v1146_v55 = vadd.f32 %v1144_v13, %v1042_v28 }
 0x815   : > { %3266 = vtanh.f32 %v1146_v55  ;;  %v1207_v55 = vsel %vm682_vm7, %v3825_v60, %v4216_v20 }
 0x816   : > { %v1176_v58 = vpop.permute.xlu0 %1175 }
 0x817   : > { %v1178_v56 = vadd.f32 %v1176_v58, %v1113_v34  ;;  %v3359_v34 = vld [vmem:[%s3580_s10 + $0x8] sm:$0xff]  ;;  %v1208_v58 = vsel %vm949_vm9, %v3828_v61, %v1207_v55  ;;  %v4369_v55 = vld [vmem:[%s3585_s13 + $0xc0] sm:$0xff] }
 0x818   : > { %v1213_v35 = vsel %vm682_vm7, %v3359_v34, %v5171_v21  ;;  %v4299_v34 = vld [vmem:[%s3585_s13 + $0x140] sm:$0xff]  ;;  %v4416_v21 = vld [vmem:[%s3585_s13 + $0x68] sm:$0xff] }
 0x819   : > { %3268 = vtanh.f32 %v1178_v56  ;;  %v1215_v46 = vsel %vm949_vm9, %v5173_v32, %v1213_v35  ;;  %v1210_v56 = vsel %vm1209_vm10, %v3834_v63, %v1208_v58  ;;  %v4304_v35 = vld [vmem:[%s3585_s13 + $0x138] sm:$0xff]  ;;  %v4373_v58 = vld [vmem:[%s3585_s13 + $0xd0] sm:$0xff]  ;;  %5316 = vst [vmem:[#allocation32_spill] sm:$0xff] %v4416_v21 }
 0x81a   : > { %3270 = vpow2.f32 %v1133_v12  ;;  %v1217_v53 = vsel %vm1209_vm10, %v5172_v43, %v1215_v46  ;;  %v4338_v46 = vld [vmem:[%s3585_s13 + $0xf8] sm:$0xff]  ;;  %v4421_v43 = vld [vmem:[%s3585_s13 + $0x60] sm:$0xff]  ;;  %v4425_v32 = vld [vmem:[%s3585_s13 + $0x70] sm:$0xff] }
 0x81b   : > { %5317 = vst [vmem:[#allocation33_spill] sm:$0xff] %v4421_v43  ;;  %5318 = vst [vmem:[#allocation34_spill] sm:$0xff] %v4425_v32 }
 0x822   : > { %v3267_v50 = vpop.eup %3266 }
 0x823   : > { %1150 = vrot.lane.b32.xlu0 %v3267_v50, %s3483_s25 }
 0x826   : > { %v3269_v8 = vpop.eup %3268 }
 0x827   : > { %1182 = vrot.lane.b32.xlu0 %v3269_v8, %s3483_s25  ;;  %v3271_v14 = vpop.eup %3270 }
 0x828   : > { %v1135_v15 = vadd.f32 1.0, %v3271_v14 }
 0x82a   : > { %3272 = vrcp.f32 %v1135_v15 }
 0x837   : > { %v3273_v18 = vpop.eup %3272 }
 0x838   : > { %v1148_v22 = vsub.f32 1.0, %v3273_v18  ;;  %v1154_v29 = vmul.f32 %v3273_v18, %v4101_v54  ;;  %v4278_v18 = vld [vmem:[%s3585_s13 + $0x168] sm:$0xff]  ;;  %v4438_v54 = vld [vmem:[%s3585_s13 + $0x58] sm:$0xff] }
 0x839   : > { %5321 = vst [vmem:[#allocation37_spill] sm:$0xff] %v4438_v54 }
 0x895   : > { %v1151_v25 = vpop.permute.xlu0 %1150 }
 0x896   : > { %v1153_v28 = vmul.f32 %v1151_v25, %v1148_v22  ;;  %v4282_v22 = vld [vmem:[%s3585_s13 + $0x178] sm:$0xff] }
 0x897   : > { %v4286_v25 = vld [vmem:[%s3585_s13 + $0x158] sm:$0xff] }
 0x898   : > { %v1155_v36 = vadd.f32 %v1154_v29, %v1153_v28  ;;  %v4291_v28 = vld [vmem:[%s3585_s13 + $0x150] sm:$0xff]  ;;  %v4295_v29 = vld [vmem:[%s3585_s13 + $0x160] sm:$0xff] }
 0x899   : > { %v1183_v41 = vpop.permute.xlu0 %1182 }
 0x89a   : > { %v1156_v44 = vmul.f32 %v1155_v36, %v4213_v16  ;;  %v1185_v45 = vmul.f32 %v1183_v41, %v1180_v37  ;;  %v4308_v36 = vld [vmem:[%s3585_s13 + $0x148] sm:$0xff]  ;;  %v4325_v41 = vld [vmem:[%s3585_s13 + $0x110] sm:$0xff]  ;;  %v4473_v16 = vld [vmem:[%s3585_s13] sm:$0xff] }
 0x89b   : > { %v4312_v37 = vld [vmem:[%s3585_s13 + $0x128] sm:$0xff]  ;;  %5329 = vst [vmem:[#allocation45_spill] sm:$0xff] %v4473_v16 }
 0x89c   : > { %v4247_v47 = vadd.f32 %v1157_v39, %v1156_v44  ;;  %v1187_v48 = vadd.f32 %v1186_v40, %v1185_v45  ;;  %v4317_v39 = vld [vmem:[%s3585_s13 + $0x120] sm:$0xff]  ;;  %v4321_v40 = vld [vmem:[%s3585_s13 + $0x130] sm:$0xff]  ;;  %v4330_v44 = vld [vmem:[%s3585_s13 + $0x108] sm:$0xff] }
 0x89d   : > { %v4334_v45 = vld [vmem:[%s3585_s13 + $0x118] sm:$0xff] }
 0x89e   : > { %5312 = vst [vmem:[#allocation15_spill] sm:$0xff] %v4247_v47  ;;  %v1188_v49 = vmul.f32 %v1187_v48, %v4222_v26  ;;  %v1222_v5 = vrot.slane %v4247_v47, 5  ;;  %v4343_v48 = vld [vmem:[%s3585_s13 + $0xf0] sm:$0xff] }
 0x8a0   : > { %v4256_v2 = vadd.f32 %v1189_v52, %v1188_v49  ;;  %v3201_v57 = vpack.i.bf16 %v1222_v5, %v1217_v53  ;;  %v4347_v53 = vld [vmem:[%s3585_s13 + $0x100] sm:$0xff]  ;;  %v4356_v49 = vld [vmem:[%s3585_s13 + $0xd8] sm:$0xff]  ;;  %v4360_v5 = vld [vmem:[%s3585_s13 + $0xe8] sm:$0xff] }
 0x8a1   : > { %v4351_v52 = vld [vmem:[%s3585_s13 + $0xe0] sm:$0xff] }
 0x8a2   : > { %v4260_v13 = vmul.f32 %v4256_v2, %v4222_v26  ;;  %3202 = vrot.lane.b32.xlu1 %v3201_v57, %s3482_s14  ;;  %v1227_v11 = vrot.slane %v4256_v2, 5  ;;  %v4364_v57 = vld [vmem:[%s3585_s13 + $0xc8] sm:$0xff]  ;;  %v4478_v26 = vld [vmem:[%s3585_s13 + $0x10] sm:$0xff] }
 0x8a3   : > { %5330 = vst [vmem:[#allocation46_spill] sm:$0xff] %v4478_v26 }
 0x8a4   : > { %5313 = vst [vmem:[#allocation16_spill] sm:$0xff] %v4260_v13  ;;  %1198 = vst.msk [vmem:[%s3984_s12 + $0x8] sm:$0xf] %vm670_vm8, %v4260_v13  ;;  %v4429_v13 = vld [vmem:[%s3585_s13 + $0x50] sm:$0xff] }
 0x8a5   : > { %5319 = vst [vmem:[#allocation35_spill] sm:$0xff] %v4429_v13 }
 0x914   : > { %v3203_v50 = vpop.permute.xlu1 %3202 }
 0x915   : > { %v3205_v8 = vunpack.i.h.bf16 %v3203_v50  ;;  %v3204_v19 = vunpack.i.l.bf16 %v3203_v50  ;;  %v4382_v50 = vld [vmem:[%s3585_s13 + $0xa8] sm:$0xff] }
 0x917   : > { %v1229_v10 = vsel %vm424_vm4, %v1210_v56, %v3204_v19  ;;  %v4377_v56 = vld [vmem:[%s3585_s13 + $0xb0] sm:$0xff]  ;;  %v4390_v19 = vld [vmem:[%s3585_s13 + $0x98] sm:$0xff] }
 0x918   : > { %v1230_v12 = vsel %vm426_vm5, %v1229_v10, %v3205_v8  ;;  %v4386_v8 = vld [vmem:[%s3585_s13 + $0xb8] sm:$0xff]  ;;  %v4395_v10 = vld [vmem:[%s3585_s13 + $0x90] sm:$0xff] }
 0x919   : > { %v1231_v14 = vsel %vm428_vm6, %v1230_v12, %v1227_v11  ;;  %v4399_v11 = vld [vmem:[%s3585_s13 + $0xa0] sm:$0xff] }
 0x91a   : > { %v1233_v15 = vrot.slane %v1231_v14, 3  ;;  %v4403_v12 = vld [vmem:[%s3585_s13 + $0x80] sm:$0xff]  ;;  %v4408_v14 = vld [vmem:[%s3585_s13 + $0x78] sm:$0xff] }
 0x91b   : > { %5314 = vst [vmem:[#allocation17_spill] sm:$0xff] %v4408_v14 }
 0x91c   : > { %1300 = vmatmul.mubr.f32.vlgmr.msra.gmra.mxu0 %v1233_v15  ;;  %3000 = vmatmul.mubr.f32.vlgmr.msra.gmra.mxu1 %v1233_v15  ;;  %v4412_v15 = vld [vmem:[%s3585_s13 + $0x88] sm:$0xff] }
 0x91d   : > { %1497 = vmatpush1.msra.mxu0 %v4278_v18  ;;  %3003 = vmatpush3.msra.mxu1 %v4282_v22  ;;  %5315 = vst [vmem:[#allocation31_spill] sm:$0xff] %v4412_v15 }
 0x91e   : > { %1498 = vmatprep.subr.mxu0 %v4286_v25  ;;  %3004 = vmatprep.subr.mxu1 %v5272_v0 }
 0x91f   : > { %1499 = vmatpush1.msra.mxu0 %v4291_v28  ;;  %3005 = vmatpush3.msra.mxu1 %v4295_v29 }
 0x920   : > { %1500 = vmatprep.subr.mxu0 %v4299_v34  ;;  %3006 = vmatprep.subr.mxu1 %v5272_v0 }
 0x921   : > { %1501 = vmatpush1.msra.mxu0 %v4304_v35  ;;  %3007 = vmatpush3.msra.mxu1 %v4308_v36 }
 0x922   : > { %1502 = vmatprep.subr.mxu0 %v4312_v37  ;;  %3008 = vmatprep.subr.mxu1 %v5272_v0 }
 0x923   : > { %1503 = vmatpush1.msra.mxu0 %v4317_v39  ;;  %3009 = vmatpush3.msra.mxu1 %v4321_v40 }
 0x924   : > { %1504 = vmatprep.subr.mxu0 %v4325_v41  ;;  %3010 = vmatprep.subr.mxu1 %v5272_v0 }
 0x925   : > { %1505 = vmatpush1.msra.mxu0 %v4330_v44  ;;  %3011 = vmatpush3.msra.mxu1 %v4334_v45 }
 0x926   : > { %1506 = vmatprep.subr.mxu0 %v4338_v46  ;;  %3012 = vmatprep.subr.mxu1 %v5272_v0 }
 0x927   : > { %1507 = vmatpush1.msra.mxu0 %v4343_v48  ;;  %3013 = vmatpush3.msra.mxu1 %v4347_v53 }
 0x928   : > { %1508 = vmatprep.subr.mxu0 %v4351_v52  ;;  %3014 = vmatprep.subr.mxu1 %v5272_v0 }
 0x929   : > { %1509 = vmatpush1.msra.mxu0 %v4356_v49  ;;  %3015 = vmatpush3.msra.mxu1 %v4360_v5 }
 0x92a   : > { %1510 = vmatprep.subr.mxu0 %v4364_v57  ;;  %3016 = vmatprep.subr.mxu1 %v5272_v0 }
 0x92b   : > { %1511 = vmatpush1.msra.mxu0 %v4369_v55  ;;  %3017 = vmatpush3.msra.mxu1 %v4373_v58 }
 0x92c   : > { %1512 = vmatprep.subr.mxu0 %v4377_v56  ;;  %3018 = vmatprep.subr.mxu1 %v5272_v0 }
 0x92d   : > { %1513 = vmatpush1.msra.mxu0 %v4382_v50  ;;  %3019 = vmatpush3.msra.mxu1 %v4386_v8 }
 0x92e   : > { %1514 = vmatprep.subr.mxu0 %v4390_v19  ;;  %3020 = vmatprep.subr.mxu1 %v5272_v0 }
 0x92f   : > { %1515 = vmatpush1.msra.mxu0 %v4395_v10  ;;  %3021 = vmatpush3.msra.mxu1 %v4399_v11 }
 0x930   : > { %1516 = vmatprep.subr.mxu0 %v4403_v12  ;;  %3022 = vmatprep.subr.mxu1 %v5272_v0 }
 0x931   : > { %1517 = vmatpush1.msra.mxu0 %v4408_v14  ;;  %3023 = vmatpush3.msra.mxu1 %v4412_v15 }
 0x932   : > { %1518 = vmatprep.subr.mxu0 %v4416_v21  ;;  %3024 = vmatprep.subr.mxu1 %v5272_v0 }
 0x933   : > { %1519 = vmatpush1.msra.mxu0 %v4421_v43  ;;  %3025 = vmatpush3.msra.mxu1 %v4425_v32 }
 0x934   : > { %1520 = vmatprep.subr.mxu0 %v4429_v13  ;;  %3026 = vmatprep.subr.mxu1 %v5272_v0 }
 0x935   : > { %1521 = vmatpush1.msra.mxu0 %v4434_v6  ;;  %3027 = vmatpush3.msra.mxu1 %v4438_v54 }
 0x936   : > { %1522 = vmatprep.subr.mxu0 %v4442_v17  ;;  %3028 = vmatprep.subr.mxu1 %v5272_v0 }
 0x937   : > { %1523 = vmatpush1.msra.mxu0 %v4447_v59  ;;  %3029 = vmatpush3.msra.mxu1 %v4451_v9 }
 0x938   : > { %1524 = vmatprep.subr.mxu0 %v4455_v62  ;;  %3030 = vmatprep.subr.mxu1 %v5272_v0  ;;  %v299_v62 = vld [vmem:[%s3934_s8 + $0x10] sm:$0xf] }
 0x939   : > { %1525 = vmatpush1.msra.mxu0 %v4460_v51  ;;  %3031 = vmatpush3.msra.mxu1 %v4464_v30 }
 0x93a   : > { %1526 = vmatprep.subr.mxu0 %v4468_v23  ;;  %3032 = vmatprep.subr.mxu1 %v5272_v0 }
 0x93b   : > { %1527 = vmatpush1.msra.mxu0 %v4473_v16  ;;  %1560 = vmatprep.mubr.f32.mxu0 %v5272_v0 }
 0x93c   : > { %3033 = vmatpush3.msra.mxu1 %v4478_v26  ;;  %3034 = vmatprep.mubr.msk.f32.mxu1 %vm3481_vm0, %v5272_v0 }
 0x93d   : > { %1759 = vmatprep.subr.mxu0 %v4195_v24  ;;  %3037 = vmatprep.subr.mxu1 %v5272_v0  ;;  %v298_v24 = vld [vmem:[%s3934_s8 + $0xc] sm:$0xf] }
 0x9dc   : > { %v1301_v38 = vpop.f32.mrf.mxu0  ;;  %v1372_v42 = vpop.f32.mrf.mxu1 }
 0x9dd   : > { %v1302_v23 = vadd.f32 %v1301_v38, %v5302_v27  ;;  %v1373_v26 = vadd.f32 %v1372_v42, %v5304_v33 }
 0x9de   : > { %v1303_v16 = vpop.f32.mrf.mxu0  ;;  %v3001_v30 = vpop.f32.mrf.mxu1 }
 0x9df   : > { %v1304_v51 = vadd.f32 %v1303_v16, %v5303_v31  ;;  %1377 = vrot.lane.b32.xlu0 %v1302_v23, %s3482_s14 }
 0x9e1   : > { %1398 = vrot.lane.b32.xlu1 %v1304_v51, %s3483_s25 }
 0x9e3   : > { %1420 = vrot.lane.b32.xlu0 %v1373_v26, %s3482_s14 }
 0x9e5   : > { %1430 = vrot.lane.b32.xlu1 %v1373_v26, %s3483_s25 }
 0x9e9   : > { %1388 = vrot.lane.b32.xlu1 %v1304_v51, %s3482_s14 }
 0x9ed   : > { %369 = vperm.xlu1 %3190, %v298_v24  }
 0x9f1   : > { %374 = vperm.xlu1 %3190, %v299_v62  }
 0xa51   : > { %v1378_v38 = vpop.permute.xlu0 %1377 }
 0xa52   : > { %v1380_v30 = vadd.f32 %v1378_v38, %v1302_v23 }
 0xa53   : > { %v1399_v13 = vpop.permute.xlu1 %1398 }
 0xa54   : > { %v1381_v27 = vsub.f32 0.0, %v1380_v30 }
 0xa55   : > { %v1421_v16 = vpop.permute.xlu0 %1420 }
 0xa56   : > { %v1382_v31 = vmul.f32 1.442695, %v1381_v27  ;;  %v1423_v9 = vadd.f32 %v1421_v16, %v1304_v51 }
 0xa57   : > { %v1431_v38 = vpop.permute.xlu1 %1430 }
 0xa58   : > { %3274 = vpow2.f32 %v1382_v31  ;;  %v1424_v42 = vsub.f32 0.0, %v1423_v9 }
 0xa5a   : > { %v1425_v33 = vmul.f32 1.442695, %v1424_v42 }
 0xa5c   : > { %3276 = vpow2.f32 %v1425_v33 }
 0xa65   : > { %v3275_v59 = vpop.eup %3274 }
 0xa66   : > { %v1384_v17 = vadd.f32 1.0, %v3275_v59 }
 0xa68   : > { %3278 = vrcp.f32 %v1384_v17 }
 0xa69   : > { %v3277_v54 = vpop.eup %3276 }
 0xa6a   : > { %v1427_v6 = vadd.f32 1.0, %v3277_v54  ;;  %v1389_v54 = vpop.permute.xlu1 %1388 }
 0xa6c   : > { %3280 = vrcp.f32 %v1427_v6  ;;  %v1391_v6 = vadd.f32 %v1389_v54, %v1302_v23 }
 0xa6e   : > { %v1392_v33 = vsub.f32 0.0, %v1391_v6  ;;  %v5335_v6 = vrot.slane %v3594_v3, 5 }
 0xa75   : > { %v3279_v24 = vpop.eup %3278 }
 0xa76   : > { %v1401_v32 = vmul.f32 %v3279_v24, %v1399_v13  ;;  %v4499_v24 = vpop.permute.xlu1 %369 }
 0xa77   : > { %5331 = vst [vmem:[#allocation47_spill] sm:$0xff] %v4499_v24 }
 0xa78   : > { %1403 = vrot.lane.b32.xlu0 %v1401_v32, %s3485_s9  ;;  %v1393_v32 = vmul.f32 1.442695, %v1392_v33 }
 0xa79   : > { %v3281_v62 = vpop.eup %3280 }
 0xa7a   : > { %v1433_v30 = vmul.f32 %v3281_v62, %v1431_v38 }
 0xa7c   : > { %1435 = vrot.lane.b32.xlu0 %v1433_v30, %s3485_s9  ;;  %v4502_v30 = vsub.f32 1.0, %v4499_v24 }
 0xa7e   : > { %5332 = vst [vmem:[#allocation48_spill] sm:$0xff] %v4502_v30 }
 0xaea   : > { %v1404_v51 = vpop.permute.xlu0 %1403 }
 0xaeb   : > { %v1406_v9 = vadd.f32 %v1404_v51, %v1302_v23  ;;  %v5334_v23 = vrot.slane %v5284_v7, 6 }
 0xaed   : > { %3282 = vtanh.f32 %v1406_v9 }
 0xaee   : > { %v1436_v27 = vpop.permute.xlu0 %1435 }
 0xaef   : > { %v1438_v31 = vadd.f32 %v1436_v27, %v1373_v26  ;;  %v5333_v27 = vrot.slane %v3588_v1, 7 }
 0xaf1   : > { %3284 = vtanh.f32 %v1438_v31  ;;  %v1476_v31 = vsel %vm949_vm9, %v5334_v23, %v5333_v27  ;;  %v1446_v27 = vmul.f32 %v3281_v62, %v4256_v2  ;;  %v4524_v23 = vpop.permute.xlu1 %374 }
 0xaf2   : > { %3286 = vpow2.f32 %v1393_v32  ;;  %v1477_v33 = vsel %vm1209_vm10, %v5335_v6, %v1476_v31  ;;  %5338 = vst [vmem:[#allocation50_spill] sm:$0xff] %v4524_v23  ;;  %v4527_v31 = vsub.f32 1.0, %v4524_v23 }
 0xaf4   : > { %5339 = vst [vmem:[#allocation51_spill] sm:$0xff] %v4527_v31  ;;  %v1449_v6 = vmul.f32 %v4256_v2, %v4527_v31 }
 0xafa   : > { %v3283_v17 = vpop.eup %3282 }
 0xafb   : > { %1410 = vrot.lane.b32.xlu0 %v3283_v17, %s3483_s25 }
 0xafe   : > { %v3285_v59 = vpop.eup %3284 }
 0xaff   : > { %1442 = vrot.lane.b32.xlu0 %v3285_v59, %s3483_s25  ;;  %v3287_v13 = vpop.eup %3286  ;;  %v1417_v59 = vmul.f32 %v4247_v47, %v4502_v30 }
 0xb00   : > { %v1395_v16 = vadd.f32 1.0, %v3287_v13  ;;  %v5337_v13 = vrot.slane %v3597_v4, 4 }
 0xb02   : > { %3288 = vrcp.f32 %v1395_v16  ;;  %v1478_v16 = vsel %vm1473_vm11, %v5337_v13, %v1477_v33 }
 0xb0f   : > { %v3289_v42 = vpop.eup %3288 }
 0xb10   : > { %v1408_v38 = vsub.f32 1.0, %v3289_v42  ;;  %v1414_v9 = vmul.f32 %v3289_v42, %v4247_v47 }
 0xb6d   : > { %v1411_v26 = vpop.permute.xlu0 %1410 }
 0xb6e   : > { %v1413_v51 = vmul.f32 %v1411_v26, %v1408_v38 }
 0xb70   : > { %v1415_v17 = vadd.f32 %v1414_v9, %v1413_v51  ;;  %v1440_v51 = vsub.f32 1.0, %v3281_v62 }
 0xb71   : > { %v1443_v26 = vpop.permute.xlu0 %1442 }
 0xb72   : > { %v1416_v54 = vmul.f32 %v1415_v17, %v4499_v24  ;;  %v1445_v9 = vmul.f32 %v1443_v26, %v1440_v51 }
 0xb74   : > { %v4516_v32 = vadd.f32 %v1417_v59, %v1416_v54  ;;  %v1447_v17 = vadd.f32 %v1446_v27, %v1445_v9  ;;  %v1471_v59 = vsel %vm949_vm9, %v3825_v60, %v4216_v20 }
 0xb75   : > { %v1472_v33 = vsel %vm1209_vm10, %v3828_v61, %v1471_v59  ;;  %v5342_v59 = vld [vmem:[#allocation35_spill] sm:$0xff] }
 0xb76   : > { %5336 = vst [vmem:[#allocation49_spill] sm:$0xff] %v4516_v32  ;;  %v1483_v42 = vrot.slane %v4516_v32, 4  ;;  %v1448_v54 = vmul.f32 %v1447_v17, %v4524_v23  ;;  %v1474_v62 = vsel %vm1473_vm11, %v3834_v63, %v1472_v33  ;;  %v5341_v17 = vld [vmem:[#allocation34_spill] sm:$0xff] }
 0xb77   : > { %v5345_v33 = vld [vmem:[#allocation38_spill] sm:$0xff] }
 0xb78   : > { %v3206_v38 = vpack.i.bf16 %v1483_v42, %v1478_v16  ;;  %v4537_v13 = vadd.f32 %v1449_v6, %v1448_v54  ;;  %v5343_v54 = vld [vmem:[#allocation36_spill] sm:$0xff]  ;;  %v5344_v6 = vld [vmem:[#allocation37_spill] sm:$0xff] }
 0xb7a   : > { %3207 = vrot.lane.b32.xlu1 %v3206_v38, %s3482_s14  ;;  %5340 = vst [vmem:[#allocation52_spill] sm:$0xff] %v4537_v13  ;;  %v1488_v51 = vrot.slane %v4537_v13, 4 }
 0xbec   : > { %v3208_v16 = vpop.permute.xlu1 %3207 }
 0xbed   : > { %v3210_v42 = vunpack.i.h.bf16 %v3208_v16  ;;  %v3209_v38 = vunpack.i.l.bf16 %v3208_v16  ;;  %v5347_v16 = vld [vmem:[#allocation40_spill] sm:$0xff] }
 0xbef   : > { %v1490_v26 = vsel %vm424_vm4, %v1474_v62, %v3209_v38  ;;  %v5346_v62 = vld [vmem:[#allocation39_spill] sm:$0xff]  ;;  %v5349_v38 = vld [vmem:[#allocation42_spill] sm:$0xff] }
 0xbf0   : > { %v1491_v9 = vsel %vm426_vm5, %v1490_v26, %v3210_v42  ;;  %v5348_v42 = vld [vmem:[#allocation41_spill] sm:$0xff]  ;;  %v5350_v26 = vld [vmem:[#allocation43_spill] sm:$0xff] }
 0xbf1   : > { %v1492_v27 = vsel %vm428_vm6, %v1491_v9, %v1488_v51  ;;  %v5351_v51 = vld [vmem:[#allocation44_spill] sm:$0xff]  ;;  %v5352_v9 = vld [vmem:[#allocation45_spill] sm:$0xff] }
 0xbf2   : > { %v1494_v2 = vrot.slane %v1492_v27, 4  ;;  %v5353_v27 = vld [vmem:[#allocation46_spill] sm:$0xff] }
 0xbf4   : > { %1561 = vmatmul.mubr.f32.vlgmr.msra.gmra.mxu0 %v1494_v2  ;;  %3035 = vmatmul.mubr.f32.vlgmr.msra.gmra.mxu1 %v1494_v2  ;;  %v5354_v2 = vld [vmem:[#allocation7_spill] sm:$0xff] }
 0xbf5   : > { %1760 = vmatpush1.msra.mxu0 %v4278_v18  ;;  %3038 = vmatpush3.msra.mxu1 %v4282_v22 }
 0xbf6   : > { %1761 = vmatprep.subr.mxu0 %v4286_v25  ;;  %3039 = vmatprep.subr.mxu1 %v5272_v0 }
 0xbf7   : > { %1762 = vmatpush1.msra.mxu0 %v4291_v28  ;;  %3040 = vmatpush3.msra.mxu1 %v4295_v29 }
 0xbf8   : > { %1763 = vmatprep.subr.mxu0 %v4299_v34  ;;  %3041 = vmatprep.subr.mxu1 %v5272_v0 }
 0xbf9   : > { %1764 = vmatpush1.msra.mxu0 %v4304_v35  ;;  %3042 = vmatpush3.msra.mxu1 %v4308_v36 }
 0xbfa   : > { %1765 = vmatprep.subr.mxu0 %v4312_v37  ;;  %3043 = vmatprep.subr.mxu1 %v5272_v0 }
 0xbfb   : > { %1766 = vmatpush1.msra.mxu0 %v4317_v39  ;;  %3044 = vmatpush3.msra.mxu1 %v4321_v40 }
 0xbfc   : > { %1767 = vmatprep.subr.mxu0 %v4325_v41  ;;  %3045 = vmatprep.subr.mxu1 %v5272_v0 }
 0xbfd   : > { %1768 = vmatpush1.msra.mxu0 %v4330_v44  ;;  %3046 = vmatpush3.msra.mxu1 %v4334_v45 }
 0xbfe   : > { %1769 = vmatprep.subr.mxu0 %v4338_v46  ;;  %3047 = vmatprep.subr.mxu1 %v5272_v0 }
 0xbff   : > { %1770 = vmatpush1.msra.mxu0 %v4343_v48  ;;  %3048 = vmatpush3.msra.mxu1 %v4347_v53 }
 0xc00   : > { %1771 = vmatprep.subr.mxu0 %v4351_v52  ;;  %3049 = vmatprep.subr.mxu1 %v5272_v0 }
 0xc01   : > { %1772 = vmatpush1.msra.mxu0 %v4356_v49  ;;  %3050 = vmatpush3.msra.mxu1 %v4360_v5 }
 0xc02   : > { %1773 = vmatprep.subr.mxu0 %v4364_v57  ;;  %3051 = vmatprep.subr.mxu1 %v5272_v0 }
 0xc03   : > { %1774 = vmatpush1.msra.mxu0 %v4369_v55  ;;  %3052 = vmatpush3.msra.mxu1 %v4373_v58 }
 0xc04   : > { %1775 = vmatprep.subr.mxu0 %v4377_v56  ;;  %3053 = vmatprep.subr.mxu1 %v5272_v0 }
 0xc05   : > { %1776 = vmatpush1.msra.mxu0 %v4382_v50  ;;  %3054 = vmatpush3.msra.mxu1 %v4386_v8 }
 0xc06   : > { %1777 = vmatprep.subr.mxu0 %v4390_v19  ;;  %3055 = vmatprep.subr.mxu1 %v5272_v0 }
 0xc07   : > { %1778 = vmatpush1.msra.mxu0 %v4395_v10  ;;  %3056 = vmatpush3.msra.mxu1 %v4399_v11 }
 0xc08   : > { %1779 = vmatprep.subr.mxu0 %v4403_v12  ;;  %3057 = vmatprep.subr.mxu1 %v5272_v0 }
 0xc09   : > { %1780 = vmatpush1.msra.mxu0 %v4408_v14  ;;  %3058 = vmatpush3.msra.mxu1 %v4412_v15 }
 0xc0a   : > { %1781 = vmatprep.subr.mxu0 %v4416_v21  ;;  %3059 = vmatprep.subr.mxu1 %v5272_v0 }
 0xc0b   : > { %1782 = vmatpush1.msra.mxu0 %v4421_v43  ;;  %3060 = vmatpush3.msra.mxu1 %v5341_v17 }
 0xc0c   : > { %1783 = vmatprep.subr.mxu0 %v5342_v59  ;;  %3061 = vmatprep.subr.mxu1 %v5272_v0 }
 0xc0d   : > { %1784 = vmatpush1.msra.mxu0 %v5343_v54  ;;  %3062 = vmatpush3.msra.mxu1 %v5344_v6 }
 0xc0e   : > { %1785 = vmatprep.subr.mxu0 %v5345_v33  ;;  %3063 = vmatprep.subr.mxu1 %v5272_v0 }
 0xc0f   : > { %1786 = vmatpush1.msra.mxu0 %v5346_v62  ;;  %3064 = vmatpush3.msra.mxu1 %v5347_v16  ;;  %v5356_v62 = vld [vmem:[#allocation19_spill] sm:$0xff] }
 0xc10   : > { %1787 = vmatprep.subr.mxu0 %v5348_v42  ;;  %3065 = vmatprep.subr.mxu1 %v5272_v0 }
 0xc11   : > { %1788 = vmatpush1.msra.mxu0 %v5349_v38  ;;  %3066 = vmatpush3.msra.mxu1 %v5350_v26  ;;  %v5355_v26 = vld [vmem:[#allocation18_spill] sm:$0xff] }
 0xc12   : > { %1789 = vmatprep.subr.mxu0 %v5351_v51  ;;  %3067 = vmatprep.subr.mxu1 %v5272_v0 }
 0xc13   : > { %1790 = vmatpush1.msra.mxu0 %v5352_v9  ;;  %1823 = vmatprep.mubr.f32.mxu0 %v5272_v0  ;;  %v5357_v9 = vld [vmem:[#allocation20_spill] sm:$0xff] }
 0xc14   : > { %3068 = vmatpush3.msra.mxu1 %v5353_v27  ;;  %3069 = vmatprep.mubr.msk.f32.mxu1 %vm3481_vm0, %v5272_v0 }
 0xc15   : > { %2026 = vmatprep.subr.mxu0 %v5354_v2  ;;  %3072 = vmatprep.subr.mxu1 %v5272_v0 }
 0xcb4   : > { %v1562_v47 = vpop.f32.mrf.mxu0  ;;  %v1633_v38 = vpop.f32.mrf.mxu1 }
 0xcb5   : > { %v1563_v42 = vadd.f32 %v1562_v47, %v5355_v26  ;;  %v1634_v6 = vadd.f32 %v1633_v38, %v5357_v9 }
 0xcb6   : > { %v1564_v51 = vpop.f32.mrf.mxu0  ;;  %v3036_v16 = vpop.f32.mrf.mxu1 }
 0xcb7   : > { %v1565_v33 = vadd.f32 %v1564_v51, %v5356_v62  ;;  %1638 = vrot.lane.b32.xlu0 %v1563_v42, %s3482_s14 }
 0xcb9   : > { %1659 = vrot.lane.b32.xlu1 %v1565_v33, %s3483_s25 }
 0xcbb   : > { %1681 = vrot.lane.b32.xlu0 %v1634_v6, %s3482_s14 }
 0xcbd   : > { %1691 = vrot.lane.b32.xlu1 %v1634_v6, %s3483_s25 }
 0xcc1   : > { %1649 = vrot.lane.b32.xlu1 %v1565_v33, %s3482_s14 }
 0xd29   : > { %v1639_v2 = vpop.permute.xlu0 %1638 }
 0xd2a   : > { %v1641_v27 = vadd.f32 %v1639_v2, %v1563_v42 }
 0xd2b   : > { %v1660_v43 = vpop.permute.xlu1 %1659 }
 0xd2c   : > { %v1642_v54 = vsub.f32 0.0, %v1641_v27 }
 0xd2d   : > { %v1682_v47 = vpop.permute.xlu0 %1681 }
 0xd2e   : > { %v1643_v26 = vmul.f32 1.442695, %v1642_v54  ;;  %v1684_v16 = vadd.f32 %v1682_v47, %v1565_v33 }
 0xd2f   : > { %v1692_v27 = vpop.permute.xlu1 %1691 }
 0xd30   : > { %3290 = vpow2.f32 %v1643_v26  ;;  %v1685_v51 = vsub.f32 0.0, %v1684_v16 }
 0xd32   : > { %v1686_v62 = vmul.f32 1.442695, %v1685_v51 }
 0xd34   : > { %3292 = vpow2.f32 %v1686_v62 }
 0xd3d   : > { %v3291_v59 = vpop.eup %3290 }
 0xd3e   : > { %v1645_v38 = vadd.f32 1.0, %v3291_v59  ;;  %v5358_v59 = vrot.slane %v3588_v1, 5 }
 0xd40   : > { %3294 = vrcp.f32 %v1645_v38 }
 0xd41   : > { %v3293_v9 = vpop.eup %3292 }
 0xd42   : > { %v1688_v17 = vadd.f32 1.0, %v3293_v9 }
 0xd44   : > { %3296 = vrcp.f32 %v1688_v17  ;;  %v5359_v17 = vrot.slane %v5284_v7, 4 }
 0xd46   : > { %v1730_v9 = vsel %vm1209_vm10, %v5359_v17, %v5358_v59 }
 0xd4d   : > { %v3295_v21 = vpop.eup %3294 }
 0xd4e   : > { %v1662_v15 = vmul.f32 %v3295_v21, %v1660_v43  ;;  %v5360_v21 = vrot.slane %v3594_v3, 3 }
 0xd50   : > { %1664 = vrot.lane.b32.xlu0 %v1662_v15, %s3485_s9  ;;  %v1731_v43 = vsel %vm1473_vm11, %v5360_v21, %v1730_v9  ;;  %v1678_v21 = vmul.f32 %v4516_v32, %v4527_v31 }
 0xd51   : > { %v3297_v2 = vpop.eup %3296 }
 0xd52   : > { %v1694_v14 = vmul.f32 %v3297_v2, %v1692_v27 }
 0xd54   : > { %1696 = vrot.lane.b32.xlu0 %v1694_v14, %s3485_s9  ;;  %v5361_v14 = vrot.slane %v3597_v4, 2 }
 0xd56   : > { %v3211_v47 = vpack.i.bf16 %v5361_v14, %v1731_v43 }
 0xdc2   : > { %v1665_v54 = vpop.permute.xlu0 %1664 }
 0xdc3   : > { %v1667_v33 = vadd.f32 %v1665_v54, %v1563_v42 }
 0xdc5   : > { %3298 = vtanh.f32 %v1667_v33 }
 0xdc6   : > { %v1697_v62 = vpop.permute.xlu0 %1696 }
 0xdc7   : > { %v1699_v26 = vadd.f32 %v1697_v62, %v1634_v6  ;;  %v1650_v6 = vpop.permute.xlu1 %1649 }
 0xdc8   : > { %v1652_v51 = vadd.f32 %v1650_v6, %v1563_v42  ;;  %v1707_v6 = vmul.f32 %v3297_v2, %v4537_v13 }
 0xdc9   : > { %3300 = vtanh.f32 %v1699_v26 }
 0xdca   : > { %v1653_v38 = vsub.f32 0.0, %v1652_v51 }
 0xdcc   : > { %v1654_v27 = vmul.f32 1.442695, %v1653_v38 }
 0xdce   : > { %3302 = vpow2.f32 %v1654_v27 }
 0xdd2   : > { %v3299_v15 = vpop.eup %3298 }
 0xdd3   : > { %1671 = vrot.lane.b32.xlu1 %v3299_v15, %s3483_s25 }
 0xdd6   : > { %v3301_v16 = vpop.eup %3300 }
 0xdd7   : > { %1703 = vrot.lane.b32.xlu0 %v3301_v16, %s3483_s25  ;;  %3212 = vrot.lane.b32.xlu1 %v3211_v47, %s3482_s14  ;;  %v1701_v47 = vsub.f32 1.0, %v3297_v2 }
 0xddb   : > { %v3303_v54 = vpop.eup %3302 }
 0xddc   : > { %v1656_v33 = vadd.f32 1.0, %v3303_v54  ;;  %v1726_v54 = vsel %vm1209_vm10, %v3825_v60, %v4216_v20  ;;  %v5382_v20 = vld [vmem:[#allocation19_spill] sm:$0xff] }
 0xdde   : > { %3304 = vrcp.f32 %v1656_v33  ;;  %v1710_v33 = vmul.f32 %v4537_v13, %v4502_v30  ;;  %v5381_v13 = vld [vmem:[#allocation18_spill] sm:$0xff] }
 0xdeb   : > { %v3305_v62 = vpop.eup %3304 }
 0xdec   : > { %v1669_v26 = vsub.f32 1.0, %v3305_v62  ;;  %v1675_v4 = vmul.f32 %v3305_v62, %v4516_v32 }
 0xe45   : > { %v1672_v59 = vpop.permute.xlu1 %1671 }
 0xe46   : > { %v1674_v17 = vmul.f32 %v1672_v59, %v1669_v26  ;;  %v1727_v59 = vsel %vm1473_vm11, %v3828_v61, %v1726_v54  ;;  %v5365_v54 = vld [vmem:[#allocation32_spill] sm:$0xff] }
 0xe48   : > { %v1676_v9 = vadd.f32 %v1675_v4, %v1674_v17 }
 0xe49   : > { %v1704_v14 = vpop.permute.xlu0 %1703  ;;  %v3213_v38 = vpop.permute.xlu1 %3212 }
 0xe4a   : > { %v1677_v43 = vmul.f32 %v1676_v9, %v4524_v23  ;;  %v1706_v16 = vmul.f32 %v1704_v14, %v1701_v47  ;;  %v3215_v62 = vunpack.i.h.bf16 %v3213_v38  ;;  %v3214_v26 = vunpack.i.l.bf16 %v3213_v38  ;;  %v5363_v38 = vld [vmem:[#allocation17_spill] sm:$0xff] }
 0xe4c   : > { %v4639_v15 = vadd.f32 %v1678_v21, %v1677_v43  ;;  %v1708_v51 = vadd.f32 %v1707_v6, %v1706_v16  ;;  %v1746_v2 = vsel %vm424_vm4, %v1727_v59, %v3214_v26  ;;  %v1747_v4 = vsel %vm424_vm4, %v3834_v63, %v3215_v62  ;;  %v5367_v62 = vld [vmem:[#allocation34_spill] sm:$0xff]  ;;  %v5368_v26 = vld [vmem:[#allocation35_spill] sm:$0xff]  ;;  %v5369_v59 = vld [vmem:[#allocation36_spill] sm:$0xff] }
 0xe4e   : > { %v1739_v42 = vrot.slane %v4639_v15, 3  ;;  %v1709_v27 = vmul.f32 %v1708_v51, %v4499_v24 }
 0xe50   : > { %1740 = vrot.lane.b32.xlu0 %v1739_v42, %s3482_s14  ;;  %v4652_v17 = vadd.f32 %v1710_v33, %v1709_v27  ;;  %v5364_v27 = vld [vmem:[#allocation31_spill] sm:$0xff]  ;;  %v5366_v33 = vld [vmem:[#allocation33_spill] sm:$0xff] }
 0xe52   : > { %5362 = vst [vmem:[#allocation53_spill] sm:$0xff] %v4652_v17  ;;  %v1744_v9 = vrot.slane %v4652_v17, 3 }
 0xec2   : > { %v1741_v21 = vpop.permute.xlu0 %1740 }
 0xec3   : > { %v1748_v43 = vsel %vm426_vm5, %v1746_v2, %v1741_v21  ;;  %v1749_v42 = vsel %vm426_vm5, %v1747_v4, %v1741_v21  ;;  %v5370_v2 = vld [vmem:[#allocation37_spill] sm:$0xff]  ;;  %v5371_v4 = vld [vmem:[#allocation38_spill] sm:$0xff]  ;;  %v5373_v21 = vld [vmem:[#allocation40_spill] sm:$0xff] }
 0xec4   : > { %v1750_v14 = vsel %vm428_vm6, %v1748_v43, %v1744_v9  ;;  %v1751_v47 = vsel %vm428_vm6, %v1749_v42, %v1744_v9  ;;  %v5372_v9 = vld [vmem:[#allocation39_spill] sm:$0xff]  ;;  %v5374_v43 = vld [vmem:[#allocation41_spill] sm:$0xff]  ;;  %v5375_v42 = vld [vmem:[#allocation42_spill] sm:$0xff] }
 0xec5   : > { %v1755_v16 = vrot.slane %v1750_v14, 5  ;;  %v1756_v6 = vrot.slane %v1751_v47, 5  ;;  %v5376_v14 = vld [vmem:[#allocation43_spill] sm:$0xff]  ;;  %v5377_v47 = vld [vmem:[#allocation44_spill] sm:$0xff] }
 0xec7   : > { %v1757_v51 = vsel %vm1754_vm12, %v1755_v16, %v1756_v6  ;;  %v5378_v16 = vld [vmem:[#allocation45_spill] sm:$0xff]  ;;  %v5379_v6 = vld [vmem:[#allocation46_spill] sm:$0xff] }
 0xec8   : > { %1824 = vmatmul.mubr.f32.vlgmr.msra.gmra.mxu0 %v1757_v51  ;;  %3070 = vmatmul.mubr.f32.vlgmr.msra.gmra.mxu1 %v1757_v51  ;;  %v5380_v51 = vld [vmem:[#allocation7_spill] sm:$0xff] }
 0xec9   : > { %2027 = vmatpush1.msra.mxu0 %v4278_v18  ;;  %3073 = vmatpush3.msra.mxu1 %v4282_v22 }
 0xeca   : > { %2028 = vmatprep.subr.mxu0 %v4286_v25  ;;  %3074 = vmatprep.subr.mxu1 %v5272_v0 }
 0xecb   : > { %2029 = vmatpush1.msra.mxu0 %v4291_v28  ;;  %3075 = vmatpush3.msra.mxu1 %v4295_v29 }
 0xecc   : > { %2030 = vmatprep.subr.mxu0 %v4299_v34  ;;  %3076 = vmatprep.subr.mxu1 %v5272_v0 }
 0xecd   : > { %2031 = vmatpush1.msra.mxu0 %v4304_v35  ;;  %3077 = vmatpush3.msra.mxu1 %v4308_v36 }
 0xece   : > { %2032 = vmatprep.subr.mxu0 %v4312_v37  ;;  %3078 = vmatprep.subr.mxu1 %v5272_v0 }
 0xecf   : > { %2033 = vmatpush1.msra.mxu0 %v4317_v39  ;;  %3079 = vmatpush3.msra.mxu1 %v4321_v40 }
 0xed0   : > { %2034 = vmatprep.subr.mxu0 %v4325_v41  ;;  %3080 = vmatprep.subr.mxu1 %v5272_v0 }
 0xed1   : > { %2035 = vmatpush1.msra.mxu0 %v4330_v44  ;;  %3081 = vmatpush3.msra.mxu1 %v4334_v45 }
 0xed2   : > { %2036 = vmatprep.subr.mxu0 %v4338_v46  ;;  %3082 = vmatprep.subr.mxu1 %v5272_v0 }
 0xed3   : > { %2037 = vmatpush1.msra.mxu0 %v4343_v48  ;;  %3083 = vmatpush3.msra.mxu1 %v4347_v53 }
 0xed4   : > { %2038 = vmatprep.subr.mxu0 %v4351_v52  ;;  %3084 = vmatprep.subr.mxu1 %v5272_v0 }
 0xed5   : > { %2039 = vmatpush1.msra.mxu0 %v4356_v49  ;;  %3085 = vmatpush3.msra.mxu1 %v4360_v5 }
 0xed6   : > { %2040 = vmatprep.subr.mxu0 %v4364_v57  ;;  %3086 = vmatprep.subr.mxu1 %v5272_v0 }
 0xed7   : > { %2041 = vmatpush1.msra.mxu0 %v4369_v55  ;;  %3087 = vmatpush3.msra.mxu1 %v4373_v58 }
 0xed8   : > { %2042 = vmatprep.subr.mxu0 %v4377_v56  ;;  %3088 = vmatprep.subr.mxu1 %v5272_v0 }
 0xed9   : > { %2043 = vmatpush1.msra.mxu0 %v4382_v50  ;;  %3089 = vmatpush3.msra.mxu1 %v4386_v8 }
 0xeda   : > { %2044 = vmatprep.subr.mxu0 %v4390_v19  ;;  %3090 = vmatprep.subr.mxu1 %v5272_v0 }
 0xedb   : > { %2045 = vmatpush1.msra.mxu0 %v4395_v10  ;;  %3091 = vmatpush3.msra.mxu1 %v4399_v11 }
 0xedc   : > { %2046 = vmatprep.subr.mxu0 %v4403_v12  ;;  %3092 = vmatprep.subr.mxu1 %v5272_v0 }
 0xedd   : > { %2047 = vmatpush1.msra.mxu0 %v5363_v38  ;;  %3093 = vmatpush3.msra.mxu1 %v5364_v27 }
 0xede   : > { %2048 = vmatprep.subr.mxu0 %v5365_v54  ;;  %3094 = vmatprep.subr.mxu1 %v5272_v0 }
 0xedf   : > { %2049 = vmatpush1.msra.mxu0 %v5366_v33  ;;  %3095 = vmatpush3.msra.mxu1 %v5367_v62 }
 0xee0   : > { %2050 = vmatprep.subr.mxu0 %v5368_v26  ;;  %3096 = vmatprep.subr.mxu1 %v5272_v0 }
 0xee1   : > { %2051 = vmatpush1.msra.mxu0 %v5369_v59  ;;  %3097 = vmatpush3.msra.mxu1 %v5370_v2 }
 0xee2   : > { %2052 = vmatprep.subr.mxu0 %v5371_v4  ;;  %3098 = vmatprep.subr.mxu1 %v5272_v0 }
 0xee3   : > { %2053 = vmatpush1.msra.mxu0 %v5372_v9  ;;  %3099 = vmatpush3.msra.mxu1 %v5373_v21 }
 0xee4   : > { %2054 = vmatprep.subr.mxu0 %v5374_v43  ;;  %3100 = vmatprep.subr.mxu1 %v5272_v0 }
 0xee5   : > { %2055 = vmatpush1.msra.mxu0 %v5375_v42  ;;  %3101 = vmatpush3.msra.mxu1 %v5376_v14 }
 0xee6   : > { %2056 = vmatprep.subr.mxu0 %v5377_v47  ;;  %3102 = vmatprep.subr.mxu1 %v5272_v0 }
 0xee7   : > { %2057 = vmatpush1.msra.mxu0 %v5378_v16  ;;  %2090 = vmatprep.mubr.f32.mxu0 %v5272_v0  ;;  %v5383_v16 = vld [vmem:[#allocation20_spill] sm:$0xff] }
 0xee8   : > { %3103 = vmatpush3.msra.mxu1 %v5379_v6  ;;  %3104 = vmatprep.mubr.msk.f32.mxu1 %vm3481_vm0, %v5272_v0 }
 0xee9   : > { %2289 = vmatprep.subr.mxu0 %v5380_v51  ;;  %3107 = vmatprep.subr.mxu1 %v5272_v0 }
 0xf88   : > { %v1825_v30 = vpop.f32.mrf.mxu0  ;;  %v1896_v31 = vpop.f32.mrf.mxu1 }
 0xf89   : > { %v1826_v23 = vadd.f32 %v1825_v30, %v5381_v13  ;;  %v1897_v14 = vadd.f32 %v1896_v31, %v5383_v16 }
 0xf8a   : > { %v1827_v32 = vpop.f32.mrf.mxu0  ;;  %v3071_v24 = vpop.f32.mrf.mxu1 }
 0xf8b   : > { %v1828_v47 = vadd.f32 %v1827_v32, %v5382_v20  ;;  %1901 = vrot.lane.b32.xlu1 %v1826_v23, %s3482_s14 }
 0xf8d   : > { %1922 = vrot.lane.b32.xlu0 %v1828_v47, %s3483_s25 }
 0xf8f   : > { %1944 = vrot.lane.b32.xlu1 %v1897_v14, %s3482_s14 }
 0xf91   : > { %1954 = vrot.lane.b32.xlu0 %v1897_v14, %s3483_s25 }
 0xf95   : > { %1912 = vrot.lane.b32.xlu0 %v1828_v47, %s3482_s14 }
 0xffd   : > { %v1902_v51 = vpop.permute.xlu1 %1901 }
 0xffe   : > { %v1904_v6 = vadd.f32 %v1902_v51, %v1826_v23 }
 0xfff   : > { %v1923_v9 = vpop.permute.xlu0 %1922 }
0x1000   : > { %v1905_v42 = vsub.f32 0.0, %v1904_v6 }
0x1001   : > { %v1945_v30 = vpop.permute.xlu1 %1944 }
0x1002   : > { %v1906_v13 = vmul.f32 1.442695, %v1905_v42  ;;  %v1947_v24 = vadd.f32 %v1945_v30, %v1828_v47 }
0x1003   : > { %v1955_v6 = vpop.permute.xlu0 %1954 }
0x1004   : > { %3306 = vpow2.f32 %v1906_v13  ;;  %v1948_v32 = vsub.f32 0.0, %v1947_v24 }
0x1006   : > { %v1949_v20 = vmul.f32 1.442695, %v1948_v32 }
0x1008   : > { %3308 = vpow2.f32 %v1949_v20 }
0x1011   : > { %v3307_v43 = vpop.eup %3306 }
0x1012   : > { %v1908_v31 = vadd.f32 1.0, %v3307_v43  ;;  %v5384_v43 = vrot.slane %v3588_v1, 3 }
0x1014   : > { %3310 = vrcp.f32 %v1908_v31 }
0x1015   : > { %v3309_v16 = vpop.eup %3308 }
0x1016   : > { %v1951_v21 = vadd.f32 1.0, %v3309_v16 }
0x1018   : > { %3312 = vrcp.f32 %v1951_v21  ;;  %v5385_v21 = vrot.slane %v5284_v7, 2 }
0x101a   : > { %v1997_v16 = vsel %vm1473_vm11, %v5385_v21, %v5384_v43  ;;  %v5388_v21 = vld [vmem:[#allocation13_spill] sm:$0xff] }
0x1021   : > { %v3311_v4 = vpop.eup %3310 }
0x1022   : > { %v1925_v2 = vmul.f32 %v3311_v4, %v1923_v9  ;;  %v5386_v4 = vrot.slane %v3594_v3, 1 }
0x1024   : > { %1927 = vrot.lane.b32.xlu1 %v1925_v2, %s3485_s9  ;;  %v5387_v2 = vld [vmem:[#allocation14_spill] sm:$0xff] }
0x1025   : > { %v3313_v51 = vpop.eup %3312  ;;  %v1998_v9 = vsel %vm405_vm1, %v5387_v2, %v5386_v4  ;;  %v5389_v4 = vld [vmem:[#allocation11_spill] sm:$0xff] }
0x1026   : > { %v1957_v59 = vmul.f32 %v3313_v51, %v1955_v6 }
0x1028   : > { %1959 = vrot.lane.b32.xlu1 %v1957_v59, %s3485_s9  ;;  %v3216_v59 = vpack.i.bf16 %v1998_v9, %v1997_v16  ;;  %v1941_v16 = vmul.f32 %v4639_v15, %v5388_v21 }
0x1096   : > { %v1928_v13 = vpop.permute.xlu1 %1927 }
0x1097   : > { %v1930_v42 = vadd.f32 %v1928_v13, %v1826_v23 }
0x1099   : > { %3314 = vtanh.f32 %v1930_v42 }
0x109a   : > { %v1960_v20 = vpop.permute.xlu1 %1959 }
0x109b   : > { %v1962_v47 = vadd.f32 %v1960_v20, %v1897_v14  ;;  %v1913_v14 = vpop.permute.xlu0 %1912 }
0x109c   : > { %v1915_v1 = vadd.f32 %v1913_v14, %v1826_v23 }
0x109d   : > { %3316 = vtanh.f32 %v1962_v47 }
0x109e   : > { %v1916_v32 = vsub.f32 0.0, %v1915_v1  ;;  %v1970_v1 = vmul.f32 %v3313_v51, %v4652_v17 }
0x10a0   : > { %v1917_v7 = vmul.f32 1.442695, %v1916_v32 }
0x10a2   : > { %3318 = vpow2.f32 %v1917_v7 }
0x10a6   : > { %v3315_v30 = vpop.eup %3314 }
0x10a7   : > { %1934 = vrot.lane.b32.xlu0 %v3315_v30, %s3483_s25 }
0x10aa   : > { %v3317_v24 = vpop.eup %3316 }
0x10ab   : > { %1966 = vrot.lane.b32.xlu1 %v3317_v24, %s3483_s25  ;;  %3217 = vrot.lane.b32.xlu0 %v3216_v59, %s3482_s14  ;;  %v1964_v24 = vsub.f32 1.0, %v3313_v51 }
0x10af   : > { %v3319_v31 = vpop.eup %3318 }
0x10b0   : > { %v1919_v6 = vadd.f32 1.0, %v3319_v31  ;;  %v5390_v31 = vld [vmem:[#allocation8_spill] sm:$0xff] }
0x10b2   : > { %3320 = vrcp.f32 %v1919_v6 }
0x10bf   : > { %v3321_v3 = vpop.eup %3320 }
0x10c0   : > { %v1932_v13 = vsub.f32 1.0, %v3321_v3  ;;  %v1938_v47 = vmul.f32 %v3321_v3, %v4639_v15  ;;  %v5391_v3 = vld [vmem:[#allocation10_spill] sm:$0xff] }
0x1119   : > { %v1935_v42 = vpop.permute.xlu0 %1934 }
0x111a   : > { %v1937_v20 = vmul.f32 %v1935_v42, %v1932_v13  ;;  %v1973_v13 = vmul.f32 %v4652_v17, %v5391_v3 }
0x111c   : > { %v1939_v43 = vadd.f32 %v1938_v47, %v1937_v20  ;;  %v4764_v47 = vld [vmem:[%s3580_s10] sm:$0xff] }
0x111d   : > { %v1967_v59 = vpop.permute.xlu1 %1966  ;;  %v3218_v7 = vpop.permute.xlu0 %3217 }
0x111e   : > { %v1940_v9 = vmul.f32 %v1939_v43, %v5389_v4  ;;  %v1969_v14 = vmul.f32 %v1967_v59, %v1964_v24  ;;  %v3220_v42 = vunpack.i.h.bf16 %v3218_v7  ;;  %v3219_v20 = vunpack.i.l.bf16 %v3218_v7 }
0x111f   : > { %v1993_v43 = vsel %vm1473_vm11, %v3825_v60, %v4764_v47 }
0x1120   : > { %v4755_v23 = vadd.f32 %v1941_v16, %v1940_v9  ;;  %v1971_v32 = vadd.f32 %v1970_v1, %v1969_v14  ;;  %v1994_v16 = vsel %vm405_vm1, %v3834_v63, %v3828_v61  ;;  %v2013_v9 = vsel %vm424_vm4, %v1993_v43, %v3219_v20 }
0x1122   : > { %v2006_v30 = vrot.slane %v4755_v23, 2  ;;  %v1972_v6 = vmul.f32 %v1971_v32, %v5390_v31 }
0x1124   : > { %2007 = vrot.lane.b32.xlu1 %v2006_v30, %s3482_s14  ;;  %v4772_v51 = vadd.f32 %v1973_v13, %v1972_v6  ;;  %v2014_v30 = vsel %vm424_vm4, %v1994_v16, %v3220_v42  ;;  %v3409_v16 = vld [vmem:[%s3580_s10 + $0x8] sm:$0xff]  ;;  %s2715_s10 = sshll.u32 %s3569_s30, 2  ;;  %s5069_s30 = scalar_lea.hbm %s5120_s4, %s2725_s16 }
0x1125   : > { %s290_s15 = scalar_lea.vmem %s5121_s5, %s2715_s10 }
0x1126   : > { %v2011_v59 = vrot.slane %v4772_v51, 2 }
0x1196   : > { %v2008_v24 = vpop.permute.xlu1 %2007 }
0x1197   : > { %v2015_v14 = vsel %vm426_vm5, %v2013_v9, %v2008_v24  ;;  %v2016_v1 = vsel %vm426_vm5, %v2014_v30, %v2008_v24  ;;  %v5406_v9 = vld [vmem:[#allocation12_spill] sm:$0xff]  ;;  %v5408_v24 = vrot.slane %v5387_v2, 6 }
0x1198   : > { %v2017_v32 = vsel %vm428_vm6, %v2015_v14, %v2011_v59  ;;  %v2018_v7 = vsel %vm428_vm6, %v2016_v1, %v2011_v59  ;;  %v5407_v30 = vrot.slane %v5406_v9, 7 }
0x1199   : > { %v2022_v17 = vrot.slane %v2017_v32, 6  ;;  %v2023_v3 = vrot.slane %v2018_v7, 6  ;;  %v5409_v32 = vld [vmem:[#allocation9_spill] sm:$0xff] }
0x119a   : > { %v2260_v59 = vsel %vm405_vm1, %v5407_v30, %v3409_v16  ;;  %v5410_v7 = vrot.slane %v5409_v32, 1 }
0x119b   : > { %v2024_v6 = vsel %vm2021_vm13, %v2022_v17, %v2023_v3  ;;  %v2261_v14 = vsel %vm408_vm2, %v5408_v24, %v2260_v59 }
0x119c   : > { %2091 = vmatmul.mubr.f32.vlgmr.msra.gmra.mxu0 %v2024_v6  ;;  %3105 = vmatmul.mubr.f32.vlgmr.msra.gmra.mxu1 %v2024_v6  ;;  %v3221_v6 = vpack.i.bf16 %v2261_v14, %v5410_v7 }
0x119d   : > { %2290 = vmatpush1.msra.mxu0 %v4278_v18  ;;  %3108 = vmatpush3.msra.mxu1 %v4282_v22  ;;  %v5392_v18 = vld [vmem:[#allocation36_spill] sm:$0xff]  ;;  %v5393_v22 = vld [vmem:[#allocation37_spill] sm:$0xff] }
0x119e   : > { %2291 = vmatprep.subr.mxu0 %v4286_v25  ;;  %3109 = vmatprep.subr.mxu1 %v5272_v0  ;;  %v5394_v25 = vld [vmem:[#allocation38_spill] sm:$0xff] }
0x119f   : > { %2292 = vmatpush1.msra.mxu0 %v4291_v28  ;;  %3110 = vmatpush3.msra.mxu1 %v4295_v29  ;;  %v5395_v28 = vld [vmem:[#allocation39_spill] sm:$0xff]  ;;  %v5396_v29 = vld [vmem:[#allocation40_spill] sm:$0xff] }
0x11a0   : > { %2293 = vmatprep.subr.mxu0 %v4299_v34  ;;  %3111 = vmatprep.subr.mxu1 %v5272_v0  ;;  %v5397_v34 = vld [vmem:[#allocation41_spill] sm:$0xff] }
0x11a1   : > { %2294 = vmatpush1.msra.mxu0 %v4304_v35  ;;  %3112 = vmatpush3.msra.mxu1 %v4308_v36  ;;  %v5398_v35 = vld [vmem:[#allocation42_spill] sm:$0xff]  ;;  %v5399_v36 = vld [vmem:[#allocation43_spill] sm:$0xff] }
0x11a2   : > { %2295 = vmatprep.subr.mxu0 %v4312_v37  ;;  %3113 = vmatprep.subr.mxu1 %v5272_v0  ;;  %v5400_v37 = vld [vmem:[#allocation44_spill] sm:$0xff] }
0x11a3   : > { %2296 = vmatpush1.msra.mxu0 %v4317_v39  ;;  %3114 = vmatpush3.msra.mxu1 %v4321_v40  ;;  %v5401_v39 = vld [vmem:[#allocation45_spill] sm:$0xff]  ;;  %v5402_v40 = vld [vmem:[#allocation46_spill] sm:$0xff] }
0x11a4   : > { %2297 = vmatprep.subr.mxu0 %v4325_v41  ;;  %3115 = vmatprep.subr.mxu1 %v5272_v0 }
0x11a5   : > { %2298 = vmatpush1.msra.mxu0 %v4330_v44  ;;  %3116 = vmatpush3.msra.mxu1 %v4334_v45  ;;  %v5403_v45 = vld [vmem:[#allocation18_spill] sm:$0xff] }
0x11a6   : > { %2299 = vmatprep.subr.mxu0 %v4338_v46  ;;  %3117 = vmatprep.subr.mxu1 %v5272_v0 }
0x11a7   : > { %2300 = vmatpush1.msra.mxu0 %v4343_v48  ;;  %3118 = vmatpush3.msra.mxu1 %v4347_v53 }
0x11a8   : > { %2301 = vmatprep.subr.mxu0 %v4351_v52  ;;  %3119 = vmatprep.subr.mxu1 %v5272_v0  ;;  %v5404_v52 = vld [vmem:[#allocation19_spill] sm:$0xff] }
0x11a9   : > { %2302 = vmatpush1.msra.mxu0 %v4356_v49  ;;  %3120 = vmatpush3.msra.mxu1 %v4360_v5  ;;  %v5405_v5 = vld [vmem:[#allocation20_spill] sm:$0xff] }
0x11aa   : > { %2303 = vmatprep.subr.mxu0 %v4364_v57  ;;  %3121 = vmatprep.subr.mxu1 %v5272_v0 }
0x11ab   : > { %2304 = vmatpush1.msra.mxu0 %v4369_v55  ;;  %3122 = vmatpush3.msra.mxu1 %v4373_v58 }
0x11ac   : > { %2305 = vmatprep.subr.mxu0 %v4377_v56  ;;  %3123 = vmatprep.subr.mxu1 %v5272_v0 }
0x11ad   : > { %2306 = vmatpush1.msra.mxu0 %v4382_v50  ;;  %3124 = vmatpush3.msra.mxu1 %v4386_v8 }
0x11ae   : > { %2307 = vmatprep.subr.mxu0 %v4390_v19  ;;  %3125 = vmatprep.subr.mxu1 %v5272_v0 }
0x11af   : > { %2308 = vmatpush1.msra.mxu0 %v4395_v10  ;;  %3126 = vmatpush3.msra.mxu1 %v4399_v11 }
0x11b0   : > { %2309 = vmatprep.subr.mxu0 %v4403_v12  ;;  %3127 = vmatprep.subr.mxu1 %v5272_v0 }
0x11b1   : > { %2310 = vmatpush1.msra.mxu0 %v5363_v38  ;;  %3128 = vmatpush3.msra.mxu1 %v5364_v27 }
0x11b2   : > { %2311 = vmatprep.subr.mxu0 %v5365_v54  ;;  %3129 = vmatprep.subr.mxu1 %v5272_v0 }
0x11b3   : > { %2312 = vmatpush1.msra.mxu0 %v5366_v33  ;;  %3130 = vmatpush3.msra.mxu1 %v5367_v62 }
0x11b4   : > { %2313 = vmatprep.subr.mxu0 %v5368_v26  ;;  %3131 = vmatprep.subr.mxu1 %v5272_v0 }
0x11b5   : > { %2314 = vmatpush1.msra.mxu0 %v5392_v18  ;;  %3132 = vmatpush3.msra.mxu1 %v5393_v22 }
0x11b6   : > { %2315 = vmatprep.subr.mxu0 %v5394_v25  ;;  %3133 = vmatprep.subr.mxu1 %v5272_v0 }
0x11b7   : > { %2316 = vmatpush1.msra.mxu0 %v5395_v28  ;;  %3134 = vmatpush3.msra.mxu1 %v5396_v29 }
0x11b8   : > { %2317 = vmatprep.subr.mxu0 %v5397_v34  ;;  %3135 = vmatprep.subr.mxu1 %v5272_v0 }
0x11b9   : > { %2318 = vmatpush1.msra.mxu0 %v5398_v35  ;;  %3136 = vmatpush3.msra.mxu1 %v5399_v36 }
0x11ba   : > { %2319 = vmatprep.subr.mxu0 %v5400_v37  ;;  %3137 = vmatprep.subr.mxu1 %v5272_v0 }
0x11bb   : > { %2320 = vmatpush1.msra.mxu0 %v5401_v39  ;;  %2353 = vmatprep.mubr.f32.mxu0 %v5272_v0 }
0x11bc   : > { %3138 = vmatpush3.msra.mxu1 %v5402_v40  ;;  %3139 = vmatprep.mubr.msk.f32.mxu1 %vm3481_vm0, %v5272_v0  ;;  %vm668_vm0 = vcmask 257024  }
0x125c   : > { %v2092_v41 = vpop.f32.mrf.mxu0  ;;  %v2163_v44 = vpop.f32.mrf.mxu1 }
0x125d   : > { %v2093_v46 = vadd.f32 %v2092_v41, %v5403_v45  ;;  %v2164_v57 = vadd.f32 %v2163_v44, %v5405_v5  ;;  %v5411_v44 = vld [vmem:[#allocation29_spill] sm:$0xff] }
0x125e   : > { %v2094_v48 = vpop.f32.mrf.mxu0  ;;  %v3106_v53 = vpop.f32.mrf.mxu1 }
0x125f   : > { %v2095_v49 = vadd.f32 %v2094_v48, %v5404_v52  ;;  %2168 = vrot.lane.b32.xlu0 %v2093_v46, %s3482_s14  ;;  %v2208_v48 = vmul.f32 %v4755_v23, %v5411_v44  ;;  %v5412_v53 = vld [vmem:[#allocation28_spill] sm:$0xff] }
0x1261   : > { %2189 = vrot.lane.b32.xlu1 %v2095_v49, %s3483_s25 }
0x1263   : > { %2211 = vrot.lane.b32.xlu0 %v2164_v57, %s3482_s14 }
0x1265   : > { %2221 = vrot.lane.b32.xlu1 %v2164_v57, %s3483_s25 }
0x1269   : > { %2179 = vrot.lane.b32.xlu1 %v2095_v49, %s3482_s14 }
0x12d1   : > { %v2169_v0 = vpop.permute.xlu0 %2168 }
0x12d2   : > { %v2171_v55 = vadd.f32 %v2169_v0, %v2093_v46 }
0x12d3   : > { %v2190_v27 = vpop.permute.xlu1 %2189 }
0x12d4   : > { %v2172_v58 = vsub.f32 0.0, %v2171_v55 }
0x12d5   : > { %v2212_v56 = vpop.permute.xlu0 %2211 }
0x12d6   : > { %v2173_v50 = vmul.f32 1.442695, %v2172_v58  ;;  %v2214_v8 = vadd.f32 %v2212_v56, %v2095_v49 }
0x12d7   : > { %v2222_v26 = vpop.permute.xlu1 %2221 }
0x12d8   : > { %3322 = vpow2.f32 %v2173_v50  ;;  %v2215_v19 = vsub.f32 0.0, %v2214_v8 }
0x12da   : > { %v2216_v10 = vmul.f32 1.442695, %v2215_v19  ;;  %v5413_v19 = vld [vmem:[#allocation6_spill] sm:$0xff] }
0x12db   : > { %v2180_v22 = vpop.permute.xlu1 %2179 }
0x12dc   : > { %3324 = vpow2.f32 %v2216_v10  ;;  %v2182_v25 = vadd.f32 %v2180_v22, %v2093_v46 }
0x12de   : > { %v2183_v28 = vsub.f32 0.0, %v2182_v25 }
0x12e0   : > { %v2184_v29 = vmul.f32 1.442695, %v2183_v28 }
0x12e5   : > { %v3323_v11 = vpop.eup %3322 }
0x12e6   : > { %v2175_v12 = vadd.f32 1.0, %v3323_v11  ;;  %v2256_v11 = vsel %vm405_vm1, %v3828_v61, %v3825_v60  ;;  %vm931_vm1 = vcmask 781824  }
0x12e8   : > { %3326 = vrcp.f32 %v2175_v12  ;;  %v5414_v12 = vld [vmem:[#allocation5_spill] sm:$0xff] }
0x12e9   : > { %v3325_v17 = vpop.eup %3324 }
0x12ea   : > { %v2218_v38 = vadd.f32 1.0, %v3325_v17  ;;  %v2240_v17 = vmul.f32 %v4772_v51, %v5414_v12 }
0x12ec   : > { %3328 = vrcp.f32 %v2218_v38 }
0x12f5   : > { %v3327_v54 = vpop.eup %3326 }
0x12f6   : > { %v2192_v33 = vmul.f32 %v3327_v54, %v2190_v27  ;;  %v2257_v54 = vsel %vm408_vm2, %v3834_v63, %v2256_v11  ;;  %v3414_v11 = vld [vmem:[%s3934_s8 + $0x10] sm:$0xf]  ;;  %vm937_vm2 = vcmask 519424  }
0x12f8   : > { %2194 = vrot.lane.b32.xlu0 %v2192_v33, %s3485_s9 }
0x12f9   : > { %v3329_v62 = vpop.eup %3328 }
0x12fa   : > { %v2224_v3 = vmul.f32 %v3329_v62, %v2222_v26  ;;  %v2231_v55 = vsub.f32 1.0, %v3329_v62  ;;  %v2237_v56 = vmul.f32 %v3329_v62, %v4772_v51 }
0x12fc   : > { %2226 = vrot.lane.b32.xlu0 %v2224_v3, %s3485_s9 }
0x136a   : > { %v2195_v13 = vpop.permute.xlu0 %2194 }
0x136b   : > { %v2197_v42 = vadd.f32 %v2195_v13, %v2093_v46 }
0x136d   : > { %3330 = vtanh.f32 %v2197_v42 }
0x136e   : > { %v2227_v20 = vpop.permute.xlu0 %2226 }
0x136f   : > { %v2229_v43 = vadd.f32 %v2227_v20, %v2164_v57 }
0x1371   : > { %3332 = vtanh.f32 %v2229_v43 }
0x1372   : > { %3334 = vpow2.f32 %v2184_v29 }
0x137a   : > { %v3331_v1 = vpop.eup %3330 }
0x137b   : > { %2201 = vrot.lane.b32.xlu1 %v3331_v1, %s3483_s25 }
0x137e   : > { %v3333_v18 = vpop.eup %3332 }
0x137f   : > { %2233 = vrot.lane.b32.xlu0 %v3333_v18, %s3483_s25  ;;  %3222 = vrot.lane.b32.xlu1 %v3221_v6, %s3482_s14  ;;  %v3335_v34 = vpop.eup %3334 }
0x1380   : > { %v2186_v2 = vadd.f32 1.0, %v3335_v34 }
0x1382   : > { %3336 = vrcp.f32 %v2186_v2 }
0x138f   : > { %v3337_v35 = vpop.eup %3336 }
0x1390   : > { %v2199_v36 = vsub.f32 1.0, %v3337_v35  ;;  %v2205_v40 = vmul.f32 %v3337_v35, %v4755_v23 }
0x13ed   : > { %v2202_v37 = vpop.permute.xlu1 %2201 }
0x13ee   : > { %v2204_v39 = vmul.f32 %v2202_v37, %v2199_v36 }
0x13f0   : > { %v2206_v41 = vadd.f32 %v2205_v40, %v2204_v39 }
0x13f1   : > { %v2234_v0 = vpop.permute.xlu0 %2233  ;;  %v3223_v8 = vpop.permute.xlu1 %3222 }
0x13f2   : > { %v2207_v49 = vmul.f32 %v2206_v41, %v5412_v53  ;;  %v2236_v58 = vmul.f32 %v2234_v0, %v2231_v55  ;;  %v3225_v38 = vunpack.i.h.bf16 %v3223_v8  ;;  %v3224_v27 = vunpack.i.l.bf16 %v3223_v8  ;;  %v3410_v41 = vld [vmem:[%s3934_s8] sm:$0xf]  ;;  %v3412_v55 = vld [vmem:[%s3934_s8 + $0x8] sm:$0xf] }
0x13f4   : > { %v4872_v57 = vadd.f32 %v2208_v48, %v2207_v49  ;;  %v2238_v50 = vadd.f32 %v2237_v56, %v2236_v58  ;;  %v2276_v62 = vsel %vm424_vm4, %v4764_v47, %v3224_v27  ;;  %v2277_v26 = vsel %vm424_vm4, %v2257_v54, %v3225_v38  ;;  %v3411_v49 = vld [vmem:[%s3934_s8 + $0x4] sm:$0xf]  ;;  %v3415_v27 = vld [vmem:[%s3934_s8 + $0x14] sm:$0xf] }
0x13f5   : > { %v2524_v48 = vsel %vm2523_vm15, %v3410_v41, 0.0  ;;  %v2527_v58 = vsel %vm2523_vm15, %v3412_v55, 0.0  ;;  %v2533_v54 = vsel %vm2523_vm15, %v3415_v27, 0.0  ;;  %v4983_v55 = vmul.f32 -10000000.0, %v5411_v44  ;;  %v5427_v27 = vld [vmem:[#allocation10_spill] sm:$0xff] }
0x13f6   : > { %v2269_v46 = vrot.slane %v4872_v57, 1  ;;  %v2239_v10 = vmul.f32 %v2238_v50, %v5413_v19  ;;  %v3413_v50 = vld [vmem:[%s3934_s8 + $0xc] sm:$0xf] }
0x13f7   : > { %v2529_v8 = vsel %vm2523_vm15, %v3413_v50, 0.0 }
0x13f8   : > { %2270 = vrot.lane.b32.xlu0 %v2269_v46, %s3482_s14  ;;  %v4885_v33 = vadd.f32 %v2240_v17, %v2239_v10  ;;  %v2525_v46 = vsel %vm2523_vm15, %v3411_v49, 0.0  ;;  %v2531_v17 = vsel %vm2523_vm15, %v3414_v11, 0.0 }
0x13f9   : > { %v2526_v0 = vadd.f32 %v2525_v46, %v2524_v48  ;;  %v5424_v48 = vld [vmem:[#allocation25_spill] sm:$0xff]  ;;  %v5425_v46 = vld [vmem:[#allocation22_spill] sm:$0xff] }
0x13fa   : > { %v2274_v3 = vrot.slane %v4885_v33, 1  ;;  %v4975_v49 = vmul.f32 -10000000.0, %v5424_v48 }
0x13fb   : > { %v2528_v56 = vadd.f32 %v2527_v58, %v2526_v0  ;;  %v4978_v0 = vmul.f32 -10000000.0, %v5425_v46 }
0x13fd   : > { %v2530_v10 = vadd.f32 %v2529_v8, %v2528_v56  ;;  %v1204_v8 = vmul.f32 -10000000.0, %v5388_v21 }
0x13ff   : > { %v2532_v38 = vadd.f32 %v2531_v17, %v2530_v10 }
0x146a   : > { %v2271_v13 = vpop.permute.xlu0 %2270 }
0x146b   : > { %v2278_v60 = vsel %vm426_vm5, %v2276_v62, %v2271_v13  ;;  %v2279_v61 = vsel %vm426_vm5, %v2277_v26, %v2271_v13  ;;  %v2534_v62 = vadd.f32 %v2533_v54, %v2532_v38  ;;  %v3416_v26 = vld [vmem:[%s3934_s8 + $0x18] sm:$0xf]  ;;  %v1201_v54 = vmul.f32 -10000000.0, %v5427_v27 }
0x146c   : > { %v2280_v42 = vsel %vm428_vm6, %v2278_v60, %v2274_v3  ;;  %v2281_v20 = vsel %vm428_vm6, %v2279_v61, %v2274_v3  ;;  %v2535_v3 = vsel %vm2523_vm15, %v3416_v26, 0.0  ;;  %v3417_v60 = vld [vmem:[%s3934_s8 + $0x1c] sm:$0xf]  ;;  %s3422_s8 = sshll.u32 %s3486_s7, 4  ;;  %s3423_s8 = int_to_ptr.vmem [resolvable:$false] %s3422_s8 }
0x146d   : > { %v2285_v63 = vrot.slane %v2280_v42, 7  ;;  %v2286_v43 = vrot.slane %v2281_v20, 7  ;;  %v2536_v13 = vadd.f32 %v2535_v3, %v2534_v62  ;;  %v2537_v61 = vsel %vm2523_vm15, %v3417_v60, 0.0  ;;  %v5428_v26 = vld [vmem:[#allocation16_spill] sm:$0xff]  ;;  %v5429_v3 = vld [vmem:[#allocation51_spill] sm:$0xff]  ;;  %p3425_p0 = scmp.lt.s32.totalorder %s5071_s17, %s3423_s8 }
0x146e   : > { %v1468_v44 = vmul.f32 -10000000.0, %v5429_v3 }
0x146f   : > { %v2287_v16 = vsel %vm2284_vm14, %v2285_v63, %v2286_v43  ;;  %v2538_v43 = vadd.f32 %v2537_v61, %v2536_v13  ;;  %v5430_v13 = vld [vmem:[#allocation53_spill] sm:$0xff] }
0x1470   : > { %2354 = vmatmul.mubr.f32.vlgmr.msra.gmra.mxu0 %v2287_v16  ;;  %3140 = vmatmul.mubr.f32.vlgmr.msra.gmra.mxu1 %v2287_v16 }
0x1530   : > { %v2355_v47 = vpop.f32.mrf.mxu0  ;;  %v2426_v9 = vpop.f32.mrf.mxu1 }
0x1531   : > { %v4896_v30 = vadd.f32 %v2355_v47, %v5403_v45  ;;  %v2427_v59 = vadd.f32 %v2426_v9, %v5405_v5 }
0x1532   : > { %v2357_v24 = vpop.f32.mrf.mxu0  ;;  %v3141_v14 = vpop.f32.mrf.mxu1 }
0x1533   : > { %2474 = vrot.lane.b32.xlu0 %v2427_v59, %s3482_s14  ;;  %2431 = vrot.lane.b32.xlu1 %v4896_v30, %s3482_s14  ;;  %v2358_v1 = vadd.f32 %v2357_v24, %v5404_v52  ;;  %v5415_v14 = vld [vmem:[#allocation21_spill] sm:$0xff] }
0x1537   : > { %2484 = vrot.lane.b32.xlu0 %v2427_v59, %s3483_s25  ;;  %2452 = vrot.lane.b32.xlu1 %v2358_v1, %s3483_s25 }
0x15a5   : > { %v2475_v32 = vpop.permute.xlu0 %2474  ;;  %v2432_v7 = vpop.permute.xlu1 %2431 }
0x15a6   : > { %v2477_v6 = vadd.f32 %v2475_v32, %v2358_v1  ;;  %v2434_v45 = vadd.f32 %v2432_v7, %v4896_v30 }
0x15a8   : > { %v2478_v18 = vsub.f32 0.0, %v2477_v6  ;;  %v2435_v5 = vsub.f32 0.0, %v2434_v45  ;;  %v5418_v6 = vld [vmem:[#allocation15_spill] sm:$0xff] }
0x15a9   : > { %v2485_v35 = vpop.permute.xlu0 %2484  ;;  %v2453_v39 = vpop.permute.xlu1 %2452  ;;  %v1191_v45 = vmul.f32 %v5418_v6, %v5390_v31 }
0x15aa   : > { %v2479_v22 = vmul.f32 1.442695, %v2478_v18  ;;  %v2436_v25 = vmul.f32 1.442695, %v2435_v5  ;;  %v5419_v18 = vld [vmem:[#allocation47_spill] sm:$0xff]  ;;  %v5420_v5 = vld [vmem:[#allocation49_spill] sm:$0xff] }
0x15ab   : > { %v4994_v60 = vmul.f32 %v5430_v13, %v5419_v18 }
0x15ac   : > { %3338 = vpow2.f32 %v2479_v22  ;;  %v1451_v22 = vmul.f32 %v5420_v5, %v5419_v18 }
0x15ad   : > { %3340 = vpow2.f32 %v2436_v25  ;;  %v5421_v25 = vld [vmem:[#allocation30_spill] sm:$0xff] }
0x15b9   : > { %v3339_v28 = vpop.eup %3338 }
0x15ba   : > { %v3341_v29 = vpop.eup %3340  ;;  %v2481_v34 = vadd.f32 1.0, %v3339_v28  ;;  %v926_v28 = vmul.f32 %v5421_v25, %v5412_v53 }
0x15bb   : > { %v2438_v52 = vadd.f32 1.0, %v3341_v29  ;;  %v4948_v29 = vmul.f32 %v4872_v57, %v5412_v53  ;;  %v4969_v53 = vmul.f32 %v4772_v51, %v5390_v31  ;;  %v941_v51 = vmul.f32 -10000000.0, %v5414_v12 }
0x15bc   : > { %3342 = vrcp.f32 %v2481_v34  ;;  %v5422_v34 = vld [vmem:[#allocation50_spill] sm:$0xff]  ;;  %v945_v50 = vadd.f32 %v4983_v55, %v926_v28  ;;  %v1205_v12 = vadd.f32 %v1204_v8, %v5428_v26 }
0x15bd   : > { %3344 = vrcp.f32 %v2438_v52  ;;  %v5423_v52 = vld [vmem:[#allocation52_spill] sm:$0xff]  ;;  %v2252_v13 = vadd.f32 %v4948_v29, %v4983_v55 }
0x15c9   : > { %v4906_v2 = vpop.eup %3342 }
0x15ca   : > { %v3345_v36 = vpop.eup %3344  ;;  %v2487_v37 = vmul.f32 %v4906_v2, %v2485_v35  ;;  %v1452_v35 = vmul.f32 %v5423_v52, %v5422_v34  ;;  %v2494_v21 = vsub.f32 1.0, %v4906_v2 }
0x15cb   : > { %v2455_v40 = vmul.f32 %v3345_v36, %v2453_v39  ;;  %v4957_v36 = vmul.f32 %v4755_v23, %v5389_v4 }
0x15cc   : > { %2489 = vrot.lane.b32.xlu0 %v2487_v37, %s3485_s9  ;;  %v4961_v37 = vmul.f32 %v4639_v15, %v5422_v34  ;;  %v2243_v34 = vmul.f32 %v4885_v33, %v5413_v19 }
0x15cd   : > { %2457 = vrot.lane.b32.xlu1 %v2455_v40, %s3485_s9 }
0x15d1   : > { %2442 = vrot.lane.b32.xlu1 %v2358_v1, %s3482_s14  ;;  %v5416_v1 = vld [vmem:[#allocation23_spill] sm:$0xff] }
0x15d2   : > { %v662_v32 = vmul.f32 %v5416_v1, %v5415_v14 }
0x15d4   : > { %v675_v31 = vadd.f32 %v4978_v0, %v662_v32 }
0x15d6   : > { %v676_v10 = vmax.f32 %v675_v31, -10000000.0  ;;  %v5432_v31 = vld [vmem:[#allocation24_spill] sm:$0xff] }
0x163e   : > { %v2490_v42 = vpop.permute.xlu0 %2489 }
0x163f   : > { %v2492_v20 = vadd.f32 %v2490_v42, %v2427_v59  ;;  %v2458_v63 = vpop.permute.xlu1 %2457  ;;  %v5417_v59 = vld [vmem:[#allocation27_spill] sm:$0xff] }
0x1640   : > { %v2460_v16 = vadd.f32 %v2458_v63, %v4896_v30  ;;  %v925_v7 = vmul.f32 %v5417_v59, %v5413_v19  ;;  %v2500_v59 = vmul.f32 %v4906_v2, %v4885_v33  ;;  %v1991_v2 = vadd.f32 %v4969_v53, %v1201_v54 }
0x1641   : > { %3346 = vtanh.f32 %v2492_v20  ;;  %v1202_v20 = vadd.f32 %v1201_v54, %v1191_v45  ;;  %v2471_v19 = vmul.f32 %v4872_v57, %v5424_v48 }
0x1642   : > { %3348 = vtanh.f32 %v2460_v16  ;;  %v942_v56 = vadd.f32 %v941_v51, %v925_v7  ;;  %v939_v17 = vadd.f32 %v925_v7, %v662_v32 }
0x1643   : > { %3350 = vrcp.f32 %v2538_v43  ;;  %v2443_v39 = vpop.permute.xlu1 %2442  ;;  %v1469_v43 = vadd.f32 %v1468_v44, %v1452_v35 }
0x1644   : > { %v2445_v4 = vadd.f32 %v2443_v39, %v4896_v30  ;;  %v5426_v30 = vld [vmem:[#allocation26_spill] sm:$0xff]  ;;  %v943_v62 = vmax.f32 %v676_v10, %v942_v56  ;;  %v1199_v63 = vadd.f32 %v1191_v45, %v939_v17 }
0x1645   : > { %v678_v58 = vadd.f32 %v4975_v49, %v5426_v30  ;;  %v940_v61 = vadd.f32 %v926_v28, %v5426_v30 }
0x1646   : > { %v2446_v23 = vsub.f32 0.0, %v2445_v4  ;;  %v1463_v39 = vadd.f32 %v1451_v22, %v1199_v63 }
0x1647   : > { %v679_v38 = vmax.f32 %v678_v58, -10000000.0  ;;  %v1200_v1 = vadd.f32 %v5428_v26, %v940_v61 }
0x1648   : > { %v2447_v40 = vmul.f32 1.442695, %v2446_v23  ;;  %v1720_v30 = vadd.f32 %v4961_v37, %v1463_v39 }
0x1649   : > { %v946_v42 = vmax.f32 %v679_v38, %v945_v50  ;;  %v1464_v25 = vadd.f32 %v1452_v35, %v1200_v1  ;;  %v2254_v50 = vadd.f32 %v2243_v34, %v941_v51  ;;  %v1722_v38 = vadd.f32 %v4961_v37, %v1468_v44 }
0x164a   : > { %3352 = vpow2.f32 %v2447_v40  ;;  %v1987_v17 = vadd.f32 %v4957_v36, %v1720_v30 }
0x164b   : > { %v1206_v6 = vmax.f32 %v946_v42, %v1205_v12 }
0x164c   : > { %v2250_v51 = vadd.f32 %v4948_v29, %v1987_v17 }
0x164d   : > { %v1470_v4 = vmax.f32 %v1206_v6, %v1469_v43 }
0x164e   : > { %v3347_v47 = vpop.eup %3346 }
0x164f   : > { %v3349_v9 = vpop.eup %3348  ;;  %2496 = vrot.lane.b32.xlu1 %v3347_v47, %s3483_s25 }
0x1650   : > { %2464 = vrot.lane.b32.xlu0 %v3349_v9, %s3483_s25  ;;  %v3351_v24 = vpop.eup %3350  ;;  %v5431_v9 = vld [vmem:[#allocation48_spill] sm:$0xff] }
0x1653   : > { %665 = vrot.lane.b32.xlu1 %v662_v32, %s3483_s25 }
0x1654   : > { %2543 = vperm.xlu0 %3189, %v3351_v24   ;;  %v1465_v24 = vmul.f32 -10000000.0, %v5431_v9 }
0x1656   : > { %v1466_v52 = vadd.f32 %v1465_v24, %v1451_v22 }
0x1657   : > { %928 = vrot.lane.b32.xlu1 %v925_v7, %s3482_s14  ;;  %v3353_v15 = vpop.eup %3352 }
0x1658   : > { %1194 = vrot.lane.b32.xlu0 %v1191_v45, %s3483_s25  ;;  %v2449_v41 = vadd.f32 1.0, %v3353_v15  ;;  %v1724_v45 = vadd.f32 %v4994_v60, %v1465_v24  ;;  %v2503_v15 = vmul.f32 %v4885_v33, %v5425_v46  ;;  %v1203_v46 = vmax.f32 %v943_v62, %v1202_v20 }
0x165a   : > { %3354 = vrcp.f32 %v2449_v41  ;;  %v1725_v58 = vmax.f32 %v1470_v4, %v1724_v45  ;;  %v1467_v54 = vmax.f32 %v1203_v46, %v1466_v52 }
0x165b   : > { %1454 = vrot.lane.b32.xlu1 %v1451_v22, %s3482_s14 }
0x165c   : > { %934 = vrot.lane.b32.xlu0 %v926_v28, %s3485_s9  ;;  %v1992_v27 = vmax.f32 %v1725_v58, %v1991_v2 }
0x165e   : > { %v2255_v62 = vmax.f32 %v1992_v27, %v2254_v50 }
0x165f   : > { %2245 = vrot.lane.b32.xlu1 %v4948_v29, %s3483_s25 }
0x1660   : > { %1459 = vrot.lane.b32.xlu0 %v1452_v35, %s3485_s9  ;;  %v1721_v35 = vadd.f32 %v4994_v60, %v1464_v25 }
0x1662   : > { %v1988_v33 = vadd.f32 %v4969_v53, %v1721_v35 }
0x1663   : > { %1978 = vrot.lane.b32.xlu1 %v4957_v36, %s3482_s14 }
0x1664   : > { %1715 = vrot.lane.b32.xlu0 %v4961_v37, %s3483_s25 }
0x1667   : > { %v3355_v11 = vpop.eup %3354 }
0x1668   : > { %1983 = vrot.lane.b32.xlu0 %v4969_v53, %s3485_s9  ;;  %v2462_v16 = vsub.f32 1.0, %v3355_v11  ;;  %v2468_v5 = vmul.f32 %v3355_v11, %v4872_v57  ;;  %v2251_v57 = vadd.f32 %v2243_v34, %v1988_v33  ;;  %v1989_v53 = vadd.f32 %v4957_v36, %v1204_v8 }
0x16c1   : > { %v2497_v47 = vpop.permute.xlu1 %2496 }
0x16c2   : > { %v2465_v32 = vpop.permute.xlu0 %2464  ;;  %v2499_v7 = vmul.f32 %v2497_v47, %v2494_v21 }
0x16c3   : > { %v2467_v18 = vmul.f32 %v2465_v32, %v2462_v16 }
0x16c4   : > { %v2501_v28 = vadd.f32 %v2500_v59, %v2499_v7 }
0x16c5   : > { %v2469_v23 = vadd.f32 %v2468_v5, %v2467_v18  ;;  %v666_v40 = vpop.permute.xlu1 %665 }
0x16c6   : > { %v2502_v41 = vmul.f32 %v2501_v28, %v5415_v14  ;;  %669 = vst.msk [vmem:[%s3984_s12] sm:$0xf] %vm668_vm0, %v666_v40 }
0x16c7   : > { %v2470_v22 = vmul.f32 %v2469_v23, %v5432_v31 }
0x16c8   : > { %v2504_v56 = vadd.f32 %v2503_v15, %v2502_v41 }
0x16c9   : > { %v2472_v10 = vadd.f32 %v2471_v19, %v2470_v22  ;;  %v929_v11 = vpop.permute.xlu1 %928 }
0x16ca   : > { %932 = vst.msk [vmem:[%s3984_s12] sm:$0xf] %vm931_vm1, %v929_v11  ;;  %v2506_v48 = vmul.f32 %v2504_v56, %v5415_v14  ;;  %v1723_v14 = vmax.f32 %v1467_v54, %v1722_v38 }
0x16cb   : > { %v2505_v26 = vmul.f32 %v2472_v10, %v5432_v31  ;;  %2249 = vst.msk [vmem:[%s3984_s12] sm:$0xf] %vm670_vm8, %v2243_v34 }
0x16cc   : > { %v2518_v12 = vadd.f32 %v2506_v48, %v2251_v57  ;;  %v2521_v3 = vadd.f32 %v2506_v48, %v4978_v0  ;;  %v1990_v20 = vmax.f32 %v1723_v14, %v1989_v53 }
0x16cd   : > { %2508 = vrot.lane.b32.xlu1 %v2505_v26, %s3482_s14  ;;  %v2517_v37 = vadd.f32 %v2505_v26, %v2250_v51  ;;  %v2519_v36 = vadd.f32 %v2505_v26, %v4975_v49  ;;  %v1455_v0 = vpop.permute.xlu1 %1454 }
0x16ce   : > { %v2522_v44 = vmax.f32 %v2255_v62, %v2521_v3  ;;  %v2253_v8 = vmax.f32 %v1990_v20, %v2252_v13 }
0x16cf   : > { %v2544_v61 = vpop.permute.xlu0 %2543 }
0x16d0   : > { %v2546_v42 = vmul.f32 %v2544_v61, %v2517_v37  ;;  %v2552_v21 = vmul.f32 %v2544_v61, %v2518_v12  ;;  %v2520_v29 = vmax.f32 %v2253_v8, %v2519_v36 }
0x16d1   : > { %v2246_v55 = vpop.permute.xlu1 %2245 }
0x16d2   : > { %2548 = vrot.lane.b32.xlu1 %v2546_v42, %s3483_s25  ;;  %2554 = vrot.lane.b32.xlu0 %v2552_v21, %s3485_s9 }
0x16d3   : > { %v1195_v63 = vpop.permute.xlu0 %1194 }
0x16d4   : > { %1197 = vst.msk [vmem:[%s3984_s12 + $0x4] sm:$0xf] %vm668_vm0, %v1195_v63 }
0x16d5   : > { %1457 = vst.msk [vmem:[%s3984_s12 + $0x4] sm:$0xf] %vm931_vm1, %v1455_v0  ;;  %v1979_v47 = vpop.permute.xlu1 %1978 }
0x16d6   : > { %2559 = vrot.lane.b32.xlu1 %v2520_v29, %s3482_s14  ;;  %2513 = vrot.lane.b32.xlu0 %v2506_v48, %s3485_s9  ;;  %1719 = vst.msk [vmem:[%s3984_s12 + $0x4] sm:$0xf] %vm670_vm8, %v4994_v60  ;;  %s3424_s9 = scalar_lea.vmem %s3423_s8, 512 }
0x16d7   : > { %v935_v49 = vpop.permute.xlu0 %934  ;;  %p3426_p1 = scmp.lt.s32.totalorder %s3424_s9, %s3418_s26 }
0x16d8   : > { %938 = vst.msk [vmem:[%s3984_s12 + $0xc] sm:$0xf] %vm937_vm2, %v935_v49 }
0x16d9   : > { %2248 = vst.msk [vmem:[%s3984_s12 + $0xc] sm:$0xf] %vm668_vm0, %v2246_v55  ;;  %p3427_p2 = por %p3426_p1, %p3425_p0 }
0x16db   : > { %v1460_v43 = vpop.permute.xlu0 %1459  ;;  %p3428_p3 = pnand %p3427_p2, %p3421_p13 }
0x16dc   : > { %1462 = vst.msk [vmem:[%s3984_s12 + $0x8] sm:$0xf] %vm937_vm2, %v1460_v43 }
0x16df   : > { %v1716_v16 = vpop.permute.xlu0 %1715 }
0x16e0   : > { %1718 = vst.msk [vmem:[%s3984_s12 + $0x8] sm:$0xf] %vm668_vm0, %v1716_v16 }
0x16e1   : > { %1981 = vst.msk [vmem:[%s3984_s12 + $0x8] sm:$0xf] %vm931_vm1, %v1979_v47 }
0x16e3   : > { %v1984_v9 = vpop.permute.xlu0 %1983 }
0x16e4   : > { %1986 = vst.msk [vmem:[%s3984_s12 + $0x4] sm:$0xf] %vm937_vm2, %v1984_v9 }
0x173f   : > { %v2509_v60 = vpop.permute.xlu1 %2508 }
0x1740   : > { %2511 = vst.msk [vmem:[%s3984_s12 + $0xc] sm:$0xf] %vm931_vm1, %v2509_v60 }
0x1744   : > { %v2549_v24 = vpop.permute.xlu1 %2548  ;;  %v2555_v1 = vpop.permute.xlu0 %2554 }
0x1745   : > { %2551 = vst.msk [vmem:[%s290_s15] sm:$0xf] %vm668_vm0, %v2549_v24 }
0x1746   : > { %2557 = vst.msk [vmem:[%s290_s15] sm:$0xf] %vm937_vm2, %v2555_v1 }
0x1748   : > { %v2560_v32 = vpop.permute.xlu1 %2559  ;;  %v2514_v59 = vpop.permute.xlu0 %2513 }
0x1749   : > { %2562 = vst.msk [vmem:[%s290_s15] sm:$0xf] %vm931_vm1, %v2560_v32 }
0x174a   : > { %2516 = vst.msk [vmem:[%s3984_s12] sm:$0xf] %vm937_vm2, %v2514_v59 }
0x174b   : > { %2563 = vst.msk [vmem:[%s290_s15] sm:$0xf] %vm670_vm8, %v2522_v44 }
0x174c   : > { %3431 = shalt.err (!%p3428_p3)
}
0x174d   : > { %s3432_s11 = scalar_lea.hbm %s5069_s30, 256  ;;  %s3436_s10 = scalar_lea.hbm %s5120_s4, 512 }
0x174e   : > { %p3433_p4 = scmp.ne.s32.totalorder %s5069_s30, %s3432_s11  ;;  %p3437_p9 = scmp.lt.s32.totalorder %s5069_s30, %s5120_s4 }
0x174f   : > { %p3438_p10 = scmp.lt.s32.totalorder %s3436_s10, %s3432_s11 }
0x1750   : > { %p3434_p7 = pnand %p3433_p4, %p3555_p5 }
0x1751   : > { %p3439_p11 = por %p3438_p10, %p3437_p9 }
0x1752   : > { %p3435_p8 = pneg %p3434_p7 }
0x1754   : > { %p3440_p12 = pnand %p3439_p11, %p3435_p8 }
0x1756   : > { %3443 = shalt.err (!%p3440_p12)
}
0x1757   : > { %3144 = dma.vmem_to_hbm [thread:$0]  (%p3555_p5), %s5071_s17, 256, %s5069_s30, %s2565_s22  }
0x1758 PF: > { %p3150_p13 = scmp.ge.s32.totalorder %s3478_s21, 2  ;;  %s2598_s15 = sand.u32 1, %s3466_s18  }
0x1759   : > { %s2599_s16 = scalar_lea.sflag [#allocation3], %s2598_s15 }
0x175a   : > { %p3147_p0 = pnand %p3150_p13, %p3559_p6 }
0x175c   : > { %p3148_p1 = pneg %p3147_p0 }
0x175e   : > { %3461 = dma.done.wait (%p3148_p1), %s2599_s16, 256  }
0x175f   : > { %3463 = vsyncadd (%p3148_p1), %s2599_s16, 4294967040  ;;  %p16_p2 = scmp.ge.s32.totalorder %s3542_s24, 4   ;;  %s5433_s18 = smov %s3470_s19 }
0x1760   : > { %s5434_s19 = smov %s3474_s20  ;;  %s5435_s20 = smov %s3553_s27 }
0x1761   : > { %s5436_s21 = smov %s3542_s24  ;;  %18 = sbr.rel (!%p16_p2) target bundleno = 3 (0x3), region = 92 }
0x1766   :  { %2611 = vsyncpa [#allocation3], 1 }
0x1767   :  { %2613 = vsyncpa [#allocation3 + $0x1], 1 }

</bundles_post_ra>
